<compile_context>
chip_gen: v6e
topology: v6e:2x2x1
jax: 0.10.0
libtpu: 0.0.40
codegen_flags: <defaults>
</compile_context>

<pallas_src>
import functools
import math

import jax
import jax.numpy as jnp
from jax import lax
from jax.experimental import pallas as pl
from jax.experimental.pallas import tpu as pltpu


def _conv_layer_kernel(x_ref, w_ref, prm_ref, o_ref, xp_ref, *,
                       Cin, Cout, K, stride, Ho, Wo,
                       use_relu, negative_slope, use_in, eps):
    H = x_ref.shape[2]
    W = x_ref.shape[3]
    p = K // 2

    # ---- ReflectionPad2d(p), fused: write tile into the interior of a f32
    #      VMEM scratch, then mirror 2p rows and 2p columns (slab copies).
    xp_ref[:, p:p + H, p:p + W] = x_ref[0].astype(jnp.float32)
    for i in range(p):
        # top / bottom rows (interior columns only; they are the valid ones)
        xp_ref[:, i:i + 1, p:p + W] = xp_ref[:, 2 * p - i:2 * p - i + 1, p:p + W]
        xp_ref[:, p + H + i:p + H + i + 1, p:p + W] = \
            xp_ref[:, p + H - 2 - i:p + H - 1 - i, p:p + W]
    for j in range(p):
        # left / right columns over the full padded height (corners come free)
        xp_ref[:, :, j:j + 1] = xp_ref[:, :, 2 * p - j:2 * p - j + 1]
        xp_ref[:, :, p + W + j:p + W + j + 1] = \
            xp_ref[:, :, p + W - 2 - j:p + W - 1 - j]

    span_h = (Ho - 1) * stride + 1
    span_w = (Wo - 1) * stride + 1

    # ---- Direct conv: shifted-tap VPU MACs, f32 accumulation.
    # prm_ref packs [bias(Cout), gamma(Cout), beta(Cout)] in SMEM; bias is
    # folded into the accumulator init.
    acc = [jnp.zeros((Ho, Wo), jnp.float32) + prm_ref[co] for co in range(Cout)]
    for ci in range(Cin):
        for kh in range(K):
            for kw in range(K):
                if stride == 1:
                    tap = xp_ref[ci, kh:kh + Ho, kw:kw + Wo]          # (Ho, Wo)
                else:
                    xch = xp_ref[ci]
                    tap = lax.slice(xch, (kh, kw),
                                    (kh + span_h, kw + span_w),
                                    (stride, stride))                 # (Ho, Wo)
                for co in range(Cout):
                    w = w_ref[((co * Cin + ci) * K + kh) * K + kw]    # SMEM scalar
                    acc[co] = acc[co] + w * tap

    # ---- InstanceNorm2d(affine) + LeakyReLU(0.2), per output channel.
    for co in range(Cout):
        y = acc[co]
        if use_in:
            mean = jnp.mean(y, keepdims=True)                         # (1,1)
            var = jnp.mean((y - mean) ** 2, keepdims=True)            # biased var
            y = (y - mean) * lax.rsqrt(var + eps)
            y = y * prm_ref[Cout + co] + prm_ref[2 * Cout + co]
        if use_relu:
            y = jnp.where(y >= 0, y, negative_slope * y)
        o_ref[0, co] = y.astype(o_ref.dtype)                          # NCHW store


def conv_layer_forward(x_nchw, weight_oihw, bias, stride,
                       relu=True, instance_norm=False, gamma=None, beta=None):
    """Forward pass of PyNET ConvLayer. x_nchw: (N, Cin, H, W); NCHW output."""
    Cout, Cin, K, K2 = weight_oihw.shape
    assert K == K2
    N, C, H, W = x_nchw.shape
    assert C == Cin
    p = K // 2
    Ho = (H + 2 * p - K) // stride + 1
    Wo = (W + 2 * p - K) // stride + 1

    # bf16 activations into the kernel (halves input DMA); f32 math inside.
    # TODO(synk): keep PyNET activations bf16 NCHW end-to-end so this cast
    # disappears and the layer output can also be stored bf16.
    x_bf16 = x_nchw.astype(jnp.bfloat16)

    # Weights flat in SMEM (OIHW order matches in-kernel index math);
    # bias / gamma / beta packed into ONE small SMEM vector.
    w_flat = weight_oihw.astype(jnp.float32).reshape(-1)              # (Cout*Cin*K*K,)
    if gamma is None:
        gamma = jnp.ones((Cout,), jnp.float32)
    if beta is None:
        beta = jnp.zeros((Cout,), jnp.float32)
    params = jnp.concatenate([bias.astype(jnp.float32).reshape(-1),
                              gamma.astype(jnp.float32).reshape(-1),
                              beta.astype(jnp.float32).reshape(-1)])  # (3*Cout,)

    kernel = functools.partial(
        _conv_layer_kernel, Cin=Cin, Cout=Cout, K=K, stride=stride,
        Ho=Ho, Wo=Wo, use_relu=relu, negative_slope=0.2,
        use_in=instance_norm, eps=1e-5)

    out = pl.pallas_call(
        kernel,
        out_shape=jax.ShapeDtypeStruct((N, Cout, Ho, Wo), x_nchw.dtype),
        grid_spec=pltpu.PrefetchScalarGridSpec(
            num_scalar_prefetch=0,
            grid=(N,),
            in_specs=[
                pl.BlockSpec((1, Cin, H, W), lambda n: (n, 0, 0, 0)),
                pl.BlockSpec(memory_space=pltpu.MemorySpace.SMEM),     # weights
                pl.BlockSpec(memory_space=pltpu.MemorySpace.SMEM),     # bias/gamma/beta
            ],
            out_specs=pl.BlockSpec((1, Cout, Ho, Wo), lambda n: (n, 0, 0, 0)),
            scratch_shapes=[pltpu.VMEM((Cin, H + 2 * p, W + 2 * p), jnp.float32)],
        ),
        compiler_params=pltpu.CompilerParams(dimension_semantics=("parallel",)),
    )(x_bf16, w_flat, params)
    return out


def _reference(x_nchw, weight_oihw, bias, stride, relu=True,
               instance_norm=False, gamma=None, beta=None):
    """Plain-JAX reference. x is bf16-rounded (matches the kernel's bf16 DMA)."""
    p = weight_oihw.shape[-1] // 2
    xq = x_nchw.astype(jnp.bfloat16).astype(jnp.float32)
    xpad = jnp.pad(xq, ((0, 0), (0, 0), (p, p), (p, p)), mode="reflect")
    y = lax.conv_general_dilated(
        xpad, weight_oihw.astype(jnp.float32), (stride, stride), "VALID",
        dimension_numbers=("NCHW", "OIHW", "NCHW"),
        precision=lax.Precision.HIGHEST)
    y = y + bias.reshape(1, -1, 1, 1)
    if instance_norm:
        mean = jnp.mean(y, axis=(2, 3), keepdims=True)
        var = jnp.mean((y - mean) ** 2, axis=(2, 3), keepdims=True)
        y = (y - mean) * lax.rsqrt(var + 1e-5)
        y = y * gamma.reshape(1, -1, 1, 1) + beta.reshape(1, -1, 1, 1)
    if relu:
        y = jnp.where(y >= 0, y, 0.2 * y)
    return y


if __name__ == "__main__":
    # ConvLayer(in_channels=4, out_channels=8, kernel_size=3, stride=1)
    N, Cin, H, W = 2, 4, 16, 16
    Cout, K, stride = 8, 3, 1

    key = jax.random.PRNGKey(0)
    kx, kw, kb, kg, kbe = jax.random.split(key, 5)

    x = jax.random.normal(kx, (N, Cin, H, W), dtype=jnp.float32)
    fan_in = Cin * K * K
    scale = 1.0 / math.sqrt(fan_in)
    weight = jax.random.uniform(kw, (Cout, Cin, K, K), jnp.float32,
                                minval=-scale, maxval=scale)
    bias = jax.random.uniform(kb, (Cout,), jnp.float32,
                              minval=-scale, maxval=scale)

    # Default ConvLayer config: relu=True, instance_norm=False.
    out = conv_layer_forward(x, weight, bias, stride,
                             relu=True, instance_norm=False)
    out = jax.block_until_ready(out)
    ref = _reference(x, weight, bias, stride, relu=True, instance_norm=False)
    assert out.shape == (N, Cout, H, W)
    assert jnp.allclose(out, ref, rtol=1e-3, atol=1e-3), \
        f"max abs err = {jnp.max(jnp.abs(out - ref))}"

    # instance_norm=True path (affine InstanceNorm2d + LeakyReLU).
    gamma = jax.random.normal(kg, (Cout,), dtype=jnp.float32)
    beta = jax.random.normal(kbe, (Cout,), dtype=jnp.float32)
    out_in = conv_layer_forward(x, weight, bias, stride, relu=True,
                                instance_norm=True, gamma=gamma, beta=beta)
    out_in = jax.block_until_ready(out_in)
    ref_in = _reference(x, weight, bias, stride, relu=True,
                        instance_norm=True, gamma=gamma, beta=beta)
    assert jnp.allclose(out_in, ref_in, rtol=1e-3, atol=1e-3), \
        f"max abs err (IN) = {jnp.max(jnp.abs(out_in - ref_in))}"

    print("KERNEL_OK")
</pallas_src>

<mosaic_0001>
module attributes {stable_mosaic.version = 11 : i64} {
  func.func @_conv_layer_kernel(%arg0: i32, %arg1: memref<1x4x16x16xbf16, #tpu.memory_space<vmem>>, %arg2: memref<288xf32, #tpu.memory_space<smem>>, %arg3: memref<24xf32, #tpu.memory_space<smem>>, %arg4: memref<1x8x16x16xf32, #tpu.memory_space<vmem>>, %arg5: memref<4x18x18xf32, #tpu.memory_space<vmem>>) attributes {dimension_semantics = [#tpu.dimension_semantics<parallel>], iteration_bounds = array<i64: 2>, scalar_prefetch = 0 : i64, scratch_operands = 1 : i64, tpu.core_type = #tpu.core_type<tc>, window_params = [{transform_indices = @transform_0, window_bounds = array<i64: 1, 4, 16, 16>}, {transform_indices = @transform_1, window_bounds = array<i64: 288>}, {transform_indices = @transform_2, window_bounds = array<i64: 24>}, {transform_indices = @transform_3, window_bounds = array<i64: 1, 8, 16, 16>}]} {
    %c0 = arith.constant 0 : index
    %c0_0 = arith.constant 0 : index
    %c0_1 = arith.constant 0 : index
    %c0_2 = arith.constant 0 : index
    %0 = vector.load %arg1[%c0, %c0_0, %c0_1, %c0_2] : memref<1x4x16x16xbf16, #tpu.memory_space<vmem>>, vector<1x4x16x16xbf16>
    %1 = vector.shape_cast %0 : vector<1x4x16x16xbf16> to vector<4x16x16xbf16>
    %2 = arith.extf %1 : vector<4x16x16xbf16> to vector<4x16x16xf32>
    %c0_3 = arith.constant 0 : index
    %c1 = arith.constant 1 : index
    %c1_4 = arith.constant 1 : index
    %3 = vector.load %arg5[%c0_3, %c1, %c1_4] : memref<4x18x18xf32, #tpu.memory_space<vmem>>, vector<4x16x16xf32>
    tpu.vector_store %arg5[%c0_3, %c1, %c1_4], %2 {strides = array<i32>} : memref<4x18x18xf32, #tpu.memory_space<vmem>>, vector<4x16x16xf32>,
    %c0_5 = arith.constant 0 : index
    %c2 = arith.constant 2 : index
    %c1_6 = arith.constant 1 : index
    %4 = vector.load %arg5[%c0_5, %c2, %c1_6] : memref<4x18x18xf32, #tpu.memory_space<vmem>>, vector<4x1x16xf32>
    %c0_7 = arith.constant 0 : index
    %c0_8 = arith.constant 0 : index
    %c1_9 = arith.constant 1 : index
    %5 = vector.load %arg5[%c0_7, %c0_8, %c1_9] : memref<4x18x18xf32, #tpu.memory_space<vmem>>, vector<4x1x16xf32>
    tpu.vector_store %arg5[%c0_7, %c0_8, %c1_9], %4 {strides = array<i32>} : memref<4x18x18xf32, #tpu.memory_space<vmem>>, vector<4x1x16xf32>,
    %c0_10 = arith.constant 0 : index
    %c15 = arith.constant 15 : index
    %c1_11 = arith.constant 1 : index
    %6 = vector.load %arg5[%c0_10, %c15, %c1_11] : memref<4x18x18xf32, #tpu.memory_space<vmem>>, vector<4x1x16xf32>
    %c0_12 = arith.constant 0 : index
    %c17 = arith.constant 17 : index
    %c1_13 = arith.constant 1 : index
    %7 = vector.load %arg5[%c0_12, %c17, %c1_13] : memref<4x18x18xf32, #tpu.memory_space<vmem>>, vector<4x1x16xf32>
    tpu.vector_store %arg5[%c0_12, %c17, %c1_13], %6 {strides = array<i32>} : memref<4x18x18xf32, #tpu.memory_space<vmem>>, vector<4x1x16xf32>,
    %c0_14 = arith.constant 0 : index
    %c0_15 = arith.constant 0 : index
    %c2_16 = arith.constant 2 : index
    %8 = vector.load %arg5[%c0_14, %c0_15, %c2_16] : memref<4x18x18xf32, #tpu.memory_space<vmem>>, vector<4x18x1xf32>
    %c0_17 = arith.constant 0 : index
    %c0_18 = arith.constant 0 : index
    %c0_19 = arith.constant 0 : index
    %9 = vector.load %arg5[%c0_17, %c0_18, %c0_19] : memref<4x18x18xf32, #tpu.memory_space<vmem>>, vector<4x18x1xf32>
    tpu.vector_store %arg5[%c0_17, %c0_18, %c0_19], %8 {strides = array<i32>} : memref<4x18x18xf32, #tpu.memory_space<vmem>>, vector<4x18x1xf32>,
    %c0_20 = arith.constant 0 : index
    %c0_21 = arith.constant 0 : index
    %c15_22 = arith.constant 15 : index
    %10 = vector.load %arg5[%c0_20, %c0_21, %c15_22] : memref<4x18x18xf32, #tpu.memory_space<vmem>>, vector<4x18x1xf32>
    %c0_23 = arith.constant 0 : index
    %c0_24 = arith.constant 0 : index
    %c17_25 = arith.constant 17 : index
    %11 = vector.load %arg5[%c0_23, %c0_24, %c17_25] : memref<4x18x18xf32, #tpu.memory_space<vmem>>, vector<4x18x1xf32>
    tpu.vector_store %arg5[%c0_23, %c0_24, %c17_25], %10 {strides = array<i32>} : memref<4x18x18xf32, #tpu.memory_space<vmem>>, vector<4x18x1xf32>,
    %cst = arith.constant 0.000000e+00 : f32
    %12 = vector.broadcast %cst : f32 to vector<16x16xf32>
    %c0_26 = arith.constant 0 : index
    %13 = memref.load %arg3[%c0_26] : memref<24xf32, #tpu.memory_space<smem>>
    %14 = vector.broadcast %13 : f32 to vector<16x16xf32>
    %15 = arith.addf %12, %14 : vector<16x16xf32>
    %cst_27 = arith.constant 0.000000e+00 : f32
    %16 = vector.broadcast %cst_27 : f32 to vector<16x16xf32>
    %c1_28 = arith.constant 1 : index
    %17 = memref.load %arg3[%c1_28] : memref<24xf32, #tpu.memory_space<smem>>
    %18 = vector.broadcast %17 : f32 to vector<16x16xf32>
    %19 = arith.addf %16, %18 : vector<16x16xf32>
    %cst_29 = arith.constant 0.000000e+00 : f32
    %20 = vector.broadcast %cst_29 : f32 to vector<16x16xf32>
    %c2_30 = arith.constant 2 : index
    %21 = memref.load %arg3[%c2_30] : memref<24xf32, #tpu.memory_space<smem>>
    %22 = vector.broadcast %21 : f32 to vector<16x16xf32>
    %23 = arith.addf %20, %22 : vector<16x16xf32>
    %cst_31 = arith.constant 0.000000e+00 : f32
    %24 = vector.broadcast %cst_31 : f32 to vector<16x16xf32>
    %c3 = arith.constant 3 : index
    %25 = memref.load %arg3[%c3] : memref<24xf32, #tpu.memory_space<smem>>
    %26 = vector.broadcast %25 : f32 to vector<16x16xf32>
    %27 = arith.addf %24, %26 : vector<16x16xf32>
    %cst_32 = arith.constant 0.000000e+00 : f32
    %28 = vector.broadcast %cst_32 : f32 to vector<16x16xf32>
    %c4 = arith.constant 4 : index
    %29 = memref.load %arg3[%c4] : memref<24xf32, #tpu.memory_space<smem>>
    %30 = vector.broadcast %29 : f32 to vector<16x16xf32>
    %31 = arith.addf %28, %30 : vector<16x16xf32>
    %cst_33 = arith.constant 0.000000e+00 : f32
    %32 = vector.broadcast %cst_33 : f32 to vector<16x16xf32>
    %c5 = arith.constant 5 : index
    %33 = memref.load %arg3[%c5] : memref<24xf32, #tpu.memory_space<smem>>
    %34 = vector.broadcast %33 : f32 to vector<16x16xf32>
    %35 = arith.addf %32, %34 : vector<16x16xf32>
    %cst_34 = arith.constant 0.000000e+00 : f32
    %36 = vector.broadcast %cst_34 : f32 to vector<16x16xf32>
    %c6 = arith.constant 6 : index
    %37 = memref.load %arg3[%c6] : memref<24xf32, #tpu.memory_space<smem>>
    %38 = vector.broadcast %37 : f32 to vector<16x16xf32>
    %39 = arith.addf %36, %38 : vector<16x16xf32>
    %cst_35 = arith.constant 0.000000e+00 : f32
    %40 = vector.broadcast %cst_35 : f32 to vector<16x16xf32>
    %c7 = arith.constant 7 : index
    %41 = memref.load %arg3[%c7] : memref<24xf32, #tpu.memory_space<smem>>
    %42 = vector.broadcast %41 : f32 to vector<16x16xf32>
    %43 = arith.addf %40, %42 : vector<16x16xf32>
    %c0_36 = arith.constant 0 : index
    %c0_37 = arith.constant 0 : index
    %c0_38 = arith.constant 0 : index
    %44 = vector.load %arg5[%c0_36, %c0_37, %c0_38] : memref<4x18x18xf32, #tpu.memory_space<vmem>>, vector<1x16x16xf32>
    %45 = vector.shape_cast %44 : vector<1x16x16xf32> to vector<16x16xf32>
    %c0_39 = arith.constant 0 : index
    %46 = memref.load %arg2[%c0_39] : memref<288xf32, #tpu.memory_space<smem>>
    %47 = vector.broadcast %46 : f32 to vector<16x16xf32>
    %48 = arith.mulf %47, %45 : vector<16x16xf32>
    %49 = arith.addf %15, %48 : vector<16x16xf32>
    %c36 = arith.constant 36 : index
    %50 = memref.load %arg2[%c36] : memref<288xf32, #tpu.memory_space<smem>>
    %51 = vector.broadcast %50 : f32 to vector<16x16xf32>
    %52 = arith.mulf %51, %45 : vector<16x16xf32>
    %53 = arith.addf %19, %52 : vector<16x16xf32>
    %c72 = arith.constant 72 : index
    %54 = memref.load %arg2[%c72] : memref<288xf32, #tpu.memory_space<smem>>
    %55 = vector.broadcast %54 : f32 to vector<16x16xf32>
    %56 = arith.mulf %55, %45 : vector<16x16xf32>
    %57 = arith.addf %23, %56 : vector<16x16xf32>
    %c108 = arith.constant 108 : index
    %58 = memref.load %arg2[%c108] : memref<288xf32, #tpu.memory_space<smem>>
    %59 = vector.broadcast %58 : f32 to vector<16x16xf32>
    %60 = arith.mulf %59, %45 : vector<16x16xf32>
    %61 = arith.addf %27, %60 : vector<16x16xf32>
    %c144 = arith.constant 144 : index
    %62 = memref.load %arg2[%c144] : memref<288xf32, #tpu.memory_space<smem>>
    %63 = vector.broadcast %62 : f32 to vector<16x16xf32>
    %64 = arith.mulf %63, %45 : vector<16x16xf32>
    %65 = arith.addf %31, %64 : vector<16x16xf32>
    %c180 = arith.constant 180 : index
    %66 = memref.load %arg2[%c180] : memref<288xf32, #tpu.memory_space<smem>>
    %67 = vector.broadcast %66 : f32 to vector<16x16xf32>
    %68 = arith.mulf %67, %45 : vector<16x16xf32>
    %69 = arith.addf %35, %68 : vector<16x16xf32>
    %c216 = arith.constant 216 : index
    %70 = memref.load %arg2[%c216] : memref<288xf32, #tpu.memory_space<smem>>
    %71 = vector.broadcast %70 : f32 to vector<16x16xf32>
    %72 = arith.mulf %71, %45 : vector<16x16xf32>
    %73 = arith.addf %39, %72 : vector<16x16xf32>
    %c252 = arith.constant 252 : index
    %74 = memref.load %arg2[%c252] : memref<288xf32, #tpu.memory_space<smem>>
    %75 = vector.broadcast %74 : f32 to vector<16x16xf32>
    %76 = arith.mulf %75, %45 : vector<16x16xf32>
    %77 = arith.addf %43, %76 : vector<16x16xf32>
    %c0_40 = arith.constant 0 : index
    %c0_41 = arith.constant 0 : index
    %c1_42 = arith.constant 1 : index
    %78 = vector.load %arg5[%c0_40, %c0_41, %c1_42] : memref<4x18x18xf32, #tpu.memory_space<vmem>>, vector<1x16x16xf32>
    %79 = vector.shape_cast %78 : vector<1x16x16xf32> to vector<16x16xf32>
    %c1_43 = arith.constant 1 : index
    %80 = memref.load %arg2[%c1_43] : memref<288xf32, #tpu.memory_space<smem>>
    %81 = vector.broadcast %80 : f32 to vector<16x16xf32>
    %82 = arith.mulf %81, %79 : vector<16x16xf32>
    %83 = arith.addf %49, %82 : vector<16x16xf32>
    %c37 = arith.constant 37 : index
    %84 = memref.load %arg2[%c37] : memref<288xf32, #tpu.memory_space<smem>>
    %85 = vector.broadcast %84 : f32 to vector<16x16xf32>
    %86 = arith.mulf %85, %79 : vector<16x16xf32>
    %87 = arith.addf %53, %86 : vector<16x16xf32>
    %c73 = arith.constant 73 : index
    %88 = memref.load %arg2[%c73] : memref<288xf32, #tpu.memory_space<smem>>
    %89 = vector.broadcast %88 : f32 to vector<16x16xf32>
    %90 = arith.mulf %89, %79 : vector<16x16xf32>
    %91 = arith.addf %57, %90 : vector<16x16xf32>
    %c109 = arith.constant 109 : index
    %92 = memref.load %arg2[%c109] : memref<288xf32, #tpu.memory_space<smem>>
    %93 = vector.broadcast %92 : f32 to vector<16x16xf32>
    %94 = arith.mulf %93, %79 : vector<16x16xf32>
    %95 = arith.addf %61, %94 : vector<16x16xf32>
    %c145 = arith.constant 145 : index
    %96 = memref.load %arg2[%c145] : memref<288xf32, #tpu.memory_space<smem>>
    %97 = vector.broadcast %96 : f32 to vector<16x16xf32>
    %98 = arith.mulf %97, %79 : vector<16x16xf32>
    %99 = arith.addf %65, %98 : vector<16x16xf32>
    %c181 = arith.constant 181 : index
    %100 = memref.load %arg2[%c181] : memref<288xf32, #tpu.memory_space<smem>>
    %101 = vector.broadcast %100 : f32 to vector<16x16xf32>
    %102 = arith.mulf %101, %79 : vector<16x16xf32>
    %103 = arith.addf %69, %102 : vector<16x16xf32>
    %c217 = arith.constant 217 : index
    %104 = memref.load %arg2[%c217] : memref<288xf32, #tpu.memory_space<smem>>
    %105 = vector.broadcast %104 : f32 to vector<16x16xf32>
    %106 = arith.mulf %105, %79 : vector<16x16xf32>
    %107 = arith.addf %73, %106 : vector<16x16xf32>
    %c253 = arith.constant 253 : index
    %108 = memref.load %arg2[%c253] : memref<288xf32, #tpu.memory_space<smem>>
    %109 = vector.broadcast %108 : f32 to vector<16x16xf32>
    %110 = arith.mulf %109, %79 : vector<16x16xf32>
    %111 = arith.addf %77, %110 : vector<16x16xf32>
    %c0_44 = arith.constant 0 : index
    %c0_45 = arith.constant 0 : index
    %c2_46 = arith.constant 2 : index
    %112 = vector.load %arg5[%c0_44, %c0_45, %c2_46] : memref<4x18x18xf32, #tpu.memory_space<vmem>>, vector<1x16x16xf32>
    %113 = vector.shape_cast %112 : vector<1x16x16xf32> to vector<16x16xf32>
    %c2_47 = arith.constant 2 : index
    %114 = memref.load %arg2[%c2_47] : memref<288xf32, #tpu.memory_space<smem>>
    %115 = vector.broadcast %114 : f32 to vector<16x16xf32>
    %116 = arith.mulf %115, %113 : vector<16x16xf32>
    %117 = arith.addf %83, %116 : vector<16x16xf32>
    %c38 = arith.constant 38 : index
    %118 = memref.load %arg2[%c38] : memref<288xf32, #tpu.memory_space<smem>>
    %119 = vector.broadcast %118 : f32 to vector<16x16xf32>
    %120 = arith.mulf %119, %113 : vector<16x16xf32>
    %121 = arith.addf %87, %120 : vector<16x16xf32>
    %c74 = arith.constant 74 : index
    %122 = memref.load %arg2[%c74] : memref<288xf32, #tpu.memory_space<smem>>
    %123 = vector.broadcast %122 : f32 to vector<16x16xf32>
    %124 = arith.mulf %123, %113 : vector<16x16xf32>
    %125 = arith.addf %91, %124 : vector<16x16xf32>
    %c110 = arith.constant 110 : index
    %126 = memref.load %arg2[%c110] : memref<288xf32, #tpu.memory_space<smem>>
    %127 = vector.broadcast %126 : f32 to vector<16x16xf32>
    %128 = arith.mulf %127, %113 : vector<16x16xf32>
    %129 = arith.addf %95, %128 : vector<16x16xf32>
    %c146 = arith.constant 146 : index
    %130 = memref.load %arg2[%c146] : memref<288xf32, #tpu.memory_space<smem>>
    %131 = vector.broadcast %130 : f32 to vector<16x16xf32>
    %132 = arith.mulf %131, %113 : vector<16x16xf32>
    %133 = arith.addf %99, %132 : vector<16x16xf32>
    %c182 = arith.constant 182 : index
    %134 = memref.load %arg2[%c182] : memref<288xf32, #tpu.memory_space<smem>>
    %135 = vector.broadcast %134 : f32 to vector<16x16xf32>
    %136 = arith.mulf %135, %113 : vector<16x16xf32>
    %137 = arith.addf %103, %136 : vector<16x16xf32>
    %c218 = arith.constant 218 : index
    %138 = memref.load %arg2[%c218] : memref<288xf32, #tpu.memory_space<smem>>
    %139 = vector.broadcast %138 : f32 to vector<16x16xf32>
    %140 = arith.mulf %139, %113 : vector<16x16xf32>
    %141 = arith.addf %107, %140 : vector<16x16xf32>
    %c254 = arith.constant 254 : index
    %142 = memref.load %arg2[%c254] : memref<288xf32, #tpu.memory_space<smem>>
    %143 = vector.broadcast %142 : f32 to vector<16x16xf32>
    %144 = arith.mulf %143, %113 : vector<16x16xf32>
    %145 = arith.addf %111, %144 : vector<16x16xf32>
    %c0_48 = arith.constant 0 : index
    %c1_49 = arith.constant 1 : index
    %c0_50 = arith.constant 0 : index
    %146 = vector.load %arg5[%c0_48, %c1_49, %c0_50] : memref<4x18x18xf32, #tpu.memory_space<vmem>>, vector<1x16x16xf32>
    %147 = vector.shape_cast %146 : vector<1x16x16xf32> to vector<16x16xf32>
    %c3_51 = arith.constant 3 : index
    %148 = memref.load %arg2[%c3_51] : memref<288xf32, #tpu.memory_space<smem>>
    %149 = vector.broadcast %148 : f32 to vector<16x16xf32>
    %150 = arith.mulf %149, %147 : vector<16x16xf32>
    %151 = arith.addf %117, %150 : vector<16x16xf32>
    %c39 = arith.constant 39 : index
    %152 = memref.load %arg2[%c39] : memref<288xf32, #tpu.memory_space<smem>>
    %153 = vector.broadcast %152 : f32 to vector<16x16xf32>
    %154 = arith.mulf %153, %147 : vector<16x16xf32>
    %155 = arith.addf %121, %154 : vector<16x16xf32>
    %c75 = arith.constant 75 : index
    %156 = memref.load %arg2[%c75] : memref<288xf32, #tpu.memory_space<smem>>
    %157 = vector.broadcast %156 : f32 to vector<16x16xf32>
    %158 = arith.mulf %157, %147 : vector<16x16xf32>
    %159 = arith.addf %125, %158 : vector<16x16xf32>
    %c111 = arith.constant 111 : index
    %160 = memref.load %arg2[%c111] : memref<288xf32, #tpu.memory_space<smem>>
    %161 = vector.broadcast %160 : f32 to vector<16x16xf32>
    %162 = arith.mulf %161, %147 : vector<16x16xf32>
    %163 = arith.addf %129, %162 : vector<16x16xf32>
    %c147 = arith.constant 147 : index
    %164 = memref.load %arg2[%c147] : memref<288xf32, #tpu.memory_space<smem>>
    %165 = vector.broadcast %164 : f32 to vector<16x16xf32>
    %166 = arith.mulf %165, %147 : vector<16x16xf32>
    %167 = arith.addf %133, %166 : vector<16x16xf32>
    %c183 = arith.constant 183 : index
    %168 = memref.load %arg2[%c183] : memref<288xf32, #tpu.memory_space<smem>>
    %169 = vector.broadcast %168 : f32 to vector<16x16xf32>
    %170 = arith.mulf %169, %147 : vector<16x16xf32>
    %171 = arith.addf %137, %170 : vector<16x16xf32>
    %c219 = arith.constant 219 : index
    %172 = memref.load %arg2[%c219] : memref<288xf32, #tpu.memory_space<smem>>
    %173 = vector.broadcast %172 : f32 to vector<16x16xf32>
    %174 = arith.mulf %173, %147 : vector<16x16xf32>
    %175 = arith.addf %141, %174 : vector<16x16xf32>
    %c255 = arith.constant 255 : index
    %176 = memref.load %arg2[%c255] : memref<288xf32, #tpu.memory_space<smem>>
    %177 = vector.broadcast %176 : f32 to vector<16x16xf32>
    %178 = arith.mulf %177, %147 : vector<16x16xf32>
    %179 = arith.addf %145, %178 : vector<16x16xf32>
    %c0_52 = arith.constant 0 : index
    %c1_53 = arith.constant 1 : index
    %c1_54 = arith.constant 1 : index
    %180 = vector.load %arg5[%c0_52, %c1_53, %c1_54] : memref<4x18x18xf32, #tpu.memory_space<vmem>>, vector<1x16x16xf32>
    %181 = vector.shape_cast %180 : vector<1x16x16xf32> to vector<16x16xf32>
    %c4_55 = arith.constant 4 : index
    %182 = memref.load %arg2[%c4_55] : memref<288xf32, #tpu.memory_space<smem>>
    %183 = vector.broadcast %182 : f32 to vector<16x16xf32>
    %184 = arith.mulf %183, %181 : vector<16x16xf32>
    %185 = arith.addf %151, %184 : vector<16x16xf32>
    %c40 = arith.constant 40 : index
    %186 = memref.load %arg2[%c40] : memref<288xf32, #tpu.memory_space<smem>>
    %187 = vector.broadcast %186 : f32 to vector<16x16xf32>
    %188 = arith.mulf %187, %181 : vector<16x16xf32>
    %189 = arith.addf %155, %188 : vector<16x16xf32>
    %c76 = arith.constant 76 : index
    %190 = memref.load %arg2[%c76] : memref<288xf32, #tpu.memory_space<smem>>
    %191 = vector.broadcast %190 : f32 to vector<16x16xf32>
    %192 = arith.mulf %191, %181 : vector<16x16xf32>
    %193 = arith.addf %159, %192 : vector<16x16xf32>
    %c112 = arith.constant 112 : index
    %194 = memref.load %arg2[%c112] : memref<288xf32, #tpu.memory_space<smem>>
    %195 = vector.broadcast %194 : f32 to vector<16x16xf32>
    %196 = arith.mulf %195, %181 : vector<16x16xf32>
    %197 = arith.addf %163, %196 : vector<16x16xf32>
    %c148 = arith.constant 148 : index
    %198 = memref.load %arg2[%c148] : memref<288xf32, #tpu.memory_space<smem>>
    %199 = vector.broadcast %198 : f32 to vector<16x16xf32>
    %200 = arith.mulf %199, %181 : vector<16x16xf32>
    %201 = arith.addf %167, %200 : vector<16x16xf32>
    %c184 = arith.constant 184 : index
    %202 = memref.load %arg2[%c184] : memref<288xf32, #tpu.memory_space<smem>>
    %203 = vector.broadcast %202 : f32 to vector<16x16xf32>
    %204 = arith.mulf %203, %181 : vector<16x16xf32>
    %205 = arith.addf %171, %204 : vector<16x16xf32>
    %c220 = arith.constant 220 : index
    %206 = memref.load %arg2[%c220] : memref<288xf32, #tpu.memory_space<smem>>
    %207 = vector.broadcast %206 : f32 to vector<16x16xf32>
    %208 = arith.mulf %207, %181 : vector<16x16xf32>
    %209 = arith.addf %175, %208 : vector<16x16xf32>
    %c256 = arith.constant 256 : index
    %210 = memref.load %arg2[%c256] : memref<288xf32, #tpu.memory_space<smem>>
    %211 = vector.broadcast %210 : f32 to vector<16x16xf32>
    %212 = arith.mulf %211, %181 : vector<16x16xf32>
    %213 = arith.addf %179, %212 : vector<16x16xf32>
    %c0_56 = arith.constant 0 : index
    %c1_57 = arith.constant 1 : index
    %c2_58 = arith.constant 2 : index
    %214 = vector.load %arg5[%c0_56, %c1_57, %c2_58] : memref<4x18x18xf32, #tpu.memory_space<vmem>>, vector<1x16x16xf32>
    %215 = vector.shape_cast %214 : vector<1x16x16xf32> to vector<16x16xf32>
    %c5_59 = arith.constant 5 : index
    %216 = memref.load %arg2[%c5_59] : memref<288xf32, #tpu.memory_space<smem>>
    %217 = vector.broadcast %216 : f32 to vector<16x16xf32>
    %218 = arith.mulf %217, %215 : vector<16x16xf32>
    %219 = arith.addf %185, %218 : vector<16x16xf32>
    %c41 = arith.constant 41 : index
    %220 = memref.load %arg2[%c41] : memref<288xf32, #tpu.memory_space<smem>>
    %221 = vector.broadcast %220 : f32 to vector<16x16xf32>
    %222 = arith.mulf %221, %215 : vector<16x16xf32>
    %223 = arith.addf %189, %222 : vector<16x16xf32>
    %c77 = arith.constant 77 : index
    %224 = memref.load %arg2[%c77] : memref<288xf32, #tpu.memory_space<smem>>
    %225 = vector.broadcast %224 : f32 to vector<16x16xf32>
    %226 = arith.mulf %225, %215 : vector<16x16xf32>
    %227 = arith.addf %193, %226 : vector<16x16xf32>
    %c113 = arith.constant 113 : index
    %228 = memref.load %arg2[%c113] : memref<288xf32, #tpu.memory_space<smem>>
    %229 = vector.broadcast %228 : f32 to vector<16x16xf32>
    %230 = arith.mulf %229, %215 : vector<16x16xf32>
    %231 = arith.addf %197, %230 : vector<16x16xf32>
    %c149 = arith.constant 149 : index
    %232 = memref.load %arg2[%c149] : memref<288xf32, #tpu.memory_space<smem>>
    %233 = vector.broadcast %232 : f32 to vector<16x16xf32>
    %234 = arith.mulf %233, %215 : vector<16x16xf32>
    %235 = arith.addf %201, %234 : vector<16x16xf32>
    %c185 = arith.constant 185 : index
    %236 = memref.load %arg2[%c185] : memref<288xf32, #tpu.memory_space<smem>>
    %237 = vector.broadcast %236 : f32 to vector<16x16xf32>
    %238 = arith.mulf %237, %215 : vector<16x16xf32>
    %239 = arith.addf %205, %238 : vector<16x16xf32>
    %c221 = arith.constant 221 : index
    %240 = memref.load %arg2[%c221] : memref<288xf32, #tpu.memory_space<smem>>
    %241 = vector.broadcast %240 : f32 to vector<16x16xf32>
    %242 = arith.mulf %241, %215 : vector<16x16xf32>
    %243 = arith.addf %209, %242 : vector<16x16xf32>
    %c257 = arith.constant 257 : index
    %244 = memref.load %arg2[%c257] : memref<288xf32, #tpu.memory_space<smem>>
    %245 = vector.broadcast %244 : f32 to vector<16x16xf32>
    %246 = arith.mulf %245, %215 : vector<16x16xf32>
    %247 = arith.addf %213, %246 : vector<16x16xf32>
    %c0_60 = arith.constant 0 : index
    %c2_61 = arith.constant 2 : index
    %c0_62 = arith.constant 0 : index
    %248 = vector.load %arg5[%c0_60, %c2_61, %c0_62] : memref<4x18x18xf32, #tpu.memory_space<vmem>>, vector<1x16x16xf32>
    %249 = vector.shape_cast %248 : vector<1x16x16xf32> to vector<16x16xf32>
    %c6_63 = arith.constant 6 : index
    %250 = memref.load %arg2[%c6_63] : memref<288xf32, #tpu.memory_space<smem>>
    %251 = vector.broadcast %250 : f32 to vector<16x16xf32>
    %252 = arith.mulf %251, %249 : vector<16x16xf32>
    %253 = arith.addf %219, %252 : vector<16x16xf32>
    %c42 = arith.constant 42 : index
    %254 = memref.load %arg2[%c42] : memref<288xf32, #tpu.memory_space<smem>>
    %255 = vector.broadcast %254 : f32 to vector<16x16xf32>
    %256 = arith.mulf %255, %249 : vector<16x16xf32>
    %257 = arith.addf %223, %256 : vector<16x16xf32>
    %c78 = arith.constant 78 : index
    %258 = memref.load %arg2[%c78] : memref<288xf32, #tpu.memory_space<smem>>
    %259 = vector.broadcast %258 : f32 to vector<16x16xf32>
    %260 = arith.mulf %259, %249 : vector<16x16xf32>
    %261 = arith.addf %227, %260 : vector<16x16xf32>
    %c114 = arith.constant 114 : index
    %262 = memref.load %arg2[%c114] : memref<288xf32, #tpu.memory_space<smem>>
    %263 = vector.broadcast %262 : f32 to vector<16x16xf32>
    %264 = arith.mulf %263, %249 : vector<16x16xf32>
    %265 = arith.addf %231, %264 : vector<16x16xf32>
    %c150 = arith.constant 150 : index
    %266 = memref.load %arg2[%c150] : memref<288xf32, #tpu.memory_space<smem>>
    %267 = vector.broadcast %266 : f32 to vector<16x16xf32>
    %268 = arith.mulf %267, %249 : vector<16x16xf32>
    %269 = arith.addf %235, %268 : vector<16x16xf32>
    %c186 = arith.constant 186 : index
    %270 = memref.load %arg2[%c186] : memref<288xf32, #tpu.memory_space<smem>>
    %271 = vector.broadcast %270 : f32 to vector<16x16xf32>
    %272 = arith.mulf %271, %249 : vector<16x16xf32>
    %273 = arith.addf %239, %272 : vector<16x16xf32>
    %c222 = arith.constant 222 : index
    %274 = memref.load %arg2[%c222] : memref<288xf32, #tpu.memory_space<smem>>
    %275 = vector.broadcast %274 : f32 to vector<16x16xf32>
    %276 = arith.mulf %275, %249 : vector<16x16xf32>
    %277 = arith.addf %243, %276 : vector<16x16xf32>
    %c258 = arith.constant 258 : index
    %278 = memref.load %arg2[%c258] : memref<288xf32, #tpu.memory_space<smem>>
    %279 = vector.broadcast %278 : f32 to vector<16x16xf32>
    %280 = arith.mulf %279, %249 : vector<16x16xf32>
    %281 = arith.addf %247, %280 : vector<16x16xf32>
    %c0_64 = arith.constant 0 : index
    %c2_65 = arith.constant 2 : index
    %c1_66 = arith.constant 1 : index
    %282 = vector.load %arg5[%c0_64, %c2_65, %c1_66] : memref<4x18x18xf32, #tpu.memory_space<vmem>>, vector<1x16x16xf32>
    %283 = vector.shape_cast %282 : vector<1x16x16xf32> to vector<16x16xf32>
    %c7_67 = arith.constant 7 : index
    %284 = memref.load %arg2[%c7_67] : memref<288xf32, #tpu.memory_space<smem>>
    %285 = vector.broadcast %284 : f32 to vector<16x16xf32>
    %286 = arith.mulf %285, %283 : vector<16x16xf32>
    %287 = arith.addf %253, %286 : vector<16x16xf32>
    %c43 = arith.constant 43 : index
    %288 = memref.load %arg2[%c43] : memref<288xf32, #tpu.memory_space<smem>>
    %289 = vector.broadcast %288 : f32 to vector<16x16xf32>
    %290 = arith.mulf %289, %283 : vector<16x16xf32>
    %291 = arith.addf %257, %290 : vector<16x16xf32>
    %c79 = arith.constant 79 : index
    %292 = memref.load %arg2[%c79] : memref<288xf32, #tpu.memory_space<smem>>
    %293 = vector.broadcast %292 : f32 to vector<16x16xf32>
    %294 = arith.mulf %293, %283 : vector<16x16xf32>
    %295 = arith.addf %261, %294 : vector<16x16xf32>
    %c115 = arith.constant 115 : index
    %296 = memref.load %arg2[%c115] : memref<288xf32, #tpu.memory_space<smem>>
    %297 = vector.broadcast %296 : f32 to vector<16x16xf32>
    %298 = arith.mulf %297, %283 : vector<16x16xf32>
    %299 = arith.addf %265, %298 : vector<16x16xf32>
    %c151 = arith.constant 151 : index
    %300 = memref.load %arg2[%c151] : memref<288xf32, #tpu.memory_space<smem>>
    %301 = vector.broadcast %300 : f32 to vector<16x16xf32>
    %302 = arith.mulf %301, %283 : vector<16x16xf32>
    %303 = arith.addf %269, %302 : vector<16x16xf32>
    %c187 = arith.constant 187 : index
    %304 = memref.load %arg2[%c187] : memref<288xf32, #tpu.memory_space<smem>>
    %305 = vector.broadcast %304 : f32 to vector<16x16xf32>
    %306 = arith.mulf %305, %283 : vector<16x16xf32>
    %307 = arith.addf %273, %306 : vector<16x16xf32>
    %c223 = arith.constant 223 : index
    %308 = memref.load %arg2[%c223] : memref<288xf32, #tpu.memory_space<smem>>
    %309 = vector.broadcast %308 : f32 to vector<16x16xf32>
    %310 = arith.mulf %309, %283 : vector<16x16xf32>
    %311 = arith.addf %277, %310 : vector<16x16xf32>
    %c259 = arith.constant 259 : index
    %312 = memref.load %arg2[%c259] : memref<288xf32, #tpu.memory_space<smem>>
    %313 = vector.broadcast %312 : f32 to vector<16x16xf32>
    %314 = arith.mulf %313, %283 : vector<16x16xf32>
    %315 = arith.addf %281, %314 : vector<16x16xf32>
    %c0_68 = arith.constant 0 : index
    %c2_69 = arith.constant 2 : index
    %c2_70 = arith.constant 2 : index
    %316 = vector.load %arg5[%c0_68, %c2_69, %c2_70] : memref<4x18x18xf32, #tpu.memory_space<vmem>>, vector<1x16x16xf32>
    %317 = vector.shape_cast %316 : vector<1x16x16xf32> to vector<16x16xf32>
    %c8 = arith.constant 8 : index
    %318 = memref.load %arg2[%c8] : memref<288xf32, #tpu.memory_space<smem>>
    %319 = vector.broadcast %318 : f32 to vector<16x16xf32>
    %320 = arith.mulf %319, %317 : vector<16x16xf32>
    %321 = arith.addf %287, %320 : vector<16x16xf32>
    %c44 = arith.constant 44 : index
    %322 = memref.load %arg2[%c44] : memref<288xf32, #tpu.memory_space<smem>>
    %323 = vector.broadcast %322 : f32 to vector<16x16xf32>
    %324 = arith.mulf %323, %317 : vector<16x16xf32>
    %325 = arith.addf %291, %324 : vector<16x16xf32>
    %c80 = arith.constant 80 : index
    %326 = memref.load %arg2[%c80] : memref<288xf32, #tpu.memory_space<smem>>
    %327 = vector.broadcast %326 : f32 to vector<16x16xf32>
    %328 = arith.mulf %327, %317 : vector<16x16xf32>
    %329 = arith.addf %295, %328 : vector<16x16xf32>
    %c116 = arith.constant 116 : index
    %330 = memref.load %arg2[%c116] : memref<288xf32, #tpu.memory_space<smem>>
    %331 = vector.broadcast %330 : f32 to vector<16x16xf32>
    %332 = arith.mulf %331, %317 : vector<16x16xf32>
    %333 = arith.addf %299, %332 : vector<16x16xf32>
    %c152 = arith.constant 152 : index
    %334 = memref.load %arg2[%c152] : memref<288xf32, #tpu.memory_space<smem>>
    %335 = vector.broadcast %334 : f32 to vector<16x16xf32>
    %336 = arith.mulf %335, %317 : vector<16x16xf32>
    %337 = arith.addf %303, %336 : vector<16x16xf32>
    %c188 = arith.constant 188 : index
    %338 = memref.load %arg2[%c188] : memref<288xf32, #tpu.memory_space<smem>>
    %339 = vector.broadcast %338 : f32 to vector<16x16xf32>
    %340 = arith.mulf %339, %317 : vector<16x16xf32>
    %341 = arith.addf %307, %340 : vector<16x16xf32>
    %c224 = arith.constant 224 : index
    %342 = memref.load %arg2[%c224] : memref<288xf32, #tpu.memory_space<smem>>
    %343 = vector.broadcast %342 : f32 to vector<16x16xf32>
    %344 = arith.mulf %343, %317 : vector<16x16xf32>
    %345 = arith.addf %311, %344 : vector<16x16xf32>
    %c260 = arith.constant 260 : index
    %346 = memref.load %arg2[%c260] : memref<288xf32, #tpu.memory_space<smem>>
    %347 = vector.broadcast %346 : f32 to vector<16x16xf32>
    %348 = arith.mulf %347, %317 : vector<16x16xf32>
    %349 = arith.addf %315, %348 : vector<16x16xf32>
    %c1_71 = arith.constant 1 : index
    %c0_72 = arith.constant 0 : index
    %c0_73 = arith.constant 0 : index
    %350 = vector.load %arg5[%c1_71, %c0_72, %c0_73] : memref<4x18x18xf32, #tpu.memory_space<vmem>>, vector<1x16x16xf32>
    %351 = vector.shape_cast %350 : vector<1x16x16xf32> to vector<16x16xf32>
    %c9 = arith.constant 9 : index
    %352 = memref.load %arg2[%c9] : memref<288xf32, #tpu.memory_space<smem>>
    %353 = vector.broadcast %352 : f32 to vector<16x16xf32>
    %354 = arith.mulf %353, %351 : vector<16x16xf32>
    %355 = arith.addf %321, %354 : vector<16x16xf32>
    %c45 = arith.constant 45 : index
    %356 = memref.load %arg2[%c45] : memref<288xf32, #tpu.memory_space<smem>>
    %357 = vector.broadcast %356 : f32 to vector<16x16xf32>
    %358 = arith.mulf %357, %351 : vector<16x16xf32>
    %359 = arith.addf %325, %358 : vector<16x16xf32>
    %c81 = arith.constant 81 : index
    %360 = memref.load %arg2[%c81] : memref<288xf32, #tpu.memory_space<smem>>
    %361 = vector.broadcast %360 : f32 to vector<16x16xf32>
    %362 = arith.mulf %361, %351 : vector<16x16xf32>
    %363 = arith.addf %329, %362 : vector<16x16xf32>
    %c117 = arith.constant 117 : index
    %364 = memref.load %arg2[%c117] : memref<288xf32, #tpu.memory_space<smem>>
    %365 = vector.broadcast %364 : f32 to vector<16x16xf32>
    %366 = arith.mulf %365, %351 : vector<16x16xf32>
    %367 = arith.addf %333, %366 : vector<16x16xf32>
    %c153 = arith.constant 153 : index
    %368 = memref.load %arg2[%c153] : memref<288xf32, #tpu.memory_space<smem>>
    %369 = vector.broadcast %368 : f32 to vector<16x16xf32>
    %370 = arith.mulf %369, %351 : vector<16x16xf32>
    %371 = arith.addf %337, %370 : vector<16x16xf32>
    %c189 = arith.constant 189 : index
    %372 = memref.load %arg2[%c189] : memref<288xf32, #tpu.memory_space<smem>>
    %373 = vector.broadcast %372 : f32 to vector<16x16xf32>
    %374 = arith.mulf %373, %351 : vector<16x16xf32>
    %375 = arith.addf %341, %374 : vector<16x16xf32>
    %c225 = arith.constant 225 : index
    %376 = memref.load %arg2[%c225] : memref<288xf32, #tpu.memory_space<smem>>
    %377 = vector.broadcast %376 : f32 to vector<16x16xf32>
    %378 = arith.mulf %377, %351 : vector<16x16xf32>
    %379 = arith.addf %345, %378 : vector<16x16xf32>
    %c261 = arith.constant 261 : index
    %380 = memref.load %arg2[%c261] : memref<288xf32, #tpu.memory_space<smem>>
    %381 = vector.broadcast %380 : f32 to vector<16x16xf32>
    %382 = arith.mulf %381, %351 : vector<16x16xf32>
    %383 = arith.addf %349, %382 : vector<16x16xf32>
    %c1_74 = arith.constant 1 : index
    %c0_75 = arith.constant 0 : index
    %c1_76 = arith.constant 1 : index
    %384 = vector.load %arg5[%c1_74, %c0_75, %c1_76] : memref<4x18x18xf32, #tpu.memory_space<vmem>>, vector<1x16x16xf32>
    %385 = vector.shape_cast %384 : vector<1x16x16xf32> to vector<16x16xf32>
    %c10 = arith.constant 10 : index
    %386 = memref.load %arg2[%c10] : memref<288xf32, #tpu.memory_space<smem>>
    %387 = vector.broadcast %386 : f32 to vector<16x16xf32>
    %388 = arith.mulf %387, %385 : vector<16x16xf32>
    %389 = arith.addf %355, %388 : vector<16x16xf32>
    %c46 = arith.constant 46 : index
    %390 = memref.load %arg2[%c46] : memref<288xf32, #tpu.memory_space<smem>>
    %391 = vector.broadcast %390 : f32 to vector<16x16xf32>
    %392 = arith.mulf %391, %385 : vector<16x16xf32>
    %393 = arith.addf %359, %392 : vector<16x16xf32>
    %c82 = arith.constant 82 : index
    %394 = memref.load %arg2[%c82] : memref<288xf32, #tpu.memory_space<smem>>
    %395 = vector.broadcast %394 : f32 to vector<16x16xf32>
    %396 = arith.mulf %395, %385 : vector<16x16xf32>
    %397 = arith.addf %363, %396 : vector<16x16xf32>
    %c118 = arith.constant 118 : index
    %398 = memref.load %arg2[%c118] : memref<288xf32, #tpu.memory_space<smem>>
    %399 = vector.broadcast %398 : f32 to vector<16x16xf32>
    %400 = arith.mulf %399, %385 : vector<16x16xf32>
    %401 = arith.addf %367, %400 : vector<16x16xf32>
    %c154 = arith.constant 154 : index
    %402 = memref.load %arg2[%c154] : memref<288xf32, #tpu.memory_space<smem>>
    %403 = vector.broadcast %402 : f32 to vector<16x16xf32>
    %404 = arith.mulf %403, %385 : vector<16x16xf32>
    %405 = arith.addf %371, %404 : vector<16x16xf32>
    %c190 = arith.constant 190 : index
    %406 = memref.load %arg2[%c190] : memref<288xf32, #tpu.memory_space<smem>>
    %407 = vector.broadcast %406 : f32 to vector<16x16xf32>
    %408 = arith.mulf %407, %385 : vector<16x16xf32>
    %409 = arith.addf %375, %408 : vector<16x16xf32>
    %c226 = arith.constant 226 : index
    %410 = memref.load %arg2[%c226] : memref<288xf32, #tpu.memory_space<smem>>
    %411 = vector.broadcast %410 : f32 to vector<16x16xf32>
    %412 = arith.mulf %411, %385 : vector<16x16xf32>
    %413 = arith.addf %379, %412 : vector<16x16xf32>
    %c262 = arith.constant 262 : index
    %414 = memref.load %arg2[%c262] : memref<288xf32, #tpu.memory_space<smem>>
    %415 = vector.broadcast %414 : f32 to vector<16x16xf32>
    %416 = arith.mulf %415, %385 : vector<16x16xf32>
    %417 = arith.addf %383, %416 : vector<16x16xf32>
    %c1_77 = arith.constant 1 : index
    %c0_78 = arith.constant 0 : index
    %c2_79 = arith.constant 2 : index
    %418 = vector.load %arg5[%c1_77, %c0_78, %c2_79] : memref<4x18x18xf32, #tpu.memory_space<vmem>>, vector<1x16x16xf32>
    %419 = vector.shape_cast %418 : vector<1x16x16xf32> to vector<16x16xf32>
    %c11 = arith.constant 11 : index
    %420 = memref.load %arg2[%c11] : memref<288xf32, #tpu.memory_space<smem>>
    %421 = vector.broadcast %420 : f32 to vector<16x16xf32>
    %422 = arith.mulf %421, %419 : vector<16x16xf32>
    %423 = arith.addf %389, %422 : vector<16x16xf32>
    %c47 = arith.constant 47 : index
    %424 = memref.load %arg2[%c47] : memref<288xf32, #tpu.memory_space<smem>>
    %425 = vector.broadcast %424 : f32 to vector<16x16xf32>
    %426 = arith.mulf %425, %419 : vector<16x16xf32>
    %427 = arith.addf %393, %426 : vector<16x16xf32>
    %c83 = arith.constant 83 : index
    %428 = memref.load %arg2[%c83] : memref<288xf32, #tpu.memory_space<smem>>
    %429 = vector.broadcast %428 : f32 to vector<16x16xf32>
    %430 = arith.mulf %429, %419 : vector<16x16xf32>
    %431 = arith.addf %397, %430 : vector<16x16xf32>
    %c119 = arith.constant 119 : index
    %432 = memref.load %arg2[%c119] : memref<288xf32, #tpu.memory_space<smem>>
    %433 = vector.broadcast %432 : f32 to vector<16x16xf32>
    %434 = arith.mulf %433, %419 : vector<16x16xf32>
    %435 = arith.addf %401, %434 : vector<16x16xf32>
    %c155 = arith.constant 155 : index
    %436 = memref.load %arg2[%c155] : memref<288xf32, #tpu.memory_space<smem>>
    %437 = vector.broadcast %436 : f32 to vector<16x16xf32>
    %438 = arith.mulf %437, %419 : vector<16x16xf32>
    %439 = arith.addf %405, %438 : vector<16x16xf32>
    %c191 = arith.constant 191 : index
    %440 = memref.load %arg2[%c191] : memref<288xf32, #tpu.memory_space<smem>>
    %441 = vector.broadcast %440 : f32 to vector<16x16xf32>
    %442 = arith.mulf %441, %419 : vector<16x16xf32>
    %443 = arith.addf %409, %442 : vector<16x16xf32>
    %c227 = arith.constant 227 : index
    %444 = memref.load %arg2[%c227] : memref<288xf32, #tpu.memory_space<smem>>
    %445 = vector.broadcast %444 : f32 to vector<16x16xf32>
    %446 = arith.mulf %445, %419 : vector<16x16xf32>
    %447 = arith.addf %413, %446 : vector<16x16xf32>
    %c263 = arith.constant 263 : index
    %448 = memref.load %arg2[%c263] : memref<288xf32, #tpu.memory_space<smem>>
    %449 = vector.broadcast %448 : f32 to vector<16x16xf32>
    %450 = arith.mulf %449, %419 : vector<16x16xf32>
    %451 = arith.addf %417, %450 : vector<16x16xf32>
    %c1_80 = arith.constant 1 : index
    %c1_81 = arith.constant 1 : index
    %c0_82 = arith.constant 0 : index
    %452 = vector.load %arg5[%c1_80, %c1_81, %c0_82] : memref<4x18x18xf32, #tpu.memory_space<vmem>>, vector<1x16x16xf32>
    %453 = vector.shape_cast %452 : vector<1x16x16xf32> to vector<16x16xf32>
    %c12 = arith.constant 12 : index
    %454 = memref.load %arg2[%c12] : memref<288xf32, #tpu.memory_space<smem>>
    %455 = vector.broadcast %454 : f32 to vector<16x16xf32>
    %456 = arith.mulf %455, %453 : vector<16x16xf32>
    %457 = arith.addf %423, %456 : vector<16x16xf32>
    %c48 = arith.constant 48 : index
    %458 = memref.load %arg2[%c48] : memref<288xf32, #tpu.memory_space<smem>>
    %459 = vector.broadcast %458 : f32 to vector<16x16xf32>
    %460 = arith.mulf %459, %453 : vector<16x16xf32>
    %461 = arith.addf %427, %460 : vector<16x16xf32>
    %c84 = arith.constant 84 : index
    %462 = memref.load %arg2[%c84] : memref<288xf32, #tpu.memory_space<smem>>
    %463 = vector.broadcast %462 : f32 to vector<16x16xf32>
    %464 = arith.mulf %463, %453 : vector<16x16xf32>
    %465 = arith.addf %431, %464 : vector<16x16xf32>
    %c120 = arith.constant 120 : index
    %466 = memref.load %arg2[%c120] : memref<288xf32, #tpu.memory_space<smem>>
    %467 = vector.broadcast %466 : f32 to vector<16x16xf32>
    %468 = arith.mulf %467, %453 : vector<16x16xf32>
    %469 = arith.addf %435, %468 : vector<16x16xf32>
    %c156 = arith.constant 156 : index
    %470 = memref.load %arg2[%c156] : memref<288xf32, #tpu.memory_space<smem>>
    %471 = vector.broadcast %470 : f32 to vector<16x16xf32>
    %472 = arith.mulf %471, %453 : vector<16x16xf32>
    %473 = arith.addf %439, %472 : vector<16x16xf32>
    %c192 = arith.constant 192 : index
    %474 = memref.load %arg2[%c192] : memref<288xf32, #tpu.memory_space<smem>>
    %475 = vector.broadcast %474 : f32 to vector<16x16xf32>
    %476 = arith.mulf %475, %453 : vector<16x16xf32>
    %477 = arith.addf %443, %476 : vector<16x16xf32>
    %c228 = arith.constant 228 : index
    %478 = memref.load %arg2[%c228] : memref<288xf32, #tpu.memory_space<smem>>
    %479 = vector.broadcast %478 : f32 to vector<16x16xf32>
    %480 = arith.mulf %479, %453 : vector<16x16xf32>
    %481 = arith.addf %447, %480 : vector<16x16xf32>
    %c264 = arith.constant 264 : index
    %482 = memref.load %arg2[%c264] : memref<288xf32, #tpu.memory_space<smem>>
    %483 = vector.broadcast %482 : f32 to vector<16x16xf32>
    %484 = arith.mulf %483, %453 : vector<16x16xf32>
    %485 = arith.addf %451, %484 : vector<16x16xf32>
    %c1_83 = arith.constant 1 : index
    %c1_84 = arith.constant 1 : index
    %c1_85 = arith.constant 1 : index
    %486 = vector.load %arg5[%c1_83, %c1_84, %c1_85] : memref<4x18x18xf32, #tpu.memory_space<vmem>>, vector<1x16x16xf32>
    %487 = vector.shape_cast %486 : vector<1x16x16xf32> to vector<16x16xf32>
    %c13 = arith.constant 13 : index
    %488 = memref.load %arg2[%c13] : memref<288xf32, #tpu.memory_space<smem>>
    %489 = vector.broadcast %488 : f32 to vector<16x16xf32>
    %490 = arith.mulf %489, %487 : vector<16x16xf32>
    %491 = arith.addf %457, %490 : vector<16x16xf32>
    %c49 = arith.constant 49 : index
    %492 = memref.load %arg2[%c49] : memref<288xf32, #tpu.memory_space<smem>>
    %493 = vector.broadcast %492 : f32 to vector<16x16xf32>
    %494 = arith.mulf %493, %487 : vector<16x16xf32>
    %495 = arith.addf %461, %494 : vector<16x16xf32>
    %c85 = arith.constant 85 : index
    %496 = memref.load %arg2[%c85] : memref<288xf32, #tpu.memory_space<smem>>
    %497 = vector.broadcast %496 : f32 to vector<16x16xf32>
    %498 = arith.mulf %497, %487 : vector<16x16xf32>
    %499 = arith.addf %465, %498 : vector<16x16xf32>
    %c121 = arith.constant 121 : index
    %500 = memref.load %arg2[%c121] : memref<288xf32, #tpu.memory_space<smem>>
    %501 = vector.broadcast %500 : f32 to vector<16x16xf32>
    %502 = arith.mulf %501, %487 : vector<16x16xf32>
    %503 = arith.addf %469, %502 : vector<16x16xf32>
    %c157 = arith.constant 157 : index
    %504 = memref.load %arg2[%c157] : memref<288xf32, #tpu.memory_space<smem>>
    %505 = vector.broadcast %504 : f32 to vector<16x16xf32>
    %506 = arith.mulf %505, %487 : vector<16x16xf32>
    %507 = arith.addf %473, %506 : vector<16x16xf32>
    %c193 = arith.constant 193 : index
    %508 = memref.load %arg2[%c193] : memref<288xf32, #tpu.memory_space<smem>>
    %509 = vector.broadcast %508 : f32 to vector<16x16xf32>
    %510 = arith.mulf %509, %487 : vector<16x16xf32>
    %511 = arith.addf %477, %510 : vector<16x16xf32>
    %c229 = arith.constant 229 : index
    %512 = memref.load %arg2[%c229] : memref<288xf32, #tpu.memory_space<smem>>
    %513 = vector.broadcast %512 : f32 to vector<16x16xf32>
    %514 = arith.mulf %513, %487 : vector<16x16xf32>
    %515 = arith.addf %481, %514 : vector<16x16xf32>
    %c265 = arith.constant 265 : index
    %516 = memref.load %arg2[%c265] : memref<288xf32, #tpu.memory_space<smem>>
    %517 = vector.broadcast %516 : f32 to vector<16x16xf32>
    %518 = arith.mulf %517, %487 : vector<16x16xf32>
    %519 = arith.addf %485, %518 : vector<16x16xf32>
    %c1_86 = arith.constant 1 : index
    %c1_87 = arith.constant 1 : index
    %c2_88 = arith.constant 2 : index
    %520 = vector.load %arg5[%c1_86, %c1_87, %c2_88] : memref<4x18x18xf32, #tpu.memory_space<vmem>>, vector<1x16x16xf32>
    %521 = vector.shape_cast %520 : vector<1x16x16xf32> to vector<16x16xf32>
    %c14 = arith.constant 14 : index
    %522 = memref.load %arg2[%c14] : memref<288xf32, #tpu.memory_space<smem>>
    %523 = vector.broadcast %522 : f32 to vector<16x16xf32>
    %524 = arith.mulf %523, %521 : vector<16x16xf32>
    %525 = arith.addf %491, %524 : vector<16x16xf32>
    %c50 = arith.constant 50 : index
    %526 = memref.load %arg2[%c50] : memref<288xf32, #tpu.memory_space<smem>>
    %527 = vector.broadcast %526 : f32 to vector<16x16xf32>
    %528 = arith.mulf %527, %521 : vector<16x16xf32>
    %529 = arith.addf %495, %528 : vector<16x16xf32>
    %c86 = arith.constant 86 : index
    %530 = memref.load %arg2[%c86] : memref<288xf32, #tpu.memory_space<smem>>
    %531 = vector.broadcast %530 : f32 to vector<16x16xf32>
    %532 = arith.mulf %531, %521 : vector<16x16xf32>
    %533 = arith.addf %499, %532 : vector<16x16xf32>
    %c122 = arith.constant 122 : index
    %534 = memref.load %arg2[%c122] : memref<288xf32, #tpu.memory_space<smem>>
    %535 = vector.broadcast %534 : f32 to vector<16x16xf32>
    %536 = arith.mulf %535, %521 : vector<16x16xf32>
    %537 = arith.addf %503, %536 : vector<16x16xf32>
    %c158 = arith.constant 158 : index
    %538 = memref.load %arg2[%c158] : memref<288xf32, #tpu.memory_space<smem>>
    %539 = vector.broadcast %538 : f32 to vector<16x16xf32>
    %540 = arith.mulf %539, %521 : vector<16x16xf32>
    %541 = arith.addf %507, %540 : vector<16x16xf32>
    %c194 = arith.constant 194 : index
    %542 = memref.load %arg2[%c194] : memref<288xf32, #tpu.memory_space<smem>>
    %543 = vector.broadcast %542 : f32 to vector<16x16xf32>
    %544 = arith.mulf %543, %521 : vector<16x16xf32>
    %545 = arith.addf %511, %544 : vector<16x16xf32>
    %c230 = arith.constant 230 : index
    %546 = memref.load %arg2[%c230] : memref<288xf32, #tpu.memory_space<smem>>
    %547 = vector.broadcast %546 : f32 to vector<16x16xf32>
    %548 = arith.mulf %547, %521 : vector<16x16xf32>
    %549 = arith.addf %515, %548 : vector<16x16xf32>
    %c266 = arith.constant 266 : index
    %550 = memref.load %arg2[%c266] : memref<288xf32, #tpu.memory_space<smem>>
    %551 = vector.broadcast %550 : f32 to vector<16x16xf32>
    %552 = arith.mulf %551, %521 : vector<16x16xf32>
    %553 = arith.addf %519, %552 : vector<16x16xf32>
    %c1_89 = arith.constant 1 : index
    %c2_90 = arith.constant 2 : index
    %c0_91 = arith.constant 0 : index
    %554 = vector.load %arg5[%c1_89, %c2_90, %c0_91] : memref<4x18x18xf32, #tpu.memory_space<vmem>>, vector<1x16x16xf32>
    %555 = vector.shape_cast %554 : vector<1x16x16xf32> to vector<16x16xf32>
    %c15_92 = arith.constant 15 : index
    %556 = memref.load %arg2[%c15_92] : memref<288xf32, #tpu.memory_space<smem>>
    %557 = vector.broadcast %556 : f32 to vector<16x16xf32>
    %558 = arith.mulf %557, %555 : vector<16x16xf32>
    %559 = arith.addf %525, %558 : vector<16x16xf32>
    %c51 = arith.constant 51 : index
    %560 = memref.load %arg2[%c51] : memref<288xf32, #tpu.memory_space<smem>>
    %561 = vector.broadcast %560 : f32 to vector<16x16xf32>
    %562 = arith.mulf %561, %555 : vector<16x16xf32>
    %563 = arith.addf %529, %562 : vector<16x16xf32>
    %c87 = arith.constant 87 : index
    %564 = memref.load %arg2[%c87] : memref<288xf32, #tpu.memory_space<smem>>
    %565 = vector.broadcast %564 : f32 to vector<16x16xf32>
    %566 = arith.mulf %565, %555 : vector<16x16xf32>
    %567 = arith.addf %533, %566 : vector<16x16xf32>
    %c123 = arith.constant 123 : index
    %568 = memref.load %arg2[%c123] : memref<288xf32, #tpu.memory_space<smem>>
    %569 = vector.broadcast %568 : f32 to vector<16x16xf32>
    %570 = arith.mulf %569, %555 : vector<16x16xf32>
    %571 = arith.addf %537, %570 : vector<16x16xf32>
    %c159 = arith.constant 159 : index
    %572 = memref.load %arg2[%c159] : memref<288xf32, #tpu.memory_space<smem>>
    %573 = vector.broadcast %572 : f32 to vector<16x16xf32>
    %574 = arith.mulf %573, %555 : vector<16x16xf32>
    %575 = arith.addf %541, %574 : vector<16x16xf32>
    %c195 = arith.constant 195 : index
    %576 = memref.load %arg2[%c195] : memref<288xf32, #tpu.memory_space<smem>>
    %577 = vector.broadcast %576 : f32 to vector<16x16xf32>
    %578 = arith.mulf %577, %555 : vector<16x16xf32>
    %579 = arith.addf %545, %578 : vector<16x16xf32>
    %c231 = arith.constant 231 : index
    %580 = memref.load %arg2[%c231] : memref<288xf32, #tpu.memory_space<smem>>
    %581 = vector.broadcast %580 : f32 to vector<16x16xf32>
    %582 = arith.mulf %581, %555 : vector<16x16xf32>
    %583 = arith.addf %549, %582 : vector<16x16xf32>
    %c267 = arith.constant 267 : index
    %584 = memref.load %arg2[%c267] : memref<288xf32, #tpu.memory_space<smem>>
    %585 = vector.broadcast %584 : f32 to vector<16x16xf32>
    %586 = arith.mulf %585, %555 : vector<16x16xf32>
    %587 = arith.addf %553, %586 : vector<16x16xf32>
    %c1_93 = arith.constant 1 : index
    %c2_94 = arith.constant 2 : index
    %c1_95 = arith.constant 1 : index
    %588 = vector.load %arg5[%c1_93, %c2_94, %c1_95] : memref<4x18x18xf32, #tpu.memory_space<vmem>>, vector<1x16x16xf32>
    %589 = vector.shape_cast %588 : vector<1x16x16xf32> to vector<16x16xf32>
    %c16 = arith.constant 16 : index
    %590 = memref.load %arg2[%c16] : memref<288xf32, #tpu.memory_space<smem>>
    %591 = vector.broadcast %590 : f32 to vector<16x16xf32>
    %592 = arith.mulf %591, %589 : vector<16x16xf32>
    %593 = arith.addf %559, %592 : vector<16x16xf32>
    %c52 = arith.constant 52 : index
    %594 = memref.load %arg2[%c52] : memref<288xf32, #tpu.memory_space<smem>>
    %595 = vector.broadcast %594 : f32 to vector<16x16xf32>
    %596 = arith.mulf %595, %589 : vector<16x16xf32>
    %597 = arith.addf %563, %596 : vector<16x16xf32>
    %c88 = arith.constant 88 : index
    %598 = memref.load %arg2[%c88] : memref<288xf32, #tpu.memory_space<smem>>
    %599 = vector.broadcast %598 : f32 to vector<16x16xf32>
    %600 = arith.mulf %599, %589 : vector<16x16xf32>
    %601 = arith.addf %567, %600 : vector<16x16xf32>
    %c124 = arith.constant 124 : index
    %602 = memref.load %arg2[%c124] : memref<288xf32, #tpu.memory_space<smem>>
    %603 = vector.broadcast %602 : f32 to vector<16x16xf32>
    %604 = arith.mulf %603, %589 : vector<16x16xf32>
    %605 = arith.addf %571, %604 : vector<16x16xf32>
    %c160 = arith.constant 160 : index
    %606 = memref.load %arg2[%c160] : memref<288xf32, #tpu.memory_space<smem>>
    %607 = vector.broadcast %606 : f32 to vector<16x16xf32>
    %608 = arith.mulf %607, %589 : vector<16x16xf32>
    %609 = arith.addf %575, %608 : vector<16x16xf32>
    %c196 = arith.constant 196 : index
    %610 = memref.load %arg2[%c196] : memref<288xf32, #tpu.memory_space<smem>>
    %611 = vector.broadcast %610 : f32 to vector<16x16xf32>
    %612 = arith.mulf %611, %589 : vector<16x16xf32>
    %613 = arith.addf %579, %612 : vector<16x16xf32>
    %c232 = arith.constant 232 : index
    %614 = memref.load %arg2[%c232] : memref<288xf32, #tpu.memory_space<smem>>
    %615 = vector.broadcast %614 : f32 to vector<16x16xf32>
    %616 = arith.mulf %615, %589 : vector<16x16xf32>
    %617 = arith.addf %583, %616 : vector<16x16xf32>
    %c268 = arith.constant 268 : index
    %618 = memref.load %arg2[%c268] : memref<288xf32, #tpu.memory_space<smem>>
    %619 = vector.broadcast %618 : f32 to vector<16x16xf32>
    %620 = arith.mulf %619, %589 : vector<16x16xf32>
    %621 = arith.addf %587, %620 : vector<16x16xf32>
    %c1_96 = arith.constant 1 : index
    %c2_97 = arith.constant 2 : index
    %c2_98 = arith.constant 2 : index
    %622 = vector.load %arg5[%c1_96, %c2_97, %c2_98] : memref<4x18x18xf32, #tpu.memory_space<vmem>>, vector<1x16x16xf32>
    %623 = vector.shape_cast %622 : vector<1x16x16xf32> to vector<16x16xf32>
    %c17_99 = arith.constant 17 : index
    %624 = memref.load %arg2[%c17_99] : memref<288xf32, #tpu.memory_space<smem>>
    %625 = vector.broadcast %624 : f32 to vector<16x16xf32>
    %626 = arith.mulf %625, %623 : vector<16x16xf32>
    %627 = arith.addf %593, %626 : vector<16x16xf32>
    %c53 = arith.constant 53 : index
    %628 = memref.load %arg2[%c53] : memref<288xf32, #tpu.memory_space<smem>>
    %629 = vector.broadcast %628 : f32 to vector<16x16xf32>
    %630 = arith.mulf %629, %623 : vector<16x16xf32>
    %631 = arith.addf %597, %630 : vector<16x16xf32>
    %c89 = arith.constant 89 : index
    %632 = memref.load %arg2[%c89] : memref<288xf32, #tpu.memory_space<smem>>
    %633 = vector.broadcast %632 : f32 to vector<16x16xf32>
    %634 = arith.mulf %633, %623 : vector<16x16xf32>
    %635 = arith.addf %601, %634 : vector<16x16xf32>
    %c125 = arith.constant 125 : index
    %636 = memref.load %arg2[%c125] : memref<288xf32, #tpu.memory_space<smem>>
    %637 = vector.broadcast %636 : f32 to vector<16x16xf32>
    %638 = arith.mulf %637, %623 : vector<16x16xf32>
    %639 = arith.addf %605, %638 : vector<16x16xf32>
    %c161 = arith.constant 161 : index
    %640 = memref.load %arg2[%c161] : memref<288xf32, #tpu.memory_space<smem>>
    %641 = vector.broadcast %640 : f32 to vector<16x16xf32>
    %642 = arith.mulf %641, %623 : vector<16x16xf32>
    %643 = arith.addf %609, %642 : vector<16x16xf32>
    %c197 = arith.constant 197 : index
    %644 = memref.load %arg2[%c197] : memref<288xf32, #tpu.memory_space<smem>>
    %645 = vector.broadcast %644 : f32 to vector<16x16xf32>
    %646 = arith.mulf %645, %623 : vector<16x16xf32>
    %647 = arith.addf %613, %646 : vector<16x16xf32>
    %c233 = arith.constant 233 : index
    %648 = memref.load %arg2[%c233] : memref<288xf32, #tpu.memory_space<smem>>
    %649 = vector.broadcast %648 : f32 to vector<16x16xf32>
    %650 = arith.mulf %649, %623 : vector<16x16xf32>
    %651 = arith.addf %617, %650 : vector<16x16xf32>
    %c269 = arith.constant 269 : index
    %652 = memref.load %arg2[%c269] : memref<288xf32, #tpu.memory_space<smem>>
    %653 = vector.broadcast %652 : f32 to vector<16x16xf32>
    %654 = arith.mulf %653, %623 : vector<16x16xf32>
    %655 = arith.addf %621, %654 : vector<16x16xf32>
    %c2_100 = arith.constant 2 : index
    %c0_101 = arith.constant 0 : index
    %c0_102 = arith.constant 0 : index
    %656 = vector.load %arg5[%c2_100, %c0_101, %c0_102] : memref<4x18x18xf32, #tpu.memory_space<vmem>>, vector<1x16x16xf32>
    %657 = vector.shape_cast %656 : vector<1x16x16xf32> to vector<16x16xf32>
    %c18 = arith.constant 18 : index
    %658 = memref.load %arg2[%c18] : memref<288xf32, #tpu.memory_space<smem>>
    %659 = vector.broadcast %658 : f32 to vector<16x16xf32>
    %660 = arith.mulf %659, %657 : vector<16x16xf32>
    %661 = arith.addf %627, %660 : vector<16x16xf32>
    %c54 = arith.constant 54 : index
    %662 = memref.load %arg2[%c54] : memref<288xf32, #tpu.memory_space<smem>>
    %663 = vector.broadcast %662 : f32 to vector<16x16xf32>
    %664 = arith.mulf %663, %657 : vector<16x16xf32>
    %665 = arith.addf %631, %664 : vector<16x16xf32>
    %c90 = arith.constant 90 : index
    %666 = memref.load %arg2[%c90] : memref<288xf32, #tpu.memory_space<smem>>
    %667 = vector.broadcast %666 : f32 to vector<16x16xf32>
    %668 = arith.mulf %667, %657 : vector<16x16xf32>
    %669 = arith.addf %635, %668 : vector<16x16xf32>
    %c126 = arith.constant 126 : index
    %670 = memref.load %arg2[%c126] : memref<288xf32, #tpu.memory_space<smem>>
    %671 = vector.broadcast %670 : f32 to vector<16x16xf32>
    %672 = arith.mulf %671, %657 : vector<16x16xf32>
    %673 = arith.addf %639, %672 : vector<16x16xf32>
    %c162 = arith.constant 162 : index
    %674 = memref.load %arg2[%c162] : memref<288xf32, #tpu.memory_space<smem>>
    %675 = vector.broadcast %674 : f32 to vector<16x16xf32>
    %676 = arith.mulf %675, %657 : vector<16x16xf32>
    %677 = arith.addf %643, %676 : vector<16x16xf32>
    %c198 = arith.constant 198 : index
    %678 = memref.load %arg2[%c198] : memref<288xf32, #tpu.memory_space<smem>>
    %679 = vector.broadcast %678 : f32 to vector<16x16xf32>
    %680 = arith.mulf %679, %657 : vector<16x16xf32>
    %681 = arith.addf %647, %680 : vector<16x16xf32>
    %c234 = arith.constant 234 : index
    %682 = memref.load %arg2[%c234] : memref<288xf32, #tpu.memory_space<smem>>
    %683 = vector.broadcast %682 : f32 to vector<16x16xf32>
    %684 = arith.mulf %683, %657 : vector<16x16xf32>
    %685 = arith.addf %651, %684 : vector<16x16xf32>
    %c270 = arith.constant 270 : index
    %686 = memref.load %arg2[%c270] : memref<288xf32, #tpu.memory_space<smem>>
    %687 = vector.broadcast %686 : f32 to vector<16x16xf32>
    %688 = arith.mulf %687, %657 : vector<16x16xf32>
    %689 = arith.addf %655, %688 : vector<16x16xf32>
    %c2_103 = arith.constant 2 : index
    %c0_104 = arith.constant 0 : index
    %c1_105 = arith.constant 1 : index
    %690 = vector.load %arg5[%c2_103, %c0_104, %c1_105] : memref<4x18x18xf32, #tpu.memory_space<vmem>>, vector<1x16x16xf32>
    %691 = vector.shape_cast %690 : vector<1x16x16xf32> to vector<16x16xf32>
    %c19 = arith.constant 19 : index
    %692 = memref.load %arg2[%c19] : memref<288xf32, #tpu.memory_space<smem>>
    %693 = vector.broadcast %692 : f32 to vector<16x16xf32>
    %694 = arith.mulf %693, %691 : vector<16x16xf32>
    %695 = arith.addf %661, %694 : vector<16x16xf32>
    %c55 = arith.constant 55 : index
    %696 = memref.load %arg2[%c55] : memref<288xf32, #tpu.memory_space<smem>>
    %697 = vector.broadcast %696 : f32 to vector<16x16xf32>
    %698 = arith.mulf %697, %691 : vector<16x16xf32>
    %699 = arith.addf %665, %698 : vector<16x16xf32>
    %c91 = arith.constant 91 : index
    %700 = memref.load %arg2[%c91] : memref<288xf32, #tpu.memory_space<smem>>
    %701 = vector.broadcast %700 : f32 to vector<16x16xf32>
    %702 = arith.mulf %701, %691 : vector<16x16xf32>
    %703 = arith.addf %669, %702 : vector<16x16xf32>
    %c127 = arith.constant 127 : index
    %704 = memref.load %arg2[%c127] : memref<288xf32, #tpu.memory_space<smem>>
    %705 = vector.broadcast %704 : f32 to vector<16x16xf32>
    %706 = arith.mulf %705, %691 : vector<16x16xf32>
    %707 = arith.addf %673, %706 : vector<16x16xf32>
    %c163 = arith.constant 163 : index
    %708 = memref.load %arg2[%c163] : memref<288xf32, #tpu.memory_space<smem>>
    %709 = vector.broadcast %708 : f32 to vector<16x16xf32>
    %710 = arith.mulf %709, %691 : vector<16x16xf32>
    %711 = arith.addf %677, %710 : vector<16x16xf32>
    %c199 = arith.constant 199 : index
    %712 = memref.load %arg2[%c199] : memref<288xf32, #tpu.memory_space<smem>>
    %713 = vector.broadcast %712 : f32 to vector<16x16xf32>
    %714 = arith.mulf %713, %691 : vector<16x16xf32>
    %715 = arith.addf %681, %714 : vector<16x16xf32>
    %c235 = arith.constant 235 : index
    %716 = memref.load %arg2[%c235] : memref<288xf32, #tpu.memory_space<smem>>
    %717 = vector.broadcast %716 : f32 to vector<16x16xf32>
    %718 = arith.mulf %717, %691 : vector<16x16xf32>
    %719 = arith.addf %685, %718 : vector<16x16xf32>
    %c271 = arith.constant 271 : index
    %720 = memref.load %arg2[%c271] : memref<288xf32, #tpu.memory_space<smem>>
    %721 = vector.broadcast %720 : f32 to vector<16x16xf32>
    %722 = arith.mulf %721, %691 : vector<16x16xf32>
    %723 = arith.addf %689, %722 : vector<16x16xf32>
    %c2_106 = arith.constant 2 : index
    %c0_107 = arith.constant 0 : index
    %c2_108 = arith.constant 2 : index
    %724 = vector.load %arg5[%c2_106, %c0_107, %c2_108] : memref<4x18x18xf32, #tpu.memory_space<vmem>>, vector<1x16x16xf32>
    %725 = vector.shape_cast %724 : vector<1x16x16xf32> to vector<16x16xf32>
    %c20 = arith.constant 20 : index
    %726 = memref.load %arg2[%c20] : memref<288xf32, #tpu.memory_space<smem>>
    %727 = vector.broadcast %726 : f32 to vector<16x16xf32>
    %728 = arith.mulf %727, %725 : vector<16x16xf32>
    %729 = arith.addf %695, %728 : vector<16x16xf32>
    %c56 = arith.constant 56 : index
    %730 = memref.load %arg2[%c56] : memref<288xf32, #tpu.memory_space<smem>>
    %731 = vector.broadcast %730 : f32 to vector<16x16xf32>
    %732 = arith.mulf %731, %725 : vector<16x16xf32>
    %733 = arith.addf %699, %732 : vector<16x16xf32>
    %c92 = arith.constant 92 : index
    %734 = memref.load %arg2[%c92] : memref<288xf32, #tpu.memory_space<smem>>
    %735 = vector.broadcast %734 : f32 to vector<16x16xf32>
    %736 = arith.mulf %735, %725 : vector<16x16xf32>
    %737 = arith.addf %703, %736 : vector<16x16xf32>
    %c128 = arith.constant 128 : index
    %738 = memref.load %arg2[%c128] : memref<288xf32, #tpu.memory_space<smem>>
    %739 = vector.broadcast %738 : f32 to vector<16x16xf32>
    %740 = arith.mulf %739, %725 : vector<16x16xf32>
    %741 = arith.addf %707, %740 : vector<16x16xf32>
    %c164 = arith.constant 164 : index
    %742 = memref.load %arg2[%c164] : memref<288xf32, #tpu.memory_space<smem>>
    %743 = vector.broadcast %742 : f32 to vector<16x16xf32>
    %744 = arith.mulf %743, %725 : vector<16x16xf32>
    %745 = arith.addf %711, %744 : vector<16x16xf32>
    %c200 = arith.constant 200 : index
    %746 = memref.load %arg2[%c200] : memref<288xf32, #tpu.memory_space<smem>>
    %747 = vector.broadcast %746 : f32 to vector<16x16xf32>
    %748 = arith.mulf %747, %725 : vector<16x16xf32>
    %749 = arith.addf %715, %748 : vector<16x16xf32>
    %c236 = arith.constant 236 : index
    %750 = memref.load %arg2[%c236] : memref<288xf32, #tpu.memory_space<smem>>
    %751 = vector.broadcast %750 : f32 to vector<16x16xf32>
    %752 = arith.mulf %751, %725 : vector<16x16xf32>
    %753 = arith.addf %719, %752 : vector<16x16xf32>
    %c272 = arith.constant 272 : index
    %754 = memref.load %arg2[%c272] : memref<288xf32, #tpu.memory_space<smem>>
    %755 = vector.broadcast %754 : f32 to vector<16x16xf32>
    %756 = arith.mulf %755, %725 : vector<16x16xf32>
    %757 = arith.addf %723, %756 : vector<16x16xf32>
    %c2_109 = arith.constant 2 : index
    %c1_110 = arith.constant 1 : index
    %c0_111 = arith.constant 0 : index
    %758 = vector.load %arg5[%c2_109, %c1_110, %c0_111] : memref<4x18x18xf32, #tpu.memory_space<vmem>>, vector<1x16x16xf32>
    %759 = vector.shape_cast %758 : vector<1x16x16xf32> to vector<16x16xf32>
    %c21 = arith.constant 21 : index
    %760 = memref.load %arg2[%c21] : memref<288xf32, #tpu.memory_space<smem>>
    %761 = vector.broadcast %760 : f32 to vector<16x16xf32>
    %762 = arith.mulf %761, %759 : vector<16x16xf32>
    %763 = arith.addf %729, %762 : vector<16x16xf32>
    %c57 = arith.constant 57 : index
    %764 = memref.load %arg2[%c57] : memref<288xf32, #tpu.memory_space<smem>>
    %765 = vector.broadcast %764 : f32 to vector<16x16xf32>
    %766 = arith.mulf %765, %759 : vector<16x16xf32>
    %767 = arith.addf %733, %766 : vector<16x16xf32>
    %c93 = arith.constant 93 : index
    %768 = memref.load %arg2[%c93] : memref<288xf32, #tpu.memory_space<smem>>
    %769 = vector.broadcast %768 : f32 to vector<16x16xf32>
    %770 = arith.mulf %769, %759 : vector<16x16xf32>
    %771 = arith.addf %737, %770 : vector<16x16xf32>
    %c129 = arith.constant 129 : index
    %772 = memref.load %arg2[%c129] : memref<288xf32, #tpu.memory_space<smem>>
    %773 = vector.broadcast %772 : f32 to vector<16x16xf32>
    %774 = arith.mulf %773, %759 : vector<16x16xf32>
    %775 = arith.addf %741, %774 : vector<16x16xf32>
    %c165 = arith.constant 165 : index
    %776 = memref.load %arg2[%c165] : memref<288xf32, #tpu.memory_space<smem>>
    %777 = vector.broadcast %776 : f32 to vector<16x16xf32>
    %778 = arith.mulf %777, %759 : vector<16x16xf32>
    %779 = arith.addf %745, %778 : vector<16x16xf32>
    %c201 = arith.constant 201 : index
    %780 = memref.load %arg2[%c201] : memref<288xf32, #tpu.memory_space<smem>>
    %781 = vector.broadcast %780 : f32 to vector<16x16xf32>
    %782 = arith.mulf %781, %759 : vector<16x16xf32>
    %783 = arith.addf %749, %782 : vector<16x16xf32>
    %c237 = arith.constant 237 : index
    %784 = memref.load %arg2[%c237] : memref<288xf32, #tpu.memory_space<smem>>
    %785 = vector.broadcast %784 : f32 to vector<16x16xf32>
    %786 = arith.mulf %785, %759 : vector<16x16xf32>
    %787 = arith.addf %753, %786 : vector<16x16xf32>
    %c273 = arith.constant 273 : index
    %788 = memref.load %arg2[%c273] : memref<288xf32, #tpu.memory_space<smem>>
    %789 = vector.broadcast %788 : f32 to vector<16x16xf32>
    %790 = arith.mulf %789, %759 : vector<16x16xf32>
    %791 = arith.addf %757, %790 : vector<16x16xf32>
    %c2_112 = arith.constant 2 : index
    %c1_113 = arith.constant 1 : index
    %c1_114 = arith.constant 1 : index
    %792 = vector.load %arg5[%c2_112, %c1_113, %c1_114] : memref<4x18x18xf32, #tpu.memory_space<vmem>>, vector<1x16x16xf32>
    %793 = vector.shape_cast %792 : vector<1x16x16xf32> to vector<16x16xf32>
    %c22 = arith.constant 22 : index
    %794 = memref.load %arg2[%c22] : memref<288xf32, #tpu.memory_space<smem>>
    %795 = vector.broadcast %794 : f32 to vector<16x16xf32>
    %796 = arith.mulf %795, %793 : vector<16x16xf32>
    %797 = arith.addf %763, %796 : vector<16x16xf32>
    %c58 = arith.constant 58 : index
    %798 = memref.load %arg2[%c58] : memref<288xf32, #tpu.memory_space<smem>>
    %799 = vector.broadcast %798 : f32 to vector<16x16xf32>
    %800 = arith.mulf %799, %793 : vector<16x16xf32>
    %801 = arith.addf %767, %800 : vector<16x16xf32>
    %c94 = arith.constant 94 : index
    %802 = memref.load %arg2[%c94] : memref<288xf32, #tpu.memory_space<smem>>
    %803 = vector.broadcast %802 : f32 to vector<16x16xf32>
    %804 = arith.mulf %803, %793 : vector<16x16xf32>
    %805 = arith.addf %771, %804 : vector<16x16xf32>
    %c130 = arith.constant 130 : index
    %806 = memref.load %arg2[%c130] : memref<288xf32, #tpu.memory_space<smem>>
    %807 = vector.broadcast %806 : f32 to vector<16x16xf32>
    %808 = arith.mulf %807, %793 : vector<16x16xf32>
    %809 = arith.addf %775, %808 : vector<16x16xf32>
    %c166 = arith.constant 166 : index
    %810 = memref.load %arg2[%c166] : memref<288xf32, #tpu.memory_space<smem>>
    %811 = vector.broadcast %810 : f32 to vector<16x16xf32>
    %812 = arith.mulf %811, %793 : vector<16x16xf32>
    %813 = arith.addf %779, %812 : vector<16x16xf32>
    %c202 = arith.constant 202 : index
    %814 = memref.load %arg2[%c202] : memref<288xf32, #tpu.memory_space<smem>>
    %815 = vector.broadcast %814 : f32 to vector<16x16xf32>
    %816 = arith.mulf %815, %793 : vector<16x16xf32>
    %817 = arith.addf %783, %816 : vector<16x16xf32>
    %c238 = arith.constant 238 : index
    %818 = memref.load %arg2[%c238] : memref<288xf32, #tpu.memory_space<smem>>
    %819 = vector.broadcast %818 : f32 to vector<16x16xf32>
    %820 = arith.mulf %819, %793 : vector<16x16xf32>
    %821 = arith.addf %787, %820 : vector<16x16xf32>
    %c274 = arith.constant 274 : index
    %822 = memref.load %arg2[%c274] : memref<288xf32, #tpu.memory_space<smem>>
    %823 = vector.broadcast %822 : f32 to vector<16x16xf32>
    %824 = arith.mulf %823, %793 : vector<16x16xf32>
    %825 = arith.addf %791, %824 : vector<16x16xf32>
    %c2_115 = arith.constant 2 : index
    %c1_116 = arith.constant 1 : index
    %c2_117 = arith.constant 2 : index
    %826 = vector.load %arg5[%c2_115, %c1_116, %c2_117] : memref<4x18x18xf32, #tpu.memory_space<vmem>>, vector<1x16x16xf32>
    %827 = vector.shape_cast %826 : vector<1x16x16xf32> to vector<16x16xf32>
    %c23 = arith.constant 23 : index
    %828 = memref.load %arg2[%c23] : memref<288xf32, #tpu.memory_space<smem>>
    %829 = vector.broadcast %828 : f32 to vector<16x16xf32>
    %830 = arith.mulf %829, %827 : vector<16x16xf32>
    %831 = arith.addf %797, %830 : vector<16x16xf32>
    %c59 = arith.constant 59 : index
    %832 = memref.load %arg2[%c59] : memref<288xf32, #tpu.memory_space<smem>>
    %833 = vector.broadcast %832 : f32 to vector<16x16xf32>
    %834 = arith.mulf %833, %827 : vector<16x16xf32>
    %835 = arith.addf %801, %834 : vector<16x16xf32>
    %c95 = arith.constant 95 : index
    %836 = memref.load %arg2[%c95] : memref<288xf32, #tpu.memory_space<smem>>
    %837 = vector.broadcast %836 : f32 to vector<16x16xf32>
    %838 = arith.mulf %837, %827 : vector<16x16xf32>
    %839 = arith.addf %805, %838 : vector<16x16xf32>
    %c131 = arith.constant 131 : index
    %840 = memref.load %arg2[%c131] : memref<288xf32, #tpu.memory_space<smem>>
    %841 = vector.broadcast %840 : f32 to vector<16x16xf32>
    %842 = arith.mulf %841, %827 : vector<16x16xf32>
    %843 = arith.addf %809, %842 : vector<16x16xf32>
    %c167 = arith.constant 167 : index
    %844 = memref.load %arg2[%c167] : memref<288xf32, #tpu.memory_space<smem>>
    %845 = vector.broadcast %844 : f32 to vector<16x16xf32>
    %846 = arith.mulf %845, %827 : vector<16x16xf32>
    %847 = arith.addf %813, %846 : vector<16x16xf32>
    %c203 = arith.constant 203 : index
    %848 = memref.load %arg2[%c203] : memref<288xf32, #tpu.memory_space<smem>>
    %849 = vector.broadcast %848 : f32 to vector<16x16xf32>
    %850 = arith.mulf %849, %827 : vector<16x16xf32>
    %851 = arith.addf %817, %850 : vector<16x16xf32>
    %c239 = arith.constant 239 : index
    %852 = memref.load %arg2[%c239] : memref<288xf32, #tpu.memory_space<smem>>
    %853 = vector.broadcast %852 : f32 to vector<16x16xf32>
    %854 = arith.mulf %853, %827 : vector<16x16xf32>
    %855 = arith.addf %821, %854 : vector<16x16xf32>
    %c275 = arith.constant 275 : index
    %856 = memref.load %arg2[%c275] : memref<288xf32, #tpu.memory_space<smem>>
    %857 = vector.broadcast %856 : f32 to vector<16x16xf32>
    %858 = arith.mulf %857, %827 : vector<16x16xf32>
    %859 = arith.addf %825, %858 : vector<16x16xf32>
    %c2_118 = arith.constant 2 : index
    %c2_119 = arith.constant 2 : index
    %c0_120 = arith.constant 0 : index
    %860 = vector.load %arg5[%c2_118, %c2_119, %c0_120] : memref<4x18x18xf32, #tpu.memory_space<vmem>>, vector<1x16x16xf32>
    %861 = vector.shape_cast %860 : vector<1x16x16xf32> to vector<16x16xf32>
    %c24 = arith.constant 24 : index
    %862 = memref.load %arg2[%c24] : memref<288xf32, #tpu.memory_space<smem>>
    %863 = vector.broadcast %862 : f32 to vector<16x16xf32>
    %864 = arith.mulf %863, %861 : vector<16x16xf32>
    %865 = arith.addf %831, %864 : vector<16x16xf32>
    %c60 = arith.constant 60 : index
    %866 = memref.load %arg2[%c60] : memref<288xf32, #tpu.memory_space<smem>>
    %867 = vector.broadcast %866 : f32 to vector<16x16xf32>
    %868 = arith.mulf %867, %861 : vector<16x16xf32>
    %869 = arith.addf %835, %868 : vector<16x16xf32>
    %c96 = arith.constant 96 : index
    %870 = memref.load %arg2[%c96] : memref<288xf32, #tpu.memory_space<smem>>
    %871 = vector.broadcast %870 : f32 to vector<16x16xf32>
    %872 = arith.mulf %871, %861 : vector<16x16xf32>
    %873 = arith.addf %839, %872 : vector<16x16xf32>
    %c132 = arith.constant 132 : index
    %874 = memref.load %arg2[%c132] : memref<288xf32, #tpu.memory_space<smem>>
    %875 = vector.broadcast %874 : f32 to vector<16x16xf32>
    %876 = arith.mulf %875, %861 : vector<16x16xf32>
    %877 = arith.addf %843, %876 : vector<16x16xf32>
    %c168 = arith.constant 168 : index
    %878 = memref.load %arg2[%c168] : memref<288xf32, #tpu.memory_space<smem>>
    %879 = vector.broadcast %878 : f32 to vector<16x16xf32>
    %880 = arith.mulf %879, %861 : vector<16x16xf32>
    %881 = arith.addf %847, %880 : vector<16x16xf32>
    %c204 = arith.constant 204 : index
    %882 = memref.load %arg2[%c204] : memref<288xf32, #tpu.memory_space<smem>>
    %883 = vector.broadcast %882 : f32 to vector<16x16xf32>
    %884 = arith.mulf %883, %861 : vector<16x16xf32>
    %885 = arith.addf %851, %884 : vector<16x16xf32>
    %c240 = arith.constant 240 : index
    %886 = memref.load %arg2[%c240] : memref<288xf32, #tpu.memory_space<smem>>
    %887 = vector.broadcast %886 : f32 to vector<16x16xf32>
    %888 = arith.mulf %887, %861 : vector<16x16xf32>
    %889 = arith.addf %855, %888 : vector<16x16xf32>
    %c276 = arith.constant 276 : index
    %890 = memref.load %arg2[%c276] : memref<288xf32, #tpu.memory_space<smem>>
    %891 = vector.broadcast %890 : f32 to vector<16x16xf32>
    %892 = arith.mulf %891, %861 : vector<16x16xf32>
    %893 = arith.addf %859, %892 : vector<16x16xf32>
    %c2_121 = arith.constant 2 : index
    %c2_122 = arith.constant 2 : index
    %c1_123 = arith.constant 1 : index
    %894 = vector.load %arg5[%c2_121, %c2_122, %c1_123] : memref<4x18x18xf32, #tpu.memory_space<vmem>>, vector<1x16x16xf32>
    %895 = vector.shape_cast %894 : vector<1x16x16xf32> to vector<16x16xf32>
    %c25 = arith.constant 25 : index
    %896 = memref.load %arg2[%c25] : memref<288xf32, #tpu.memory_space<smem>>
    %897 = vector.broadcast %896 : f32 to vector<16x16xf32>
    %898 = arith.mulf %897, %895 : vector<16x16xf32>
    %899 = arith.addf %865, %898 : vector<16x16xf32>
    %c61 = arith.constant 61 : index
    %900 = memref.load %arg2[%c61] : memref<288xf32, #tpu.memory_space<smem>>
    %901 = vector.broadcast %900 : f32 to vector<16x16xf32>
    %902 = arith.mulf %901, %895 : vector<16x16xf32>
    %903 = arith.addf %869, %902 : vector<16x16xf32>
    %c97 = arith.constant 97 : index
    %904 = memref.load %arg2[%c97] : memref<288xf32, #tpu.memory_space<smem>>
    %905 = vector.broadcast %904 : f32 to vector<16x16xf32>
    %906 = arith.mulf %905, %895 : vector<16x16xf32>
    %907 = arith.addf %873, %906 : vector<16x16xf32>
    %c133 = arith.constant 133 : index
    %908 = memref.load %arg2[%c133] : memref<288xf32, #tpu.memory_space<smem>>
    %909 = vector.broadcast %908 : f32 to vector<16x16xf32>
    %910 = arith.mulf %909, %895 : vector<16x16xf32>
    %911 = arith.addf %877, %910 : vector<16x16xf32>
    %c169 = arith.constant 169 : index
    %912 = memref.load %arg2[%c169] : memref<288xf32, #tpu.memory_space<smem>>
    %913 = vector.broadcast %912 : f32 to vector<16x16xf32>
    %914 = arith.mulf %913, %895 : vector<16x16xf32>
    %915 = arith.addf %881, %914 : vector<16x16xf32>
    %c205 = arith.constant 205 : index
    %916 = memref.load %arg2[%c205] : memref<288xf32, #tpu.memory_space<smem>>
    %917 = vector.broadcast %916 : f32 to vector<16x16xf32>
    %918 = arith.mulf %917, %895 : vector<16x16xf32>
    %919 = arith.addf %885, %918 : vector<16x16xf32>
    %c241 = arith.constant 241 : index
    %920 = memref.load %arg2[%c241] : memref<288xf32, #tpu.memory_space<smem>>
    %921 = vector.broadcast %920 : f32 to vector<16x16xf32>
    %922 = arith.mulf %921, %895 : vector<16x16xf32>
    %923 = arith.addf %889, %922 : vector<16x16xf32>
    %c277 = arith.constant 277 : index
    %924 = memref.load %arg2[%c277] : memref<288xf32, #tpu.memory_space<smem>>
    %925 = vector.broadcast %924 : f32 to vector<16x16xf32>
    %926 = arith.mulf %925, %895 : vector<16x16xf32>
    %927 = arith.addf %893, %926 : vector<16x16xf32>
    %c2_124 = arith.constant 2 : index
    %c2_125 = arith.constant 2 : index
    %c2_126 = arith.constant 2 : index
    %928 = vector.load %arg5[%c2_124, %c2_125, %c2_126] : memref<4x18x18xf32, #tpu.memory_space<vmem>>, vector<1x16x16xf32>
    %929 = vector.shape_cast %928 : vector<1x16x16xf32> to vector<16x16xf32>
    %c26 = arith.constant 26 : index
    %930 = memref.load %arg2[%c26] : memref<288xf32, #tpu.memory_space<smem>>
    %931 = vector.broadcast %930 : f32 to vector<16x16xf32>
    %932 = arith.mulf %931, %929 : vector<16x16xf32>
    %933 = arith.addf %899, %932 : vector<16x16xf32>
    %c62 = arith.constant 62 : index
    %934 = memref.load %arg2[%c62] : memref<288xf32, #tpu.memory_space<smem>>
    %935 = vector.broadcast %934 : f32 to vector<16x16xf32>
    %936 = arith.mulf %935, %929 : vector<16x16xf32>
    %937 = arith.addf %903, %936 : vector<16x16xf32>
    %c98 = arith.constant 98 : index
    %938 = memref.load %arg2[%c98] : memref<288xf32, #tpu.memory_space<smem>>
    %939 = vector.broadcast %938 : f32 to vector<16x16xf32>
    %940 = arith.mulf %939, %929 : vector<16x16xf32>
    %941 = arith.addf %907, %940 : vector<16x16xf32>
    %c134 = arith.constant 134 : index
    %942 = memref.load %arg2[%c134] : memref<288xf32, #tpu.memory_space<smem>>
    %943 = vector.broadcast %942 : f32 to vector<16x16xf32>
    %944 = arith.mulf %943, %929 : vector<16x16xf32>
    %945 = arith.addf %911, %944 : vector<16x16xf32>
    %c170 = arith.constant 170 : index
    %946 = memref.load %arg2[%c170] : memref<288xf32, #tpu.memory_space<smem>>
    %947 = vector.broadcast %946 : f32 to vector<16x16xf32>
    %948 = arith.mulf %947, %929 : vector<16x16xf32>
    %949 = arith.addf %915, %948 : vector<16x16xf32>
    %c206 = arith.constant 206 : index
    %950 = memref.load %arg2[%c206] : memref<288xf32, #tpu.memory_space<smem>>
    %951 = vector.broadcast %950 : f32 to vector<16x16xf32>
    %952 = arith.mulf %951, %929 : vector<16x16xf32>
    %953 = arith.addf %919, %952 : vector<16x16xf32>
    %c242 = arith.constant 242 : index
    %954 = memref.load %arg2[%c242] : memref<288xf32, #tpu.memory_space<smem>>
    %955 = vector.broadcast %954 : f32 to vector<16x16xf32>
    %956 = arith.mulf %955, %929 : vector<16x16xf32>
    %957 = arith.addf %923, %956 : vector<16x16xf32>
    %c278 = arith.constant 278 : index
    %958 = memref.load %arg2[%c278] : memref<288xf32, #tpu.memory_space<smem>>
    %959 = vector.broadcast %958 : f32 to vector<16x16xf32>
    %960 = arith.mulf %959, %929 : vector<16x16xf32>
    %961 = arith.addf %927, %960 : vector<16x16xf32>
    %c3_127 = arith.constant 3 : index
    %c0_128 = arith.constant 0 : index
    %c0_129 = arith.constant 0 : index
    %962 = vector.load %arg5[%c3_127, %c0_128, %c0_129] : memref<4x18x18xf32, #tpu.memory_space<vmem>>, vector<1x16x16xf32>
    %963 = vector.shape_cast %962 : vector<1x16x16xf32> to vector<16x16xf32>
    %c27 = arith.constant 27 : index
    %964 = memref.load %arg2[%c27] : memref<288xf32, #tpu.memory_space<smem>>
    %965 = vector.broadcast %964 : f32 to vector<16x16xf32>
    %966 = arith.mulf %965, %963 : vector<16x16xf32>
    %967 = arith.addf %933, %966 : vector<16x16xf32>
    %c63 = arith.constant 63 : index
    %968 = memref.load %arg2[%c63] : memref<288xf32, #tpu.memory_space<smem>>
    %969 = vector.broadcast %968 : f32 to vector<16x16xf32>
    %970 = arith.mulf %969, %963 : vector<16x16xf32>
    %971 = arith.addf %937, %970 : vector<16x16xf32>
    %c99 = arith.constant 99 : index
    %972 = memref.load %arg2[%c99] : memref<288xf32, #tpu.memory_space<smem>>
    %973 = vector.broadcast %972 : f32 to vector<16x16xf32>
    %974 = arith.mulf %973, %963 : vector<16x16xf32>
    %975 = arith.addf %941, %974 : vector<16x16xf32>
    %c135 = arith.constant 135 : index
    %976 = memref.load %arg2[%c135] : memref<288xf32, #tpu.memory_space<smem>>
    %977 = vector.broadcast %976 : f32 to vector<16x16xf32>
    %978 = arith.mulf %977, %963 : vector<16x16xf32>
    %979 = arith.addf %945, %978 : vector<16x16xf32>
    %c171 = arith.constant 171 : index
    %980 = memref.load %arg2[%c171] : memref<288xf32, #tpu.memory_space<smem>>
    %981 = vector.broadcast %980 : f32 to vector<16x16xf32>
    %982 = arith.mulf %981, %963 : vector<16x16xf32>
    %983 = arith.addf %949, %982 : vector<16x16xf32>
    %c207 = arith.constant 207 : index
    %984 = memref.load %arg2[%c207] : memref<288xf32, #tpu.memory_space<smem>>
    %985 = vector.broadcast %984 : f32 to vector<16x16xf32>
    %986 = arith.mulf %985, %963 : vector<16x16xf32>
    %987 = arith.addf %953, %986 : vector<16x16xf32>
    %c243 = arith.constant 243 : index
    %988 = memref.load %arg2[%c243] : memref<288xf32, #tpu.memory_space<smem>>
    %989 = vector.broadcast %988 : f32 to vector<16x16xf32>
    %990 = arith.mulf %989, %963 : vector<16x16xf32>
    %991 = arith.addf %957, %990 : vector<16x16xf32>
    %c279 = arith.constant 279 : index
    %992 = memref.load %arg2[%c279] : memref<288xf32, #tpu.memory_space<smem>>
    %993 = vector.broadcast %992 : f32 to vector<16x16xf32>
    %994 = arith.mulf %993, %963 : vector<16x16xf32>
    %995 = arith.addf %961, %994 : vector<16x16xf32>
    %c3_130 = arith.constant 3 : index
    %c0_131 = arith.constant 0 : index
    %c1_132 = arith.constant 1 : index
    %996 = vector.load %arg5[%c3_130, %c0_131, %c1_132] : memref<4x18x18xf32, #tpu.memory_space<vmem>>, vector<1x16x16xf32>
    %997 = vector.shape_cast %996 : vector<1x16x16xf32> to vector<16x16xf32>
    %c28 = arith.constant 28 : index
    %998 = memref.load %arg2[%c28] : memref<288xf32, #tpu.memory_space<smem>>
    %999 = vector.broadcast %998 : f32 to vector<16x16xf32>
    %1000 = arith.mulf %999, %997 : vector<16x16xf32>
    %1001 = arith.addf %967, %1000 : vector<16x16xf32>
    %c64 = arith.constant 64 : index
    %1002 = memref.load %arg2[%c64] : memref<288xf32, #tpu.memory_space<smem>>
    %1003 = vector.broadcast %1002 : f32 to vector<16x16xf32>
    %1004 = arith.mulf %1003, %997 : vector<16x16xf32>
    %1005 = arith.addf %971, %1004 : vector<16x16xf32>
    %c100 = arith.constant 100 : index
    %1006 = memref.load %arg2[%c100] : memref<288xf32, #tpu.memory_space<smem>>
    %1007 = vector.broadcast %1006 : f32 to vector<16x16xf32>
    %1008 = arith.mulf %1007, %997 : vector<16x16xf32>
    %1009 = arith.addf %975, %1008 : vector<16x16xf32>
    %c136 = arith.constant 136 : index
    %1010 = memref.load %arg2[%c136] : memref<288xf32, #tpu.memory_space<smem>>
    %1011 = vector.broadcast %1010 : f32 to vector<16x16xf32>
    %1012 = arith.mulf %1011, %997 : vector<16x16xf32>
    %1013 = arith.addf %979, %1012 : vector<16x16xf32>
    %c172 = arith.constant 172 : index
    %1014 = memref.load %arg2[%c172] : memref<288xf32, #tpu.memory_space<smem>>
    %1015 = vector.broadcast %1014 : f32 to vector<16x16xf32>
    %1016 = arith.mulf %1015, %997 : vector<16x16xf32>
    %1017 = arith.addf %983, %1016 : vector<16x16xf32>
    %c208 = arith.constant 208 : index
    %1018 = memref.load %arg2[%c208] : memref<288xf32, #tpu.memory_space<smem>>
    %1019 = vector.broadcast %1018 : f32 to vector<16x16xf32>
    %1020 = arith.mulf %1019, %997 : vector<16x16xf32>
    %1021 = arith.addf %987, %1020 : vector<16x16xf32>
    %c244 = arith.constant 244 : index
    %1022 = memref.load %arg2[%c244] : memref<288xf32, #tpu.memory_space<smem>>
    %1023 = vector.broadcast %1022 : f32 to vector<16x16xf32>
    %1024 = arith.mulf %1023, %997 : vector<16x16xf32>
    %1025 = arith.addf %991, %1024 : vector<16x16xf32>
    %c280 = arith.constant 280 : index
    %1026 = memref.load %arg2[%c280] : memref<288xf32, #tpu.memory_space<smem>>
    %1027 = vector.broadcast %1026 : f32 to vector<16x16xf32>
    %1028 = arith.mulf %1027, %997 : vector<16x16xf32>
    %1029 = arith.addf %995, %1028 : vector<16x16xf32>
    %c3_133 = arith.constant 3 : index
    %c0_134 = arith.constant 0 : index
    %c2_135 = arith.constant 2 : index
    %1030 = vector.load %arg5[%c3_133, %c0_134, %c2_135] : memref<4x18x18xf32, #tpu.memory_space<vmem>>, vector<1x16x16xf32>
    %1031 = vector.shape_cast %1030 : vector<1x16x16xf32> to vector<16x16xf32>
    %c29 = arith.constant 29 : index
    %1032 = memref.load %arg2[%c29] : memref<288xf32, #tpu.memory_space<smem>>
    %1033 = vector.broadcast %1032 : f32 to vector<16x16xf32>
    %1034 = arith.mulf %1033, %1031 : vector<16x16xf32>
    %1035 = arith.addf %1001, %1034 : vector<16x16xf32>
    %c65 = arith.constant 65 : index
    %1036 = memref.load %arg2[%c65] : memref<288xf32, #tpu.memory_space<smem>>
    %1037 = vector.broadcast %1036 : f32 to vector<16x16xf32>
    %1038 = arith.mulf %1037, %1031 : vector<16x16xf32>
    %1039 = arith.addf %1005, %1038 : vector<16x16xf32>
    %c101 = arith.constant 101 : index
    %1040 = memref.load %arg2[%c101] : memref<288xf32, #tpu.memory_space<smem>>
    %1041 = vector.broadcast %1040 : f32 to vector<16x16xf32>
    %1042 = arith.mulf %1041, %1031 : vector<16x16xf32>
    %1043 = arith.addf %1009, %1042 : vector<16x16xf32>
    %c137 = arith.constant 137 : index
    %1044 = memref.load %arg2[%c137] : memref<288xf32, #tpu.memory_space<smem>>
    %1045 = vector.broadcast %1044 : f32 to vector<16x16xf32>
    %1046 = arith.mulf %1045, %1031 : vector<16x16xf32>
    %1047 = arith.addf %1013, %1046 : vector<16x16xf32>
    %c173 = arith.constant 173 : index
    %1048 = memref.load %arg2[%c173] : memref<288xf32, #tpu.memory_space<smem>>
    %1049 = vector.broadcast %1048 : f32 to vector<16x16xf32>
    %1050 = arith.mulf %1049, %1031 : vector<16x16xf32>
    %1051 = arith.addf %1017, %1050 : vector<16x16xf32>
    %c209 = arith.constant 209 : index
    %1052 = memref.load %arg2[%c209] : memref<288xf32, #tpu.memory_space<smem>>
    %1053 = vector.broadcast %1052 : f32 to vector<16x16xf32>
    %1054 = arith.mulf %1053, %1031 : vector<16x16xf32>
    %1055 = arith.addf %1021, %1054 : vector<16x16xf32>
    %c245 = arith.constant 245 : index
    %1056 = memref.load %arg2[%c245] : memref<288xf32, #tpu.memory_space<smem>>
    %1057 = vector.broadcast %1056 : f32 to vector<16x16xf32>
    %1058 = arith.mulf %1057, %1031 : vector<16x16xf32>
    %1059 = arith.addf %1025, %1058 : vector<16x16xf32>
    %c281 = arith.constant 281 : index
    %1060 = memref.load %arg2[%c281] : memref<288xf32, #tpu.memory_space<smem>>
    %1061 = vector.broadcast %1060 : f32 to vector<16x16xf32>
    %1062 = arith.mulf %1061, %1031 : vector<16x16xf32>
    %1063 = arith.addf %1029, %1062 : vector<16x16xf32>
    %c3_136 = arith.constant 3 : index
    %c1_137 = arith.constant 1 : index
    %c0_138 = arith.constant 0 : index
    %1064 = vector.load %arg5[%c3_136, %c1_137, %c0_138] : memref<4x18x18xf32, #tpu.memory_space<vmem>>, vector<1x16x16xf32>
    %1065 = vector.shape_cast %1064 : vector<1x16x16xf32> to vector<16x16xf32>
    %c30 = arith.constant 30 : index
    %1066 = memref.load %arg2[%c30] : memref<288xf32, #tpu.memory_space<smem>>
    %1067 = vector.broadcast %1066 : f32 to vector<16x16xf32>
    %1068 = arith.mulf %1067, %1065 : vector<16x16xf32>
    %1069 = arith.addf %1035, %1068 : vector<16x16xf32>
    %c66 = arith.constant 66 : index
    %1070 = memref.load %arg2[%c66] : memref<288xf32, #tpu.memory_space<smem>>
    %1071 = vector.broadcast %1070 : f32 to vector<16x16xf32>
    %1072 = arith.mulf %1071, %1065 : vector<16x16xf32>
    %1073 = arith.addf %1039, %1072 : vector<16x16xf32>
    %c102 = arith.constant 102 : index
    %1074 = memref.load %arg2[%c102] : memref<288xf32, #tpu.memory_space<smem>>
    %1075 = vector.broadcast %1074 : f32 to vector<16x16xf32>
    %1076 = arith.mulf %1075, %1065 : vector<16x16xf32>
    %1077 = arith.addf %1043, %1076 : vector<16x16xf32>
    %c138 = arith.constant 138 : index
    %1078 = memref.load %arg2[%c138] : memref<288xf32, #tpu.memory_space<smem>>
    %1079 = vector.broadcast %1078 : f32 to vector<16x16xf32>
    %1080 = arith.mulf %1079, %1065 : vector<16x16xf32>
    %1081 = arith.addf %1047, %1080 : vector<16x16xf32>
    %c174 = arith.constant 174 : index
    %1082 = memref.load %arg2[%c174] : memref<288xf32, #tpu.memory_space<smem>>
    %1083 = vector.broadcast %1082 : f32 to vector<16x16xf32>
    %1084 = arith.mulf %1083, %1065 : vector<16x16xf32>
    %1085 = arith.addf %1051, %1084 : vector<16x16xf32>
    %c210 = arith.constant 210 : index
    %1086 = memref.load %arg2[%c210] : memref<288xf32, #tpu.memory_space<smem>>
    %1087 = vector.broadcast %1086 : f32 to vector<16x16xf32>
    %1088 = arith.mulf %1087, %1065 : vector<16x16xf32>
    %1089 = arith.addf %1055, %1088 : vector<16x16xf32>
    %c246 = arith.constant 246 : index
    %1090 = memref.load %arg2[%c246] : memref<288xf32, #tpu.memory_space<smem>>
    %1091 = vector.broadcast %1090 : f32 to vector<16x16xf32>
    %1092 = arith.mulf %1091, %1065 : vector<16x16xf32>
    %1093 = arith.addf %1059, %1092 : vector<16x16xf32>
    %c282 = arith.constant 282 : index
    %1094 = memref.load %arg2[%c282] : memref<288xf32, #tpu.memory_space<smem>>
    %1095 = vector.broadcast %1094 : f32 to vector<16x16xf32>
    %1096 = arith.mulf %1095, %1065 : vector<16x16xf32>
    %1097 = arith.addf %1063, %1096 : vector<16x16xf32>
    %c3_139 = arith.constant 3 : index
    %c1_140 = arith.constant 1 : index
    %c1_141 = arith.constant 1 : index
    %1098 = vector.load %arg5[%c3_139, %c1_140, %c1_141] : memref<4x18x18xf32, #tpu.memory_space<vmem>>, vector<1x16x16xf32>
    %1099 = vector.shape_cast %1098 : vector<1x16x16xf32> to vector<16x16xf32>
    %c31 = arith.constant 31 : index
    %1100 = memref.load %arg2[%c31] : memref<288xf32, #tpu.memory_space<smem>>
    %1101 = vector.broadcast %1100 : f32 to vector<16x16xf32>
    %1102 = arith.mulf %1101, %1099 : vector<16x16xf32>
    %1103 = arith.addf %1069, %1102 : vector<16x16xf32>
    %c67 = arith.constant 67 : index
    %1104 = memref.load %arg2[%c67] : memref<288xf32, #tpu.memory_space<smem>>
    %1105 = vector.broadcast %1104 : f32 to vector<16x16xf32>
    %1106 = arith.mulf %1105, %1099 : vector<16x16xf32>
    %1107 = arith.addf %1073, %1106 : vector<16x16xf32>
    %c103 = arith.constant 103 : index
    %1108 = memref.load %arg2[%c103] : memref<288xf32, #tpu.memory_space<smem>>
    %1109 = vector.broadcast %1108 : f32 to vector<16x16xf32>
    %1110 = arith.mulf %1109, %1099 : vector<16x16xf32>
    %1111 = arith.addf %1077, %1110 : vector<16x16xf32>
    %c139 = arith.constant 139 : index
    %1112 = memref.load %arg2[%c139] : memref<288xf32, #tpu.memory_space<smem>>
    %1113 = vector.broadcast %1112 : f32 to vector<16x16xf32>
    %1114 = arith.mulf %1113, %1099 : vector<16x16xf32>
    %1115 = arith.addf %1081, %1114 : vector<16x16xf32>
    %c175 = arith.constant 175 : index
    %1116 = memref.load %arg2[%c175] : memref<288xf32, #tpu.memory_space<smem>>
    %1117 = vector.broadcast %1116 : f32 to vector<16x16xf32>
    %1118 = arith.mulf %1117, %1099 : vector<16x16xf32>
    %1119 = arith.addf %1085, %1118 : vector<16x16xf32>
    %c211 = arith.constant 211 : index
    %1120 = memref.load %arg2[%c211] : memref<288xf32, #tpu.memory_space<smem>>
    %1121 = vector.broadcast %1120 : f32 to vector<16x16xf32>
    %1122 = arith.mulf %1121, %1099 : vector<16x16xf32>
    %1123 = arith.addf %1089, %1122 : vector<16x16xf32>
    %c247 = arith.constant 247 : index
    %1124 = memref.load %arg2[%c247] : memref<288xf32, #tpu.memory_space<smem>>
    %1125 = vector.broadcast %1124 : f32 to vector<16x16xf32>
    %1126 = arith.mulf %1125, %1099 : vector<16x16xf32>
    %1127 = arith.addf %1093, %1126 : vector<16x16xf32>
    %c283 = arith.constant 283 : index
    %1128 = memref.load %arg2[%c283] : memref<288xf32, #tpu.memory_space<smem>>
    %1129 = vector.broadcast %1128 : f32 to vector<16x16xf32>
    %1130 = arith.mulf %1129, %1099 : vector<16x16xf32>
    %1131 = arith.addf %1097, %1130 : vector<16x16xf32>
    %c3_142 = arith.constant 3 : index
    %c1_143 = arith.constant 1 : index
    %c2_144 = arith.constant 2 : index
    %1132 = vector.load %arg5[%c3_142, %c1_143, %c2_144] : memref<4x18x18xf32, #tpu.memory_space<vmem>>, vector<1x16x16xf32>
    %1133 = vector.shape_cast %1132 : vector<1x16x16xf32> to vector<16x16xf32>
    %c32 = arith.constant 32 : index
    %1134 = memref.load %arg2[%c32] : memref<288xf32, #tpu.memory_space<smem>>
    %1135 = vector.broadcast %1134 : f32 to vector<16x16xf32>
    %1136 = arith.mulf %1135, %1133 : vector<16x16xf32>
    %1137 = arith.addf %1103, %1136 : vector<16x16xf32>
    %c68 = arith.constant 68 : index
    %1138 = memref.load %arg2[%c68] : memref<288xf32, #tpu.memory_space<smem>>
    %1139 = vector.broadcast %1138 : f32 to vector<16x16xf32>
    %1140 = arith.mulf %1139, %1133 : vector<16x16xf32>
    %1141 = arith.addf %1107, %1140 : vector<16x16xf32>
    %c104 = arith.constant 104 : index
    %1142 = memref.load %arg2[%c104] : memref<288xf32, #tpu.memory_space<smem>>
    %1143 = vector.broadcast %1142 : f32 to vector<16x16xf32>
    %1144 = arith.mulf %1143, %1133 : vector<16x16xf32>
    %1145 = arith.addf %1111, %1144 : vector<16x16xf32>
    %c140 = arith.constant 140 : index
    %1146 = memref.load %arg2[%c140] : memref<288xf32, #tpu.memory_space<smem>>
    %1147 = vector.broadcast %1146 : f32 to vector<16x16xf32>
    %1148 = arith.mulf %1147, %1133 : vector<16x16xf32>
    %1149 = arith.addf %1115, %1148 : vector<16x16xf32>
    %c176 = arith.constant 176 : index
    %1150 = memref.load %arg2[%c176] : memref<288xf32, #tpu.memory_space<smem>>
    %1151 = vector.broadcast %1150 : f32 to vector<16x16xf32>
    %1152 = arith.mulf %1151, %1133 : vector<16x16xf32>
    %1153 = arith.addf %1119, %1152 : vector<16x16xf32>
    %c212 = arith.constant 212 : index
    %1154 = memref.load %arg2[%c212] : memref<288xf32, #tpu.memory_space<smem>>
    %1155 = vector.broadcast %1154 : f32 to vector<16x16xf32>
    %1156 = arith.mulf %1155, %1133 : vector<16x16xf32>
    %1157 = arith.addf %1123, %1156 : vector<16x16xf32>
    %c248 = arith.constant 248 : index
    %1158 = memref.load %arg2[%c248] : memref<288xf32, #tpu.memory_space<smem>>
    %1159 = vector.broadcast %1158 : f32 to vector<16x16xf32>
    %1160 = arith.mulf %1159, %1133 : vector<16x16xf32>
    %1161 = arith.addf %1127, %1160 : vector<16x16xf32>
    %c284 = arith.constant 284 : index
    %1162 = memref.load %arg2[%c284] : memref<288xf32, #tpu.memory_space<smem>>
    %1163 = vector.broadcast %1162 : f32 to vector<16x16xf32>
    %1164 = arith.mulf %1163, %1133 : vector<16x16xf32>
    %1165 = arith.addf %1131, %1164 : vector<16x16xf32>
    %c3_145 = arith.constant 3 : index
    %c2_146 = arith.constant 2 : index
    %c0_147 = arith.constant 0 : index
    %1166 = vector.load %arg5[%c3_145, %c2_146, %c0_147] : memref<4x18x18xf32, #tpu.memory_space<vmem>>, vector<1x16x16xf32>
    %1167 = vector.shape_cast %1166 : vector<1x16x16xf32> to vector<16x16xf32>
    %c33 = arith.constant 33 : index
    %1168 = memref.load %arg2[%c33] : memref<288xf32, #tpu.memory_space<smem>>
    %1169 = vector.broadcast %1168 : f32 to vector<16x16xf32>
    %1170 = arith.mulf %1169, %1167 : vector<16x16xf32>
    %1171 = arith.addf %1137, %1170 : vector<16x16xf32>
    %c69 = arith.constant 69 : index
    %1172 = memref.load %arg2[%c69] : memref<288xf32, #tpu.memory_space<smem>>
    %1173 = vector.broadcast %1172 : f32 to vector<16x16xf32>
    %1174 = arith.mulf %1173, %1167 : vector<16x16xf32>
    %1175 = arith.addf %1141, %1174 : vector<16x16xf32>
    %c105 = arith.constant 105 : index
    %1176 = memref.load %arg2[%c105] : memref<288xf32, #tpu.memory_space<smem>>
    %1177 = vector.broadcast %1176 : f32 to vector<16x16xf32>
    %1178 = arith.mulf %1177, %1167 : vector<16x16xf32>
    %1179 = arith.addf %1145, %1178 : vector<16x16xf32>
    %c141 = arith.constant 141 : index
    %1180 = memref.load %arg2[%c141] : memref<288xf32, #tpu.memory_space<smem>>
    %1181 = vector.broadcast %1180 : f32 to vector<16x16xf32>
    %1182 = arith.mulf %1181, %1167 : vector<16x16xf32>
    %1183 = arith.addf %1149, %1182 : vector<16x16xf32>
    %c177 = arith.constant 177 : index
    %1184 = memref.load %arg2[%c177] : memref<288xf32, #tpu.memory_space<smem>>
    %1185 = vector.broadcast %1184 : f32 to vector<16x16xf32>
    %1186 = arith.mulf %1185, %1167 : vector<16x16xf32>
    %1187 = arith.addf %1153, %1186 : vector<16x16xf32>
    %c213 = arith.constant 213 : index
    %1188 = memref.load %arg2[%c213] : memref<288xf32, #tpu.memory_space<smem>>
    %1189 = vector.broadcast %1188 : f32 to vector<16x16xf32>
    %1190 = arith.mulf %1189, %1167 : vector<16x16xf32>
    %1191 = arith.addf %1157, %1190 : vector<16x16xf32>
    %c249 = arith.constant 249 : index
    %1192 = memref.load %arg2[%c249] : memref<288xf32, #tpu.memory_space<smem>>
    %1193 = vector.broadcast %1192 : f32 to vector<16x16xf32>
    %1194 = arith.mulf %1193, %1167 : vector<16x16xf32>
    %1195 = arith.addf %1161, %1194 : vector<16x16xf32>
    %c285 = arith.constant 285 : index
    %1196 = memref.load %arg2[%c285] : memref<288xf32, #tpu.memory_space<smem>>
    %1197 = vector.broadcast %1196 : f32 to vector<16x16xf32>
    %1198 = arith.mulf %1197, %1167 : vector<16x16xf32>
    %1199 = arith.addf %1165, %1198 : vector<16x16xf32>
    %c3_148 = arith.constant 3 : index
    %c2_149 = arith.constant 2 : index
    %c1_150 = arith.constant 1 : index
    %1200 = vector.load %arg5[%c3_148, %c2_149, %c1_150] : memref<4x18x18xf32, #tpu.memory_space<vmem>>, vector<1x16x16xf32>
    %1201 = vector.shape_cast %1200 : vector<1x16x16xf32> to vector<16x16xf32>
    %c34 = arith.constant 34 : index
    %1202 = memref.load %arg2[%c34] : memref<288xf32, #tpu.memory_space<smem>>
    %1203 = vector.broadcast %1202 : f32 to vector<16x16xf32>
    %1204 = arith.mulf %1203, %1201 : vector<16x16xf32>
    %1205 = arith.addf %1171, %1204 : vector<16x16xf32>
    %c70 = arith.constant 70 : index
    %1206 = memref.load %arg2[%c70] : memref<288xf32, #tpu.memory_space<smem>>
    %1207 = vector.broadcast %1206 : f32 to vector<16x16xf32>
    %1208 = arith.mulf %1207, %1201 : vector<16x16xf32>
    %1209 = arith.addf %1175, %1208 : vector<16x16xf32>
    %c106 = arith.constant 106 : index
    %1210 = memref.load %arg2[%c106] : memref<288xf32, #tpu.memory_space<smem>>
    %1211 = vector.broadcast %1210 : f32 to vector<16x16xf32>
    %1212 = arith.mulf %1211, %1201 : vector<16x16xf32>
    %1213 = arith.addf %1179, %1212 : vector<16x16xf32>
    %c142 = arith.constant 142 : index
    %1214 = memref.load %arg2[%c142] : memref<288xf32, #tpu.memory_space<smem>>
    %1215 = vector.broadcast %1214 : f32 to vector<16x16xf32>
    %1216 = arith.mulf %1215, %1201 : vector<16x16xf32>
    %1217 = arith.addf %1183, %1216 : vector<16x16xf32>
    %c178 = arith.constant 178 : index
    %1218 = memref.load %arg2[%c178] : memref<288xf32, #tpu.memory_space<smem>>
    %1219 = vector.broadcast %1218 : f32 to vector<16x16xf32>
    %1220 = arith.mulf %1219, %1201 : vector<16x16xf32>
    %1221 = arith.addf %1187, %1220 : vector<16x16xf32>
    %c214 = arith.constant 214 : index
    %1222 = memref.load %arg2[%c214] : memref<288xf32, #tpu.memory_space<smem>>
    %1223 = vector.broadcast %1222 : f32 to vector<16x16xf32>
    %1224 = arith.mulf %1223, %1201 : vector<16x16xf32>
    %1225 = arith.addf %1191, %1224 : vector<16x16xf32>
    %c250 = arith.constant 250 : index
    %1226 = memref.load %arg2[%c250] : memref<288xf32, #tpu.memory_space<smem>>
    %1227 = vector.broadcast %1226 : f32 to vector<16x16xf32>
    %1228 = arith.mulf %1227, %1201 : vector<16x16xf32>
    %1229 = arith.addf %1195, %1228 : vector<16x16xf32>
    %c286 = arith.constant 286 : index
    %1230 = memref.load %arg2[%c286] : memref<288xf32, #tpu.memory_space<smem>>
    %1231 = vector.broadcast %1230 : f32 to vector<16x16xf32>
    %1232 = arith.mulf %1231, %1201 : vector<16x16xf32>
    %1233 = arith.addf %1199, %1232 : vector<16x16xf32>
    %c3_151 = arith.constant 3 : index
    %c2_152 = arith.constant 2 : index
    %c2_153 = arith.constant 2 : index
    %1234 = vector.load %arg5[%c3_151, %c2_152, %c2_153] : memref<4x18x18xf32, #tpu.memory_space<vmem>>, vector<1x16x16xf32>
    %1235 = vector.shape_cast %1234 : vector<1x16x16xf32> to vector<16x16xf32>
    %c35 = arith.constant 35 : index
    %1236 = memref.load %arg2[%c35] : memref<288xf32, #tpu.memory_space<smem>>
    %1237 = vector.broadcast %1236 : f32 to vector<16x16xf32>
    %1238 = arith.mulf %1237, %1235 : vector<16x16xf32>
    %1239 = arith.addf %1205, %1238 : vector<16x16xf32>
    %c71 = arith.constant 71 : index
    %1240 = memref.load %arg2[%c71] : memref<288xf32, #tpu.memory_space<smem>>
    %1241 = vector.broadcast %1240 : f32 to vector<16x16xf32>
    %1242 = arith.mulf %1241, %1235 : vector<16x16xf32>
    %1243 = arith.addf %1209, %1242 : vector<16x16xf32>
    %c107 = arith.constant 107 : index
    %1244 = memref.load %arg2[%c107] : memref<288xf32, #tpu.memory_space<smem>>
    %1245 = vector.broadcast %1244 : f32 to vector<16x16xf32>
    %1246 = arith.mulf %1245, %1235 : vector<16x16xf32>
    %1247 = arith.addf %1213, %1246 : vector<16x16xf32>
    %c143 = arith.constant 143 : index
    %1248 = memref.load %arg2[%c143] : memref<288xf32, #tpu.memory_space<smem>>
    %1249 = vector.broadcast %1248 : f32 to vector<16x16xf32>
    %1250 = arith.mulf %1249, %1235 : vector<16x16xf32>
    %1251 = arith.addf %1217, %1250 : vector<16x16xf32>
    %c179 = arith.constant 179 : index
    %1252 = memref.load %arg2[%c179] : memref<288xf32, #tpu.memory_space<smem>>
    %1253 = vector.broadcast %1252 : f32 to vector<16x16xf32>
    %1254 = arith.mulf %1253, %1235 : vector<16x16xf32>
    %1255 = arith.addf %1221, %1254 : vector<16x16xf32>
    %c215 = arith.constant 215 : index
    %1256 = memref.load %arg2[%c215] : memref<288xf32, #tpu.memory_space<smem>>
    %1257 = vector.broadcast %1256 : f32 to vector<16x16xf32>
    %1258 = arith.mulf %1257, %1235 : vector<16x16xf32>
    %1259 = arith.addf %1225, %1258 : vector<16x16xf32>
    %c251 = arith.constant 251 : index
    %1260 = memref.load %arg2[%c251] : memref<288xf32, #tpu.memory_space<smem>>
    %1261 = vector.broadcast %1260 : f32 to vector<16x16xf32>
    %1262 = arith.mulf %1261, %1235 : vector<16x16xf32>
    %1263 = arith.addf %1229, %1262 : vector<16x16xf32>
    %c287 = arith.constant 287 : index
    %1264 = memref.load %arg2[%c287] : memref<288xf32, #tpu.memory_space<smem>>
    %1265 = vector.broadcast %1264 : f32 to vector<16x16xf32>
    %1266 = arith.mulf %1265, %1235 : vector<16x16xf32>
    %1267 = arith.addf %1233, %1266 : vector<16x16xf32>
    %cst_154 = arith.constant 0.000000e+00 : f32
    %1268 = vector.broadcast %cst_154 : f32 to vector<16x16xf32>
    %1269 = arith.cmpf oge, %1239, %1268 : vector<16x16xf32>
    %cst_155 = arith.constant 2.000000e-01 : f32
    %1270 = vector.broadcast %cst_155 : f32 to vector<16x16xf32>
    %1271 = arith.mulf %1270, %1239 : vector<16x16xf32>
    %1272 = arith.select %1269, %1239, %1271 : vector<16x16xi1>, vector<16x16xf32>
    %c0_156 = arith.constant 0 : index
    %c0_157 = arith.constant 0 : index
    %c0_158 = arith.constant 0 : index
    %c0_159 = arith.constant 0 : index
    %1273 = vector.load %arg4[%c0_156, %c0_157, %c0_158, %c0_159] : memref<1x8x16x16xf32, #tpu.memory_space<vmem>>, vector<1x1x16x16xf32>
    %1274 = vector.shape_cast %1273 : vector<1x1x16x16xf32> to vector<16x16xf32>
    %1275 = vector.shape_cast %1272 : vector<16x16xf32> to vector<1x1x16x16xf32>
    tpu.vector_store %arg4[%c0_156, %c0_157, %c0_158, %c0_159], %1275 {strides = array<i32>} : memref<1x8x16x16xf32, #tpu.memory_space<vmem>>, vector<1x1x16x16xf32>,
    %cst_160 = arith.constant 0.000000e+00 : f32
    %1276 = vector.broadcast %cst_160 : f32 to vector<16x16xf32>
    %1277 = arith.cmpf oge, %1243, %1276 : vector<16x16xf32>
    %cst_161 = arith.constant 2.000000e-01 : f32
    %1278 = vector.broadcast %cst_161 : f32 to vector<16x16xf32>
    %1279 = arith.mulf %1278, %1243 : vector<16x16xf32>
    %1280 = arith.select %1277, %1243, %1279 : vector<16x16xi1>, vector<16x16xf32>
    %c0_162 = arith.constant 0 : index
    %c1_163 = arith.constant 1 : index
    %c0_164 = arith.constant 0 : index
    %c0_165 = arith.constant 0 : index
    %1281 = vector.load %arg4[%c0_162, %c1_163, %c0_164, %c0_165] : memref<1x8x16x16xf32, #tpu.memory_space<vmem>>, vector<1x1x16x16xf32>
    %1282 = vector.shape_cast %1281 : vector<1x1x16x16xf32> to vector<16x16xf32>
    %1283 = vector.shape_cast %1280 : vector<16x16xf32> to vector<1x1x16x16xf32>
    tpu.vector_store %arg4[%c0_162, %c1_163, %c0_164, %c0_165], %1283 {strides = array<i32>} : memref<1x8x16x16xf32, #tpu.memory_space<vmem>>, vector<1x1x16x16xf32>,
    %cst_166 = arith.constant 0.000000e+00 : f32
    %1284 = vector.broadcast %cst_166 : f32 to vector<16x16xf32>
    %1285 = arith.cmpf oge, %1247, %1284 : vector<16x16xf32>
    %cst_167 = arith.constant 2.000000e-01 : f32
    %1286 = vector.broadcast %cst_167 : f32 to vector<16x16xf32>
    %1287 = arith.mulf %1286, %1247 : vector<16x16xf32>
    %1288 = arith.select %1285, %1247, %1287 : vector<16x16xi1>, vector<16x16xf32>
    %c0_168 = arith.constant 0 : index
    %c2_169 = arith.constant 2 : index
    %c0_170 = arith.constant 0 : index
    %c0_171 = arith.constant 0 : index
    %1289 = vector.load %arg4[%c0_168, %c2_169, %c0_170, %c0_171] : memref<1x8x16x16xf32, #tpu.memory_space<vmem>>, vector<1x1x16x16xf32>
    %1290 = vector.shape_cast %1289 : vector<1x1x16x16xf32> to vector<16x16xf32>
    %1291 = vector.shape_cast %1288 : vector<16x16xf32> to vector<1x1x16x16xf32>
    tpu.vector_store %arg4[%c0_168, %c2_169, %c0_170, %c0_171], %1291 {strides = array<i32>} : memref<1x8x16x16xf32, #tpu.memory_space<vmem>>, vector<1x1x16x16xf32>,
    %cst_172 = arith.constant 0.000000e+00 : f32
    %1292 = vector.broadcast %cst_172 : f32 to vector<16x16xf32>
    %1293 = arith.cmpf oge, %1251, %1292 : vector<16x16xf32>
    %cst_173 = arith.constant 2.000000e-01 : f32
    %1294 = vector.broadcast %cst_173 : f32 to vector<16x16xf32>
    %1295 = arith.mulf %1294, %1251 : vector<16x16xf32>
    %1296 = arith.select %1293, %1251, %1295 : vector<16x16xi1>, vector<16x16xf32>
    %c0_174 = arith.constant 0 : index
    %c3_175 = arith.constant 3 : index
    %c0_176 = arith.constant 0 : index
    %c0_177 = arith.constant 0 : index
    %1297 = vector.load %arg4[%c0_174, %c3_175, %c0_176, %c0_177] : memref<1x8x16x16xf32, #tpu.memory_space<vmem>>, vector<1x1x16x16xf32>
    %1298 = vector.shape_cast %1297 : vector<1x1x16x16xf32> to vector<16x16xf32>
    %1299 = vector.shape_cast %1296 : vector<16x16xf32> to vector<1x1x16x16xf32>
    tpu.vector_store %arg4[%c0_174, %c3_175, %c0_176, %c0_177], %1299 {strides = array<i32>} : memref<1x8x16x16xf32, #tpu.memory_space<vmem>>, vector<1x1x16x16xf32>,
    %cst_178 = arith.constant 0.000000e+00 : f32
    %1300 = vector.broadcast %cst_178 : f32 to vector<16x16xf32>
    %1301 = arith.cmpf oge, %1255, %1300 : vector<16x16xf32>
    %cst_179 = arith.constant 2.000000e-01 : f32
    %1302 = vector.broadcast %cst_179 : f32 to vector<16x16xf32>
    %1303 = arith.mulf %1302, %1255 : vector<16x16xf32>
    %1304 = arith.select %1301, %1255, %1303 : vector<16x16xi1>, vector<16x16xf32>
    %c0_180 = arith.constant 0 : index
    %c4_181 = arith.constant 4 : index
    %c0_182 = arith.constant 0 : index
    %c0_183 = arith.constant 0 : index
    %1305 = vector.load %arg4[%c0_180, %c4_181, %c0_182, %c0_183] : memref<1x8x16x16xf32, #tpu.memory_space<vmem>>, vector<1x1x16x16xf32>
    %1306 = vector.shape_cast %1305 : vector<1x1x16x16xf32> to vector<16x16xf32>
    %1307 = vector.shape_cast %1304 : vector<16x16xf32> to vector<1x1x16x16xf32>
    tpu.vector_store %arg4[%c0_180, %c4_181, %c0_182, %c0_183], %1307 {strides = array<i32>} : memref<1x8x16x16xf32, #tpu.memory_space<vmem>>, vector<1x1x16x16xf32>,
    %cst_184 = arith.constant 0.000000e+00 : f32
    %1308 = vector.broadcast %cst_184 : f32 to vector<16x16xf32>
    %1309 = arith.cmpf oge, %1259, %1308 : vector<16x16xf32>
    %cst_185 = arith.constant 2.000000e-01 : f32
    %1310 = vector.broadcast %cst_185 : f32 to vector<16x16xf32>
    %1311 = arith.mulf %1310, %1259 : vector<16x16xf32>
    %1312 = arith.select %1309, %1259, %1311 : vector<16x16xi1>, vector<16x16xf32>
    %c0_186 = arith.constant 0 : index
    %c5_187 = arith.constant 5 : index
    %c0_188 = arith.constant 0 : index
    %c0_189 = arith.constant 0 : index
    %1313 = vector.load %arg4[%c0_186, %c5_187, %c0_188, %c0_189] : memref<1x8x16x16xf32, #tpu.memory_space<vmem>>, vector<1x1x16x16xf32>
    %1314 = vector.shape_cast %1313 : vector<1x1x16x16xf32> to vector<16x16xf32>
    %1315 = vector.shape_cast %1312 : vector<16x16xf32> to vector<1x1x16x16xf32>
    tpu.vector_store %arg4[%c0_186, %c5_187, %c0_188, %c0_189], %1315 {strides = array<i32>} : memref<1x8x16x16xf32, #tpu.memory_space<vmem>>, vector<1x1x16x16xf32>,
    %cst_190 = arith.constant 0.000000e+00 : f32
    %1316 = vector.broadcast %cst_190 : f32 to vector<16x16xf32>
    %1317 = arith.cmpf oge, %1263, %1316 : vector<16x16xf32>
    %cst_191 = arith.constant 2.000000e-01 : f32
    %1318 = vector.broadcast %cst_191 : f32 to vector<16x16xf32>
    %1319 = arith.mulf %1318, %1263 : vector<16x16xf32>
    %1320 = arith.select %1317, %1263, %1319 : vector<16x16xi1>, vector<16x16xf32>
    %c0_192 = arith.constant 0 : index
    %c6_193 = arith.constant 6 : index
    %c0_194 = arith.constant 0 : index
    %c0_195 = arith.constant 0 : index
    %1321 = vector.load %arg4[%c0_192, %c6_193, %c0_194, %c0_195] : memref<1x8x16x16xf32, #tpu.memory_space<vmem>>, vector<1x1x16x16xf32>
    %1322 = vector.shape_cast %1321 : vector<1x1x16x16xf32> to vector<16x16xf32>
    %1323 = vector.shape_cast %1320 : vector<16x16xf32> to vector<1x1x16x16xf32>
    tpu.vector_store %arg4[%c0_192, %c6_193, %c0_194, %c0_195], %1323 {strides = array<i32>} : memref<1x8x16x16xf32, #tpu.memory_space<vmem>>, vector<1x1x16x16xf32>,
    %cst_196 = arith.constant 0.000000e+00 : f32
    %1324 = vector.broadcast %cst_196 : f32 to vector<16x16xf32>
    %1325 = arith.cmpf oge, %1267, %1324 : vector<16x16xf32>
    %cst_197 = arith.constant 2.000000e-01 : f32
    %1326 = vector.broadcast %cst_197 : f32 to vector<16x16xf32>
    %1327 = arith.mulf %1326, %1267 : vector<16x16xf32>
    %1328 = arith.select %1325, %1267, %1327 : vector<16x16xi1>, vector<16x16xf32>
    %c0_198 = arith.constant 0 : index
    %c7_199 = arith.constant 7 : index
    %c0_200 = arith.constant 0 : index
    %c0_201 = arith.constant 0 : index
    %1329 = vector.load %arg4[%c0_198, %c7_199, %c0_200, %c0_201] : memref<1x8x16x16xf32, #tpu.memory_space<vmem>>, vector<1x1x16x16xf32>
    %1330 = vector.shape_cast %1329 : vector<1x1x16x16xf32> to vector<16x16xf32>
    %1331 = vector.shape_cast %1328 : vector<16x16xf32> to vector<1x1x16x16xf32>
    tpu.vector_store %arg4[%c0_198, %c7_199, %c0_200, %c0_201], %1331 {strides = array<i32>} : memref<1x8x16x16xf32, #tpu.memory_space<vmem>>, vector<1x1x16x16xf32>,
    return
  }
  func.func @transform_0(%arg0: i32) -> (i32, i32, i32, i32) {
    %c0_i32 = arith.constant 0 : i32
    %c0_i32_0 = arith.constant 0 : i32
    %c0_i32_1 = arith.constant 0 : i32
    %c0_i32_2 = arith.constant 0 : i32
    return %arg0, %c0_i32, %c0_i32_0, %c0_i32_1 : i32, i32, i32, i32
  }
  func.func @transform_1(%arg0: i32) -> i32 {
    %c0_i32 = arith.constant 0 : i32
    %c0_i32_0 = arith.constant 0 : i32
    return %c0_i32 : i32
  }
  func.func @transform_2(%arg0: i32) -> i32 {
    %c0_i32 = arith.constant 0 : i32
    %c0_i32_0 = arith.constant 0 : i32
    return %c0_i32 : i32
  }
  func.func @transform_3(%arg0: i32) -> (i32, i32, i32, i32) {
    %c0_i32 = arith.constant 0 : i32
    %c0_i32_0 = arith.constant 0 : i32
    %c0_i32_1 = arith.constant 0 : i32
    %c0_i32_2 = arith.constant 0 : i32
    return %arg0, %c0_i32, %c0_i32_0, %c0_i32_1 : i32, i32, i32, i32
  }
}

</mosaic_0001>

<bundles_post_ra>
// kernel: tpu_custom_call.1
= control target key start
LH: loop header
LB: loop body
LE: loop exit
PB: predicated region body
PF: predicated region fallthrough
CT: control target
= control target key end

     0   :  { %s8204_s0 = inlined_call_operand.hbm [shape: bf16[2,4,16,16], index: 0, kind: input, shape index: {}]   ;;  %s8205_s1 = inlined_call_operand.hbm [shape: f32[288], index: 1, kind: input, shape index: {}]   ;;  %s8206_s2 = inlined_call_operand.vmem [shape: f32[24], index: 2, kind: input, shape index: {}]   ;;  %s8207_s3 = inlined_call_operand.hbm [shape: f32[2,8,16,16], index: 3, kind: output, shape index: {}]  }
   0x1   :  { %8283 = sst [smem:[#allocation50_spill]] %s8204_s0 }
   0x2   :  { %8284 = sst [smem:[#allocation51_spill]] %s8205_s1 }
   0x3   :  { %8285 = sst [smem:[#allocation52_spill]] %s8206_s2 }
   0x4   :  { %8286 = sst [smem:[#allocation53_spill]] %s8207_s3 }
   0x5   :  { %8 = vsyncpa [#allocation4], 0 }
   0x6   :  { %10 = vsyncpa [#allocation4 + $0x1], 0 }
   0x7   :  { %11 = vsyncpa [#allocation6], 0 }
   0x8   :  { %12 = vsyncpa [#allocation7], 0 }
   0x9   :  { %13 = vsyncpa [#allocation5], 0 }
   0xa   :  { %15 = vsyncpa [#allocation5 + $0x1], 0  ;;  %s4537_s12 = smov 0   ;;  %s4539_s13 = smov 0  }
   0xb   :  { %s4541_s14 = smov 0   ;;  %s4543_s15 = smov 0  }
   0xc LB: > { %8287 = sst [smem:[#allocation15_spill]] %s4491_s12  ;;  %s4558_s16 = sadd.s32 4294967295, %s4503_s15   ;;  %s4503_s15 = sphi %s4543_s15, %s8406_s15   ;;  %s4499_s14 = sphi %s4541_s14, %s8409_s14   ;;  %s4495_s13 = sphi %s4539_s13, %s8408_s13   ;;  %s4491_s12 = sphi %s4537_s12, %s8407_s12  }
   0xd   : > { %8288 = sst [smem:[#allocation16_spill]] %s4495_s13  ;;  %s3934_s17 = sadd.s32 4294967294, %s4503_s15  }
   0xe   : > { %8289 = sst [smem:[#allocation17_spill]] %s4499_s14  ;;  %s4562_s18 = sadd.s32 1, %s4503_s15  }
   0xf   : > { %8290 = sst [smem:[#allocation18_spill]] %s4503_s15  ;;  %s28_s19 = sadd.s32 1, %s4499_s14 }
  0x10   : > { %8291 = sst [smem:[#allocation19_spill]] %s4558_s16  ;;  %s25_s20 = ssub.s32 %s4503_s15, %s4562_s18 }
  0x11   : > { %8292 = sst [smem:[#allocation20_spill]] %s4562_s18  ;;  %p35_p0 = scmp.ne.s32.totalorder %s4499_s14, %s4495_s13 }
  0x12   : > { %p26_p1 = scmp.eq.s32.totalorder %s25_s20, 0  ;;  %p36_p2 = scmp.eq.s32.totalorder %s4503_s15, 0 }
  0x13   : > { %p41_p3 = scmp.ne.s32.totalorder %s4495_s13, %s4491_s12  ;;  %p8208_p4 = scmp.eq.s32.totalorder %s4558_s16, 0 }
  0x14   : > { %s4574_s21 = scalar_select %p26_p1, %s4499_s14, %s28_s19  }
  0x15   : > { %p4576_p5 = por %p36_p2, %p35_p0  ;;  %p4582_p6 = por %p8208_p4, %p41_p3 }
  0x16   : > { %8293 = sst [smem:[#allocation21_spill]] %s4574_s21  ;;  %p107_p7 = scmp.eq.s32.totalorder %s4558_s16, 1 }
  0x17   : > { %s8295_s23 = scalar_select %p4582_p6, 1, 0 }
  0x18   : > { %p113_p8 = scmp.eq.s32.totalorder %s3934_s17, 1  ;;  %p3935_p9 = scmp.ge.s32.totalorder %s4503_s15, 1 }
  0x19   : > { %p120_p10 = scmp.lt.s32.totalorder %s4503_s15, 3  ;;  %p4589_p11 = por %p107_p7, %p35_p0 }
  0x1a   : > { %p4593_p12 = por %p113_p8, %p41_p3  ;;  %p4310_p4 = scmp.lt.s32.totalorder %s4503_s15, 2 }
  0x1b   : > { %s8296_s24 = scalar_select %p4589_p11, 1, 0 }
  0x1c   : > { %s8298_s25 = scalar_select %p4593_p12, 1, 0 }
  0x1d   : > { %8297 = sst [smem:[#allocation22_spill]] %s8296_s24  ;;  %p4597_p13 = pnand %p3935_p9, %p120_p10 }
  0x1e   : > { %8299 = sst [smem:[#allocation23_spill]] %s8298_s25  ;;  %p8302_p0 = scmp.eq.s32.totalorder %s4558_s16, 0 }
  0x1f   : > { %s8300_s26 = scalar_select %p4597_p13, 1, 0 }
  0x20   : > { %p4293_p2 = pneg %p4597_p13  ;;  %s8301_s2 = sld [smem:[#allocation52_spill]] }
  0x21   : > { %p4616_p3 = pnand %p4310_p4, %p4576_p5  ;;  %s153_s5 = sand.u32 1, %s4499_s14  }
  0x22   : > { %p4610_p7 = pnand %p4293_p2, %p8302_p0  ;;  %s4505_s6 = smov [#allocation8]  }
  0x23   : > { %s8305_s1 = sld [smem:[#allocation51_spill]] }
  0x24   : > { %p4390_p9 = pneg %p4610_p7 }
  0x26   : > { %s142_s29 = sshll.u32 %s8301_s2, 4  ;;  %s143_s29 = int_to_ptr.vmem [resolvable:$true] %s142_s29 }
  0x27   : > { %s4388_s9 = scalar_lea.vmem %s143_s29, 16  ;;  %p4396_p0 = scmp.lt.s32.totalorder %s143_s29, %s143_s29 }
  0x28   : > { %p4389_p8 = scmp.ne.s32.totalorder %s143_s29, %s4388_s9  ;;  %p4397_p1 = scmp.lt.s32.totalorder %s4388_s9, %s4388_s9 }
  0x29   : > { %4296 = dma.hbm_to_smem (!%p4610_p7), %s8305_s1, 48, %s4505_s6, [#allocation6]  }
  0x2a   : > { %p4391_p10 = pnand %p4390_p9, %p4389_p8  ;;  %p4398_p4 = por %p4397_p1, %p4396_p0 }
  0x2c   : > { %p4392_p2 = pneg %p4391_p10 }
  0x2e   : > { %p4399_p5 = pnand %p4398_p4, %p4392_p2 }
  0x30   : > { %4402 = shalt.err (!%p4399_p5)
}
  0x31   : > { %s4506_s10 = smov [#allocation9]   ;;  %s3939_s11 = sshll.u32 %s153_s5, 5 }
  0x32   : > { %4299 = dma.vmem_to_smem (!%p4610_p7), %s143_s29, 16, %s4506_s10, [#allocation7]  }
  0x33   : > { %s4260_s17 = sshll.u32 %s4503_s15, 9  ;;  %s8306_s0 = sld [smem:[#allocation50_spill]] }
  0x34   : > { %s157_s27 = scalar_lea.vmem [#allocation3], %s3939_s11  ;;  %s4638_s6 = scalar_lea.sflag [#allocation4], %s153_s5 }
  0x35   : > { %s164_s28 = sshll.u32 %s157_s27, 4  ;;  %p4405_p7 = pneg %p4616_p3  ;;  %s4636_s28 = int_to_ptr.vmem [resolvable:$true] %s164_s28 }
  0x39   : > { %s4634_s22 = scalar_lea.hbm %s8306_s0, %s4260_s17  ;;  %s4408_s8 = scalar_lea.hbm %s8306_s0, 1024 }
  0x3a   : > { %s4403_s30 = scalar_lea.hbm %s4634_s22, 512  ;;  %p4409_p10 = scmp.lt.s32.totalorder %s4634_s22, %s8306_s0 }
  0x3b   : > { %p4404_p1 = scmp.ne.s32.totalorder %s4634_s22, %s4403_s30  ;;  %p4410_p2 = scmp.lt.s32.totalorder %s4408_s8, %s4403_s30 }
  0x3d   : > { %p4406_p8 = pnand %p4405_p7, %p4404_p1  ;;  %p4411_p0 = por %p4410_p2, %p4409_p10 }
  0x3f   : > { %p4407_p9 = pneg %p4406_p8 }
  0x41   : > { %p4412_p4 = pnand %p4411_p0, %p4407_p9 }
  0x43   : > { %4415 = shalt.err (!%p4412_p4)
}
  0x44   : > { %s4416_s5 = scalar_lea.vmem %s4636_s28, 512  ;;  %s4507_s11 = smov [#allocation3]  }
  0x45   : > { %p4417_p5 = scmp.ne.s32.totalorder %s4636_s28, %s4416_s5  ;;  %s4421_s17 = sshll.u32 %s4507_s11, 4  ;;  %s4422_s17 = int_to_ptr.vmem [resolvable:$false] %s4421_s17 }
  0x46   : > { %s4423_s19 = scalar_lea.vmem %s4422_s17, 1024  ;;  %p4424_p8 = scmp.lt.s32.totalorder %s4636_s28, %s4422_s17 }
  0x47   : > { %p4419_p12 = pnand %p4417_p5, %p4405_p7  ;;  %p4425_p11 = scmp.lt.s32.totalorder %s4423_s19, %s4416_s5 }
  0x49   : > { %p4420_p1 = pneg %p4419_p12  ;;  %p4426_p6 = por %p4425_p11, %p4424_p8 }
  0x4b   : > { %p4427_p13 = pnand %p4426_p6, %p4420_p1 }
  0x4d   : > { %4430 = shalt.err (!%p4427_p13)
}
  0x4e   : > { %s4508_s20 = smov 64   ;;  %s4509_s27 = smov 4  }
  0x4f   : > { %4303 = dma.hbm_to_vmem [thread:$0]  (!%p4616_p3), %s4634_s22, 512, %s4636_s28, %s4638_s6, %s4508_s20, %s4508_s20, %s4509_s27  }
  0x50   : > { %p8307_p7 = scmp.ne.s32.totalorder %s8300_s26, 0 }
  0x52   : > { %176 = sbr.rel (%p8307_p7) target bundleno = 1390 (0x56e), region = 32 }
  0x57   : > { %s4662_s30 = sand.u32 1, %s4495_s13   ;;  %p8309_p6 = scmp.ne.s32.totalorder %s8295_s23, 0 }
  0x58   : > { %8308 = sst [smem:[#allocation24_spill]] %s4662_s30  ;;  %s3943_s29 = sshll.u32 %s4662_s30, 5 }
  0x59   : > { %s179_s7 = scalar_lea.sflag [#allocation4], %s4662_s30  ;;  %s182_s8 = scalar_lea.vmem [#allocation3], %s3943_s29 }
  0x5a   : > { %4474 = dma.done.wait (%p8309_p6), %s179_s7, 512  }
  0x5b   : > { %4476 = vsyncadd (%p8309_p6), %s179_s7, 4294966784  ;;  %p8310_p11 = scmp.eq.s32.totalorder %s4558_s16, 0 }
  0x5d   : > { %4478 = dma.done.wait (%p8310_p11), [#allocation6], 48   ;;  %p8311_p12 = pmov %p8310_p11 }
  0x5e   : > { %p8312_p13 = pmov %p8310_p11 }
  0x5f   : > { %4480 = vsyncadd (%p8311_p12), [#allocation6], 4294967248 }
  0x60   : > { %4482 = dma.done.wait (%p8312_p13), [#allocation7], 16   ;;  %p8313_p3 = pmov %p8310_p11 }
  0x62   : > { %4484 = vsyncadd (%p8313_p3), [#allocation7], 4294967280 }
  0x63   : > { %195 = sfence }
  0x64   : > { %v4279_v0 = vld [vmem:[%s182_s8 + $0x10] sm:$0xff]   ;;  %v4263_v1 = vld [vmem:[%s182_s8] sm:$0xff]   ;;  %v4280_v2 = vld [vmem:[%s182_s8 + $0x18] sm:$0xff]   ;;  %s4510_s23 = smov 1   ;;  %vm262_vm0 = vcmask 138248   ;;  %vm275_vm1 = vcmask 131080  }
  0x65   : > { %v4272_v3 = vunpack.c.l.bf16 %v4279_v0  ;;  %v4273_v4 = vunpack.c.h.bf16 %v4279_v0  ;;  %v4264_v5 = vunpack.c.l.bf16 %v4263_v1  ;;  %v4265_v6 = vunpack.c.h.bf16 %v4263_v1  ;;  %v4278_v7 = vld [vmem:[%s182_s8 + $0x8] sm:$0xff]   ;;  %s8212_s26 = smov 126   ;;  %s4512_s4 = smov 2  }
  0x66   : > { %v4276_v8 = vunpack.c.l.bf16 %v4280_v2  ;;  %v4277_v9 = vunpack.c.h.bf16 %v4280_v2  ;;  %v4268_v10 = vunpack.c.l.bf16 %v4278_v7  ;;  %v4269_v11 = vunpack.c.h.bf16 %v4278_v7  ;;  %s4730_s22 = sld [smem:[#allocation8 + $0x1]]  ;;  %s8224_s10 = smov 127  }
  0x67   : > { %v4366_v12 = vpack.i.bf16 %v4273_v4, %v4272_v3  ;;  %v4356_v13 = vpack.i.bf16 %v4265_v6, %v4264_v5  ;;  %vm348_vm2 = vcmask 7168   ;;  %vm351_vm3 = vcmask 1024   ;;  %s4733_s28 = sld [smem:[#allocation8 + $0x25]]  ;;  %s8326_s14 = smov 126  }
  0x68   : > { %v4371_v14 = vpack.i.bf16 %v4277_v9, %v4276_v8  ;;  %v4361_v15 = vpack.i.bf16 %v4269_v11, %v4268_v10  ;;  %vm422_vm4 = vcmask 146568   ;;  %s4738_s6 = sld [smem:[#allocation8 + $0x49]]  ;;  %vm425_vm5 = vcmask 140424  }
  0x69   : > { %4367 = vrot.lane.b32.xlu1 %v4366_v12, %s4510_s23  ;;  %4357 = vrot.lane.b32.xlu0 %v4356_v13, %s4510_s23  ;;  %s4745_s9 = sld [smem:[#allocation8 + $0x6d]]  ;;  %vm3757_vm6 = vcmask 130048  }
  0x6a   : > { %s4752_s5 = sld [smem:[#allocation8 + $0x91]] }
  0x6b   : > { %s4759_s11 = sld [smem:[#allocation8 + $0xb5]] }
  0x6c   : > { %v511_v11 = vstv %s4730_s22  ;;  %s4769_s17 = sld [smem:[#allocation8 + $0xd9]] }
  0x6d   : > { %4372 = vrot.lane.b32.xlu1 %v4371_v14, %s4510_s23  ;;  %4362 = vrot.lane.b32.xlu0 %v4361_v15, %s4510_s23  ;;  %v525_v15 = vstv %s4733_s28  ;;  %s4778_s19 = sld [smem:[#allocation8 + $0xfd]] }
  0x6e   : > { %s4785_s20 = sld [smem:[#allocation8 + $0x2]] }
  0x6f   : > { %s4792_s27 = sld [smem:[#allocation8 + $0x26]] }
  0x70   : > { %s4799_s29 = sld [smem:[#allocation8 + $0x4a]] }
  0x71   : > { %s4806_s7 = sld [smem:[#allocation8 + $0x6e]] }
  0x72   : > { %s4813_s8 = sld [smem:[#allocation8 + $0x92]] }
  0x73   : > { %s4820_s23 = sld [smem:[#allocation8 + $0xb6]] }
  0x74   : > { %s4834_s22 = sld [smem:[#allocation8 + $0xfe]] }
  0x75   : > { %s4841_s28 = sld [smem:[#allocation8 + $0xa]] }
  0x76   : > { %s4950_s0 = sld [smem:[#allocation8 + $0xdc]] }
  0x77   : > { %s4960_s1 = sld [smem:[#allocation8 + $0x53]] }
  0x78   : > { %s4964_s2 = sld [smem:[#allocation8 + $0x100]] }
  0x79   : > { %s4974_s21 = sld [smem:[#allocation8 + $0x77]] }
  0x7a   : > { %s4978_s13 = sld [smem:[#allocation8 + $0x5]] }
  0x7b   : > { %8314 = sst [smem:[#allocation25_spill]] %s4841_s28 }
  0x7c   : > { %s4988_s18 = sld [smem:[#allocation8 + $0x9b]] }
  0x7d   : > { %8324 = sst [smem:[#allocation35_spill]] %s4960_s1 }
  0x7e   : > { %s4992_s15 = sld [smem:[#allocation8 + $0x29]] }
  0x7f   : > { %8325 = sst [smem:[#allocation36_spill]] %s4974_s21 }
  0x80   : > { %s5002_s25 = sld [smem:[#allocation8 + $0xbf]] }
  0x81   : > { %s5006_s12 = sld [smem:[#allocation8 + $0x4d]] }
  0x82   : > { %8327 = sst [smem:[#allocation37_spill]] %s4988_s18 }
  0x83   : > { %s5016_s3 = sld [smem:[#allocation8 + $0xe3]] }
  0x84   : > { %s5020_s24 = sld [smem:[#allocation8 + $0x71]] }
  0x85   : > { %s5034_s16 = sld [smem:[#allocation8 + $0x95]] }
  0x86   : > { %8328 = sst [smem:[#allocation38_spill]] %s5002_s25 }
  0x87   : > { %s5048_s30 = sld [smem:[#allocation8 + $0xb9]] }
  0x89   : > { %8329 = sst [smem:[#allocation39_spill]] %s5016_s3 }
  0x8a   : > { %8330 = sst [smem:[#allocation40_spill]] %s5020_s24 }
  0x8b   : > { %8332 = sst [smem:[#allocation42_spill]] %s5034_s16 }
  0x8d   : > { %8333 = sst [smem:[#allocation43_spill]] %s5048_s30 }
  0xdb   : > { %v4368_v16 = vpop.permute.xlu1 %4367  ;;  %v4358_v17 = vpop.permute.xlu0 %4357 }
  0xdc   : > { %v4370_v18 = vunpack.i.h.bf16 %v4368_v16  ;;  %v4369_v19 = vunpack.i.l.bf16 %v4368_v16  ;;  %v4360_v20 = vunpack.i.h.bf16 %v4358_v17  ;;  %v4359_v21 = vunpack.i.l.bf16 %v4358_v17 }
  0xde   : > { %268 = vst.msk [vmem:[#allocation2 + $0x39] sm:$0xff] %vm262_vm0, %v4370_v18  ;;  %267 = vst.msk [vmem:[#allocation2 + $0x31] sm:$0xff] %vm262_vm0, %v4369_v19  ;;  %v539_v19 = vstv %s4738_s6  ;;  %s4848_s6 = sld [smem:[#allocation8 + $0x2e]] }
  0xdf   : > { %264 = vst.msk [vmem:[#allocation2 + $0x9] sm:$0xff] %vm262_vm0, %v4360_v20  ;;  %263 = vst.msk [vmem:[#allocation2 + $0x1] sm:$0xff] %vm262_vm0, %v4359_v21  ;;  %v4373_v22 = vpop.permute.xlu1 %4372  ;;  %v4363_v23 = vpop.permute.xlu0 %4362 }
  0xe0   : > { %v4375_v24 = vunpack.i.h.bf16 %v4373_v22  ;;  %v4374_v25 = vunpack.i.l.bf16 %v4373_v22  ;;  %v4365_v26 = vunpack.i.h.bf16 %v4363_v23  ;;  %v4364_v27 = vunpack.i.l.bf16 %v4363_v23 }
  0xe1   : > { %v553_v23 = vstv %s4745_s9  ;;  %s4857_s9 = sld [smem:[#allocation8 + $0x52]] }
  0xe2   : > { %270 = vst.msk [vmem:[#allocation2 + $0x51] sm:$0xff] %vm262_vm0, %v4375_v24  ;;  %269 = vst.msk [vmem:[#allocation2 + $0x49] sm:$0xff] %vm262_vm0, %v4374_v25 }
  0xe3   : > { %266 = vst.msk [vmem:[#allocation2 + $0x21] sm:$0xff] %vm262_vm0, %v4365_v26  ;;  %265 = vst.msk [vmem:[#allocation2 + $0x19] sm:$0xff] %vm262_vm0, %v4364_v27 }
  0xe4   : > { %8315 = sst [smem:[#allocation26_spill]] %s4848_s6 }
  0xe5   : > { %v273_v31 = vld [vmem:[#allocation2 + $0x32] sm:$0x1]  ;;  %v282_v32 = vld [vmem:[#allocation2 + $0x3f] sm:$0x1] }
  0xe6   : > { %v289_v28 = vld [vmem:[#allocation2 + $0x8] sm:$0xff]  ;;  %v271_v29 = vld [vmem:[#allocation2 + $0x2] sm:$0x1]  ;;  %v295_v33 = vld [vmem:[#allocation2 + $0x38] sm:$0xff]  ;;  %278 = vst.msk [vmem:[#allocation2 + $0x30] sm:$0x1] %vm275_vm1, %v273_v31 }
  0xe7   : > { %314 = vrot.lane.b32.xlu1 %v289_v28, %s8212_s26  ;;  %276 = vst.msk [vmem:[#allocation2] sm:$0x1] %vm275_vm1, %v271_v29  ;;  %v280_v30 = vld [vmem:[#allocation2 + $0xf] sm:$0x1]  ;;  %286 = vst.msk [vmem:[#allocation2 + $0x41] sm:$0x1] %vm275_vm1, %v282_v32  ;;  %v567_v29 = vstv %s4752_s5 }
  0xe8   : > { %284 = vst.msk [vmem:[#allocation2 + $0x11] sm:$0x1] %vm275_vm1, %v280_v30  ;;  %8316 = sst [smem:[#allocation27_spill]] %s4857_s9 }
  0xe9   : > { %v274_v37 = vld [vmem:[#allocation2 + $0x4a] sm:$0x1]  ;;  %v283_v38 = vld [vmem:[#allocation2 + $0x57] sm:$0x1]  ;;  %s4866_s5 = sld [smem:[#allocation8 + $0x76]] }
  0xea   : > { %v292_v34 = vld [vmem:[#allocation2 + $0x20] sm:$0xff]  ;;  %v272_v35 = vld [vmem:[#allocation2 + $0x1a] sm:$0x1]  ;;  %v298_v39 = vld [vmem:[#allocation2 + $0x50] sm:$0xff]  ;;  %279 = vst.msk [vmem:[#allocation2 + $0x48] sm:$0x1] %vm275_vm1, %v274_v37  ;;  %v595_v37 = vstv %s4769_s17 }
  0xeb   : > { %320 = vrot.lane.b32.xlu0 %v292_v34, %s8212_s26  ;;  %326 = vrot.lane.b32.xlu1 %v295_v33, %s8212_s26  ;;  %277 = vst.msk [vmem:[#allocation2 + $0x18] sm:$0x1] %vm275_vm1, %v272_v35  ;;  %v281_v36 = vld [vmem:[#allocation2 + $0x27] sm:$0x1]  ;;  %287 = vst.msk [vmem:[#allocation2 + $0x59] sm:$0x1] %vm275_vm1, %v283_v38  ;;  %v581_v34 = vstv %s4759_s11 }
  0xec   : > { %285 = vst.msk [vmem:[#allocation2 + $0x29] sm:$0x1] %vm275_vm1, %v281_v36  ;;  %s4869_s11 = sld [smem:[#allocation8 + $0x4]] }
  0xed   : > { %v294_v45 = vld [vmem:[#allocation2 + $0x30] sm:$0xff]  ;;  %s4877_s17 = sld [smem:[#allocation8 + $0x9a]] }
  0xee   : > { %v288_v41 = vld [vmem:[#allocation2] sm:$0xff] }
  0xef   : > { %332 = vrot.lane.b32.xlu0 %v298_v39, %s8212_s26  ;;  %v290_v43 = vld [vmem:[#allocation2 + $0x10] sm:$0x3]  ;;  %v296_v47 = vld [vmem:[#allocation2 + $0x40] sm:$0x3]  ;;  %8317 = sst [smem:[#allocation28_spill]] %s4866_s5 }
  0xf1   : > { %v297_v44 = vld [vmem:[#allocation2 + $0x48] sm:$0xff] }
  0xf2   : > { %v291_v40 = vld [vmem:[#allocation2 + $0x18] sm:$0xff] }
  0xf3   : > { %318 = vrot.lane.b32.xlu1 %v291_v40, %s8212_s26  ;;  %312 = vrot.lane.b32.xlu0 %v288_v41, %s8212_s26  ;;  %v293_v42 = vld [vmem:[#allocation2 + $0x28] sm:$0x3]  ;;  %v299_v46 = vld [vmem:[#allocation2 + $0x58] sm:$0x3]  ;;  %v609_v40 = vstv %s4778_s19  ;;  %8318 = sst [smem:[#allocation29_spill]] %s4877_s17 }
  0xf4   : > { %s4880_s19 = sld [smem:[#allocation8 + $0x28]] }
  0xf7   : > { %322 = vrot.lane.b32.xlu1 %v293_v42, %s8212_s26  ;;  %316 = vrot.lane.b32.xlu0 %v290_v43, %s8212_s26  ;;  %v623_v43 = vstv %s4785_s20  ;;  %s4888_s20 = sld [smem:[#allocation8 + $0xbe]] }
  0xfb   : > { %330 = vrot.lane.b32.xlu1 %v297_v44, %s8212_s26  ;;  %324 = vrot.lane.b32.xlu0 %v294_v45, %s8212_s26 }
  0xfd   : > { %8319 = sst [smem:[#allocation30_spill]] %s4888_s20 }
  0xff   : > { %334 = vrot.lane.b32.xlu1 %v299_v46, %s8212_s26  ;;  %328 = vrot.lane.b32.xlu0 %v296_v47, %s8212_s26  ;;  %v637_v46 = vstv %s4792_s27  ;;  %s4894_s27 = sld [smem:[#allocation8 + $0x4c]] }
 0x159   : > { %v315_v48 = vpop.permute.xlu1 %314 }
 0x15a   : > { %350 = vst.msk [vmem:[#allocation2 + $0x8] sm:$0xff] %vm348_vm2, %v315_v48 }
 0x15d   : > { %v321_v49 = vpop.permute.xlu0 %320  ;;  %v327_v50 = vpop.permute.xlu1 %326 }
 0x15e   : > { %354 = vst.msk [vmem:[#allocation2 + $0x20] sm:$0xff] %vm348_vm2, %v321_v49  ;;  %357 = vst.msk [vmem:[#allocation2 + $0x38] sm:$0xff] %vm348_vm2, %v327_v50  ;;  %v651_v49 = vstv %s4799_s29  ;;  %s4904_s29 = sld [smem:[#allocation8 + $0xe2]] }
 0x161   : > { %v333_v51 = vpop.permute.xlu0 %332  ;;  %v363_v52 = vld [vmem:[#allocation2 + $0x8] sm:$0xff] }
 0x162   : > { %360 = vst.msk [vmem:[#allocation2 + $0x50] sm:$0xff] %vm348_vm2, %v333_v51  ;;  %388 = vrot.lane.b32.xlu1 %v363_v52, %s4512_s4  ;;  %v665_v52 = vstv %s4806_s7  ;;  %s4908_s7 = sld [smem:[#allocation8 + $0x70]] }
 0x164   : > { %8320 = sst [smem:[#allocation31_spill]] %s4904_s29 }
 0x165   : > { %v319_v53 = vpop.permute.xlu1 %318  ;;  %v313_v54 = vpop.permute.xlu0 %312  ;;  %v369_v55 = vld [vmem:[#allocation2 + $0x38] sm:$0xff]  ;;  %v366_v56 = vld [vmem:[#allocation2 + $0x20] sm:$0xff] }
 0x166   : > { %353 = vst.msk [vmem:[#allocation2 + $0x18] sm:$0xff] %vm348_vm2, %v319_v53  ;;  %349 = vst.msk [vmem:[#allocation2] sm:$0xff] %vm348_vm2, %v313_v54  ;;  %400 = vrot.lane.b32.xlu1 %v369_v55, %s4512_s4  ;;  %394 = vrot.lane.b32.xlu0 %v366_v56, %s4512_s4  ;;  %v679_v55 = vstv %s4813_s8  ;;  %s4918_s8 = sld [smem:[#allocation8 + $0x106]] }
 0x169   : > { %v323_v57 = vpop.permute.xlu1 %322  ;;  %v317_v58 = vpop.permute.xlu0 %316  ;;  %v372_v59 = vld [vmem:[#allocation2 + $0x50] sm:$0xff] }
 0x16a   : > { %355 = vst.msk [vmem:[#allocation2 + $0x28] sm:$0x3] %vm351_vm3, %v323_v57  ;;  %352 = vst.msk [vmem:[#allocation2 + $0x10] sm:$0x3] %vm351_vm3, %v317_v58  ;;  %406 = vrot.lane.b32.xlu0 %v372_v59, %s4512_s4  ;;  %v693_v58 = vstv %s4820_s23  ;;  %s4922_s23 = sld [smem:[#allocation8 + $0x94]] }
 0x16c   : > { %8321 = sst [smem:[#allocation32_spill]] %s4918_s8 }
 0x16d   : > { %v331_v60 = vpop.permute.xlu1 %330  ;;  %v325_v61 = vpop.permute.xlu0 %324  ;;  %v365_v62 = vld [vmem:[#allocation2 + $0x18] sm:$0xff]  ;;  %v362_v63 = vld [vmem:[#allocation2] sm:$0xff] }
 0x16e   : > { %359 = vst.msk [vmem:[#allocation2 + $0x48] sm:$0xff] %vm348_vm2, %v331_v60  ;;  %356 = vst.msk [vmem:[#allocation2 + $0x30] sm:$0xff] %vm348_vm2, %v325_v61  ;;  %392 = vrot.lane.b32.xlu1 %v365_v62, %s4512_s4  ;;  %386 = vrot.lane.b32.xlu0 %v362_v63, %s4512_s4 }
 0x171   : > { %v335_v0 = vpop.permute.xlu1 %334  ;;  %v329_v1 = vpop.permute.xlu0 %328  ;;  %v367_v2 = vld [vmem:[#allocation2 + $0x28] sm:$0x3]  ;;  %v364_v3 = vld [vmem:[#allocation2 + $0x10] sm:$0x3] }
 0x172   : > { %361 = vst.msk [vmem:[#allocation2 + $0x58] sm:$0x3] %vm351_vm3, %v335_v0  ;;  %358 = vst.msk [vmem:[#allocation2 + $0x40] sm:$0x3] %vm351_vm3, %v329_v1  ;;  %396 = vrot.lane.b32.xlu1 %v367_v2, %s4512_s4  ;;  %390 = vrot.lane.b32.xlu0 %v364_v3, %s4512_s4  ;;  %v721_v0 = vstv %s4834_s22  ;;  %s4936_s22 = sld [smem:[#allocation8 + $0xb8]] }
 0x175   : > { %v371_v4 = vld [vmem:[#allocation2 + $0x48] sm:$0xff]  ;;  %v368_v5 = vld [vmem:[#allocation2 + $0x30] sm:$0xff] }
 0x176   : > { %404 = vrot.lane.b32.xlu1 %v371_v4, %s4512_s4  ;;  %398 = vrot.lane.b32.xlu0 %v368_v5, %s4512_s4  ;;  %v8269_v4 = vstv %s4841_s28  ;;  %s5160_s28 = sld [smem:[#allocation8 + $0xb4]] }
 0x179   : > { %v373_v6 = vld [vmem:[#allocation2 + $0x58] sm:$0x3]  ;;  %v370_v7 = vld [vmem:[#allocation2 + $0x40] sm:$0x3] }
 0x17a   : > { %408 = vrot.lane.b32.xlu1 %v373_v6, %s4512_s4  ;;  %402 = vrot.lane.b32.xlu0 %v370_v7, %s4512_s4  ;;  %s4827_s4 = sld [smem:[#allocation8 + $0xda]]  ;;  %v8267_v7 = vstv %s4848_s6 }
 0x17b   : > { %s5155_s6 = sld [smem:[#allocation8 + $0x3]] }
 0x180   : > { %v707_v61 = vstv %s4827_s4  ;;  %s4932_s4 = sld [smem:[#allocation8 + $0xb]] }
 0x186   : > { %8322 = sst [smem:[#allocation33_spill]] %s4932_s4 }
 0x1d4   : > { %v389_v8 = vpop.permute.xlu1 %388 }
 0x1d5   : > { %424 = vst.msk [vmem:[#allocation2 + $0x8] sm:$0xff] %vm422_vm4, %v389_v8 }
 0x1d8   : > { %v401_v9 = vpop.permute.xlu1 %400  ;;  %v395_v10 = vpop.permute.xlu0 %394 }
 0x1d9   : > { %431 = vst.msk [vmem:[#allocation2 + $0x38] sm:$0xff] %vm422_vm4, %v401_v9  ;;  %428 = vst.msk [vmem:[#allocation2 + $0x20] sm:$0xff] %vm422_vm4, %v395_v10  ;;  %v8266_v10 = vstv %s4857_s9  ;;  %s5145_s9 = sld [smem:[#allocation8 + $0x4f]] }
 0x1dc   : > { %v4740_v12 = vld [vmem:[#allocation2 + $0x8] sm:$0xff]  ;;  %v407_v13 = vpop.permute.xlu0 %406 }
 0x1dd   : > { %434 = vst.msk [vmem:[#allocation2 + $0x50] sm:$0xff] %vm422_vm4, %v407_v13  ;;  %v513_v14 = vmul.f32 %v511_v11, %v4740_v12  ;;  %v527_v18 = vmul.f32 %v525_v15, %v4740_v12  ;;  %v541_v22 = vmul.f32 %v539_v19, %v4740_v12  ;;  %v555_v27 = vmul.f32 %v553_v23, %v4740_v12 }
 0x1de   : > { %v569_v32 = vmul.f32 %v567_v29, %v4740_v12  ;;  %v583_v35 = vmul.f32 %v581_v34, %v4740_v12  ;;  %v597_v38 = vmul.f32 %v595_v37, %v4740_v12  ;;  %v611_v41 = vmul.f32 %v609_v40, %v4740_v12 }
 0x1df   : > { %518 = vrot.lane.b32.xlu1 %v513_v14, %s8224_s10  ;;  %v625_v44 = vmul.f32 %v623_v43, %v4740_v12  ;;  %v639_v47 = vmul.f32 %v637_v46, %v4740_v12  ;;  %v653_v50 = vmul.f32 %v651_v49, %v4740_v12  ;;  %v667_v53 = vmul.f32 %v665_v52, %v4740_v12  ;;  %8339 = sst [smem:[#allocation48_spill]] %s5145_s9 }
 0x1e0   : > { %v393_v16 = vpop.permute.xlu1 %392  ;;  %v387_v17 = vpop.permute.xlu0 %386  ;;  %v681_v56 = vmul.f32 %v679_v55, %v4740_v12  ;;  %v695_v59 = vmul.f32 %v693_v58, %v4740_v12  ;;  %v709_v62 = vmul.f32 %v707_v61, %v4740_v12  ;;  %v723_v1 = vmul.f32 %v721_v0, %v4740_v12  ;;  %v4853_v2 = vld [vmem:[#allocation2 + $0x20] sm:$0xff] }
 0x1e1   : > { %427 = vst.msk [vmem:[#allocation2 + $0x18] sm:$0xff] %vm422_vm4, %v393_v16  ;;  %423 = vst.msk [vmem:[#allocation2] sm:$0xff] %vm422_vm4, %v387_v17  ;;  %v1336_v5 = vmul.f32 %v8269_v4, %v4853_v2  ;;  %v1350_v8 = vmul.f32 %v8267_v7, %v4853_v2  ;;  %v8265_v14 = vstv %s4866_s5  ;;  %v785_v16 = vstv %s4869_s11  ;;  %s5105_s11 = sld [smem:[#allocation8 + $0x48]] }
 0x1e2   : > { %v1378_v17 = vmul.f32 %v8265_v14, %v4853_v2  ;;  %s5133_s5 = sld [smem:[#allocation8 + $0x90]] }
 0x1e3   : > { %532 = vrot.lane.b32.xlu1 %v527_v18, %s8224_s10 }
 0x1e4   : > { %v397_v20 = vpop.permute.xlu1 %396  ;;  %v391_v21 = vpop.permute.xlu0 %390 }
 0x1e5   : > { %429 = vst.msk [vmem:[#allocation2 + $0x28] sm:$0x3] %vm425_vm5, %v397_v20  ;;  %426 = vst.msk [vmem:[#allocation2 + $0x10] sm:$0x3] %vm425_vm5, %v391_v21  ;;  %v799_v20 = vstv %s4880_s19  ;;  %s5126_s19 = sld [smem:[#allocation9 + $0x4]] }
 0x1e7   : > { %546 = vrot.lane.b32.xlu1 %v541_v22, %s8224_s10 }
 0x1e8   : > { %v405_v24 = vpop.permute.xlu1 %404  ;;  %v399_v25 = vpop.permute.xlu0 %398  ;;  %v4762_v26 = vld [vmem:[#allocation2] sm:$0xff] }
 0x1e9   : > { %433 = vst.msk [vmem:[#allocation2 + $0x48] sm:$0xff] %vm422_vm4, %v405_v24  ;;  %430 = vst.msk [vmem:[#allocation2 + $0x30] sm:$0xff] %vm422_vm4, %v399_v25  ;;  %v512_v28 = vmul.f32 %v511_v11, %v4762_v26  ;;  %v526_v33 = vmul.f32 %v525_v15, %v4762_v26  ;;  %v540_v36 = vmul.f32 %v539_v19, %v4762_v26  ;;  %v4890_v15 = vld [vmem:[#allocation2 + $0x1] sm:$0xff]  ;;  %v8264_v19 = vstv %s4877_s17  ;;  %s5123_s17 = sld [smem:[#allocation8 + $0x6c]] }
 0x1ea   : > { %v554_v39 = vmul.f32 %v553_v23, %v4762_v26  ;;  %v568_v42 = vmul.f32 %v567_v29, %v4762_v26  ;;  %v582_v45 = vmul.f32 %v581_v34, %v4762_v26  ;;  %v596_v48 = vmul.f32 %v595_v37, %v4762_v26 }
 0x1eb   : > { %560 = vrot.lane.b32.xlu1 %v555_v27, %s8224_s10  ;;  %516 = vrot.lane.b32.xlu0 %v512_v28, %s8224_s10  ;;  %v610_v51 = vmul.f32 %v609_v40, %v4762_v26  ;;  %v624_v54 = vmul.f32 %v623_v43, %v4762_v26  ;;  %v638_v57 = vmul.f32 %v637_v46, %v4762_v26  ;;  %v8263_v23 = vstv %s4888_s20  ;;  %s5121_s20 = sld [smem:[#allocation8 + $0x2b]] }
 0x1ec   : > { %v409_v30 = vpop.permute.xlu1 %408  ;;  %v403_v31 = vpop.permute.xlu0 %402  ;;  %v652_v60 = vmul.f32 %v651_v49, %v4762_v26  ;;  %v666_v63 = vmul.f32 %v665_v52, %v4762_v26  ;;  %v680_v3 = vmul.f32 %v679_v55, %v4762_v26  ;;  %v694_v6 = vmul.f32 %v693_v58, %v4762_v26 }
 0x1ed   : > { %435 = vst.msk [vmem:[#allocation2 + $0x58] sm:$0x3] %vm425_vm5, %v409_v30  ;;  %432 = vst.msk [vmem:[#allocation2 + $0x40] sm:$0x3] %vm425_vm5, %v403_v31  ;;  %v708_v9 = vmul.f32 %v707_v61, %v4762_v26  ;;  %v1364_v11 = vmul.f32 %v8266_v10, %v4853_v2  ;;  %v722_v13 = vmul.f32 %v721_v0, %v4762_v26  ;;  %v813_v24 = vstv %s4894_s27  ;;  %s5147_s27 = sld [smem:[#allocation9 + $0x5]] }
 0x1ee   : > { %v786_v18 = vmul.f32 %v785_v16, %v4890_v15  ;;  %v1392_v21 = vmul.f32 %v8264_v19, %v4853_v2  ;;  %v800_v22 = vmul.f32 %v799_v20, %v4890_v15  ;;  %v1406_v25 = vmul.f32 %v8263_v23, %v4853_v2 }
 0x1ef   : > { %574 = vrot.lane.b32.xlu1 %v569_v32, %s8224_s10  ;;  %530 = vrot.lane.b32.xlu0 %v526_v33, %s8224_s10  ;;  %v814_v27 = vmul.f32 %v813_v24, %v4890_v15  ;;  %v8262_v28 = vstv %s4904_s29  ;;  %v827_v29 = vstv %s4908_s7  ;;  %s5112_s29 = sld [smem:[#allocation9 + $0x3]] }
 0x1f0   : > { %v1420_v30 = vmul.f32 %v8262_v28, %v4853_v2  ;;  %v828_v31 = vmul.f32 %v827_v29, %v4890_v15  ;;  %v8261_v32 = vstv %s4918_s8  ;;  %v841_v33 = vstv %s4922_s23  ;;  %s5102_s8 = sld [smem:[#allocation9 + $0x2]] }
 0x1f1   : > { %v1434_v34 = vmul.f32 %v8261_v32, %v4853_v2  ;;  %v855_v37 = vstv %s4936_s22  ;;  %v897_v49 = vstv %s4978_s13  ;;  %v8256_v52 = vstv %s4988_s18  ;;  %s5079_s18 = sld [smem:[#allocation8 + $0x101]] }
 0x1f2   : > { %v8253_v61 = vstv %s5016_s3  ;;  %s5072_s3 = sld [smem:[#allocation9]] }
 0x1f3   : > { %588 = vrot.lane.b32.xlu1 %v583_v35, %s8224_s10  ;;  %544 = vrot.lane.b32.xlu0 %v540_v36, %s8224_s10  ;;  %v842_v35 = vmul.f32 %v841_v33, %v4890_v15  ;;  %v8260_v36 = vstv %s4932_s4  ;;  %v1532_v0 = vmul.f32 %v8253_v61, %v4853_v2  ;;  %s5100_s4 = sld [smem:[#allocation8 + $0x7]] }
 0x1f4   : > { %8338 = sst [smem:[#allocation47_spill]] %s5121_s20 }
 0x1f5   : > { %s5171_s7 = sld [smem:[#allocation8 + $0x73]] }
 0x1f6   : > { %s5199_s23 = sld [smem:[#allocation8 + $0x97]] }
 0x1f7   : > { %602 = vrot.lane.b32.xlu1 %v597_v38, %s8224_s10  ;;  %558 = vrot.lane.b32.xlu0 %v554_v39, %s8224_s10  ;;  %v1448_v38 = vmul.f32 %v8260_v36, %v4853_v2  ;;  %v856_v39 = vmul.f32 %v855_v37, %v4890_v15  ;;  %8335 = sst [smem:[#allocation45_spill]] %s5079_s18 }
 0x1f8   : > { %s5230_s22 = sld [smem:[#allocation8 + $0xbb]] }
 0x1f9   : > { %8337 = sst [smem:[#allocation46_spill]] %s5100_s4 }
 0x1fa   : > { %s5354_s13 = sld [smem:[#allocation8 + $0xdb]] }
 0x1fb   : > { %616 = vrot.lane.b32.xlu1 %v611_v41, %s8224_s10  ;;  %572 = vrot.lane.b32.xlu0 %v568_v42, %s8224_s10  ;;  %v869_v41 = vstv %s4950_s0  ;;  %s5266_s0 = sld [smem:[#allocation8 + $0x103]] }
 0x1fc   : > { %v870_v43 = vmul.f32 %v869_v41, %v4890_v15 }
 0x1ff   : > { %630 = vrot.lane.b32.xlu1 %v625_v44, %s8212_s26  ;;  %586 = vrot.lane.b32.xlu0 %v582_v45, %s8224_s10  ;;  %v8258_v44 = vstv %s4960_s1  ;;  %v883_v45 = vstv %s4964_s2  ;;  %s5091_s1 = sld [smem:[#allocation8 + $0x24]] }
 0x200   : > { %v1476_v46 = vmul.f32 %v8258_v44, %v4853_v2  ;;  %v449_v44 = vstv %s5126_s19  ;;  %s5302_s2 = sld [smem:[#allocation8 + $0x8]] }
 0x201   : > { %s8350_s19 = sld [smem:[#allocation27_spill]] }
 0x203   : > { %644 = vrot.lane.b32.xlu1 %v639_v47, %s8212_s26  ;;  %600 = vrot.lane.b32.xlu0 %v596_v48, %s8224_s10  ;;  %v884_v47 = vmul.f32 %v883_v45, %v4890_v15  ;;  %v8257_v48 = vstv %s4974_s21  ;;  %s5081_s21 = sld [smem:[#allocation8]] }
 0x207   : > { %658 = vrot.lane.b32.xlu1 %v653_v50, %s8212_s26  ;;  %614 = vrot.lane.b32.xlu0 %v610_v51, %s8224_s10  ;;  %v1490_v50 = vmul.f32 %v8257_v48, %v4853_v2  ;;  %v898_v51 = vmul.f32 %v897_v49, %v4890_v15 }
 0x20b   : > { %672 = vrot.lane.b32.xlu1 %v667_v53, %s8212_s26  ;;  %628 = vrot.lane.b32.xlu0 %v624_v54, %s8212_s26  ;;  %v911_v53 = vstv %s4992_s15  ;;  %v1504_v54 = vmul.f32 %v8256_v52, %v4853_v2  ;;  %s5388_s15 = sld [smem:[#allocation8 + $0xff]] }
 0x20c   : > { %v912_v55 = vmul.f32 %v911_v53, %v4890_v15 }
 0x20f   : > { %686 = vrot.lane.b32.xlu1 %v681_v56, %s8212_s26  ;;  %642 = vrot.lane.b32.xlu0 %v638_v57, %s8212_s26  ;;  %v8254_v56 = vstv %s5002_s25  ;;  %v925_v57 = vstv %s5006_s12  ;;  %s5062_s25 = sld [smem:[#allocation8 + $0xdd]] }
 0x210   : > { %s5395_s12 = sld [smem:[#allocation8 + $0x50]] }
 0x213   : > { %700 = vrot.lane.b32.xlu1 %v695_v59, %s8212_s26  ;;  %656 = vrot.lane.b32.xlu0 %v652_v60, %s8212_s26  ;;  %v1518_v59 = vmul.f32 %v8254_v56, %v4853_v2  ;;  %v926_v60 = vmul.f32 %v925_v57, %v4890_v15  ;;  %v487_v56 = vstv %s5133_s5  ;;  %s5426_s5 = sld [smem:[#allocation8 + $0x74]] }
 0x214   : > { %v489_v32 = vmul.f32 %v487_v56, %v4740_v12 }
 0x215   : > { %8334 = sst [smem:[#allocation44_spill]] %s5062_s25 }
 0x217   : > { %714 = vrot.lane.b32.xlu1 %v709_v62, %s8212_s26  ;;  %670 = vrot.lane.b32.xlu0 %v666_v63, %s8212_s26  ;;  %v939_v62 = vstv %s5020_s24  ;;  %s5247_s24 = sld [smem:[#allocation8 + $0x6f]] }
 0x21b   : > { %728 = vrot.lane.b32.xlu1 %v723_v1, %s8212_s26  ;;  %684 = vrot.lane.b32.xlu0 %v680_v3, %s8212_s26  ;;  %v940_v1 = vmul.f32 %v939_v62, %v4890_v15 }
 0x21d   : > { %v755_v7 = vstv %s5247_s24  ;;  %s5460_s24 = sld [smem:[#allocation8 + $0x98]] }
 0x21f   : > { %1341 = vrot.lane.b32.xlu1 %v1336_v5, %s8224_s10  ;;  %698 = vrot.lane.b32.xlu0 %v694_v6, %s8212_s26  ;;  %v953_v5 = vstv %s5034_s16  ;;  %s5217_s16 = sld [smem:[#allocation8 + $0xfc]] }
 0x223   : > { %1355 = vrot.lane.b32.xlu1 %v1350_v8, %s8224_s10  ;;  %712 = vrot.lane.b32.xlu0 %v708_v9, %s8212_s26  ;;  %v5070_v9 = vld [vmem:[#allocation2 + $0x9] sm:$0xff] }
 0x227   : > { %1369 = vrot.lane.b32.xlu1 %v1364_v11, %s8224_s10  ;;  %726 = vrot.lane.b32.xlu0 %v722_v13, %s8212_s26  ;;  %s4946_s26 = sld [smem:[#allocation8 + $0x2f]]  ;;  %v954_v11 = vmul.f32 %v953_v5, %v4890_v15  ;;  %v967_v13 = vstv %s5048_s30 }
 0x228   : > { %s5202_s30 = sld [smem:[#allocation9 + $0x7]] }
 0x22b   : > { %1383 = vrot.lane.b32.xlu1 %v1378_v17, %s8224_s10  ;;  %790 = vrot.lane.b32.xlu0 %v786_v18, %s8224_s10  ;;  %v787_v17 = vmul.f32 %v785_v16, %v5070_v9 }
 0x22d   : > { %8323 = sst [smem:[#allocation34_spill]] %s4946_s26  ;;  %v8259_v40 = vstv %s4946_s26  ;;  %s8336_s26 = smov 127  }
 0x22e   : > { %v1462_v42 = vmul.f32 %v8259_v40, %v4853_v2  ;;  %v452_v40 = vstv %s5147_s27  ;;  %v458_v10 = vstv %s5202_s30  ;;  %s8352_s27 = sld [smem:[#allocation28_spill]] }
 0x22f   : > { %1397 = vrot.lane.b32.xlu1 %v1392_v21, %s8224_s10  ;;  %804 = vrot.lane.b32.xlu0 %v800_v22, %s8224_s10  ;;  %v968_v21 = vmul.f32 %v967_v13, %v4890_v15  ;;  %v981_v22 = vstv %s5062_s25  ;;  %s5189_s25 = sld [smem:[#allocation8 + $0xd8]] }
 0x233   : > { %1411 = vrot.lane.b32.xlu1 %v1406_v25, %s8224_s10  ;;  %818 = vrot.lane.b32.xlu0 %v814_v27, %s8224_s10  ;;  %v801_v25 = vmul.f32 %v799_v20, %v5070_v9 }
 0x237   : > { %1425 = vrot.lane.b32.xlu1 %v1420_v30, %s8224_s10  ;;  %832 = vrot.lane.b32.xlu0 %v828_v31, %s8224_s10  ;;  %v982_v30 = vmul.f32 %v981_v22, %v4890_v15  ;;  %v995_v31 = vstv %s5079_s18  ;;  %s5173_s18 = sld [smem:[#allocation9 + $0x6]] }
 0x23b   : > { %1439 = vrot.lane.b32.xlu1 %v1434_v34, %s8224_s10  ;;  %846 = vrot.lane.b32.xlu0 %v842_v35, %s8224_s10  ;;  %v815_v34 = vmul.f32 %v813_v24, %v5070_v9  ;;  %v829_v24 = vmul.f32 %v827_v29, %v5070_v9  ;;  %v469_v29 = vstv %s5091_s1  ;;  %s5308_s1 = sld [smem:[#allocation8 + $0xb7]] }
 0x23c   : > { %v470_v14 = vmul.f32 %v469_v29, %v4762_v26 }
 0x23d   : > { %v455_v36 = vstv %s5173_s18  ;;  %s5788_s18 = sld [smem:[#allocation8 + $0x55]] }
 0x23f   : > { %1453 = vrot.lane.b32.xlu1 %v1448_v38, %s8326_s14  ;;  %860 = vrot.lane.b32.xlu0 %v856_v39, %s8224_s10  ;;  %v996_v38 = vmul.f32 %v995_v31, %v4890_v15  ;;  %v5140_v39 = vld [vmem:[#allocation2 + $0x2] sm:$0xff] }
 0x243   : > { %1467 = vrot.lane.b32.xlu1 %v1462_v42, %s8326_s14  ;;  %874 = vrot.lane.b32.xlu0 %v870_v43, %s8224_s10  ;;  %v463_v42 = vstv %s5081_s21  ;;  %v1059_v43 = vstv %s5100_s4  ;;  %s5181_s4 = sld [smem:[#allocation8 + $0x27]] }
 0x244   : > { %v464_v48 = vmul.f32 %v463_v42, %v4762_v26  ;;  %s5272_s21 = sld [smem:[#allocation8 + $0x93]] }
 0x247   : > { %1481 = vrot.lane.b32.xlu1 %v1476_v46, %s8326_s14  ;;  %888 = vrot.lane.b32.xlu0 %v884_v47, %s8224_s10  ;;  %s5030_s10 = sld [smem:[#allocation8 + $0x107]]  ;;  %v465_v47 = vmul.f32 %v463_v42, %v4740_v12 }
 0x24b   : > { %1495 = vrot.lane.b32.xlu1 %v1490_v50, %s8326_s14  ;;  %902 = vrot.lane.b32.xlu0 %v898_v51, %s8326_s14  ;;  %v1060_v51 = vmul.f32 %v1059_v43, %v5140_v39 }
 0x24d   : > { %8331 = sst [smem:[#allocation41_spill]] %s5030_s10  ;;  %v8251_v3 = vstv %s5030_s10 }
 0x24e   : > { %v1546_v8 = vmul.f32 %v8251_v3, %v4853_v2  ;;  %s5084_s10 = sld [smem:[#allocation9 + $0x1]]  ;;  %v1101_v3 = vstv %s5171_s7 }
 0x24f   : > { %1509 = vrot.lane.b32.xlu1 %v1504_v54, %s8326_s14  ;;  %916 = vrot.lane.b32.xlu0 %v912_v55, %s8326_s14  ;;  %v437_v54 = vstv %s5072_s3  ;;  %v1073_v55 = vstv %s5121_s20  ;;  %s5213_s20 = sld [smem:[#allocation8 + $0x4b]] }
 0x250   : > { %s5340_s3 = sld [smem:[#allocation8 + $0x2c]] }
 0x251   : > { %v5037_v58 = vpop.permute.xlu1 %518  ;;  %s8355_s7 = sld [smem:[#allocation29_spill]] }
 0x252   : > { %s8378_s30 = sld [smem:[#allocation41_spill]] }
 0x253   : > { %1523 = vrot.lane.b32.xlu1 %v1518_v59, %s8326_s14  ;;  %930 = vrot.lane.b32.xlu0 %v926_v60, %s8326_s14  ;;  %v843_v59 = vmul.f32 %v841_v33, %v5070_v9  ;;  %v1074_v33 = vmul.f32 %v1073_v55, %v5140_v39 }
 0x255   : > { %v5051_v63 = vpop.permute.xlu1 %532  ;;  %v749_v28 = vstv %s5213_s20  ;;  %s8374_s20 = sld [smem:[#allocation38_spill]] }
 0x257   : > { %1537 = vrot.lane.b32.xlu1 %v1532_v0, %s8326_s14  ;;  %944 = vrot.lane.b32.xlu0 %v940_v1, %s8326_s14  ;;  %v467_v0 = vadd.f32 %v465_v47, %v437_v54  ;;  %v471_v1 = vmul.f32 %v469_v29, %v4740_v12  ;;  %v737_v47 = vstv %s5155_s6  ;;  %v899_v29 = vmul.f32 %v897_v49, %v5070_v9  ;;  %s8368_s6 = sld [smem:[#allocation35_spill]] }
 0x258   : > { %v757_v49 = vmul.f32 %v755_v7, %v5070_v9 }
 0x259   : > { %v5065_v6 = vpop.permute.xlu1 %546 }
 0x25b   : > { %1551 = vrot.lane.b32.xlu1 %v1546_v8, %s8326_s14  ;;  %958 = vrot.lane.b32.xlu0 %v954_v11, %s8326_s14  ;;  %v475_v8 = vstv %s5105_s11  ;;  %s8349_s11 = sld [smem:[#allocation26_spill]] }
 0x25d   : > { %v5086_v2 = vpop.permute.xlu1 %560  ;;  %v5093_v18 = vpop.permute.xlu0 %516 }
 0x25f   : > { %792 = vrot.lane.b32.xlu1 %v787_v17, %s8336_s26  ;;  %972 = vrot.lane.b32.xlu0 %v968_v21, %s8326_s14  ;;  %v440_v17 = vstv %s5084_s10  ;;  %v1087_v21 = vstv %s5145_s9  ;;  %s5235_s9 = sld [smem:[#allocation8 + $0xdf]] }
 0x260   : > { %s8366_s10 = sld [smem:[#allocation34_spill]] }
 0x261   : > { %v5107_v16 = vpop.permute.xlu1 %574  ;;  %v5114_v27 = vpop.permute.xlu0 %530 }
 0x263   : > { %806 = vrot.lane.b32.xlu1 %v801_v25, %s8336_s26  ;;  %986 = vrot.lane.b32.xlu0 %v982_v30, %s8326_s14  ;;  %v523_v25 = vadd.f32 %v5037_v58, %v467_v0  ;;  %v857_v30 = vmul.f32 %v855_v37, %v5070_v9  ;;  %v473_v58 = vadd.f32 %v471_v1, %v440_v17 }
 0x264   : > { %v1088_v37 = vmul.f32 %v1087_v21, %v5140_v39  ;;  %v739_v0 = vmul.f32 %v737_v47, %v5070_v9 }
 0x265   : > { %v5128_v20 = vpop.permute.xlu1 %588  ;;  %v5135_v35 = vpop.permute.xlu0 %544  ;;  %v537_v1 = vadd.f32 %v5051_v63, %v473_v58  ;;  %v743_v58 = vstv %s5181_s4  ;;  %s8348_s4 = sld [smem:[#allocation25_spill]] }
 0x267   : > { %820 = vrot.lane.b32.xlu1 %v815_v34, %s8336_s26  ;;  %1000 = vrot.lane.b32.xlu0 %v996_v38, %s8326_s14  ;;  %v477_v34 = vmul.f32 %v475_v8, %v4740_v12  ;;  %v481_v38 = vstv %s5123_s17  ;;  %s8372_s17 = sld [smem:[#allocation37_spill]] }
 0x268   : > { %v483_v61 = vmul.f32 %v481_v38, %v4740_v12 }
 0x269   : > { %v5153_v46 = vpop.permute.xlu1 %602  ;;  %v5162_v50 = vpop.permute.xlu0 %558 }
 0x26b   : > { %834 = vrot.lane.b32.xlu1 %v829_v24, %s8336_s26  ;;  %1064 = vrot.lane.b32.xlu0 %v1060_v51, %s8336_s26 }
 0x26d   : > { %v5179_v60 = vpop.permute.xlu1 %616  ;;  %v5191_v11 = vpop.permute.xlu0 %572 }
 0x26f   : > { %848 = vrot.lane.b32.xlu1 %v843_v59, %s8336_s26  ;;  %1078 = vrot.lane.b32.xlu0 %v1074_v33, %s8336_s26  ;;  %v443_v33 = vstv %s5102_s8  ;;  %s5816_s8 = sld [smem:[#allocation8 + $0x9d]] }
 0x271   : > { %v631_v24 = vpop.permute.xlu1 %630  ;;  %v5219_v59 = vpop.permute.xlu0 %586 }
 0x272   : > { %v635_v51 = vadd.f32 %v631_v24, %v523_v25  ;;  %v446_v25 = vstv %s5112_s29  ;;  %s5526_s29 = sld [smem:[#allocation8 + $0x104]] }
 0x273   : > { %862 = vrot.lane.b32.xlu1 %v857_v30, %s8336_s26  ;;  %1092 = vrot.lane.b32.xlu0 %v1088_v37, %s8336_s26  ;;  %v871_v30 = vmul.f32 %v869_v41, %v5070_v9  ;;  %v479_v37 = vadd.f32 %v477_v34, %v443_v33  ;;  %v1102_v41 = vmul.f32 %v1101_v3, %v5140_v39  ;;  %v8268_v34 = vstv %s5199_s23 }
 0x274   : > { %v5237_v24 = vadd.f32 %v739_v0, %v635_v51  ;;  %v745_v0 = vmul.f32 %v743_v58, %v5070_v9  ;;  %v485_v23 = vadd.f32 %v483_v61, %v446_v25  ;;  %v1129_v61 = vstv %s5230_s22  ;;  %s8358_s22 = sld [smem:[#allocation30_spill]] }
 0x275   : > { %v645_v63 = vpop.permute.xlu1 %644  ;;  %v5251_v51 = vpop.permute.xlu0 %600 }
 0x276   : > { %v649_v52 = vadd.f32 %v645_v63, %v537_v1  ;;  %v551_v1 = vadd.f32 %v5065_v6, %v479_v37  ;;  %v493_v63 = vstv %s5160_s28  ;;  %v499_v6 = vstv %s5189_s25  ;;  %s5486_s25 = sld [smem:[#allocation8 + $0xbc]] }
 0x277   : > { %876 = vrot.lane.b32.xlu1 %v871_v30, %s8336_s26  ;;  %1106 = vrot.lane.b32.xlu0 %v1102_v41, %s8336_s26  ;;  %v885_v30 = vmul.f32 %v883_v45, %v5070_v9  ;;  %v751_v45 = vmul.f32 %v749_v28, %v5070_v9  ;;  %s8370_s28 = sld [smem:[#allocation36_spill]] }
 0x278   : > { %v5274_v42 = vadd.f32 %v745_v0, %v649_v52  ;;  %v1116_v52 = vmul.f32 %v8268_v34, %v5140_v39  ;;  %v466_v0 = vadd.f32 %v464_v48, %v437_v54  ;;  %v1143_v48 = vstv %s5235_s9  ;;  %s5631_s9 = sld [smem:[#allocation8 + $0x4e]] }
 0x279   : > { %v659_v37 = vpop.permute.xlu1 %658  ;;  %v5286_v41 = vpop.permute.xlu0 %614 }
 0x27a   : > { %v663_v19 = vadd.f32 %v659_v37, %v551_v1  ;;  %v565_v1 = vadd.f32 %v5086_v2, %v485_v23  ;;  %v505_v37 = vstv %s5217_s16  ;;  %v495_v23 = vmul.f32 %v493_v63, %v4740_v12  ;;  %s5507_s16 = sld [smem:[#allocation8 + $0xe0]] }
 0x27b   : > { %890 = vrot.lane.b32.xlu1 %v885_v30, %s8336_s26  ;;  %1120 = vrot.lane.b32.xlu0 %v1116_v52, %s8336_s26  ;;  %v522_v30 = vadd.f32 %v5093_v18, %v466_v0  ;;  %v491_v52 = vadd.f32 %v489_v32, %v449_v44  ;;  %v472_v18 = vadd.f32 %v470_v14, %v440_v17  ;;  %v761_v14 = vstv %s5272_s21  ;;  %s5616_s21 = sld [smem:[#allocation8 + $0x2a]] }
 0x27c   : > { %v5310_v54 = vadd.f32 %v751_v45, %v663_v19  ;;  %v1130_v19 = vmul.f32 %v1129_v61, %v5140_v39  ;;  %v476_v45 = vmul.f32 %v475_v8, %v4762_v26  ;;  %v738_v32 = vmul.f32 %v737_v47, %v4890_v15 }
 0x27d   : > { %v673_v2 = vpop.permute.xlu1 %672  ;;  %v629_v4 = vpop.permute.xlu0 %628  ;;  %v536_v17 = vadd.f32 %v5114_v27, %v472_v18  ;;  %v763_v27 = vmul.f32 %v761_v14, %v5070_v9 }
 0x27e   : > { %v677_v34 = vadd.f32 %v673_v2, %v565_v1  ;;  %v634_v0 = vadd.f32 %v629_v4, %v522_v30  ;;  %v579_v1 = vadd.f32 %v5107_v16, %v491_v52  ;;  %v1157_v2 = vstv %s5266_s0  ;;  %s5648_s0 = sld [smem:[#allocation8 + $0x72]] }
 0x27f   : > { %904 = vrot.lane.b32.xlu1 %v899_v29, %s8326_s14  ;;  %1134 = vrot.lane.b32.xlu0 %v1130_v19, %s8336_s26  ;;  %v913_v4 = vmul.f32 %v911_v53, %v5070_v9  ;;  %v501_v16 = vmul.f32 %v499_v6, %v4740_v12  ;;  %v1144_v53 = vmul.f32 %v1143_v48, %v5140_v39 }
 0x280   : > { %v5343_v8 = vadd.f32 %v757_v49, %v677_v34  ;;  %v5352_v29 = vadd.f32 %v738_v32, %v634_v0  ;;  %v497_v34 = vadd.f32 %v495_v23, %v452_v40  ;;  %v478_v19 = vadd.f32 %v476_v45, %v443_v33 }
 0x281   : > { %v687_v47 = vpop.permute.xlu1 %686  ;;  %v643_v52 = vpop.permute.xlu0 %642  ;;  %v482_v49 = vmul.f32 %v481_v38, %v4762_v26  ;;  %v744_v23 = vmul.f32 %v743_v58, %v4890_v15  ;;  %v1171_v32 = vstv %s5302_s2  ;;  %v767_v33 = vstv %s5308_s1  ;;  %s8360_s1 = sld [smem:[#allocation31_spill]] }
 0x282   : > { %v691_v30 = vadd.f32 %v687_v47, %v579_v1  ;;  %v648_v18 = vadd.f32 %v643_v52, %v536_v17  ;;  %v593_v0 = vadd.f32 %v5128_v20, %v497_v34  ;;  %v927_v38 = vmul.f32 %v925_v57, %v5070_v9  ;;  %s8362_s2 = sld [smem:[#allocation32_spill]] }
 0x283   : > { %918 = vrot.lane.b32.xlu1 %v913_v4, %s8326_s14  ;;  %1148 = vrot.lane.b32.xlu0 %v1144_v53, %s8336_s26  ;;  %v550_v1 = vadd.f32 %v5135_v35, %v478_v19  ;;  %v507_v58 = vmul.f32 %v505_v37, %v4740_v12  ;;  %v503_v17 = vadd.f32 %v501_v16, %v455_v36 }
 0x284   : > { %v5377_v45 = vadd.f32 %v763_v27, %v691_v30  ;;  %v5386_v20 = vadd.f32 %v744_v23, %v648_v18  ;;  %v1158_v57 = vmul.f32 %v1157_v2, %v5140_v39  ;;  %v769_v12 = vmul.f32 %v767_v33, %v5070_v9 }
 0x285   : > { %v701_v4 = vpop.permute.xlu1 %700  ;;  %v657_v34 = vpop.permute.xlu0 %656  ;;  %v484_v35 = vadd.f32 %v482_v49, %v446_v25  ;;  %v488_v30 = vmul.f32 %v487_v56, %v4762_v26  ;;  %v750_v16 = vmul.f32 %v749_v28, %v4890_v15  ;;  %v607_v53 = vadd.f32 %v5153_v46, %v503_v17 }
 0x286   : > { %v705_v47 = vadd.f32 %v701_v4, %v593_v0  ;;  %v662_v52 = vadd.f32 %v657_v34, %v550_v1  ;;  %v1185_v27 = vstv %s5340_s3  ;;  %v941_v56 = vmul.f32 %v939_v62, %v5070_v9  ;;  %s5667_s3 = sld [smem:[#allocation8 + $0x96]] }
 0x287   : > { %932 = vrot.lane.b32.xlu1 %v927_v38, %s8326_s14  ;;  %1162 = vrot.lane.b32.xlu0 %v1158_v57, %s8336_s26  ;;  %v564_v25 = vadd.f32 %v5162_v50, %v484_v35  ;;  %v773_v28 = vstv %s5354_s13  ;;  %v509_v23 = vadd.f32 %v507_v58, %v458_v10  ;;  %v1172_v38 = vmul.f32 %v1171_v32, %v5140_v39  ;;  %s8364_s13 = sld [smem:[#allocation33_spill]] }
 0x288   : > { %v5412_v19 = vadd.f32 %v769_v12, %v705_v47  ;;  %v5418_v18 = vadd.f32 %v750_v16, %v662_v52  ;;  %v775_v1 = vmul.f32 %v773_v28, %v5070_v9  ;;  %v490_v62 = vadd.f32 %v488_v30, %v449_v44 }
 0x289   : > { %v715_v49 = vpop.permute.xlu1 %714  ;;  %v671_v0 = vpop.permute.xlu0 %670  ;;  %v494_v50 = vmul.f32 %v493_v63, %v4762_v26  ;;  %v756_v58 = vmul.f32 %v755_v7, %v4890_v15  ;;  %v621_v17 = vadd.f32 %v5179_v60, %v509_v23  ;;  %v955_v44 = vmul.f32 %v953_v5, %v5070_v9 }
 0x28a   : > { %v719_v46 = vadd.f32 %v715_v49, %v607_v53  ;;  %v676_v4 = vadd.f32 %v671_v0, %v564_v25  ;;  %v578_v63 = vadd.f32 %v5191_v11, %v490_v62  ;;  %v779_v12 = vstv %s5388_s15  ;;  %s5686_s15 = sld [smem:[#allocation8 + $0xba]] }
 0x28b   : > { %946 = vrot.lane.b32.xlu1 %v941_v56, %s8326_s14  ;;  %1176 = vrot.lane.b32.xlu0 %v1172_v38, %s8326_s14  ;;  %v1186_v7 = vmul.f32 %v1185_v27, %v5140_v39  ;;  %v1199_v60 = vstv %s5395_s12  ;;  %v781_v52 = vmul.f32 %v779_v12, %v5070_v9  ;;  %v496_v5 = vadd.f32 %v494_v50, %v452_v40  ;;  %s5706_s12 = sld [smem:[#allocation8 + $0xde]] }
 0x28c   : > { %v5440_v47 = vadd.f32 %v775_v1, %v719_v46  ;;  %v5446_v57 = vadd.f32 %v756_v58, %v676_v4  ;;  %v500_v11 = vmul.f32 %v499_v6, %v4762_v26  ;;  %v762_v53 = vmul.f32 %v761_v14, %v4890_v15 }
 0x28d   : > { %v729_v34 = vpop.permute.xlu1 %728  ;;  %v685_v30 = vpop.permute.xlu0 %684  ;;  %v969_v40 = vmul.f32 %v967_v13, %v5070_v9  ;;  %v592_v25 = vadd.f32 %v5219_v59, %v496_v5  ;;  %v1200_v14 = vmul.f32 %v1199_v60, %v5140_v39  ;;  %v1213_v46 = vstv %s5426_s5  ;;  %s5726_s5 = sld [smem:[#allocation8 + $0x102]] }
 0x28e   : > { %v733_v35 = vadd.f32 %v729_v34, %v621_v17  ;;  %v690_v16 = vadd.f32 %v685_v30, %v578_v63  ;;  %v502_v0 = vadd.f32 %v500_v11, %v455_v36  ;;  %v506_v38 = vmul.f32 %v505_v37, %v4762_v26  ;;  %v5519_v63 = vld [vmem:[#allocation2 + $0xa] sm:$0xff] }
 0x28f   : > { %960 = vrot.lane.b32.xlu1 %v955_v44, %s8326_s14  ;;  %1190 = vrot.lane.b32.xlu0 %v1186_v7, %s8326_s14  ;;  %v768_v59 = vmul.f32 %v767_v33, %v4890_v15  ;;  %v983_v1 = vmul.f32 %v981_v22, %v5070_v9  ;;  %v1214_v37 = vmul.f32 %v1213_v46, %v5140_v39  ;;  %v1227_v58 = vstv %s5460_s24  ;;  %s5745_s24 = sld [smem:[#allocation8 + $0xd]] }
 0x290   : > { %v5466_v56 = vadd.f32 %v781_v52, %v733_v35  ;;  %v5474_v49 = vadd.f32 %v762_v53, %v690_v16  ;;  %v606_v36 = vadd.f32 %v5251_v51, %v502_v0  ;;  %v508_v4 = vadd.f32 %v506_v38, %v458_v10 }
 0x291   : > { %v5472_v6 = vpop.permute.xlu1 %1341  ;;  %v699_v23 = vpop.permute.xlu0 %698  ;;  %v774_v22 = vmul.f32 %v773_v28, %v4890_v15  ;;  %v997_v51 = vmul.f32 %v995_v31, %v5070_v9  ;;  %v1228_v28 = vmul.f32 %v1227_v58, %v5140_v39  ;;  %v1241_v9 = vstv %s5486_s25  ;;  %s5765_s25 = sld [smem:[#allocation8 + $0x31]] }
 0x292   : > { %v704_v13 = vadd.f32 %v699_v23, %v592_v25  ;;  %v620_v17 = vadd.f32 %v5286_v41, %v508_v4  ;;  %v780_v31 = vmul.f32 %v779_v12, %v4890_v15  ;;  %v1061_v41 = vmul.f32 %v1059_v43, %v5519_v63 }
 0x293   : > { %974 = vrot.lane.b32.xlu1 %v969_v40, %s8326_s14  ;;  %1204 = vrot.lane.b32.xlu0 %v1200_v14, %s8326_s14  ;;  %v1242_v5 = vmul.f32 %v1241_v9, %v5140_v39  ;;  %v1255_v11 = vstv %s5507_s16  ;;  %v1075_v15 = vmul.f32 %v1073_v55, %v5519_v63  ;;  %v1269_v53 = vstv %s5526_s29  ;;  %v5562_v14 = vld [vmem:[#allocation2 + $0x18] sm:$0xff]  ;;  %s8376_s16 = sld [smem:[#allocation39_spill]] }
 0x294   : > { %v5498_v50 = vadd.f32 %v768_v59, %v704_v13  ;;  %v1256_v16 = vmul.f32 %v1255_v11, %v5140_v39  ;;  %v1089_v40 = vmul.f32 %v1087_v21, %v5519_v63  ;;  %v1270_v23 = vmul.f32 %v1269_v53, %v5140_v39  ;;  %s5803_s29 = sld [smem:[#allocation8 + $0x79]] }
 0x295   : > { %v5496_v62 = vpop.permute.xlu1 %1355  ;;  %v713_v26 = vpop.permute.xlu0 %712  ;;  %v1103_v38 = vmul.f32 %v1101_v3, %v5519_v63  ;;  %v8351_v21 = vstv %s8348_s4  ;;  %s5831_s4 = sld [smem:[#allocation8 + $0xc1]] }
 0x296   : > { %v718_v33 = vadd.f32 %v713_v26, %v606_v36  ;;  %v1335_v13 = vmul.f32 %v8351_v21, %v5562_v14  ;;  %v8353_v36 = vstv %s5199_s23  ;;  %s5602_s23 = sld [smem:[#allocation8 + $0x6]] }
 0x297   : > { %988 = vrot.lane.b32.xlu1 %v983_v1, %s8326_s14  ;;  %1218 = vrot.lane.b32.xlu0 %v1214_v37, %s8326_s14  ;;  %v1117_v26 = vmul.f32 %v8353_v36, %v5519_v63  ;;  %v8354_v37 = vstv %s8349_s11  ;;  %s5842_s11 = sld [smem:[#allocation8 + $0xe5]] }
 0x298   : > { %v5517_v10 = vadd.f32 %v774_v22, %v718_v33  ;;  %v1349_v4 = vmul.f32 %v8354_v37, %v5562_v14  ;;  %v1131_v22 = vmul.f32 %v1129_v61, %v5519_v63 }
 0x299   : > { %v5515_v44 = vpop.permute.xlu1 %1369  ;;  %v727_v34 = vpop.permute.xlu0 %726 }
 0x29a   : > { %v732_v35 = vadd.f32 %v727_v34, %v620_v17 }
 0x29b   : > { %1002 = vrot.lane.b32.xlu1 %v997_v51, %s8326_s14  ;;  %1232 = vrot.lane.b32.xlu0 %v1228_v28, %s8326_s14  ;;  %v8356_v51 = vstv %s8350_s19  ;;  %s5855_s19 = sld [smem:[#allocation8 + $0x109]] }
 0x29c   : > { %v5535_v7 = vadd.f32 %v780_v31, %v732_v35  ;;  %v1363_v17 = vmul.f32 %v8356_v51, %v5562_v14  ;;  %v1145_v35 = vmul.f32 %v1143_v48, %v5519_v63  ;;  %v8357_v31 = vstv %s8352_s27  ;;  %s5869_s27 = sld [smem:[#allocation8 + $0xe]] }
 0x29d   : > { %v5533_v30 = vpop.permute.xlu1 %1383  ;;  %v791_v52 = vpop.permute.xlu0 %790  ;;  %v1377_v61 = vmul.f32 %v8357_v31, %v5562_v14  ;;  %v8359_v48 = vstv %s8355_s7  ;;  %s5880_s7 = sld [smem:[#allocation8 + $0x9]] }
 0x29f   : > { %1066 = vrot.lane.b32.xlu1 %v1061_v41, %s8336_s26  ;;  %1246 = vrot.lane.b32.xlu0 %v1242_v5, %s8326_s14 }
 0x2a1   : > { %v5546_v43 = vpop.permute.xlu1 %1397  ;;  %v805_v12 = vpop.permute.xlu0 %804 }
 0x2a3   : > { %1080 = vrot.lane.b32.xlu1 %v1075_v15, %s8336_s26  ;;  %1260 = vrot.lane.b32.xlu0 %v1256_v16, %s8326_s14  ;;  %v1159_v15 = vmul.f32 %v1157_v2, %v5519_v63  ;;  %v1391_v16 = vmul.f32 %v8359_v48, %v5562_v14  ;;  %v1173_v2 = vmul.f32 %v1171_v32, %v5519_v63 }
 0x2a4   : > { %v810_v32 = vadd.f32 %v805_v12, %v5386_v20  ;;  %v8275_v12 = vstv %s5631_s9  ;;  %v1201_v48 = vmul.f32 %v1199_v60, %v5519_v63 }
 0x2a5   : > { %v5557_v25 = vpop.permute.xlu1 %1411  ;;  %v819_v55 = vpop.permute.xlu0 %818 }
 0x2a7   : > { %1094 = vrot.lane.b32.xlu1 %v1089_v40, %s8336_s26  ;;  %1274 = vrot.lane.b32.xlu0 %v1270_v23, %s8326_s14  ;;  %v1011_v23 = vstv %s5602_s23  ;;  %s5887_s23 = sld [smem:[#allocation8 + $0x32]] }
 0x2a9   : > { %v5566_v0 = vpop.permute.xlu1 %1425  ;;  %v5574_v59 = vpop.permute.xlu0 %832 }
 0x2aa   : > { %v838_v60 = vadd.f32 %v5574_v59, %v5446_v57  ;;  %v8273_v59 = vstv %s5667_s3 }
 0x2ab   : > { %1108 = vrot.lane.b32.xlu1 %v1103_v38, %s8336_s26  ;;  %1339 = vrot.lane.b32.xlu0 %v1335_v13, %s8336_s26  ;;  %v796_v38 = vadd.f32 %v791_v52, %v5352_v29  ;;  %v8361_v13 = vstv %s8358_s22  ;;  %v1017_v29 = vstv %s5616_s21  ;;  %s5898_s22 = sld [smem:[#allocation8 + $0x2d]] }
 0x2ac   : > { %v1405_v36 = vmul.f32 %v8361_v13, %v5562_v14  ;;  %v1018_v20 = vmul.f32 %v1017_v29, %v5140_v39  ;;  %s5905_s21 = sld [smem:[#allocation8 + $0x56]] }
 0x2ad   : > { %v5578_v1 = vpop.permute.xlu1 %1439  ;;  %v5586_v3 = vpop.permute.xlu0 %846 }
 0x2af   : > { %1122 = vrot.lane.b32.xlu1 %v1117_v26, %s8336_s26  ;;  %1353 = vrot.lane.b32.xlu0 %v1349_v4, %s8336_s26  ;;  %v1012_v4 = vmul.f32 %v1011_v23, %v5140_v39 }
 0x2b1   : > { %v5590_v33 = vpop.permute.xlu1 %1453  ;;  %v5598_v34 = vpop.permute.xlu0 %860 }
 0x2b3   : > { %1136 = vrot.lane.b32.xlu1 %v1131_v22, %s8336_s26  ;;  %1367 = vrot.lane.b32.xlu0 %v1363_v17, %s8336_s26  ;;  %v1187_v22 = vmul.f32 %v1185_v27, %v5519_v63  ;;  %v8363_v17 = vstv %s8360_s1  ;;  %v824_v27 = vadd.f32 %v819_v55, %v5418_v18  ;;  %v1024_v18 = vmul.f32 %v8275_v12, %v5140_v39  ;;  %s5927_s1 = sld [smem:[#allocation8 + $0x7a]] }
 0x2b4   : > { %v8274_v55 = vstv %s5648_s0 }
 0x2b5   : > { %v5604_v28 = vpop.permute.xlu1 %1467  ;;  %v5612_v41 = vpop.permute.xlu0 %874  ;;  %v1030_v57 = vmul.f32 %v8274_v55, %v5140_v39 }
 0x2b7   : > { %1150 = vrot.lane.b32.xlu1 %v1145_v35, %s8336_s26  ;;  %1381 = vrot.lane.b32.xlu0 %v1377_v61, %s8336_s26  ;;  %v1419_v35 = vmul.f32 %v8363_v17, %v5562_v14 }
 0x2b9   : > { %v5618_v5 = vpop.permute.xlu1 %1481  ;;  %v5626_v40 = vpop.permute.xlu0 %888 }
 0x2bb   : > { %1164 = vrot.lane.b32.xlu1 %v1159_v15, %s8336_s26  ;;  %1395 = vrot.lane.b32.xlu0 %v1391_v16, %s8336_s26 }
 0x2bd   : > { %v5634_v21 = vpop.permute.xlu1 %1495  ;;  %v903_v26 = vpop.permute.xlu0 %902 }
 0x2be   : > { %v908_v37 = vadd.f32 %v903_v26, %v796_v38  ;;  %v8365_v38 = vstv %s8362_s2  ;;  %s5953_s2 = sld [smem:[#allocation8 + $0x9e]] }
 0x2bf   : > { %1178 = vrot.lane.b32.xlu1 %v1173_v2, %s8326_s14  ;;  %1409 = vrot.lane.b32.xlu0 %v1405_v36, %s8336_s26  ;;  %v1433_v2 = vmul.f32 %v8365_v38, %v5562_v14 }
 0x2c0   : > { %v5656_v51 = vadd.f32 %v1012_v4, %v908_v37  ;;  %v1215_v37 = vmul.f32 %v1213_v46, %v5519_v63  ;;  %v852_v46 = vadd.f32 %v5586_v3, %v5474_v49  ;;  %v1036_v49 = vmul.f32 %v8273_v59, %v5140_v39 }
 0x2c1   : > { %v5651_v52 = vpop.permute.xlu1 %1509  ;;  %v917_v31 = vpop.permute.xlu0 %916  ;;  %v8272_v3 = vstv %s5686_s15 }
 0x2c2   : > { %v922_v61 = vadd.f32 %v917_v31, %v810_v32  ;;  %v8367_v32 = vstv %s8364_s13  ;;  %s5977_s13 = sld [smem:[#allocation8 + $0xc2]] }
 0x2c3   : > { %1192 = vrot.lane.b32.xlu1 %v1187_v22, %s8326_s14  ;;  %1423 = vrot.lane.b32.xlu0 %v1419_v35, %s8336_s26  ;;  %v1447_v22 = vmul.f32 %v8367_v32, %v5562_v14 }
 0x2c4   : > { %v5675_v16 = vadd.f32 %v1018_v20, %v922_v61  ;;  %v1229_v61 = vmul.f32 %v1227_v58, %v5519_v63  ;;  %v866_v58 = vadd.f32 %v5598_v34, %v5498_v50  ;;  %v1042_v50 = vmul.f32 %v8272_v3, %v5140_v39 }
 0x2c5   : > { %v5670_v15 = vpop.permute.xlu1 %1523  ;;  %v931_v13 = vpop.permute.xlu0 %930  ;;  %v880_v34 = vadd.f32 %v5612_v41, %v5517_v10  ;;  %v8270_v41 = vstv %s5726_s5 }
 0x2c6   : > { %v936_v36 = vadd.f32 %v931_v13, %v824_v27  ;;  %v8369_v27 = vstv %s8366_s10  ;;  %s6001_s10 = sld [smem:[#allocation8 + $0xe6]] }
 0x2c7   : > { %1206 = vrot.lane.b32.xlu1 %v1201_v48, %s8326_s14  ;;  %1437 = vrot.lane.b32.xlu0 %v1433_v2, %s8336_s26  ;;  %v1461_v48 = vmul.f32 %v8369_v27, %v5562_v14 }
 0x2c8   : > { %v5695_v4 = vadd.f32 %v1024_v18, %v936_v36  ;;  %v1243_v36 = vmul.f32 %v1241_v9, %v5519_v63  ;;  %v8271_v9 = vstv %s5706_s12 }
 0x2c9   : > { %v5690_v26 = vpop.permute.xlu1 %1537  ;;  %v945_v17 = vpop.permute.xlu0 %944  ;;  %v1048_v10 = vmul.f32 %v8271_v9, %v5140_v39 }
 0x2ca   : > { %v950_v35 = vadd.f32 %v945_v17, %v838_v60  ;;  %v8371_v60 = vstv %s8368_s6  ;;  %s6025_s6 = sld [smem:[#allocation8 + $0x10a]] }
 0x2cb   : > { %1220 = vrot.lane.b32.xlu1 %v1215_v37, %s8326_s14  ;;  %1451 = vrot.lane.b32.xlu0 %v1447_v22, %s8326_s14  ;;  %v1475_v37 = vmul.f32 %v8371_v60, %v5562_v14 }
 0x2cc   : > { %v5715_v20 = vadd.f32 %v1030_v57, %v950_v35  ;;  %v1257_v35 = vmul.f32 %v1255_v11, %v5519_v63  ;;  %v894_v11 = vadd.f32 %v5626_v40, %v5535_v7  ;;  %v1054_v7 = vmul.f32 %v8270_v41, %v5140_v39 }
 0x2cd   : > { %v5710_v31 = vpop.permute.xlu1 %1551  ;;  %v959_v38 = vpop.permute.xlu0 %958  ;;  %v1608_v40 = vstv %s5745_s24  ;;  %v1622_v39 = vstv %s5765_s25  ;;  %s6063_s24 = sld [smem:[#allocation8 + $0x34]] }
 0x2ce   : > { %v964_v2 = vadd.f32 %v959_v38, %v852_v46  ;;  %v8373_v46 = vstv %s8370_s28  ;;  %s6046_s28 = sld [smem:[#allocation8 + $0x10]] }
 0x2cf   : > { %1234 = vrot.lane.b32.xlu1 %v1229_v61, %s8326_s14  ;;  %1465 = vrot.lane.b32.xlu0 %v1461_v48, %s8326_s14  ;;  %v1489_v61 = vmul.f32 %v8373_v46, %v5562_v14  ;;  %s6095_s25 = sld [smem:[#allocation8 + $0x7c]] }
 0x2d0   : > { %v5735_v18 = vadd.f32 %v1036_v49, %v964_v2  ;;  %v1271_v2 = vmul.f32 %v1269_v53, %v5519_v63 }
 0x2d1   : > { %v5730_v13 = vpop.permute.xlu1 %792  ;;  %v973_v32 = vpop.permute.xlu0 %972 }
 0x2d2   : > { %v978_v22 = vadd.f32 %v973_v32, %v866_v58  ;;  %v5777_v58 = vld [vmem:[#allocation2 + $0x21] sm:$0xff] }
 0x2d3   : > { %1248 = vrot.lane.b32.xlu1 %v1243_v36, %s8326_s14  ;;  %1479 = vrot.lane.b32.xlu0 %v1475_v37, %s8326_s14  ;;  %v8375_v36 = vstv %s8372_s17  ;;  %s6082_s17 = sld [smem:[#allocation8 + $0x58]] }
 0x2d4   : > { %v5755_v57 = vadd.f32 %v1042_v50, %v978_v22  ;;  %v1503_v60 = vmul.f32 %v8375_v36, %v5562_v14  ;;  %v1610_v22 = vmul.f32 %v1608_v40, %v5777_v58 }
 0x2d5   : > { %v5750_v17 = vpop.permute.xlu1 %806  ;;  %v987_v27 = vpop.permute.xlu0 %986 }
 0x2d6   : > { %v992_v48 = vadd.f32 %v987_v27, %v880_v34  ;;  %v8377_v34 = vstv %s8374_s20  ;;  %v1624_v27 = vmul.f32 %v1622_v39, %v5777_v58  ;;  %s6106_s20 = sld [smem:[#allocation8 + $0xa0]] }
 0x2d7   : > { %1262 = vrot.lane.b32.xlu1 %v1257_v35, %s8326_s14  ;;  %1493 = vrot.lane.b32.xlu0 %v1489_v61, %s8326_s14  ;;  %v1517_v35 = vmul.f32 %v8377_v34, %v5562_v14  ;;  %v1650_v34 = vstv %s5803_s29  ;;  %s6141_s29 = sld [smem:[#allocation8 + $0xc]] }
 0x2d8   : > { %v5775_v49 = vadd.f32 %v1048_v10, %v992_v48  ;;  %v8379_v48 = vstv %s8376_s16  ;;  %s6119_s16 = sld [smem:[#allocation8 + $0xc4]] }
 0x2d9   : > { %v5770_v38 = vpop.permute.xlu1 %820  ;;  %v1001_v37 = vpop.permute.xlu0 %1000  ;;  %v1531_v10 = vmul.f32 %v8379_v48, %v5562_v14 }
 0x2da   : > { %v1006_v32 = vadd.f32 %v1001_v37, %v894_v11  ;;  %v8380_v37 = vstv %s8378_s30  ;;  %s6138_s30 = sld [smem:[#allocation8 + $0x10c]] }
 0x2db   : > { %1276 = vrot.lane.b32.xlu1 %v1271_v2, %s8326_s14  ;;  %1507 = vrot.lane.b32.xlu0 %v1503_v60, %s8326_s14  ;;  %v1636_v2 = vstv %s5788_s18  ;;  %s6130_s18 = sld [smem:[#allocation8 + $0xe8]] }
 0x2dc   : > { %v5793_v50 = vadd.f32 %v1054_v7, %v1006_v32  ;;  %v1638_v60 = vmul.f32 %v1636_v2, %v5777_v58  ;;  %v1545_v32 = vmul.f32 %v8380_v37, %v5562_v14  ;;  %v1664_v37 = vstv %s5816_s8  ;;  %s6156_s8 = sld [smem:[#allocation8 + $0x11]] }
 0x2dd   : > { %v5790_v53 = vpop.permute.xlu1 %834  ;;  %v5798_v46 = vpop.permute.xlu0 %1064 }
 0x2df   : > { %1615 = vrot.lane.b32.xlu1 %v1610_v22, %s8336_s26  ;;  %1521 = vrot.lane.b32.xlu0 %v1517_v35, %s8326_s14  ;;  %v5826_v22 = vld [vmem:[#allocation2 + $0x19] sm:$0xff] }
 0x2e0   : > { %v1623_v9 = vmul.f32 %v1622_v39, %v5826_v22  ;;  %v1637_v12 = vmul.f32 %v1636_v2, %v5826_v22  ;;  %v1013_v39 = vmul.f32 %v1011_v23, %v5519_v63  ;;  %v1651_v23 = vmul.f32 %v1650_v34, %v5826_v22 }
 0x2e1   : > { %v5805_v61 = vpop.permute.xlu1 %848  ;;  %v5811_v11 = vpop.permute.xlu0 %1078 }
 0x2e3   : > { %1629 = vrot.lane.b32.xlu1 %v1624_v27, %s8336_s26  ;;  %1535 = vrot.lane.b32.xlu0 %v1531_v10, %s8326_s14  ;;  %v1652_v27 = vmul.f32 %v1650_v34, %v5777_v58  ;;  %v1609_v10 = vmul.f32 %v1608_v40, %v5826_v22  ;;  %v797_v40 = vadd.f32 %v5730_v13, %v5237_v24  ;;  %v1692_v13 = vstv %s5842_s11  ;;  %s6175_s11 = sld [smem:[#allocation8 + $0x35]] }
 0x2e4   : > { %v811_v24 = vadd.f32 %v5750_v17, %v5274_v42  ;;  %v825_v42 = vadd.f32 %v5770_v38, %v5310_v54  ;;  %v839_v38 = vadd.f32 %v5790_v53, %v5343_v8  ;;  %v8382_v53 = vstv %s5648_s0  ;;  %s5943_s0 = sld [smem:[#allocation8 + $0x75]] }
 0x2e5   : > { %v5818_v36 = vpop.permute.xlu1 %862  ;;  %v5824_v7 = vpop.permute.xlu0 %1092 }
 0x2e7   : > { %1643 = vrot.lane.b32.xlu1 %v1638_v60, %s8336_s26  ;;  %1549 = vrot.lane.b32.xlu0 %v1545_v32, %s8326_s14  ;;  %v1666_v32 = vmul.f32 %v1664_v37, %v5777_v58 }
 0x2e9   : > { %v5833_v35 = vpop.permute.xlu1 %876  ;;  %v5836_v48 = vpop.permute.xlu0 %1106 }
 0x2eb   : > { %1657 = vrot.lane.b32.xlu1 %v1652_v27, %s8336_s26  ;;  %1613 = vrot.lane.b32.xlu0 %v1609_v10, %s8336_s26  ;;  %v1678_v27 = vstv %s5831_s4  ;;  %s6159_s4 = sld [smem:[#allocation8 + $0x30]] }
 0x2ec   : > { %v1680_v3 = vmul.f32 %v1678_v27, %v5777_v58  ;;  %v1679_v8 = vmul.f32 %v1678_v27, %v5826_v22  ;;  %v1734_v27 = vstv %s5887_s23  ;;  %s6221_s23 = sld [smem:[#allocation8 + $0x7d]] }
 0x2ed   : > { %v5844_v60 = vpop.permute.xlu1 %890  ;;  %v5847_v41 = vpop.permute.xlu0 %1120 }
 0x2ef   : > { %1671 = vrot.lane.b32.xlu1 %v1666_v32, %s8336_s26  ;;  %1627 = vrot.lane.b32.xlu0 %v1623_v9, %s8336_s26 }
 0x2f1   : > { %v905_v10 = vpop.permute.xlu1 %904  ;;  %v5858_v55 = vpop.permute.xlu0 %1134 }
 0x2f2   : > { %v909_v59 = vadd.f32 %v905_v10, %v797_v40  ;;  %v1694_v40 = vmul.f32 %v1692_v13, %v5777_v58 }
 0x2f3   : > { %1685 = vrot.lane.b32.xlu1 %v1680_v3, %s8336_s26  ;;  %1641 = vrot.lane.b32.xlu0 %v1637_v12, %s8336_s26  ;;  %v1019_v3 = vmul.f32 %v1017_v29, %v5519_v63  ;;  %v1706_v12 = vstv %s5855_s19  ;;  %s6180_s19 = sld [smem:[#allocation8 + $0x54]] }
 0x2f4   : > { %v5871_v9 = vadd.f32 %v1013_v39, %v909_v59  ;;  %v1708_v34 = vmul.f32 %v1706_v12, %v5777_v58 }
 0x2f5   : > { %v919_v32 = vpop.permute.xlu1 %918  ;;  %v5874_v10 = vpop.permute.xlu0 %1148 }
 0x2f6   : > { %v923_v2 = vadd.f32 %v919_v32, %v811_v24  ;;  %v1665_v24 = vmul.f32 %v1664_v37, %v5826_v22  ;;  %v8381_v32 = vstv %s5631_s9  ;;  %v1070_v37 = vadd.f32 %v5798_v46, %v5656_v51  ;;  %s5917_s9 = sld [smem:[#allocation8 + $0x51]] }
 0x2f7   : > { %1699 = vrot.lane.b32.xlu1 %v1694_v40, %s8336_s26  ;;  %1655 = vrot.lane.b32.xlu0 %v1651_v23, %s8336_s26  ;;  %v1025_v54 = vmul.f32 %v8381_v32, %v5519_v63  ;;  %v1720_v40 = vstv %s5869_s27  ;;  %v853_v46 = vadd.f32 %v5805_v61, %v5377_v45  ;;  %v1693_v61 = vmul.f32 %v1692_v13, %v5826_v22  ;;  %s6197_s27 = sld [smem:[#allocation8 + $0x59]] }
 0x2f8   : > { %v5889_v59 = vadd.f32 %v1019_v3, %v923_v2  ;;  %v1722_v3 = vmul.f32 %v1720_v40, %v5777_v58  ;;  %v1748_v13 = vstv %s5905_s21  ;;  %s6250_s21 = sld [smem:[#allocation8 + $0xa1]] }
 0x2f9   : > { %v933_v17 = vpop.permute.xlu1 %932  ;;  %v5892_v29 = vpop.permute.xlu0 %1162 }
 0x2fa   : > { %v937_v39 = vadd.f32 %v933_v17, %v825_v42 }
 0x2fb   : > { %1713 = vrot.lane.b32.xlu1 %v1708_v34, %s8336_s26  ;;  %1669 = vrot.lane.b32.xlu0 %v1665_v24, %s8336_s26  ;;  %v1031_v34 = vmul.f32 %v8382_v53, %v5519_v63  ;;  %v1286_v24 = vstv %s5880_s7  ;;  %v1292_v53 = vstv %s5898_s22  ;;  %s6204_s7 = sld [smem:[#allocation8 + $0x78]] }
 0x2fc   : > { %v5907_v2 = vadd.f32 %v1025_v54, %v937_v39  ;;  %v1287_v51 = vmul.f32 %v1286_v24, %v5562_v14  ;;  %v1084_v54 = vadd.f32 %v5811_v11, %v5675_v16  ;;  %v1293_v16 = vmul.f32 %v1292_v53, %v5562_v14  ;;  %s6229_s22 = sld [smem:[#allocation8 + $0x9c]] }
 0x2fd   : > { %v947_v23 = vpop.permute.xlu1 %946  ;;  %v1177_v17 = vpop.permute.xlu0 %1176  ;;  %v867_v11 = vadd.f32 %v5818_v36, %v5412_v19  ;;  %v1707_v19 = vmul.f32 %v1706_v12, %v5826_v22  ;;  %v8384_v36 = vstv %s5686_s15  ;;  %v1762_v12 = vstv %s5927_s1  ;;  %s5991_s15 = sld [smem:[#allocation8 + $0xbd]] }
 0x2fe   : > { %v951_v42 = vadd.f32 %v947_v23, %v839_v38  ;;  %v1182_v39 = vadd.f32 %v1177_v17, %v1070_v37  ;;  %v1736_v37 = vmul.f32 %v1734_v27, %v5777_v58  ;;  %v8383_v17 = vstv %s5667_s3  ;;  %s5967_s3 = sld [smem:[#allocation8 + $0x99]] }
 0x2ff   : > { %1727 = vrot.lane.b32.xlu1 %v1722_v3, %s8326_s14  ;;  %1683 = vrot.lane.b32.xlu0 %v1679_v8, %s8336_s26  ;;  %v1037_v8 = vmul.f32 %v8383_v17, %v5519_v63  ;;  %s6285_s1 = sld [smem:[#allocation8 + $0xe4]] }
 0x300   : > { %v5929_v32 = vadd.f32 %v1031_v34, %v951_v42  ;;  %v5936_v23 = vadd.f32 %v1287_v51, %v1182_v39  ;;  %v1098_v39 = vadd.f32 %v5824_v7, %v5695_v4  ;;  %v881_v7 = vadd.f32 %v5833_v35, %v5440_v47 }
 0x301   : > { %v961_v38 = vpop.permute.xlu1 %960  ;;  %v1191_v45 = vpop.permute.xlu0 %1190  ;;  %v1721_v47 = vmul.f32 %v1720_v40, %v5826_v22  ;;  %v8385_v35 = vstv %s5706_s12  ;;  %v1776_v40 = vstv %s5953_s2  ;;  %s6017_s12 = sld [smem:[#allocation8 + $0xe1]] }
 0x302   : > { %v965_v3 = vadd.f32 %v961_v38, %v853_v46  ;;  %v1196_v42 = vadd.f32 %v1191_v45, %v1084_v54  ;;  %v1750_v46 = vmul.f32 %v1748_v13, %v5777_v58  ;;  %v1043_v45 = vmul.f32 %v8384_v36, %v5519_v63  ;;  %s6314_s2 = sld [smem:[#allocation8 + $0x108]] }
 0x303   : > { %1741 = vrot.lane.b32.xlu1 %v1736_v37, %s8326_s14  ;;  %1697 = vrot.lane.b32.xlu0 %v1693_v61, %s8336_s26  ;;  %v8281_v61 = vstv %s5917_s9  ;;  %v1126_v36 = vadd.f32 %v5847_v41, %v5735_v18  ;;  %v1790_v41 = vstv %s5977_s13  ;;  %s6344_s13 = sld [smem:[#allocation8 + $0x10d]] }
 0x304   : > { %v5955_v34 = vadd.f32 %v1037_v8, %v965_v3  ;;  %v5960_v54 = vadd.f32 %v1293_v16, %v1196_v42  ;;  %v1299_v4 = vmul.f32 %v8281_v61, %v5562_v14  ;;  %v1112_v8 = vadd.f32 %v5836_v48, %v5715_v20 }
 0x305   : > { %v975_v51 = vpop.permute.xlu1 %974  ;;  %v1205_v37 = vpop.permute.xlu0 %1204  ;;  %v1764_v16 = vmul.f32 %v1762_v12, %v5777_v58  ;;  %v895_v48 = vadd.f32 %v5844_v60, %v5466_v56  ;;  %v1735_v56 = vmul.f32 %v1734_v27, %v5826_v22  ;;  %v8386_v60 = vstv %s5726_s5  ;;  %s6038_s5 = sld [smem:[#allocation8 + $0x105]] }
 0x306   : > { %v979_v38 = vadd.f32 %v975_v51, %v867_v11  ;;  %v1210_v3 = vadd.f32 %v1205_v37, %v1098_v39  ;;  %v8280_v37 = vstv %s5943_s0 }
 0x307   : > { %1755 = vrot.lane.b32.xlu1 %v1750_v46, %s8326_s14  ;;  %1711 = vrot.lane.b32.xlu0 %v1707_v19, %s8336_s26  ;;  %v1049_v46 = vmul.f32 %v8385_v35, %v5519_v63  ;;  %v1305_v20 = vmul.f32 %v8280_v37, %v5562_v14 }
 0x308   : > { %v5979_v17 = vadd.f32 %v1043_v45, %v979_v38  ;;  %v5984_v11 = vadd.f32 %v1299_v4, %v1210_v3  ;;  %v1778_v3 = vmul.f32 %v1776_v40, %v5777_v58 }
 0x309   : > { %v989_v42 = vpop.permute.xlu1 %988  ;;  %v1219_v51 = vpop.permute.xlu0 %1218 }
 0x30a   : > { %v993_v39 = vadd.f32 %v989_v42, %v881_v7  ;;  %v1224_v38 = vadd.f32 %v1219_v51, %v1112_v8  ;;  %v1055_v42 = vmul.f32 %v8386_v60, %v5519_v63  ;;  %v1140_v63 = vadd.f32 %v5858_v55, %v5755_v57 }
 0x30b   : > { %1769 = vrot.lane.b32.xlu1 %v1764_v16, %s8326_s14  ;;  %1725 = vrot.lane.b32.xlu0 %v1721_v47, %s8326_s14  ;;  %v8279_v16 = vstv %s5967_s3  ;;  %v1792_v47 = vmul.f32 %v1790_v41, %v5777_v58  ;;  %v1804_v57 = vstv %s6001_s10  ;;  %s6380_s10 = sld [smem:[#allocation8 + $0x37]] }
 0x30c   : > { %v6003_v19 = vadd.f32 %v1049_v46, %v993_v39  ;;  %v6008_v4 = vadd.f32 %v1305_v20, %v1224_v38  ;;  %v1311_v18 = vmul.f32 %v8279_v16, %v5562_v14  ;;  %v1749_v38 = vmul.f32 %v1748_v13, %v5826_v22  ;;  %v6148_v16 = vld [vmem:[#allocation2 + $0x20] sm:$0xff] }
 0x30d   : > { %v1003_v45 = vpop.permute.xlu1 %1002  ;;  %v1233_v8 = vpop.permute.xlu0 %1232  ;;  %v8278_v20 = vstv %s5991_s15 }
 0x30e   : > { %v1007_v7 = vadd.f32 %v1003_v45, %v895_v48  ;;  %v1238_v39 = vadd.f32 %v1233_v8, %v1126_v36  ;;  %v1317_v55 = vmul.f32 %v8278_v20, %v5562_v14  ;;  %v1154_v36 = vadd.f32 %v5874_v10, %v5775_v49 }
 0x30f   : > { %1783 = vrot.lane.b32.xlu1 %v1778_v3, %s8326_s14  ;;  %1739 = vrot.lane.b32.xlu0 %v1735_v56, %s8326_s14  ;;  %v1806_v45 = vmul.f32 %v1804_v57, %v5777_v58  ;;  %v1763_v8 = vmul.f32 %v1762_v12, %v5826_v22  ;;  %v8277_v56 = vstv %s6017_s12  ;;  %v1818_v49 = vstv %s6025_s6  ;;  %s6415_s6 = sld [smem:[#allocation8 + $0x7f]] }
 0x310   : > { %v6027_v27 = vadd.f32 %v1055_v42, %v1007_v7  ;;  %v6034_v35 = vadd.f32 %v1311_v18, %v1238_v39  ;;  %v1323_v42 = vmul.f32 %v8277_v56, %v5562_v14  ;;  %v1168_v10 = vadd.f32 %v5892_v29, %v5793_v50 }
 0x311   : > { %v6031_v51 = vpop.permute.xlu1 %1066  ;;  %v1247_v46 = vpop.permute.xlu0 %1246  ;;  %v1820_v12 = vmul.f32 %v1818_v49, %v5777_v58  ;;  %v1882_v50 = vstv %s6046_s28  ;;  %s6437_s28 = sld [smem:[#allocation8 + $0xc7]] }
 0x312   : > { %v1252_v48 = vadd.f32 %v1247_v46, %v1140_v63  ;;  %v6072_v63 = vld [vmem:[#allocation2 + $0x22] sm:$0xff]  ;;  %v1777_v46 = vmul.f32 %v1776_v40, %v5826_v22 }
 0x313   : > { %1797 = vrot.lane.b32.xlu1 %v1792_v47, %s8326_s14  ;;  %1753 = vrot.lane.b32.xlu0 %v1749_v38, %s8326_s14  ;;  %v8276_v38 = vstv %s6038_s5 }
 0x314   : > { %v6053_v3 = vadd.f32 %v1317_v55, %v1252_v48  ;;  %v1329_v55 = vmul.f32 %v8276_v38, %v5562_v14  ;;  %v1896_v14 = vstv %s6063_s24  ;;  %s6446_s24 = sld [smem:[#allocation8 + $0xf]] }
 0x315   : > { %v6050_v13 = vpop.permute.xlu1 %1080  ;;  %v1261_v7 = vpop.permute.xlu0 %1260 }
 0x316   : > { %v1266_v60 = vadd.f32 %v1261_v7, %v1154_v36  ;;  %v1884_v36 = vmul.f32 %v1882_v50, %v6072_v63  ;;  %v1791_v7 = vmul.f32 %v1790_v41, %v5826_v22  ;;  %v1910_v41 = vstv %s6082_s17  ;;  %s6452_s17 = sld [smem:[#allocation8 + $0xeb]] }
 0x317   : > { %1811 = vrot.lane.b32.xlu1 %v1806_v45, %s8326_s14  ;;  %1767 = vrot.lane.b32.xlu0 %v1763_v8, %s8326_s14 }
 0x318   : > { %v6070_v18 = vadd.f32 %v1323_v42, %v1266_v60  ;;  %v1898_v60 = vmul.f32 %v1896_v14, %v6072_v63 }
 0x319   : > { %v6067_v39 = vpop.permute.xlu1 %1094  ;;  %v1275_v47 = vpop.permute.xlu0 %1274 }
 0x31a   : > { %v1280_v48 = vadd.f32 %v1275_v47, %v1168_v10  ;;  %v1805_v10 = vmul.f32 %v1804_v57, %v5826_v22  ;;  %v1912_v47 = vmul.f32 %v1910_v41, %v6072_v63  ;;  %v1924_v57 = vstv %s6095_s25  ;;  %s6459_s25 = sld [smem:[#allocation8 + $0x33]] }
 0x31b   : > { %1825 = vrot.lane.b32.xlu1 %v1820_v12, %s8326_s14  ;;  %1781 = vrot.lane.b32.xlu0 %v1777_v46, %s8326_s14 }
 0x31c   : > { %v6087_v45 = vadd.f32 %v1329_v55, %v1280_v48  ;;  %v1819_v48 = vmul.f32 %v1818_v49, %v5826_v22  ;;  %v6114_v55 = vld [vmem:[#allocation2 + $0x1a] sm:$0xff]  ;;  %v1938_v49 = vstv %s6106_s20  ;;  %s6465_s20 = sld [smem:[#allocation8 + $0x10f]] }
 0x31d   : > { %v6084_v29 = vpop.permute.xlu1 %1108  ;;  %v6089_v40 = vpop.permute.xlu0 %1339  ;;  %v1897_v56 = vmul.f32 %v1896_v14, %v6114_v55  ;;  %v1288_v14 = vmul.f32 %v6148_v16, %v1286_v24  ;;  %v1911_v61 = vmul.f32 %v1910_v41, %v6114_v55  ;;  %v8282_v24 = vstv %s6130_s18 }
 0x31e   : > { %8387 = vst [vmem:[#allocation49_spill] sm:$0xff] %v6087_v45 }
 0x31f   : > { %1889 = vrot.lane.b32.xlu1 %v1884_v36, %s8336_s26  ;;  %1795 = vrot.lane.b32.xlu0 %v1791_v7, %s8326_s14  ;;  %v1926_v7 = vmul.f32 %v1924_v57, %v6072_v63 }
 0x321   : > { %v6097_v8 = vpop.permute.xlu1 %1122  ;;  %v6100_v42 = vpop.permute.xlu0 %1353 }
 0x323   : > { %1903 = vrot.lane.b32.xlu1 %v1898_v60, %s8336_s26  ;;  %1809 = vrot.lane.b32.xlu0 %v1805_v10, %s8326_s14  ;;  %v1883_v10 = vmul.f32 %v1882_v50, %v6114_v55  ;;  %v1071_v50 = vadd.f32 %v6031_v51, %v5871_v9  ;;  %v1085_v9 = vadd.f32 %v6050_v13, %v5889_v59  ;;  %v1560_v13 = vstv %s6141_s29  ;;  %s6496_s29 = sld [smem:[#allocation8 + $0x38]] }
 0x324   : > { %v1925_v59 = vmul.f32 %v1924_v57, %v6114_v55 }
 0x325   : > { %v6108_v12 = vpop.permute.xlu1 %1136  ;;  %v6111_v46 = vpop.permute.xlu0 %1367 }
 0x327   : > { %1917 = vrot.lane.b32.xlu1 %v1912_v47, %s8336_s26  ;;  %1823 = vrot.lane.b32.xlu0 %v1819_v48, %s8326_s14  ;;  %v1940_v48 = vmul.f32 %v1938_v49, %v6072_v63 }
 0x329   : > { %v6121_v36 = vpop.permute.xlu1 %1150  ;;  %v6124_v60 = vpop.permute.xlu0 %1381 }
 0x32b   : > { %1931 = vrot.lane.b32.xlu1 %v1926_v7, %s8336_s26  ;;  %1887 = vrot.lane.b32.xlu0 %v1883_v10, %s8336_s26  ;;  %v1952_v7 = vstv %s6119_s16  ;;  %s6473_s16 = sld [smem:[#allocation8 + $0x57]] }
 0x32c   : > { %v1954_v20 = vmul.f32 %v1952_v7, %v6072_v63 }
 0x32d   : > { %v6132_v47 = vpop.permute.xlu1 %1164  ;;  %v6135_v38 = vpop.permute.xlu0 %1395 }
 0x32f   : > { %1945 = vrot.lane.b32.xlu1 %v1940_v48, %s8336_s26  ;;  %1901 = vrot.lane.b32.xlu0 %v1897_v56, %s8336_s26 }
 0x331   : > { %v1179_v10 = vpop.permute.xlu1 %1178  ;;  %v6153_v37 = vpop.permute.xlu0 %1409 }
 0x332   : > { %v1183_v48 = vadd.f32 %v1179_v10, %v1071_v50  ;;  %v1968_v50 = vmul.f32 %v8282_v24, %v6072_v63 }
 0x333   : > { %1959 = vrot.lane.b32.xlu1 %v1954_v20, %s8336_s26  ;;  %1915 = vrot.lane.b32.xlu0 %v1911_v61, %s8336_s26  ;;  %v1294_v20 = vmul.f32 %v6148_v16, %v1292_v53  ;;  %v1980_v61 = vstv %s6138_s30  ;;  %s6490_s30 = sld [smem:[#allocation8 + $0x7b]] }
 0x334   : > { %v1290_v51 = vadd.f32 %v1288_v14, %v1183_v48  ;;  %v1562_v14 = vmul.f32 %v1560_v13, %v5777_v58  ;;  %v8388_v48 = vstv %s5917_s9  ;;  %s6258_s9 = sld [smem:[#allocation8 + $0xc0]] }
 0x335   : > { %v1193_v56 = vpop.permute.xlu1 %1192  ;;  %v6172_v45 = vpop.permute.xlu0 %1423 }
 0x336   : > { %v1346_v41 = vadd.f32 %v5472_v6, %v1290_v51  ;;  %v1197_v10 = vadd.f32 %v1193_v56, %v1085_v9  ;;  %v1099_v6 = vadd.f32 %v6067_v39, %v5907_v2  ;;  %v1300_v9 = vmul.f32 %v6148_v16, %v8388_v48 }
 0x337   : > { %1973 = vrot.lane.b32.xlu1 %v1968_v50, %s8336_s26  ;;  %1929 = vrot.lane.b32.xlu0 %v1925_v59, %s8336_s26  ;;  %v1982_v56 = vmul.f32 %v1980_v61, %v6072_v63  ;;  %v1939_v39 = vmul.f32 %v1938_v49, %v6114_v55 }
 0x338   : > { %v1296_v53 = vadd.f32 %v1294_v20, %v1197_v10  ;;  %v1458_v57 = vadd.f32 %v5590_v33, %v1346_v41  ;;  %v1994_v33 = vstv %s6156_s8  ;;  %v1566_v41 = vstv %s6159_s4  ;;  %s6509_s8 = sld [smem:[#allocation8 + $0x9f]] }
 0x339   : > { %v1207_v51 = vpop.permute.xlu1 %1206  ;;  %v6194_v2 = vpop.permute.xlu0 %1437  ;;  %v1568_v49 = vmul.f32 %v1566_v41, %v5777_v58  ;;  %v1996_v48 = vmul.f32 %v1994_v33, %v6072_v63  ;;  %s6515_s4 = sld [smem:[#allocation8 + $0x5c]] }
 0x33a   : > { %v1360_v50 = vadd.f32 %v5496_v62, %v1296_v53  ;;  %v1211_v24 = vadd.f32 %v1207_v51, %v1099_v6  ;;  %v6199_v20 = vadd.f32 %v1562_v14, %v1458_v57  ;;  %v1113_v62 = vadd.f32 %v6084_v29, %v5929_v32 }
 0x33b   : > { %1987 = vrot.lane.b32.xlu1 %v1982_v56, %s8336_s26  ;;  %1943 = vrot.lane.b32.xlu0 %v1939_v39, %s8336_s26  ;;  %v1345_v6 = vadd.f32 %v6089_v40, %v5936_v23  ;;  %v8389_v53 = vstv %s5943_s0  ;;  %v2008_v40 = vstv %s6175_s11  ;;  %v1561_v56 = vmul.f32 %v1560_v13, %v5826_v22  ;;  %s6290_s0 = sld [smem:[#allocation8 + $0xc5]] }
 0x33c   : > { %v1302_v10 = vadd.f32 %v1300_v9, %v1211_v24  ;;  %v1472_v59 = vadd.f32 %v5604_v28, %v1360_v50  ;;  %v1306_v14 = vmul.f32 %v6148_v16, %v8389_v53  ;;  %v1953_v9 = vmul.f32 %v1952_v7, %v6114_v55  ;;  %s6530_s11 = sld [smem:[#allocation8 + $0xc3]] }
 0x33d   : > { %v1221_v57 = vpop.permute.xlu1 %1220  ;;  %v1452_v24 = vpop.permute.xlu0 %1451  ;;  %v1572_v51 = vstv %s6180_s19  ;;  %s6534_s19 = sld [smem:[#allocation8 + $0x80]] }
 0x33e   : > { %v1374_v32 = vadd.f32 %v5515_v44, %v1302_v10  ;;  %v1225_v29 = vadd.f32 %v1221_v57, %v1113_v62  ;;  %v6223_v28 = vadd.f32 %v1568_v49, %v1472_v59  ;;  %v1457_v23 = vadd.f32 %v1452_v24, %v1345_v6 }
 0x33f   : > { %2001 = vrot.lane.b32.xlu1 %v1996_v48, %s8326_s14  ;;  %v1127_v44 = vadd.f32 %v6097_v8, %v5955_v34  ;;  %1957 = vrot.lane.b32.xlu0 %v1953_v9, %s8336_s26  ;;  %v1574_v7 = vmul.f32 %v1572_v51, %v5777_v58  ;;  %v1359_v62 = vadd.f32 %v6100_v42, %v5960_v54  ;;  %v8390_v10 = vstv %s5967_s3  ;;  %s6319_s3 = sld [smem:[#allocation8 + $0xe9]] }
 0x340   : > { %v1308_v50 = vadd.f32 %v1306_v14, %v1225_v29  ;;  %v1486_v39 = vadd.f32 %v5618_v5, %v1374_v32  ;;  %v1312_v13 = vmul.f32 %v6148_v16, %v8390_v10  ;;  %v2010_v59 = vmul.f32 %v2008_v40, %v6072_v63 }
 0x341   : > { %v1235_v49 = vpop.permute.xlu1 %1234  ;;  %v6244_v34 = vadd.f32 %v1561_v56, %v1457_v23  ;;  %v1466_v53 = vpop.permute.xlu0 %1465  ;;  %v8391_v14 = vstv %s6130_s18  ;;  %v2022_v57 = vstv %s6197_s27  ;;  %v1578_v48 = vstv %s6204_s7  ;;  %s6479_s18 = sld [smem:[#allocation8 + $0x14]] }
 0x342   : > { %v1388_v8 = vadd.f32 %v5533_v30, %v1308_v50  ;;  %v1239_v6 = vadd.f32 %v1235_v49, %v1127_v44  ;;  %v1967_v5 = vmul.f32 %v8391_v14, %v6114_v55  ;;  %v6252_v54 = vadd.f32 %v1574_v7, %v1486_v39  ;;  %s6554_s27 = sld [smem:[#allocation8 + $0xe7]] }
 0x343   : > { %v1471_v42 = vadd.f32 %v1466_v53, %v1359_v62  ;;  %2015 = vrot.lane.b32.xlu1 %v2010_v59, %s8326_s14  ;;  %v1567_v32 = vmul.f32 %v1566_v41, %v5826_v22  ;;  %v1141_v30 = vadd.f32 %v6108_v12, %v5979_v17  ;;  %v1580_v24 = vmul.f32 %v1578_v48, %v5777_v58  ;;  %s6558_s7 = sld [smem:[#allocation8 + $0xa4]] }
 0x344   : > { %v1314_v29 = vadd.f32 %v1312_v13, %v1239_v6  ;;  %1971 = vrot.lane.b32.xlu0 %v1967_v5, %s8336_s26  ;;  %v1500_v9 = vadd.f32 %v5634_v21, %v1388_v8  ;;  %v1373_v23 = vadd.f32 %v6111_v46, %v5984_v11  ;;  %v8392_v56 = vstv %s5991_s15  ;;  %s6359_s15 = sld [smem:[#allocation8 + $0x13]] }
 0x345   : > { %v1318_v41 = vmul.f32 %v6148_v16, %v8392_v56  ;;  %v1249_v44 = vpop.permute.xlu1 %1248  ;;  %v2024_v50 = vmul.f32 %v2022_v57, %v6072_v63  ;;  %v6273_v17 = vadd.f32 %v1567_v32, %v1471_v42  ;;  %v1480_v39 = vpop.permute.xlu0 %1479  ;;  %v1981_v21 = vmul.f32 %v1980_v61, %v6114_v55 }
 0x346   : > { %v1402_v12 = vadd.f32 %v5546_v43, %v1314_v29  ;;  %v1253_v7 = vadd.f32 %v1249_v44, %v1141_v30  ;;  %v6279_v62 = vadd.f32 %v1580_v24, %v1500_v9  ;;  %v1485_v11 = vadd.f32 %v1480_v39, %v1373_v23 }
 0x347   : > { %2029 = vrot.lane.b32.xlu1 %v2024_v50, %s8326_s14  ;;  %v2036_v46 = vstv %s6221_s23  ;;  %v1584_v10 = vstv %s6229_s22  ;;  %v1573_v13 = vmul.f32 %v1572_v51, %v5826_v22  ;;  %v1155_v43 = vadd.f32 %v6121_v36, %v6003_v19  ;;  %s6576_s23 = sld [smem:[#allocation8 + $0x10b]] }
 0x348   : > { %v1320_v49 = vadd.f32 %v1318_v41, %v1253_v7  ;;  %1985 = vrot.lane.b32.xlu0 %v1981_v21, %s8336_s26  ;;  %v1586_v61 = vmul.f32 %v1584_v10, %v5777_v58  ;;  %v1514_v59 = vadd.f32 %v5651_v52, %v1402_v12  ;;  %v1387_v51 = vadd.f32 %v6124_v60, %v6008_v4  ;;  %s6582_s22 = sld [smem:[#allocation8 + $0xc8]] }
 0x349   : > { %v8393_v8 = vstv %s6017_s12  ;;  %v1263_v53 = vpop.permute.xlu1 %1262  ;;  %v2038_v19 = vmul.f32 %v2036_v46, %v6072_v63  ;;  %v6302_v36 = vadd.f32 %v1573_v13, %v1485_v11  ;;  %v1494_v42 = vpop.permute.xlu0 %1493  ;;  %v1995_v52 = vmul.f32 %v1994_v33, %v6114_v55  ;;  %s6401_s12 = sld [smem:[#allocation8 + $0x5b]] }
 0x34a   : > { %v1324_v6 = vmul.f32 %v6148_v16, %v8393_v8  ;;  %v1416_v14 = vadd.f32 %v5557_v25, %v1320_v49  ;;  %v1267_v5 = vadd.f32 %v1263_v53, %v1155_v43  ;;  %v6308_v32 = vadd.f32 %v1586_v61, %v1514_v59 }
 0x34b   : > { %v1499_v4 = vadd.f32 %v1494_v42, %v1387_v51  ;;  %2043 = vrot.lane.b32.xlu1 %v2038_v19, %s8326_s14  ;;  %v2050_v60 = vstv %s6250_s21  ;;  %v1590_v30 = vstv %s6258_s9  ;;  %v1579_v29 = vmul.f32 %v1578_v48, %v5826_v22  ;;  %s6602_s21 = sld [smem:[#allocation8 + $0xec]] }
 0x34c   : > { %v1169_v25 = vadd.f32 %v6132_v47, %v6027_v27  ;;  %v1326_v24 = vadd.f32 %v1324_v6, %v1267_v5  ;;  %1999 = vrot.lane.b32.xlu0 %v1995_v52, %s8326_s14  ;;  %v1592_v33 = vmul.f32 %v1590_v30, %v5777_v58  ;;  %v1528_v9 = vadd.f32 %v5670_v15, %v1416_v14  ;;  %v8395_v52 = vld [vmem:[#allocation49_spill] sm:$0xff]  ;;  %s6624_s9 = sld [smem:[#allocation8 + $0x110]] }
 0x34d   : > { %v1401_v23 = vadd.f32 %v6135_v38, %v6034_v35  ;;  %v8394_v48 = vstv %s6038_s5  ;;  %v1277_v41 = vpop.permute.xlu1 %1276  ;;  %v2052_v27 = vmul.f32 %v2050_v60, %v6072_v63  ;;  %v6331_v47 = vadd.f32 %v1579_v29, %v1499_v4  ;;  %v1508_v12 = vpop.permute.xlu0 %1507  ;;  %s6426_s5 = sld [smem:[#allocation8 + $0xa3]] }
 0x34e   : > { %v1330_v56 = vmul.f32 %v6148_v16, %v8394_v48  ;;  %v1430_v44 = vadd.f32 %v5566_v0, %v1326_v24  ;;  %v1281_v50 = vadd.f32 %v1277_v41, %v1169_v25  ;;  %v2009_v15 = vmul.f32 %v2008_v40, %v6114_v55  ;;  %v6395_v25 = vld [vmem:[#allocation2 + $0x38] sm:$0xff] }
 0x34f   : > { %v6337_v7 = vadd.f32 %v1592_v33, %v1528_v9  ;;  %v1513_v35 = vadd.f32 %v1508_v12, %v1401_v23  ;;  %2057 = vrot.lane.b32.xlu1 %v2052_v27, %s8326_s14  ;;  %v1596_v16 = vstv %s6285_s1  ;;  %v1585_v38 = vmul.f32 %v1584_v10, %v5826_v22  ;;  %s6646_s1 = sld [smem:[#allocation8 + $0x16]] }
 0x350   : > { %v1332_v39 = vadd.f32 %v1330_v56, %v1281_v50  ;;  %2013 = vrot.lane.b32.xlu0 %v2009_v15, %s8326_s14  ;;  %v2064_v21 = vstv %s6290_s0  ;;  %v1598_v0 = vmul.f32 %v1596_v16, %v5777_v58  ;;  %v1542_v40 = vadd.f32 %v5690_v26, %v1430_v44  ;;  %s6660_s0 = sld [smem:[#allocation8 + $0x3a]] }
 0x351   : > { %v1415_v11 = vadd.f32 %v6153_v37, %v6053_v3  ;;  %v6350_v13 = vpop.permute.xlu1 %1615  ;;  %v2066_v43 = vmul.f32 %v2064_v21, %v6072_v63  ;;  %v6353_v10 = vadd.f32 %v1585_v38, %v1513_v35  ;;  %v1522_v61 = vpop.permute.xlu0 %1521  ;;  %v2023_v59 = vmul.f32 %v2022_v57, %v6114_v55 }
 0x352   : > { %v1444_v49 = vadd.f32 %v5578_v1, %v1332_v39  ;;  %v6361_v51 = vadd.f32 %v1598_v0, %v1542_v40  ;;  %v1602_v37 = vstv %s6314_s2  ;;  %v1591_v3 = vmul.f32 %v1590_v30, %v5826_v22  ;;  %v6439_v40 = vld [vmem:[#allocation2 + $0x30] sm:$0xff]  ;;  %s6676_s2 = sld [smem:[#allocation8 + $0x5e]] }
 0x353   : > { %v1527_v26 = vadd.f32 %v1522_v61, %v1415_v11  ;;  %2071 = vrot.lane.b32.xlu1 %v2066_v43, %s8326_s14  ;;  %v2078_v8 = vstv %s6319_s3  ;;  %v1604_v1 = vmul.f32 %v1602_v37, %v5777_v58  ;;  %v1429_v57 = vadd.f32 %v6172_v45, %v6070_v18  ;;  %s6689_s3 = sld [smem:[#allocation8 + $0x82]] }
 0x354   : > { %2027 = vrot.lane.b32.xlu0 %v2023_v59, %s8326_s14  ;;  %v1556_v6 = vadd.f32 %v5710_v31, %v1444_v49  ;;  %v2080_v19 = vmul.f32 %v2078_v8, %v6072_v63  ;;  %v2037_v42 = vmul.f32 %v2036_v46, %v6114_v55  ;;  %v1597_v18 = vmul.f32 %v1596_v16, %v5826_v22 }
 0x355   : > { %v6372_v53 = vpop.permute.xlu1 %1629  ;;  %v6375_v14 = vadd.f32 %v1591_v3, %v1527_v26  ;;  %v1536_v5 = vpop.permute.xlu0 %1535  ;;  %v2092_v45 = vstv %s6344_s13  ;;  %v1443_v4 = vadd.f32 %v6194_v2, %v8395_v52  ;;  %v2051_v33 = vmul.f32 %v2050_v60, %v6114_v55  ;;  %s6700_s13 = sld [smem:[#allocation8 + $0xa6]] }
 0x356   : > { %v6382_v58 = vadd.f32 %v1604_v1, %v1556_v6  ;;  %v1541_v31 = vadd.f32 %v1536_v5, %v1429_v57  ;;  %v2094_v29 = vmul.f32 %v2092_v45, %v6072_v63  ;;  %v2157_v9 = vstv %s6359_s15  ;;  %s6711_s15 = sld [smem:[#allocation8 + $0x12]] }
 0x357   : > { %2085 = vrot.lane.b32.xlu1 %v2080_v19, %s8326_s14  ;;  %v1603_v2 = vmul.f32 %v1602_v37, %v5826_v22  ;;  %v2159_v56 = vmul.f32 %v2157_v9, %v6395_v25  ;;  %v2065_v60 = vmul.f32 %v2064_v21, %v6114_v55  ;;  %v2171_v44 = vstv %s6380_s10  ;;  %s6715_s10 = sld [smem:[#allocation8 + $0xca]] }
 0x358   : > { %2041 = vrot.lane.b32.xlu0 %v2037_v42, %s8326_s14  ;;  %v6393_v46 = vadd.f32 %v1597_v18, %v1541_v31  ;;  %v2173_v50 = vmul.f32 %v2171_v44, %v6395_v25  ;;  %v2079_v15 = vmul.f32 %v2078_v8, %v6114_v55  ;;  %v2185_v35 = vstv %s6401_s12  ;;  %s6724_s12 = sld [smem:[#allocation8 + $0x36]] }
 0x359   : > { %v6390_v30 = vpop.permute.xlu1 %1643  ;;  %v1550_v24 = vpop.permute.xlu0 %1549  ;;  %v2187_v38 = vmul.f32 %v2185_v35, %v6395_v25  ;;  %v2093_v21 = vmul.f32 %v2092_v45, %v6114_v55  ;;  %v2199_v0 = vstv %s6415_s6  ;;  %v2158_v61 = vmul.f32 %v2157_v9, %v6439_v40  ;;  %s6728_s6 = sld [smem:[#allocation8 + $0xee]] }
 0x35a   : > { %v1555_v23 = vadd.f32 %v1550_v24, %v1443_v4  ;;  %v2201_v43 = vmul.f32 %v2199_v0, %v6395_v25  ;;  %v2213_v59 = vstv %s6426_s5  ;;  %v2172_v8 = vmul.f32 %v2171_v44, %v6439_v40  ;;  %s6738_s5 = sld [smem:[#allocation8 + $0x5a]] }
 0x35b   : > { %2099 = vrot.lane.b32.xlu1 %v2094_v29, %s8326_s14  ;;  %v2215_v37 = vmul.f32 %v2213_v59, %v6395_v25  ;;  %v2227_v1 = vstv %s6437_s28  ;;  %v1620_v6 = vadd.f32 %v6350_v13, %v6199_v20  ;;  %v1834_v5 = vstv %s6446_s24  ;;  %s6744_s28 = sld [smem:[#allocation8 + $0x112]] }
 0x35c   : > { %2055 = vrot.lane.b32.xlu0 %v2051_v33, %s8326_s14  ;;  %v6409_v41 = vadd.f32 %v1603_v2, %v1555_v23  ;;  %v2229_v19 = vmul.f32 %v2227_v1, %v6395_v25  ;;  %v2186_v18 = vmul.f32 %v2185_v35, %v6439_v40  ;;  %v2241_v45 = vstv %s6452_s17  ;;  %s6753_s24 = sld [smem:[#allocation8 + $0x7e]] }
 0x35d   : > { %v6406_v48 = vpop.permute.xlu1 %1657  ;;  %v6411_v27 = vpop.permute.xlu0 %1613  ;;  %v1836_v20 = vmul.f32 %v1834_v5, %v6072_v63  ;;  %v1634_v13 = vadd.f32 %v6372_v53, %v6223_v28  ;;  %v2243_v29 = vmul.f32 %v2241_v45, %v6395_v25  ;;  %v1840_v24 = vstv %s6459_s25  ;;  %s6759_s17 = sld [smem:[#allocation8 + $0x17]] }
 0x35e   : > { %v2200_v23 = vmul.f32 %v2199_v0, %v6439_v40  ;;  %v2255_v2 = vstv %s6465_s20  ;;  %v1842_v28 = vmul.f32 %v1840_v24, %v6072_v63  ;;  %v1648_v53 = vadd.f32 %v6390_v30, %v6252_v54  ;;  %s6770_s25 = sld [smem:[#allocation8 + $0xa2]] }
 0x35f   : > { %2164 = vrot.lane.b32.xlu1 %v2159_v56, %s8336_s26  ;;  %v2257_v44 = vmul.f32 %v2255_v2, %v6395_v25  ;;  %v2269_v54 = vstv %s6479_s18  ;;  %s6776_s20 = sld [smem:[#allocation8 + $0x3b]] }
 0x360   : > { %2069 = vrot.lane.b32.xlu0 %v2065_v60, %s8326_s14  ;;  %s6795_s18 = sld [smem:[#allocation8 + $0x5f]] }
 0x361   : > { %v6419_v22 = vpop.permute.xlu1 %1671  ;;  %v6422_v12 = vpop.permute.xlu0 %1627 }
 0x363   : > { %2178 = vrot.lane.b32.xlu1 %v2173_v50, %s8336_s26  ;;  %v1846_v50 = vstv %s6473_s16  ;;  %s6789_s16 = sld [smem:[#allocation8 + $0xc6]] }
 0x364   : > { %2083 = vrot.lane.b32.xlu0 %v2079_v15, %s8326_s14  ;;  %v1848_v30 = vmul.f32 %v1846_v50, %v6072_v63 }
 0x365   : > { %v6430_v16 = vpop.permute.xlu1 %1685  ;;  %v6433_v39 = vpop.permute.xlu0 %1641 }
 0x367   : > { %2192 = vrot.lane.b32.xlu1 %v2187_v38, %s8336_s26  ;;  %v2214_v38 = vmul.f32 %v2213_v59, %v6439_v40  ;;  %v2271_v59 = vmul.f32 %v2269_v54, %v6395_v25 }
 0x368   : > { %2097 = vrot.lane.b32.xlu0 %v2093_v21, %s8326_s14  ;;  %v1662_v21 = vadd.f32 %v6406_v48, %v6279_v62  ;;  %v2228_v62 = vmul.f32 %v2227_v1, %v6439_v40  ;;  %v2283_v48 = vstv %s6496_s29  ;;  %v1633_v1 = vadd.f32 %v6422_v12, %v6273_v17  ;;  %s6815_s29 = sld [smem:[#allocation8 + $0x83]] }
 0x369   : > { %v6443_v11 = vpop.permute.xlu1 %1699  ;;  %v6448_v49 = vpop.permute.xlu0 %1655 }
 0x36b   : > { %2206 = vrot.lane.b32.xlu1 %v2201_v43, %s8336_s26  ;;  %v1619_v43 = vadd.f32 %v6411_v27, %v6244_v34  ;;  %v1835_v27 = vmul.f32 %v1834_v5, %v6114_v55 }
 0x36c   : > { %2162 = vrot.lane.b32.xlu0 %v2158_v61, %s8336_s26 }
 0x36d   : > { %v6456_v26 = vpop.permute.xlu1 %1713  ;;  %v6461_v3 = vpop.permute.xlu0 %1669 }
 0x36f   : > { %2220 = vrot.lane.b32.xlu1 %v2215_v37, %s8336_s26  ;;  %v1852_v37 = vstv %s6490_s30  ;;  %s6809_s30 = sld [smem:[#allocation8 + $0xea]] }
 0x370   : > { %2176 = vrot.lane.b32.xlu0 %v2172_v8, %s8336_s26 }
 0x371   : > { %v1728_v57 = vpop.permute.xlu1 %1727  ;;  %v6475_v31 = vpop.permute.xlu0 %1683 }
 0x372   : > { %v1732_v42 = vadd.f32 %v1728_v57, %v1620_v6  ;;  %v1854_v57 = vmul.f32 %v1852_v37, %v6072_v63 }
 0x373   : > { %2234 = vrot.lane.b32.xlu1 %v2229_v19, %s8336_s26  ;;  %v1676_v19 = vadd.f32 %v6419_v22, %v6308_v32  ;;  %v2242_v22 = vmul.f32 %v2241_v45, %v6439_v40  ;;  %v1647_v45 = vadd.f32 %v6433_v39, %v6302_v36 }
 0x374   : > { %2190 = vrot.lane.b32.xlu0 %v2186_v18, %s8336_s26  ;;  %v6486_v52 = vadd.f32 %v1836_v20, %v1732_v42  ;;  %v2285_v20 = vmul.f32 %v2283_v48, %v6395_v25 }
 0x375   : > { %v1742_v4 = vpop.permute.xlu1 %1741  ;;  %v6492_v9 = vpop.permute.xlu0 %1697 }
 0x376   : > { %v1746_v33 = vadd.f32 %v1742_v4, %v1634_v13  ;;  %v1858_v4 = vstv %s6509_s8  ;;  %s6831_s8 = sld [smem:[#allocation8 + $0x10e]] }
 0x377   : > { %2248 = vrot.lane.b32.xlu1 %v2243_v29, %s8336_s26  ;;  %v2297_v29 = vstv %s6515_s4  ;;  %v1860_v17 = vmul.f32 %v1858_v4, %v6072_v63  ;;  %s6837_s4 = sld [smem:[#allocation8 + $0xa7]] }
 0x378   : > { %2204 = vrot.lane.b32.xlu0 %v2200_v23, %s8336_s26  ;;  %v6503_v56 = vadd.f32 %v1842_v28, %v1746_v33  ;;  %v1841_v33 = vmul.f32 %v1840_v24, %v6114_v55  ;;  %v1690_v23 = vadd.f32 %v6430_v16, %v6337_v7  ;;  %v2256_v7 = vmul.f32 %v2255_v2, %v6439_v40 }
 0x379   : > { %v1756_v60 = vpop.permute.xlu1 %1755  ;;  %v6511_v35 = vpop.permute.xlu0 %1711  ;;  %v2311_v16 = vstv %s6534_s19  ;;  %v1661_v2 = vadd.f32 %v6448_v49, %v6331_v47  ;;  %v1853_v49 = vmul.f32 %v1852_v37, %v6114_v55  ;;  %s6879_s19 = sld [smem:[#allocation8 + $0xef]] }
 0x37a   : > { %v1760_v15 = vadd.f32 %v1756_v60, %v1648_v53  ;;  %v2299_v60 = vmul.f32 %v2297_v29, %v6395_v25 }
 0x37b   : > { %2262 = vrot.lane.b32.xlu1 %v2257_v44, %s8336_s26 }
 0x37c   : > { %2218 = vrot.lane.b32.xlu0 %v2214_v38, %s8336_s26  ;;  %v6522_v0 = vadd.f32 %v1848_v30, %v1760_v15  ;;  %v1864_v15 = vstv %s6530_s11  ;;  %v1847_v30 = vmul.f32 %v1846_v50, %v6114_v55  ;;  %s6859_s11 = sld [smem:[#allocation8 + $0xcb]] }
 0x37d   : > { %v1770_v61 = vpop.permute.xlu1 %1769  ;;  %v1726_v6 = vpop.permute.xlu0 %1725  ;;  %v1866_v36 = vmul.f32 %v1864_v15, %v6072_v63 }
 0x37e   : > { %v1774_v8 = vadd.f32 %v1770_v61, %v1662_v21  ;;  %v1731_v34 = vadd.f32 %v1726_v6, %v1619_v43  ;;  %v1704_v21 = vadd.f32 %v6443_v11, %v6361_v51  ;;  %v1870_v6 = vstv %s6554_s27  ;;  %s6896_s27 = sld [smem:[#allocation8 + $0x113]] }
 0x37f   : > { %2276 = vrot.lane.b32.xlu1 %v2271_v59, %s8326_s14  ;;  %v2313_v59 = vmul.f32 %v2311_v16, %v6395_v25  ;;  %v2270_v51 = vmul.f32 %v2269_v54, %v6439_v40  ;;  %v2325_v11 = vstv %s6558_s7  ;;  %v1675_v54 = vadd.f32 %v6461_v3, %v6353_v10  ;;  %s6914_s7 = sld [smem:[#allocation8 + $0x19]] }
 0x380   : > { %2232 = vrot.lane.b32.xlu0 %v2228_v62, %s8336_s26  ;;  %v6544_v42 = vadd.f32 %v1854_v57, %v1774_v8  ;;  %v6551_v13 = vadd.f32 %v1835_v27, %v1731_v34  ;;  %v1872_v57 = vmul.f32 %v1870_v6, %v6072_v63  ;;  %v1718_v34 = vadd.f32 %v6456_v26, %v6382_v58 }
 0x381   : > { %v1784_v18 = vpop.permute.xlu1 %1783  ;;  %v1740_v32 = vpop.permute.xlu0 %1739  ;;  %v2284_v58 = vmul.f32 %v2283_v48, %v6439_v40  ;;  %v2339_v26 = vstv %s6582_s22  ;;  %v1859_v10 = vmul.f32 %v1858_v4, %v6114_v55  ;;  %s6944_s22 = sld [smem:[#allocation8 + $0x61]] }
 0x382   : > { %v1788_v5 = vadd.f32 %v1784_v18, %v1676_v19  ;;  %v1745_v12 = vadd.f32 %v1740_v32, %v1633_v1  ;;  %v2327_v1 = vmul.f32 %v2325_v11, %v6395_v25  ;;  %v2341_v48 = vmul.f32 %v2339_v26, %v6395_v25 }
 0x383   : > { %2290 = vrot.lane.b32.xlu1 %v2285_v20, %s8326_s14  ;;  %v1876_v20 = vstv %s6576_s23  ;;  %s6928_s23 = sld [smem:[#allocation8 + $0x3d]] }
 0x384   : > { %2246 = vrot.lane.b32.xlu0 %v2242_v22, %s8336_s26  ;;  %v6566_v28 = vadd.f32 %v1860_v17, %v1788_v5  ;;  %v6573_v44 = vadd.f32 %v1841_v33, %v1745_v12  ;;  %v1878_v37 = vmul.f32 %v1876_v20, %v6072_v63  ;;  %v1689_v17 = vadd.f32 %v6475_v31, %v6375_v14 }
 0x385   : > { %v1798_v53 = vpop.permute.xlu1 %1797  ;;  %v1754_v38 = vpop.permute.xlu0 %1753  ;;  %v1703_v14 = vadd.f32 %v6492_v9, %v6393_v46  ;;  %v1717_v46 = vadd.f32 %v6511_v35, %v6409_v41  ;;  %v2431_v41 = vstv %s6646_s1  ;;  %s6981_s1 = sld [smem:[#allocation8 + $0xcd]] }
 0x386   : > { %v1802_v24 = vadd.f32 %v1798_v53, %v1690_v23  ;;  %v1759_v39 = vadd.f32 %v1754_v38, %v1647_v45  ;;  %v2298_v23 = vmul.f32 %v2297_v29, %v6439_v40  ;;  %v2353_v45 = vstv %s6602_s21  ;;  %s6957_s21 = sld [smem:[#allocation8 + $0x85]] }
 0x387   : > { %2304 = vrot.lane.b32.xlu1 %v2299_v60, %s8326_s14  ;;  %v1865_v53 = vmul.f32 %v1864_v15, %v6114_v55  ;;  %v2355_v60 = vmul.f32 %v2353_v45, %v6395_v25  ;;  %v2312_v38 = vmul.f32 %v2311_v16, %v6439_v40  ;;  %v1871_v15 = vmul.f32 %v1870_v6, %v6114_v55  ;;  %v6669_v16 = vld [vmem:[#allocation2 + $0x39] sm:$0xff] }
 0x388   : > { %2260 = vrot.lane.b32.xlu0 %v2256_v7, %s8336_s26  ;;  %v6590_v43 = vadd.f32 %v1866_v36, %v1802_v24  ;;  %v6595_v8 = vadd.f32 %v1847_v30, %v1759_v39  ;;  %v2367_v7 = vstv %s6624_s9  ;;  %v2433_v6 = vmul.f32 %v2431_v41, %v6669_v16  ;;  %s6968_s9 = sld [smem:[#allocation8 + $0xa9]] }
 0x389   : > { %v1812_v61 = vpop.permute.xlu1 %1811  ;;  %v1768_v50 = vpop.permute.xlu0 %1767  ;;  %v2369_v39 = vmul.f32 %v2367_v7, %v6395_v25 }
 0x38a   : > { %v1816_v62 = vadd.f32 %v1812_v61, %v1704_v21  ;;  %v1773_v47 = vadd.f32 %v1768_v50, %v1661_v2  ;;  %v2326_v2 = vmul.f32 %v2325_v11, %v6439_v40 }
 0x38b   : > { %2318 = vrot.lane.b32.xlu1 %v2313_v59, %s8326_s14  ;;  %v1877_v59 = vmul.f32 %v1876_v20, %v6114_v55  ;;  %v2445_v55 = vstv %s6660_s0  ;;  %v2368_v20 = vmul.f32 %v2367_v7, %v6439_v40  ;;  %s6986_s0 = sld [smem:[#allocation8 + $0x15]] }
 0x38c   : > { %2274 = vrot.lane.b32.xlu0 %v2270_v51, %s8326_s14  ;;  %v6612_v27 = vadd.f32 %v1872_v57, %v1816_v62  ;;  %v6617_v18 = vadd.f32 %v1853_v49, %v1773_v47  ;;  %v2340_v51 = vmul.f32 %v2339_v26, %v6439_v40  ;;  %v2447_v57 = vmul.f32 %v2445_v55, %v6669_v16 }
 0x38d   : > { %v1826_v19 = vpop.permute.xlu1 %1825  ;;  %v1782_v32 = vpop.permute.xlu0 %1781  ;;  %v2354_v49 = vmul.f32 %v2353_v45, %v6439_v40  ;;  %v2109_v45 = vstv %s6711_s15  ;;  %s7013_s15 = sld [smem:[#allocation8 + $0x5d]] }
 0x38e   : > { %v1830_v5 = vadd.f32 %v1826_v19, %v1718_v34  ;;  %v1787_v22 = vadd.f32 %v1782_v32, %v1675_v54  ;;  %v2459_v34 = vstv %s6676_s2  ;;  %v2473_v32 = vstv %s6689_s3  ;;  %s6994_s2 = sld [smem:[#allocation8 + $0xf1]] }
 0x38f   : > { %2332 = vrot.lane.b32.xlu1 %v2327_v1, %s8326_s14  ;;  %v2461_v19 = vmul.f32 %v2459_v34, %v6669_v16  ;;  %v2475_v26 = vmul.f32 %v2473_v32, %v6669_v16  ;;  %s6999_s3 = sld [smem:[#allocation8 + $0x39]] }
 0x390   : > { %2288 = vrot.lane.b32.xlu0 %v2284_v58, %s8326_s14  ;;  %v6630_v3 = vadd.f32 %v1878_v37, %v1830_v5  ;;  %v6637_v33 = vadd.f32 %v1859_v10, %v1787_v22  ;;  %v6708_v5 = vld [vmem:[#allocation2 + $0x31] sm:$0xff]  ;;  %v2487_v10 = vstv %s6700_s13  ;;  %s7009_s13 = sld [smem:[#allocation8 + $0x115]] }
 0x391   : > { %v6634_v12 = vpop.permute.xlu1 %1889  ;;  %v1796_v63 = vpop.permute.xlu0 %1795  ;;  %v2432_v22 = vmul.f32 %v2431_v41, %v6708_v5  ;;  %v2460_v7 = vmul.f32 %v2459_v34, %v6708_v5 }
 0x392   : > { %v1801_v4 = vadd.f32 %v1796_v63, %v1689_v17 }
 0x393   : > { %2346 = vrot.lane.b32.xlu1 %v2341_v48, %s8326_s14  ;;  %v2489_v48 = vmul.f32 %v2487_v10, %v6669_v16 }
 0x394   : > { %2302 = vrot.lane.b32.xlu0 %v2298_v23, %s8326_s14  ;;  %v6653_v24 = vadd.f32 %v1865_v53, %v1801_v4  ;;  %v2446_v23 = vmul.f32 %v2445_v55, %v6708_v5  ;;  %v1894_v4 = vadd.f32 %v6634_v12, %v6486_v52  ;;  %v2501_v53 = vstv %s6715_s10  ;;  %s7024_s10 = sld [smem:[#allocation8 + $0x1a]] }
 0x395   : > { %v6650_v31 = vpop.permute.xlu1 %1903  ;;  %v1810_v29 = vpop.permute.xlu0 %1809  ;;  %v2515_v12 = vstv %s6728_s6  ;;  %s7041_s6 = sld [smem:[#allocation8 + $0x3e]] }
 0x396   : > { %v1815_v36 = vadd.f32 %v1810_v29, %v1703_v14  ;;  %v1908_v52 = vadd.f32 %v6650_v31, %v6503_v56  ;;  %v2121_v56 = vstv %s6738_s5  ;;  %s7047_s5 = sld [smem:[#allocation8 + $0xa5]] }
 0x397   : > { %2360 = vrot.lane.b32.xlu1 %v2355_v60, %s8326_s14  ;;  %v2503_v60 = vmul.f32 %v2501_v53, %v6669_v16 }
 0x398   : > { %2316 = vrot.lane.b32.xlu0 %v2312_v38, %s8326_s14  ;;  %v6667_v30 = vadd.f32 %v1871_v15, %v1815_v36  ;;  %v2111_v36 = vmul.f32 %v2109_v45, %v6395_v25  ;;  %v2115_v15 = vstv %s6724_s12  ;;  %s7030_s12 = sld [smem:[#allocation8 + $0x81]] }
 0x399   : > { %v6664_v9 = vpop.permute.xlu1 %1917  ;;  %v1824_v21 = vpop.permute.xlu0 %1823  ;;  %v2117_v41 = vmul.f32 %v2115_v15, %v6395_v25 }
 0x39a   : > { %v1829_v61 = vadd.f32 %v1824_v21, %v1717_v46  ;;  %v2517_v21 = vmul.f32 %v2515_v12, %v6669_v16  ;;  %v1922_v31 = vadd.f32 %v6664_v9, %v6522_v0  ;;  %v2123_v0 = vmul.f32 %v2121_v56, %v6395_v25 }
 0x39b   : > { %2374 = vrot.lane.b32.xlu1 %v2369_v39, %s8326_s14  ;;  %v2127_v9 = vstv %s6753_s24  ;;  %s7068_s24 = sld [smem:[#allocation8 + $0xc9]] }
 0x39c   : > { %2330 = vrot.lane.b32.xlu0 %v2326_v2, %s8326_s14  ;;  %v6681_v62 = vadd.f32 %v1877_v59, %v1829_v61  ;;  %v2474_v59 = vmul.f32 %v2473_v32, %v6708_v5  ;;  %v2543_v32 = vstv %s6759_s17  ;;  %s7078_s17 = sld [smem:[#allocation8 + $0x86]] }
 0x39d   : > { %v6678_v35 = vpop.permute.xlu1 %1931  ;;  %v6683_v50 = vpop.permute.xlu0 %1887 }
 0x39f   : > { %2438 = vrot.lane.b32.xlu1 %v2433_v6, %s8336_s26  ;;  %v2529_v6 = vstv %s6744_s28  ;;  %s7058_s28 = sld [smem:[#allocation8 + $0x62]] }
 0x3a0   : > { %2344 = vrot.lane.b32.xlu0 %v2340_v51, %s8326_s14 }
 0x3a1   : > { %v6691_v11 = vpop.permute.xlu1 %1945  ;;  %v6694_v47 = vpop.permute.xlu0 %1901 }
 0x3a3   : > { %2452 = vrot.lane.b32.xlu1 %v2447_v57, %s8336_s26  ;;  %v2531_v57 = vmul.f32 %v2529_v6, %v6669_v16 }
 0x3a4   : > { %2358 = vrot.lane.b32.xlu0 %v2354_v49, %s8326_s14 }
 0x3a5   : > { %v6702_v54 = vpop.permute.xlu1 %1959  ;;  %v6705_v1 = vpop.permute.xlu0 %1915 }
 0x3a7   : > { %2466 = vrot.lane.b32.xlu1 %v2461_v19, %s8336_s26  ;;  %v2488_v19 = vmul.f32 %v2487_v10, %v6708_v5 }
 0x3a8   : > { %2372 = vrot.lane.b32.xlu0 %v2368_v20, %s8326_s14  ;;  %v1936_v20 = vadd.f32 %v6678_v35, %v6544_v42  ;;  %v2129_v42 = vmul.f32 %v2127_v9, %v6395_v25 }
 0x3a9   : > { %v6717_v58 = vpop.permute.xlu1 %1973  ;;  %v6720_v37 = vpop.permute.xlu0 %1929 }
 0x3ab   : > { %2480 = vrot.lane.b32.xlu1 %v2475_v26, %s8336_s26 }
 0x3ac   : > { %2436 = vrot.lane.b32.xlu0 %v2432_v22, %s8336_s26  ;;  %v1893_v22 = vadd.f32 %v6683_v50, %v6551_v13  ;;  %v1950_v13 = vadd.f32 %v6691_v11, %v6566_v28  ;;  %v2557_v50 = vstv %s6776_s20  ;;  %v2516_v28 = vmul.f32 %v2515_v12, %v6708_v5  ;;  %s7100_s20 = sld [smem:[#allocation8 + $0xaa]] }
 0x3ad   : > { %v6730_v17 = vpop.permute.xlu1 %1987  ;;  %v6733_v63 = vpop.permute.xlu0 %1943 }
 0x3af   : > { %2494 = vrot.lane.b32.xlu1 %v2489_v48, %s8336_s26  ;;  %v2545_v48 = vmul.f32 %v2543_v32, %v6669_v16 }
 0x3b0   : > { %2450 = vrot.lane.b32.xlu0 %v2446_v23, %s8336_s26 }
 0x3b1   : > { %v2002_v14 = vpop.permute.xlu1 %2001  ;;  %v6747_v38 = vpop.permute.xlu0 %1957 }
 0x3b2   : > { %v2006_v29 = vadd.f32 %v2002_v14, %v1894_v4  ;;  %v2502_v14 = vmul.f32 %v2501_v53, %v6708_v5 }
 0x3b3   : > { %2508 = vrot.lane.b32.xlu1 %v2503_v60, %s8336_s26  ;;  %v2110_v60 = vmul.f32 %v2109_v45, %v6439_v40  ;;  %v2559_v45 = vmul.f32 %v2557_v50, %v6669_v16 }
 0x3b4   : > { %2464 = vrot.lane.b32.xlu0 %v2460_v7, %s8336_s26  ;;  %v6761_v46 = vadd.f32 %v2111_v36, %v2006_v29  ;;  %v2133_v29 = vstv %s6770_s25  ;;  %v1907_v7 = vadd.f32 %v6694_v47, %v6573_v44  ;;  %v1964_v44 = vadd.f32 %v6702_v54, %v6590_v43  ;;  %s7090_s25 = sld [smem:[#allocation8 + $0xed]] }
 0x3b5   : > { %v2016_v39 = vpop.permute.xlu1 %2015  ;;  %v2135_v11 = vmul.f32 %v2133_v29, %v6395_v25  ;;  %v2571_v47 = vstv %s6795_s18  ;;  %v2530_v43 = vmul.f32 %v2529_v6, %v6708_v5  ;;  %s7120_s18 = sld [smem:[#allocation8 + $0xce]] }
 0x3b6   : > { %v2020_v2 = vadd.f32 %v2016_v39, %v1908_v52  ;;  %v6764_v61 = vpop.permute.xlu0 %1971 }
 0x3b7   : > { %2522 = vrot.lane.b32.xlu1 %v2517_v21, %s8336_s26 }
 0x3b8   : > { %2478 = vrot.lane.b32.xlu0 %v2474_v59, %s8336_s26  ;;  %v6778_v51 = vadd.f32 %v2117_v41, %v2020_v2  ;;  %v2116_v59 = vmul.f32 %v2115_v15, %v6439_v40  ;;  %v2139_v41 = vstv %s6789_s16  ;;  %s7110_s16 = sld [smem:[#allocation8 + $0x111]] }
 0x3b9   : > { %v2030_v55 = vpop.permute.xlu1 %2029  ;;  %v2141_v54 = vmul.f32 %v2139_v41, %v6395_v25 }
 0x3ba   : > { %v2034_v49 = vadd.f32 %v2030_v55, %v1922_v31  ;;  %v6781_v34 = vpop.permute.xlu0 %1985  ;;  %v1921_v31 = vadd.f32 %v6705_v1, %v6595_v8  ;;  %v2573_v55 = vmul.f32 %v2571_v47, %v6669_v16  ;;  %v1978_v8 = vadd.f32 %v6717_v58, %v6612_v27 }
 0x3bb   : > { %2536 = vrot.lane.b32.xlu1 %v2531_v57, %s8336_s26  ;;  %v2585_v1 = vstv %s6815_s29  ;;  %v2544_v27 = vmul.f32 %v2543_v32, %v6708_v5  ;;  %s7158_s29 = sld [smem:[#allocation8 + $0x116]] }
 0x3bc   : > { %2492 = vrot.lane.b32.xlu0 %v2488_v19, %s8336_s26  ;;  %v6797_v26 = vadd.f32 %v2123_v0, %v2034_v49 }
 0x3bd   : > { %v2044_v10 = vpop.permute.xlu1 %2043 }
 0x3be   : > { %v2048_v23 = vadd.f32 %v2044_v10, %v1936_v20  ;;  %v2000_v4 = vpop.permute.xlu0 %1999  ;;  %v2122_v20 = vmul.f32 %v2121_v56, %v6439_v40  ;;  %v1935_v10 = vadd.f32 %v6720_v37, %v6617_v18  ;;  %v2587_v56 = vmul.f32 %v2585_v1, %v6669_v16 }
 0x3bf   : > { %v2005_v35 = vadd.f32 %v2000_v4, %v1893_v22  ;;  %2550 = vrot.lane.b32.xlu1 %v2545_v48, %s8326_s14  ;;  %v2145_v22 = vstv %s6809_s30  ;;  %v1992_v18 = vadd.f32 %v6730_v17, %v6630_v3  ;;  %v2599_v37 = vstv %s6837_s4  ;;  %s7140_s30 = sld [smem:[#allocation8 + $0xf2]] }
 0x3c0   : > { %2506 = vrot.lane.b32.xlu0 %v2502_v14, %s8336_s26  ;;  %v6817_v53 = vadd.f32 %v2129_v42, %v2048_v23  ;;  %v2147_v58 = vmul.f32 %v2145_v22, %v6395_v25  ;;  %v2558_v3 = vmul.f32 %v2557_v50, %v6708_v5  ;;  %v1963_v50 = vadd.f32 %v6747_v38, %v6653_v24  ;;  %s7184_s4 = sld [smem:[#allocation8 + $0x40]] }
 0x3c1   : > { %v2058_v36 = vpop.permute.xlu1 %2057  ;;  %v6822_v52 = vadd.f32 %v2110_v60, %v2005_v35  ;;  %v2128_v35 = vmul.f32 %v2127_v9, %v6439_v40  ;;  %v2151_v60 = vstv %s6831_s8  ;;  %v1977_v24 = vadd.f32 %v6764_v61, %v6667_v30  ;;  %s7170_s8 = sld [smem:[#allocation8 + $0x1c]] }
 0x3c2   : > { %v2062_v39 = vadd.f32 %v2058_v36, %v1950_v13  ;;  %v2014_v21 = vpop.permute.xlu0 %2013  ;;  %v1949_v13 = vadd.f32 %v6733_v63, %v6637_v33  ;;  %v2601_v36 = vmul.f32 %v2599_v37, %v6669_v16  ;;  %v2153_v17 = vmul.f32 %v2151_v60, %v6395_v25 }
 0x3c3   : > { %v2019_v2 = vadd.f32 %v2014_v21, %v1907_v7  ;;  %2564 = vrot.lane.b32.xlu1 %v2559_v45, %s8326_s14  ;;  %v2613_v33 = vstv %s6859_s11  ;;  %v1991_v30 = vadd.f32 %v6781_v34, %v6681_v62  ;;  %v2705_v62 = vstv %s6914_s7  ;;  %s7201_s11 = sld [smem:[#allocation8 + $0x64]] }
 0x3c4   : > { %2520 = vrot.lane.b32.xlu0 %v2516_v28, %s8336_s26  ;;  %v6839_v12 = vadd.f32 %v2135_v11, %v2062_v39  ;;  %v2134_v28 = vmul.f32 %v2133_v29, %v6439_v40  ;;  %v2615_v25 = vmul.f32 %v2613_v33, %v6669_v16  ;;  %s7237_s7 = sld [smem:[#allocation8 + $0xd0]] }
 0x3c5   : > { %v2072_v15 = vpop.permute.xlu1 %2071  ;;  %v6844_v57 = vadd.f32 %v2116_v59, %v2019_v2 }
 0x3c6   : > { %v2076_v49 = vadd.f32 %v2072_v15, %v1964_v44  ;;  %v2028_v19 = vpop.permute.xlu0 %2027  ;;  %v2572_v44 = vmul.f32 %v2571_v47, %v6708_v5  ;;  %v2627_v15 = vstv %s6879_s19  ;;  %s7215_s19 = sld [smem:[#allocation8 + $0x88]] }
 0x3c7   : > { %v2033_v0 = vadd.f32 %v2028_v19, %v1921_v31  ;;  %2578 = vrot.lane.b32.xlu1 %v2573_v55, %s8326_s14  ;;  %v2140_v31 = vmul.f32 %v2139_v41, %v6439_v40  ;;  %v2629_v55 = vmul.f32 %v2627_v15, %v6669_v16  ;;  %v2586_v19 = vmul.f32 %v2585_v1, %v6708_v5 }
 0x3c8   : > { %2534 = vrot.lane.b32.xlu0 %v2530_v43, %s8336_s26  ;;  %v6861_v6 = vadd.f32 %v2141_v54, %v2076_v49  ;;  %v2146_v41 = vmul.f32 %v2145_v22, %v6439_v40  ;;  %v2641_v54 = vstv %s6896_s27  ;;  %v2600_v22 = vmul.f32 %v2599_v37, %v6708_v5  ;;  %s7226_s27 = sld [smem:[#allocation8 + $0xac]] }
 0x3c9   : > { %v2086_v48 = vpop.permute.xlu1 %2085  ;;  %v6866_v23 = vadd.f32 %v2122_v20, %v2033_v0  ;;  %v2643_v0 = vmul.f32 %v2641_v54, %v6669_v16 }
 0x3ca   : > { %v2090_v4 = vadd.f32 %v2086_v48, %v1978_v8  ;;  %v2042_v14 = vpop.permute.xlu0 %2041  ;;  %v6937_v8 = vld [vmem:[#allocation2 + $0x3a] sm:$0xff]  ;;  %v2152_v48 = vmul.f32 %v2151_v60, %v6439_v40  ;;  %v2719_v40 = vstv %s6928_s23  ;;  %v2628_v60 = vmul.f32 %v2627_v15, %v6708_v5  ;;  %s7246_s23 = sld [smem:[#allocation8 + $0x18]] }
 0x3cb   : > { %v2047_v42 = vadd.f32 %v2042_v14, %v1935_v10  ;;  %2592 = vrot.lane.b32.xlu1 %v2587_v56, %s8326_s14  ;;  %v2707_v56 = vmul.f32 %v2705_v62, %v6937_v8 }
 0x3cc   : > { %2548 = vrot.lane.b32.xlu0 %v2544_v27, %s8326_s14  ;;  %v6881_v32 = vadd.f32 %v2147_v58, %v2090_v4  ;;  %v2614_v27 = vmul.f32 %v2613_v33, %v6708_v5  ;;  %v2761_v33 = vstv %s6968_s9  ;;  %s7265_s9 = sld [smem:[#allocation8 + $0x118]] }
 0x3cd   : > { %v2100_v7 = vpop.permute.xlu1 %2099  ;;  %v6886_v9 = vadd.f32 %v2128_v35, %v2047_v42  ;;  %v2721_v42 = vmul.f32 %v2719_v40, %v6937_v8 }
 0x3ce   : > { %v2104_v45 = vadd.f32 %v2100_v7, %v1992_v18  ;;  %v2056_v39 = vpop.permute.xlu0 %2055  ;;  %v2733_v18 = vstv %s6944_s22  ;;  %s7252_s22 = sld [smem:[#allocation8 + $0xf4]] }
 0x3cf   : > { %v2061_v21 = vadd.f32 %v2056_v39, %v1949_v13  ;;  %2606 = vrot.lane.b32.xlu1 %v2601_v36, %s8326_s14  ;;  %v2735_v13 = vmul.f32 %v2733_v18, %v6937_v8  ;;  %v2642_v36 = vmul.f32 %v2641_v54, %v6708_v5  ;;  %v2747_v39 = vstv %s6957_s21  ;;  %s7259_s21 = sld [smem:[#allocation8 + $0x3c]] }
 0x3d0   : > { %2562 = vrot.lane.b32.xlu0 %v2558_v3, %s8326_s14  ;;  %v6898_v63 = vadd.f32 %v2153_v17, %v2104_v45  ;;  %v6976_v45 = vld [vmem:[#allocation2 + $0x32] sm:$0xff]  ;;  %v2749_v17 = vmul.f32 %v2747_v39, %v6937_v8 }
 0x3d1   : > { %v6902_v11 = vpop.permute.xlu1 %2164  ;;  %v6905_v2 = vadd.f32 %v2134_v28, %v2061_v21  ;;  %v2706_v28 = vmul.f32 %v2705_v62, %v6976_v45  ;;  %v2803_v62 = vstv %s7009_s13  ;;  %s7309_s13 = sld [smem:[#allocation8 + $0xa8]] }
 0x3d2   : > { %v2070_v59 = vpop.permute.xlu0 %2069 }
 0x3d3   : > { %v2075_v29 = vadd.f32 %v2070_v59, %v1963_v50  ;;  %2620 = vrot.lane.b32.xlu1 %v2615_v25, %s8326_s14  ;;  %v2763_v25 = vmul.f32 %v2761_v33, %v6937_v8 }
 0x3d4   : > { %2576 = vrot.lane.b32.xlu0 %v2572_v44, %s8326_s14  ;;  %v2720_v44 = vmul.f32 %v2719_v40, %v6976_v45  ;;  %v2805_v40 = vmul.f32 %v2803_v62, %v6937_v8 }
 0x3d5   : > { %v6918_v38 = vpop.permute.xlu1 %2178  ;;  %v6921_v47 = vadd.f32 %v2140_v31, %v2075_v29  ;;  %v2169_v29 = vadd.f32 %v6902_v11, %v6761_v46  ;;  %v2775_v31 = vstv %s6981_s1  ;;  %v2789_v11 = vstv %s6994_s2  ;;  %s7273_s1 = sld [smem:[#allocation8 + $0x60]] }
 0x3d6   : > { %v2084_v49 = vpop.permute.xlu0 %2083  ;;  %v2183_v46 = vadd.f32 %v6918_v38, %v6778_v51  ;;  %v2748_v51 = vmul.f32 %v2747_v39, %v6976_v45  ;;  %s7290_s2 = sld [smem:[#allocation8 + $0x84]] }
 0x3d7   : > { %v2089_v43 = vadd.f32 %v2084_v49, %v1977_v24  ;;  %2634 = vrot.lane.b32.xlu1 %v2629_v55, %s8326_s14  ;;  %v2777_v24 = vmul.f32 %v2775_v31, %v6937_v8  ;;  %v2383_v55 = vstv %s6986_s0  ;;  %s7279_s0 = sld [smem:[#allocation8 + $0x1d]] }
 0x3d8   : > { %2590 = vrot.lane.b32.xlu0 %v2586_v19, %s8326_s14 }
 0x3d9   : > { %v6932_v61 = vpop.permute.xlu1 %2192  ;;  %v6935_v20 = vadd.f32 %v2146_v41, %v2089_v43  ;;  %v2734_v43 = vmul.f32 %v2733_v18, %v6976_v45  ;;  %v2385_v41 = vmul.f32 %v2383_v55, %v6669_v16 }
 0x3da   : > { %v2098_v1 = vpop.permute.xlu0 %2097 }
 0x3db   : > { %v2103_v10 = vadd.f32 %v2098_v1, %v1991_v30  ;;  %2648 = vrot.lane.b32.xlu1 %v2643_v0, %s8326_s14  ;;  %v2791_v0 = vmul.f32 %v2789_v11, %v6937_v8  ;;  %v2389_v1 = vstv %s6999_s3  ;;  %s7296_s3 = sld [smem:[#allocation8 + $0x41]] }
 0x3dc   : > { %2604 = vrot.lane.b32.xlu0 %v2600_v22, %s8326_s14  ;;  %v2391_v38 = vmul.f32 %v2389_v1, %v6669_v16 }
 0x3dd   : > { %v6946_v34 = vpop.permute.xlu1 %2206  ;;  %v6949_v4 = vadd.f32 %v2152_v48, %v2103_v10  ;;  %v2197_v48 = vadd.f32 %v6932_v61, %v6797_v26  ;;  %v2762_v26 = vmul.f32 %v2761_v33, %v6976_v45 }
 0x3de   : > { %v6951_v14 = vpop.permute.xlu0 %2162 }
 0x3df   : > { %2712 = vrot.lane.b32.xlu1 %v2707_v56, %s8336_s26 }
 0x3e0   : > { %2618 = vrot.lane.b32.xlu0 %v2614_v27, %s8326_s14 }
 0x3e1   : > { %v6959_v58 = vpop.permute.xlu1 %2220 }
 0x3e2   : > { %v6962_v35 = vpop.permute.xlu0 %2176 }
 0x3e3   : > { %2726 = vrot.lane.b32.xlu1 %v2721_v42, %s8336_s26  ;;  %v2395_v42 = vstv %s7013_s15  ;;  %s7315_s15 = sld [smem:[#allocation8 + $0x65]] }
 0x3e4   : > { %2632 = vrot.lane.b32.xlu0 %v2628_v60, %s8326_s14  ;;  %v2397_v61 = vmul.f32 %v2395_v42, %v6669_v16 }
 0x3e5   : > { %v6970_v37 = vpop.permute.xlu1 %2234 }
 0x3e6   : > { %v6973_v7 = vpop.permute.xlu0 %2190 }
 0x3e7   : > { %2740 = vrot.lane.b32.xlu1 %v2735_v13, %s8336_s26  ;;  %v2211_v13 = vadd.f32 %v6946_v34, %v6817_v53 }
 0x3e8   : > { %2646 = vrot.lane.b32.xlu0 %v2642_v36, %s8326_s14  ;;  %v2817_v36 = vstv %s7024_s10  ;;  %s7330_s10 = sld [smem:[#allocation8 + $0xcc]] }
 0x3e9   : > { %v6983_v3 = vpop.permute.xlu1 %2248  ;;  %v2819_v33 = vmul.f32 %v2817_v36, %v6937_v8 }
 0x3ea   : > { %v6988_v21 = vpop.permute.xlu0 %2204 }
 0x3eb   : > { %2754 = vrot.lane.b32.xlu1 %v2749_v17, %s8336_s26  ;;  %v2168_v17 = vadd.f32 %v6951_v14, %v6822_v52  ;;  %v2384_v52 = vmul.f32 %v2383_v55, %v6708_v5  ;;  %v2225_v14 = vadd.f32 %v6959_v58, %v6839_v12  ;;  %v2407_v55 = vstv %s7047_s5  ;;  %s7358_s5 = sld [smem:[#allocation8 + $0xad]] }
 0x3ec   : > { %2710 = vrot.lane.b32.xlu0 %v2706_v28, %s8336_s26 }
 0x3ed   : > { %v6996_v50 = vpop.permute.xlu1 %2262 }
 0x3ee   : > { %v7001_v59 = vpop.permute.xlu0 %2218 }
 0x3ef   : > { %2768 = vrot.lane.b32.xlu1 %v2763_v25, %s8336_s26  ;;  %v2401_v25 = vstv %s7030_s12  ;;  %s7334_s12 = sld [smem:[#allocation8 + $0x89]] }
 0x3f0   : > { %2724 = vrot.lane.b32.xlu0 %v2720_v44, %s8336_s26  ;;  %v2776_v44 = vmul.f32 %v2775_v31, %v6976_v45  ;;  %v2182_v31 = vadd.f32 %v6962_v35, %v6844_v57  ;;  %v2390_v57 = vmul.f32 %v2389_v1, %v6708_v5  ;;  %v2239_v35 = vadd.f32 %v6970_v37, %v6861_v6 }
 0x3f1   : > { %v2277_v15 = vpop.permute.xlu1 %2276  ;;  %v2413_v1 = vstv %s7068_s24  ;;  %s7382_s24 = sld [smem:[#allocation8 + $0xd1]] }
 0x3f2   : > { %v2281_v49 = vadd.f32 %v2277_v15, %v2169_v29  ;;  %v7015_v19 = vpop.permute.xlu0 %2232  ;;  %v2403_v29 = vmul.f32 %v2401_v25, %v6669_v16 }
 0x3f3   : > { %2782 = vrot.lane.b32.xlu1 %v2777_v24, %s8336_s26  ;;  %v2831_v24 = vstv %s7041_s6  ;;  %s7354_s6 = sld [smem:[#allocation8 + $0xf0]] }
 0x3f4   : > { %2738 = vrot.lane.b32.xlu0 %v2734_v43, %s8336_s26  ;;  %v7026_v54 = vadd.f32 %v2385_v41, %v2281_v49  ;;  %v2833_v41 = vmul.f32 %v2831_v24, %v6937_v8 }
 0x3f5   : > { %v2291_v30 = vpop.permute.xlu1 %2290 }
 0x3f6   : > { %v2295_v22 = vadd.f32 %v2291_v30, %v2183_v46  ;;  %v7032_v10 = vpop.permute.xlu0 %2246  ;;  %v2790_v30 = vmul.f32 %v2789_v11, %v6976_v45  ;;  %v2196_v11 = vadd.f32 %v6973_v7, %v6866_v23  ;;  %v2396_v23 = vmul.f32 %v2395_v42, %v6708_v5 }
 0x3f7   : > { %2796 = vrot.lane.b32.xlu1 %v2791_v0, %s8336_s26  ;;  %v2409_v0 = vmul.f32 %v2407_v55, %v6669_v16  ;;  %v2253_v7 = vadd.f32 %v6983_v3, %v6881_v32  ;;  %v2419_v42 = vstv %s7090_s25  ;;  %v2818_v3 = vmul.f32 %v2817_v36, %v6976_v45  ;;  %s7424_s25 = sld [smem:[#allocation8 + $0x119]] }
 0x3f8   : > { %2752 = vrot.lane.b32.xlu0 %v2748_v51, %s8336_s26  ;;  %v7043_v56 = vadd.f32 %v2391_v38, %v2295_v22  ;;  %v2845_v51 = vstv %s7058_s28  ;;  %v2224_v36 = vadd.f32 %v7001_v59, %v6905_v2  ;;  %v2887_v2 = vstv %s7120_s18  ;;  %s7376_s28 = sld [smem:[#allocation8 + $0x114]] }
 0x3f9   : > { %v2305_v27 = vpop.permute.xlu1 %2304  ;;  %s7476_s18 = sld [smem:[#allocation8 + $0x67]] }
 0x3fa   : > { %v2309_v60 = vadd.f32 %v2305_v27, %v2197_v48  ;;  %v7049_v18 = vpop.permute.xlu0 %2260  ;;  %v2847_v27 = vmul.f32 %v2845_v51, %v6937_v8 }
 0x3fb   : > { %2810 = vrot.lane.b32.xlu1 %v2805_v40, %s8336_s26 }
 0x3fc   : > { %2766 = vrot.lane.b32.xlu0 %v2762_v26, %s8336_s26  ;;  %v7060_v39 = vadd.f32 %v2397_v61, %v2309_v60  ;;  %v2804_v60 = vmul.f32 %v2803_v62, %v6976_v45  ;;  %v2415_v26 = vmul.f32 %v2413_v1, %v6669_v16  ;;  %v2210_v62 = vadd.f32 %v6988_v21, %v6886_v9 }
 0x3fd   : > { %v2319_v28 = vpop.permute.xlu1 %2318  ;;  %v2402_v9 = vmul.f32 %v2401_v25, %v6708_v5  ;;  %v2267_v21 = vadd.f32 %v6996_v50, %v6898_v63  ;;  %v2425_v25 = vstv %s7110_s16  ;;  %v2832_v63 = vmul.f32 %v2831_v24, %v6976_v45  ;;  %s7460_s16 = sld [smem:[#allocation8 + $0x43]] }
 0x3fe   : > { %v2323_v53 = vadd.f32 %v2319_v28, %v2211_v13  ;;  %v2275_v34 = vpop.permute.xlu0 %2274  ;;  %v2859_v13 = vstv %s7078_s17  ;;  %v2427_v50 = vmul.f32 %v2425_v25, %v6669_v16  ;;  %s7402_s17 = sld [smem:[#allocation8 + $0xf5]] }
 0x3ff   : > { %v2280_v15 = vadd.f32 %v2275_v34, %v2168_v17  ;;  %2824 = vrot.lane.b32.xlu1 %v2819_v33, %s8326_s14  ;;  %v2861_v33 = vmul.f32 %v2859_v13, %v6937_v8 }
 0x400   : > { %2780 = vrot.lane.b32.xlu0 %v2776_v44, %s8336_s26  ;;  %v7080_v49 = vadd.f32 %v2403_v29, %v2323_v53  ;;  %v2421_v44 = vmul.f32 %v2419_v42, %v6669_v16  ;;  %v2889_v16 = vmul.f32 %v2887_v2, %v6937_v8 }
 0x401   : > { %v2333_v43 = vpop.permute.xlu1 %2332  ;;  %v7087_v46 = vadd.f32 %v2384_v52, %v2280_v15  ;;  %v2873_v15 = vstv %s7100_s20  ;;  %s7446_s20 = sld [smem:[#allocation8 + $0x1f]] }
 0x402   : > { %v2337_v12 = vadd.f32 %v2333_v43, %v2225_v14  ;;  %v2289_v58 = vpop.permute.xlu0 %2288 }
 0x403   : > { %v2294_v22 = vadd.f32 %v2289_v58, %v2182_v31  ;;  %2838 = vrot.lane.b32.xlu1 %v2833_v41, %s8326_s14  ;;  %v2875_v31 = vmul.f32 %v2873_v15, %v6937_v8 }
 0x404   : > { %2794 = vrot.lane.b32.xlu0 %v2790_v30, %s8336_s26  ;;  %v7102_v38 = vadd.f32 %v2409_v0, %v2337_v12  ;;  %v2408_v30 = vmul.f32 %v2407_v55, %v6708_v5  ;;  %v2238_v0 = vadd.f32 %v7015_v19, %v6921_v47  ;;  %v2846_v55 = vmul.f32 %v2845_v51, %v6976_v45 }
 0x405   : > { %v2347_v48 = vpop.permute.xlu1 %2346  ;;  %v7107_v40 = vadd.f32 %v2390_v57, %v2294_v22  ;;  %v2901_v47 = vstv %s7140_s30  ;;  %v2252_v19 = vadd.f32 %v7032_v10, %v6935_v20  ;;  %v2915_v20 = vstv %s7158_s29  ;;  %s7489_s30 = sld [smem:[#allocation8 + $0x8b]] }
 0x406   : > { %v2351_v6 = vadd.f32 %v2347_v48, %v2239_v35  ;;  %v2303_v37 = vpop.permute.xlu0 %2302  ;;  %v2266_v10 = vadd.f32 %v7049_v18, %v6949_v4  ;;  %v2426_v4 = vmul.f32 %v2425_v25, %v6708_v5  ;;  %v2916_v25 = vmul.f32 %v2915_v20, %v6976_v45  ;;  %s7500_s29 = sld [smem:[#allocation8 + $0xaf]] }
 0x407   : > { %v2308_v61 = vadd.f32 %v2303_v37, %v2196_v11  ;;  %2852 = vrot.lane.b32.xlu1 %v2847_v27, %s8326_s14  ;;  %v2414_v11 = vmul.f32 %v2413_v1, %v6708_v5  ;;  %v2903_v27 = vmul.f32 %v2901_v47, %v6937_v8  ;;  %v2860_v37 = vmul.f32 %v2859_v13, %v6976_v45 }
 0x408   : > { %2808 = vrot.lane.b32.xlu0 %v2804_v60, %s8336_s26  ;;  %v7122_v17 = vadd.f32 %v2415_v26, %v2351_v6  ;;  %v2420_v1 = vmul.f32 %v2419_v42, %v6708_v5 }
 0x409   : > { %v2361_v28 = vpop.permute.xlu1 %2360  ;;  %v7127_v53 = vadd.f32 %v2396_v23, %v2308_v61  ;;  %v2917_v61 = vmul.f32 %v2915_v20, %v6937_v8 }
 0x40a   : > { %v2365_v34 = vadd.f32 %v2361_v28, %v2253_v7  ;;  %v2317_v32 = vpop.permute.xlu0 %2316  ;;  %v7197_v7 = vld [vmem:[#allocation2 + $0x50] sm:$0xff]  ;;  %v2980_v28 = vstv %s7170_s8  ;;  %s7511_s8 = sld [smem:[#allocation8 + $0x1b]] }
 0x40b   : > { %v2322_v29 = vadd.f32 %v2317_v32, %v2210_v62  ;;  %2866 = vrot.lane.b32.xlu1 %v2861_v33, %s8326_s14  ;;  %v2874_v62 = vmul.f32 %v2873_v15, %v6976_v45  ;;  %v2982_v42 = vmul.f32 %v2980_v28, %v7197_v7  ;;  %v3008_v15 = vstv %s7201_s11  ;;  %s7524_s11 = sld [smem:[#allocation8 + $0x3f]] }
 0x40c   : > { %2822 = vrot.lane.b32.xlu0 %v2818_v3, %s8326_s14  ;;  %v7142_v52 = vadd.f32 %v2421_v44, %v2365_v34  ;;  %v2888_v3 = vmul.f32 %v2887_v2, %v6976_v45  ;;  %v2994_v44 = vstv %s7184_s4  ;;  %v3036_v2 = vstv %s7226_s27  ;;  %s7515_s4 = sld [smem:[#allocation8 + $0xd3]] }
 0x40d   : > { %v2375_v14 = vpop.permute.xlu1 %2374  ;;  %v7147_v43 = vadd.f32 %v2402_v9, %v2322_v29  ;;  %v2996_v29 = vmul.f32 %v2994_v44, %v7197_v7  ;;  %s7538_s27 = sld [smem:[#allocation8 + $0x63]] }
 0x40e   : > { %v2379_v41 = vadd.f32 %v2375_v14, %v2267_v21  ;;  %v2331_v12 = vpop.permute.xlu0 %2330  ;;  %v2902_v21 = vmul.f32 %v2901_v47, %v6976_v45  ;;  %v3010_v14 = vmul.f32 %v3008_v15, %v7197_v7 }
 0x40f   : > { %v2336_v58 = vadd.f32 %v2331_v12, %v2224_v36  ;;  %2880 = vrot.lane.b32.xlu1 %v2875_v31, %s8326_s14  ;;  %v7239_v12 = vld [vmem:[#allocation2 + $0x48] sm:$0xff] }
 0x410   : > { %2836 = vrot.lane.b32.xlu0 %v2832_v63, %s8326_s14  ;;  %v7160_v59 = vadd.f32 %v2427_v50, %v2379_v41  ;;  %v3022_v41 = vstv %s7215_s19  ;;  %s7528_s19 = sld [smem:[#allocation8 + $0xf7]] }
 0x411   : > { %v7164_v22 = vpop.permute.xlu1 %2438  ;;  %v7167_v24 = vadd.f32 %v2408_v30, %v2336_v58  ;;  %v3024_v50 = vmul.f32 %v3022_v41, %v7197_v7  ;;  %v2981_v30 = vmul.f32 %v2980_v28, %v7239_v12 }
 0x412   : > { %v2345_v57 = vpop.permute.xlu0 %2344 }
 0x413   : > { %v2350_v35 = vadd.f32 %v2345_v57, %v2238_v0  ;;  %2894 = vrot.lane.b32.xlu1 %v2889_v16, %s8326_s14  ;;  %v3038_v16 = vmul.f32 %v3036_v2, %v7197_v7 }
 0x414   : > { %2850 = vrot.lane.b32.xlu0 %v2846_v55, %s8326_s14  ;;  %v2995_v55 = vmul.f32 %v2994_v44, %v7239_v12 }
 0x415   : > { %v7178_v48 = vpop.permute.xlu1 %2452  ;;  %v7181_v6 = vadd.f32 %v2414_v11, %v2350_v35  ;;  %v3050_v35 = vstv %s7237_s7  ;;  %v2443_v11 = vadd.f32 %v7164_v22, %v7026_v54  ;;  %s7544_s7 = sld [smem:[#allocation8 + $0x11b]] }
 0x416   : > { %v2359_v51 = vpop.permute.xlu0 %2358  ;;  %v2457_v22 = vadd.f32 %v7178_v48, %v7043_v56 }
 0x417   : > { %v2364_v60 = vadd.f32 %v2359_v51, %v2252_v19  ;;  %2908 = vrot.lane.b32.xlu1 %v2903_v27, %s8326_s14  ;;  %v3052_v19 = vmul.f32 %v3050_v35, %v7197_v7  ;;  %v2657_v27 = vstv %s7246_s23  ;;  %s7553_s23 = sld [smem:[#allocation8 + $0x87]] }
 0x418   : > { %2864 = vrot.lane.b32.xlu0 %v2860_v37, %s8326_s14  ;;  %v2659_v54 = vmul.f32 %v2657_v27, %v6937_v8 }
 0x419   : > { %v7192_v26 = vpop.permute.xlu1 %2466  ;;  %v7195_v23 = vadd.f32 %v2420_v1, %v2364_v60  ;;  %v3009_v60 = vmul.f32 %v3008_v15, %v7239_v12  ;;  %v3064_v1 = vstv %s7252_s22  ;;  %s7559_s22 = sld [smem:[#allocation8 + $0x20]] }
 0x41a   : > { %v2373_v13 = vpop.permute.xlu0 %2372  ;;  %v2471_v48 = vadd.f32 %v7192_v26, %v7060_v39  ;;  %v3092_v39 = vstv %s7279_s0  ;;  %s7595_s0 = sld [smem:[#allocation8 + $0x68]] }
 0x41b   : > { %v2378_v33 = vadd.f32 %v2373_v13, %v2266_v10  ;;  %2922 = vrot.lane.b32.xlu1 %v2917_v61, %s8326_s14  ;;  %v3066_v61 = vmul.f32 %v3064_v1, %v7197_v7  ;;  %v2663_v13 = vstv %s7259_s21  ;;  %s7570_s21 = sld [smem:[#allocation8 + $0xab]] }
 0x41c   : > { %2878 = vrot.lane.b32.xlu0 %v2874_v62, %s8326_s14  ;;  %v2665_v56 = vmul.f32 %v2663_v13, %v6937_v8 }
 0x41d   : > { %v7206_v18 = vpop.permute.xlu1 %2480  ;;  %v7209_v34 = vadd.f32 %v2426_v4, %v2378_v33  ;;  %v3023_v33 = vmul.f32 %v3022_v41, %v7239_v12  ;;  %v3078_v4 = vstv %s7265_s9  ;;  %s7576_s9 = sld [smem:[#allocation8 + $0x44]] }
 0x41e   : > { %v7211_v32 = vpop.permute.xlu0 %2436  ;;  %v3080_v44 = vmul.f32 %v3078_v4, %v7197_v7 }
 0x41f   : > { %2987 = vrot.lane.b32.xlu1 %v2982_v42, %s8336_s26 }
 0x420   : > { %2892 = vrot.lane.b32.xlu0 %v2888_v3, %s8326_s14 }
 0x421   : > { %v7219_v5 = vpop.permute.xlu1 %2494 }
 0x422   : > { %v7222_v9 = vpop.permute.xlu0 %2450 }
 0x423   : > { %3001 = vrot.lane.b32.xlu1 %v2996_v29, %s8336_s26  ;;  %v2669_v29 = vstv %s7273_s1  ;;  %s7589_s1 = sld [smem:[#allocation8 + $0xcf]] }
 0x424   : > { %2906 = vrot.lane.b32.xlu0 %v2902_v21, %s8326_s14  ;;  %v2671_v26 = vmul.f32 %v2669_v29, %v6937_v8 }
 0x425   : > { %v7230_v36 = vpop.permute.xlu1 %2508 }
 0x426   : > { %v7233_v31 = vpop.permute.xlu0 %2464 }
 0x427   : > { %3015 = vrot.lane.b32.xlu1 %v3010_v14, %s8336_s26  ;;  %v3037_v14 = vmul.f32 %v3036_v2, %v7239_v12  ;;  %v3094_v2 = vmul.f32 %v3092_v39, %v7197_v7 }
 0x428   : > { %2920 = vrot.lane.b32.xlu0 %v2916_v25, %s8326_s14  ;;  %v2485_v25 = vadd.f32 %v7206_v18, %v7080_v49  ;;  %v3051_v49 = vmul.f32 %v3050_v35, %v7239_v12  ;;  %v3106_v18 = vstv %s7296_s3  ;;  %v2456_v35 = vadd.f32 %v7222_v9, %v7107_v40  ;;  %s7615_s3 = sld [smem:[#allocation8 + $0x8c]] }
 0x429   : > { %v7243_v63 = vpop.permute.xlu1 %2522 }
 0x42a   : > { %v7248_v58 = vpop.permute.xlu0 %2478 }
 0x42b   : > { %3029 = vrot.lane.b32.xlu1 %v3024_v50, %s8336_s26  ;;  %v2442_v50 = vadd.f32 %v7211_v32, %v7087_v46  ;;  %v2658_v32 = vmul.f32 %v2657_v27, %v6976_v45 }
 0x42c   : > { %2985 = vrot.lane.b32.xlu0 %v2981_v30, %s8336_s26 }
 0x42d   : > { %v7256_v0 = vpop.permute.xlu1 %2536 }
 0x42e   : > { %v7261_v57 = vpop.permute.xlu0 %2492 }
 0x42f   : > { %3043 = vrot.lane.b32.xlu1 %v3038_v16, %s8336_s26  ;;  %v2675_v16 = vstv %s7290_s2  ;;  %s7609_s2 = sld [smem:[#allocation8 + $0xf3]] }
 0x430   : > { %2999 = vrot.lane.b32.xlu0 %v2995_v55, %s8336_s26 }
 0x431   : > { %v2551_v47 = vpop.permute.xlu1 %2550 }
 0x432   : > { %v2555_v51 = vadd.f32 %v2551_v47, %v2443_v11  ;;  %v7275_v37 = vpop.permute.xlu0 %2506  ;;  %v2677_v47 = vmul.f32 %v2675_v16, %v6937_v8 }
 0x433   : > { %3057 = vrot.lane.b32.xlu1 %v3052_v19, %s8336_s26  ;;  %v2499_v19 = vadd.f32 %v7219_v5, %v7102_v38  ;;  %v3065_v5 = vmul.f32 %v3064_v1, %v7239_v12  ;;  %v2470_v1 = vadd.f32 %v7233_v31, %v7127_v53 }
 0x434   : > { %3013 = vrot.lane.b32.xlu0 %v3009_v60, %s8336_s26  ;;  %v7286_v20 = vadd.f32 %v2659_v54, %v2555_v51  ;;  %v3108_v54 = vmul.f32 %v3106_v18, %v7197_v7 }
 0x435   : > { %v2565_v10 = vpop.permute.xlu1 %2564 }
 0x436   : > { %v2569_v62 = vadd.f32 %v2565_v10, %v2457_v22  ;;  %v7292_v28 = vpop.permute.xlu0 %2520  ;;  %v2681_v10 = vstv %s7309_s13  ;;  %s7631_s13 = sld [smem:[#allocation8 + $0x117]] }
 0x437   : > { %3071 = vrot.lane.b32.xlu1 %v3066_v61, %s8336_s26  ;;  %v3120_v61 = vstv %s7315_s15  ;;  %v2683_v40 = vmul.f32 %v2681_v10, %v6937_v8  ;;  %s7637_s15 = sld [smem:[#allocation8 + $0xb0]] }
 0x438   : > { %3027 = vrot.lane.b32.xlu0 %v3023_v33, %s8336_s26  ;;  %v7303_v42 = vadd.f32 %v2665_v56, %v2569_v62  ;;  %v2664_v62 = vmul.f32 %v2663_v13, %v6976_v45  ;;  %v2513_v33 = vadd.f32 %v7230_v36, %v7122_v17  ;;  %v3079_v17 = vmul.f32 %v3078_v4, %v7239_v12 }
 0x439   : > { %v2579_v3 = vpop.permute.xlu1 %2578  ;;  %v3134_v36 = vstv %s7334_s12  ;;  %v2484_v4 = vadd.f32 %v7248_v58, %v7147_v43  ;;  %v2676_v58 = vmul.f32 %v2675_v16, %v6976_v45  ;;  %s7679_s12 = sld [smem:[#allocation8 + $0xf8]] }
 0x43a   : > { %v2583_v21 = vadd.f32 %v2579_v3, %v2471_v48  ;;  %v7311_v15 = vpop.permute.xlu0 %2534  ;;  %v3122_v3 = vmul.f32 %v3120_v61, %v7197_v7 }
 0x43b   : > { %3085 = vrot.lane.b32.xlu1 %v3080_v44, %s8336_s26 }
 0x43c   : > { %3041 = vrot.lane.b32.xlu0 %v3037_v14, %s8336_s26  ;;  %v7322_v41 = vadd.f32 %v2671_v26, %v2583_v21  ;;  %v2687_v21 = vstv %s7330_s10  ;;  %v2670_v26 = vmul.f32 %v2669_v29, %v6976_v45  ;;  %s7659_s10 = sld [smem:[#allocation8 + $0xd4]] }
 0x43d   : > { %v2593_v30 = vpop.permute.xlu1 %2592  ;;  %v2689_v53 = vmul.f32 %v2687_v21, %v6937_v8 }
 0x43e   : > { %v2597_v55 = vadd.f32 %v2593_v30, %v2485_v25  ;;  %v2549_v11 = vpop.permute.xlu0 %2548  ;;  %v2527_v25 = vadd.f32 %v7243_v63, %v7142_v52  ;;  %v3093_v52 = vmul.f32 %v3092_v39, %v7239_v12  ;;  %v3148_v63 = vstv %s7358_s5  ;;  %s7715_s5 = sld [smem:[#allocation8 + $0x22]] }
 0x43f   : > { %v2554_v46 = vadd.f32 %v2549_v11, %v2442_v50  ;;  %3099 = vrot.lane.b32.xlu1 %v3094_v2, %s8326_s14  ;;  %v3136_v2 = vmul.f32 %v3134_v36, %v7197_v7  ;;  %v2693_v11 = vstv %s7354_s6  ;;  %v2498_v39 = vadd.f32 %v7261_v57, %v7167_v24  ;;  %s7696_s6 = sld [smem:[#allocation8 + $0x11c]] }
 0x440   : > { %3055 = vrot.lane.b32.xlu0 %v3051_v49, %s8336_s26  ;;  %v7344_v51 = vadd.f32 %v2677_v47, %v2597_v55  ;;  %v2695_v47 = vmul.f32 %v2693_v11, %v6937_v8  ;;  %v2682_v24 = vmul.f32 %v2681_v10, %v6976_v45 }
 0x441   : > { %v2607_v60 = vpop.permute.xlu1 %2606  ;;  %v7351_v22 = vadd.f32 %v2658_v32, %v2554_v46  ;;  %v2541_v46 = vadd.f32 %v7256_v0, %v7160_v59  ;;  %v3107_v59 = vmul.f32 %v3106_v18, %v7239_v12  ;;  %v3162_v0 = vstv %s7382_s24  ;;  %s7747_s24 = sld [smem:[#allocation8 + $0x6a]] }
 0x442   : > { %v2611_v27 = vadd.f32 %v2607_v60, %v2499_v19  ;;  %v2563_v38 = vpop.permute.xlu0 %2562  ;;  %v3164_v18 = vmul.f32 %v3162_v0, %v7197_v7 }
 0x443   : > { %v2568_v9 = vadd.f32 %v2563_v38, %v2456_v35  ;;  %3113 = vrot.lane.b32.xlu1 %v3108_v54, %s8326_s14  ;;  %v3150_v35 = vmul.f32 %v3148_v63, %v7197_v7  ;;  %v2699_v54 = vstv %s7376_s28  ;;  %s7730_s28 = sld [smem:[#allocation8 + $0x46]] }
 0x444   : > { %3069 = vrot.lane.b32.xlu0 %v3065_v5, %s8336_s26  ;;  %v7366_v56 = vadd.f32 %v2683_v40, %v2611_v27  ;;  %v2701_v16 = vmul.f32 %v2699_v54, %v6937_v8  ;;  %v2512_v40 = vadd.f32 %v7275_v37, %v7181_v6  ;;  %v2526_v6 = vadd.f32 %v7292_v28, %v7195_v23 }
 0x445   : > { %v2621_v48 = vpop.permute.xlu1 %2620  ;;  %v7373_v44 = vadd.f32 %v2664_v62, %v2568_v9  ;;  %v2540_v23 = vadd.f32 %v7311_v15, %v7209_v34  ;;  %v3254_v34 = vstv %s7446_s20  ;;  %s7790_s20 = sld [smem:[#allocation8 + $0xd6]] }
 0x446   : > { %v2625_v13 = vadd.f32 %v2621_v48, %v2513_v33  ;;  %v2577_v14 = vpop.permute.xlu0 %2576  ;;  %v3121_v33 = vmul.f32 %v3120_v61, %v7239_v12  ;;  %v2688_v48 = vmul.f32 %v2687_v21, %v6976_v45  ;;  %v2694_v21 = vmul.f32 %v2693_v11, %v6976_v45 }
 0x447   : > { %v2582_v31 = vadd.f32 %v2577_v14, %v2470_v1  ;;  %3127 = vrot.lane.b32.xlu1 %v3122_v3, %s8326_s14  ;;  %v3176_v1 = vstv %s7402_s17  ;;  %v3135_v14 = vmul.f32 %v3134_v36, %v7239_v12  ;;  %v7469_v36 = vld [vmem:[#allocation2 + $0x51] sm:$0xff]  ;;  %s7762_s17 = sld [smem:[#allocation8 + $0x8e]] }
 0x448   : > { %3083 = vrot.lane.b32.xlu0 %v3079_v17, %s8336_s26  ;;  %v7390_v50 = vadd.f32 %v2689_v53, %v2625_v13  ;;  %v3178_v3 = vmul.f32 %v3176_v1, %v7197_v7  ;;  %v3190_v17 = vstv %s7424_s25  ;;  %v3256_v11 = vmul.f32 %v3254_v34, %v7469_v36  ;;  %s7775_s25 = sld [smem:[#allocation8 + $0xb2]] }
 0x449   : > { %v2635_v30 = vpop.permute.xlu1 %2634  ;;  %v7395_v55 = vadd.f32 %v2670_v26, %v2582_v31  ;;  %v3192_v31 = vmul.f32 %v3190_v17, %v7197_v7 }
 0x44a   : > { %v2639_v49 = vadd.f32 %v2635_v30, %v2527_v25  ;;  %v2591_v29 = vpop.permute.xlu0 %2590 }
 0x44b   : > { %v2596_v43 = vadd.f32 %v2591_v29, %v2484_v4  ;;  %3141 = vrot.lane.b32.xlu1 %v3136_v2, %s8326_s14  ;;  %v3149_v4 = vmul.f32 %v3148_v63, %v7239_v12  ;;  %v2700_v2 = vmul.f32 %v2699_v54, %v6976_v45  ;;  %v3268_v45 = vstv %s7460_s16  ;;  %s7793_s16 = sld [smem:[#allocation8 + $0x1e]] }
 0x44c   : > { %3097 = vrot.lane.b32.xlu0 %v3093_v52, %s8326_s14  ;;  %v7412_v32 = vadd.f32 %v2695_v47, %v2639_v49  ;;  %v3163_v52 = vmul.f32 %v3162_v0, %v7239_v12  ;;  %v3270_v47 = vmul.f32 %v3268_v45, %v7469_v36  ;;  %v3191_v54 = vmul.f32 %v3190_v17, %v7239_v12 }
 0x44d   : > { %v2649_v19 = vpop.permute.xlu1 %2648  ;;  %v7417_v60 = vadd.f32 %v2676_v58, %v2596_v43  ;;  %v3177_v58 = vmul.f32 %v3176_v1, %v7239_v12  ;;  %v2932_v1 = vstv %s7511_s8  ;;  %s7824_s8 = sld [smem:[#allocation8 + $0x66]] }
 0x44e   : > { %v2653_v27 = vadd.f32 %v2649_v19, %v2541_v46  ;;  %v2605_v38 = vpop.permute.xlu0 %2604  ;;  %v3282_v46 = vstv %s7476_s18  ;;  %s7805_s18 = sld [smem:[#allocation8 + $0xfa]] }
 0x44f   : > { %v2610_v5 = vadd.f32 %v2605_v38, %v2498_v39  ;;  %3155 = vrot.lane.b32.xlu1 %v3150_v35, %s8326_s14  ;;  %v3284_v19 = vmul.f32 %v3282_v46, %v7469_v36  ;;  %v3296_v38 = vstv %s7489_s30  ;;  %s7808_s30 = sld [smem:[#allocation8 + $0x42]] }
 0x450   : > { %3111 = vrot.lane.b32.xlu0 %v3107_v59, %s8326_s14  ;;  %v7430_v57 = vadd.f32 %v2701_v16, %v2653_v27  ;;  %v7508_v27 = vld [vmem:[#allocation2 + $0x49] sm:$0xff]  ;;  %v3298_v0 = vmul.f32 %v3296_v38, %v7469_v36 }
 0x451   : > { %v7434_v9 = vpop.permute.xlu1 %2712  ;;  %v7437_v62 = vadd.f32 %v2682_v24, %v2610_v5  ;;  %v3255_v5 = vmul.f32 %v3254_v34, %v7508_v27  ;;  %v3310_v24 = vstv %s7500_s29  ;;  %v3283_v17 = vmul.f32 %v3282_v46, %v7508_v27  ;;  %s7820_s29 = sld [smem:[#allocation8 + $0x11e]] }
 0x452   : > { %v2619_v8 = vpop.permute.xlu0 %2618 }
 0x453   : > { %v2624_v10 = vadd.f32 %v2619_v8, %v2512_v40  ;;  %3169 = vrot.lane.b32.xlu1 %v3164_v18, %s8326_s14  ;;  %v3312_v18 = vmul.f32 %v3310_v24, %v7469_v36 }
 0x454   : > { %3125 = vrot.lane.b32.xlu0 %v3121_v33, %s8326_s14  ;;  %v3269_v33 = vmul.f32 %v3268_v45, %v7508_v27 }
 0x455   : > { %v7450_v37 = vpop.permute.xlu1 %2726  ;;  %v7453_v13 = vadd.f32 %v2688_v48, %v2624_v10  ;;  %v2717_v10 = vadd.f32 %v7434_v9, %v7286_v20  ;;  %v3324_v48 = vstv %s7515_s4  ;;  %v3338_v9 = vstv %s7528_s19  ;;  %s7835_s4 = sld [smem:[#allocation8 + $0x23]] }
 0x456   : > { %v2633_v61 = vpop.permute.xlu0 %2632  ;;  %v2731_v20 = vadd.f32 %v7450_v37, %v7303_v42  ;;  %v2944_v42 = vstv %s7538_s27  ;;  %s7852_s19 = sld [smem:[#allocation8 + $0x47]] }
 0x457   : > { %v2638_v53 = vadd.f32 %v2633_v61, %v2526_v6  ;;  %3183 = vrot.lane.b32.xlu1 %v3178_v3, %s8326_s14  ;;  %v3326_v3 = vmul.f32 %v3324_v48, %v7469_v36  ;;  %s7858_s27 = sld [smem:[#allocation8 + $0xae]] }
 0x458   : > { %3139 = vrot.lane.b32.xlu0 %v3135_v14, %s8326_s14 }
 0x459   : > { %v7464_v28 = vpop.permute.xlu1 %2740  ;;  %v7467_v26 = vadd.f32 %v2694_v21, %v2638_v53  ;;  %v2934_v53 = vmul.f32 %v2932_v1, %v7197_v7  ;;  %v2938_v21 = vstv %s7524_s11  ;;  %s7841_s11 = sld [smem:[#allocation8 + $0x8a]] }
 0x45a   : > { %v2647_v25 = vpop.permute.xlu0 %2646  ;;  %v2940_v34 = vmul.f32 %v2938_v21, %v7197_v7  ;;  %v2745_v37 = vadd.f32 %v7464_v28, %v7322_v41  ;;  %v2946_v41 = vmul.f32 %v2944_v42, %v7197_v7  ;;  %v2950_v28 = vstv %s7553_s23  ;;  %s7875_s23 = sld [smem:[#allocation8 + $0xd2]] }
 0x45b   : > { %v2652_v30 = vadd.f32 %v2647_v25, %v2540_v23  ;;  %3197 = vrot.lane.b32.xlu1 %v3192_v31, %s8326_s14  ;;  %v3340_v25 = vmul.f32 %v3338_v9, %v7469_v36 }
 0x45c   : > { %3153 = vrot.lane.b32.xlu0 %v3149_v4, %s8326_s14 }
 0x45d   : > { %v7478_v15 = vpop.permute.xlu1 %2754  ;;  %v7481_v49 = vadd.f32 %v2700_v2, %v2652_v30  ;;  %v3297_v2 = vmul.f32 %v3296_v38, %v7508_v27  ;;  %v3366_v38 = vstv %s7559_s22  ;;  %s7885_s22 = sld [smem:[#allocation8 + $0x8f]] }
 0x45e   : > { %v7483_v29 = vpop.permute.xlu0 %2710 }
 0x45f   : > { %3261 = vrot.lane.b32.xlu1 %v3256_v11, %s8336_s26  ;;  %v3352_v11 = vstv %s7544_s7  ;;  %s7869_s7 = sld [smem:[#allocation8 + $0x6b]] }
 0x460   : > { %3167 = vrot.lane.b32.xlu0 %v3163_v52, %s8326_s14 }
 0x461   : > { %v7491_v63 = vpop.permute.xlu1 %2768 }
 0x462   : > { %v7494_v43 = vpop.permute.xlu0 %2724 }
 0x463   : > { %3275 = vrot.lane.b32.xlu1 %v3270_v47, %s8336_s26  ;;  %v3354_v47 = vmul.f32 %v3352_v11, %v7469_v36 }
 0x464   : > { %3181 = vrot.lane.b32.xlu0 %v3177_v58, %s8326_s14 }
 0x465   : > { %v7502_v39 = vpop.permute.xlu1 %2782 }
 0x466   : > { %v7505_v35 = vpop.permute.xlu0 %2738 }
 0x467   : > { %3289 = vrot.lane.b32.xlu1 %v3284_v19, %s8336_s26  ;;  %v3311_v19 = vmul.f32 %v3310_v24, %v7508_v27 }
 0x468   : > { %3195 = vrot.lane.b32.xlu0 %v3191_v54, %s8326_s14  ;;  %v2759_v54 = vadd.f32 %v7478_v15, %v7344_v51  ;;  %v2952_v51 = vmul.f32 %v2950_v28, %v7197_v7 }
 0x469   : > { %v7517_v59 = vpop.permute.xlu1 %2796 }
 0x46a   : > { %v7520_v16 = vpop.permute.xlu0 %2752 }
 0x46b   : > { %3303 = vrot.lane.b32.xlu1 %v3298_v0, %s8336_s26 }
 0x46c   : > { %3259 = vrot.lane.b32.xlu0 %v3255_v5, %s8336_s26  ;;  %v2716_v5 = vadd.f32 %v7483_v29, %v7351_v22  ;;  %v2773_v22 = vadd.f32 %v7491_v63, %v7366_v56  ;;  %v3380_v29 = vstv %s7576_s9  ;;  %v3339_v56 = vmul.f32 %v3338_v9, %v7508_v27  ;;  %s7903_s9 = sld [smem:[#allocation8 + $0xb3]] }
 0x46d   : > { %v7530_v40 = vpop.permute.xlu1 %2810 }
 0x46e   : > { %v7533_v8 = vpop.permute.xlu0 %2766 }
 0x46f   : > { %3317 = vrot.lane.b32.xlu1 %v3312_v18, %s8336_s26  ;;  %v3368_v18 = vmul.f32 %v3366_v38, %v7469_v36 }
 0x470   : > { %3273 = vrot.lane.b32.xlu0 %v3269_v33, %s8336_s26 }
 0x471   : > { %v2825_v6 = vpop.permute.xlu1 %2824 }
 0x472   : > { %v2829_v61 = vadd.f32 %v2825_v6, %v2717_v10  ;;  %v7547_v14 = vpop.permute.xlu0 %2780  ;;  %v3325_v6 = vmul.f32 %v3324_v48, %v7508_v27 }
 0x473   : > { %3331 = vrot.lane.b32.xlu1 %v3326_v3, %s8336_s26  ;;  %v2933_v3 = vmul.f32 %v2932_v1, %v7239_v12  ;;  %v3382_v1 = vmul.f32 %v3380_v29, %v7469_v36 }
 0x474   : > { %3287 = vrot.lane.b32.xlu0 %v3283_v17, %s8336_s26  ;;  %v7561_v23 = vadd.f32 %v2934_v53, %v2829_v61  ;;  %v2956_v61 = vstv %s7570_s21  ;;  %v2730_v17 = vadd.f32 %v7494_v43, %v7373_v44  ;;  %v2787_v44 = vadd.f32 %v7502_v39, %v7390_v50  ;;  %s7893_s21 = sld [smem:[#allocation8 + $0xf6]] }
 0x475   : > { %v2839_v31 = vpop.permute.xlu1 %2838  ;;  %v2958_v63 = vmul.f32 %v2956_v61, %v7197_v7  ;;  %v3394_v43 = vstv %s7595_s0  ;;  %v3353_v50 = vmul.f32 %v3352_v11, %v7508_v27  ;;  %s7921_s0 = sld [smem:[#allocation8 + $0xd7]] }
 0x476   : > { %v2843_v4 = vadd.f32 %v2839_v31, %v2731_v20  ;;  %v7564_v30 = vpop.permute.xlu0 %2794 }
 0x477   : > { %3345 = vrot.lane.b32.xlu1 %v3340_v25, %s8336_s26 }
 0x478   : > { %3301 = vrot.lane.b32.xlu0 %v3297_v2, %s8336_s26  ;;  %v7578_v52 = vadd.f32 %v2940_v34, %v2843_v4  ;;  %v2939_v2 = vmul.f32 %v2938_v21, %v7239_v12  ;;  %v2962_v34 = vstv %s7589_s1  ;;  %s7911_s1 = sld [smem:[#allocation8 + $0x11a]] }
 0x479   : > { %v2853_v45 = vpop.permute.xlu1 %2852  ;;  %v2964_v39 = vmul.f32 %v2962_v34, %v7197_v7 }
 0x47a   : > { %v2857_v58 = vadd.f32 %v2853_v45, %v2745_v37  ;;  %v7581_v46 = vpop.permute.xlu0 %2808  ;;  %v2744_v37 = vadd.f32 %v7505_v35, %v7395_v55  ;;  %v3396_v45 = vmul.f32 %v3394_v43, %v7469_v36  ;;  %v2801_v55 = vadd.f32 %v7517_v59, %v7412_v32 }
 0x47b   : > { %3359 = vrot.lane.b32.xlu1 %v3354_v47, %s8336_s26  ;;  %v3408_v35 = vstv %s7615_s3  ;;  %v3367_v32 = vmul.f32 %v3366_v38, %v7508_v27  ;;  %s7990_s3 = sld [smem:[#allocation8 + $0x21]] }
 0x47c   : > { %3315 = vrot.lane.b32.xlu0 %v3311_v19, %s8336_s26  ;;  %v7597_v0 = vadd.f32 %v2946_v41, %v2857_v58 }
 0x47d   : > { %v2867_v24 = vpop.permute.xlu1 %2866 }
 0x47e   : > { %v2871_v33 = vadd.f32 %v2867_v24, %v2759_v54  ;;  %v2823_v10 = vpop.permute.xlu0 %2822  ;;  %v2945_v54 = vmul.f32 %v2944_v42, %v7239_v12  ;;  %v2758_v24 = vadd.f32 %v7520_v16, %v7417_v60  ;;  %v3410_v42 = vmul.f32 %v3408_v35, %v7469_v36 }
 0x47f   : > { %v2828_v15 = vadd.f32 %v2823_v10, %v2716_v5  ;;  %3373 = vrot.lane.b32.xlu1 %v3368_v18, %s8326_s14  ;;  %v2968_v5 = vstv %s7609_s2  ;;  %v2815_v60 = vadd.f32 %v7530_v40, %v7430_v57  ;;  %v3422_v16 = vstv %s7637_s15  ;;  %s7953_s2 = sld [smem:[#allocation8 + $0x11f]] }
 0x480   : > { %3329 = vrot.lane.b32.xlu0 %v3325_v6, %s8336_s26  ;;  %v7617_v48 = vadd.f32 %v2952_v51, %v2871_v33  ;;  %v2970_v59 = vmul.f32 %v2968_v5, %v7197_v7  ;;  %v3381_v57 = vmul.f32 %v3380_v29, %v7508_v27  ;;  %v2786_v29 = vadd.f32 %v7547_v14, %v7453_v13  ;;  %s8013_s15 = sld [smem:[#allocation8 + $0x8d]] }
 0x481   : > { %v2881_v53 = vpop.permute.xlu1 %2880  ;;  %v7622_v20 = vadd.f32 %v2933_v3, %v2828_v15  ;;  %v2951_v15 = vmul.f32 %v2950_v28, %v7239_v12  ;;  %v2974_v3 = vstv %s7631_s13  ;;  %v3450_v13 = vstv %s7679_s12  ;;  %s7998_s13 = sld [smem:[#allocation8 + $0x45]] }
 0x482   : > { %v2885_v31 = vadd.f32 %v2881_v53, %v2773_v22  ;;  %v2837_v25 = vpop.permute.xlu0 %2836  ;;  %v2772_v22 = vadd.f32 %v7533_v8, %v7437_v62  ;;  %v3424_v53 = vmul.f32 %v3422_v16, %v7469_v36  ;;  %v2976_v40 = vmul.f32 %v2974_v3, %v7197_v7  ;;  %s8027_s12 = sld [smem:[#allocation8 + $0xd5]] }
 0x483   : > { %v2842_v4 = vadd.f32 %v2837_v25, %v2730_v17  ;;  %3387 = vrot.lane.b32.xlu1 %v3382_v1, %s8326_s14  ;;  %v3436_v62 = vstv %s7659_s10  ;;  %v2800_v14 = vadd.f32 %v7564_v30, %v7467_v26  ;;  %v3464_v26 = vstv %s7696_s6  ;;  %s8021_s10 = sld [smem:[#allocation8 + $0xb1]] }
 0x484   : > { %3343 = vrot.lane.b32.xlu0 %v3339_v56, %s8336_s26  ;;  %v7639_v9 = vadd.f32 %v2958_v63, %v2885_v31  ;;  %v2957_v56 = vmul.f32 %v2956_v61, %v7239_v12  ;;  %v3438_v7 = vmul.f32 %v3436_v62, %v7469_v36  ;;  %v2814_v30 = vadd.f32 %v7581_v46, %v7481_v49  ;;  %s8036_s6 = sld [smem:[#allocation8 + $0xf9]] }
 0x485   : > { %v2895_v21 = vpop.permute.xlu1 %2894  ;;  %v7644_v47 = vadd.f32 %v2939_v2, %v2842_v4  ;;  %v3528_v49 = vstv %s7715_s5  ;;  %s8045_s5 = sld [smem:[#allocation8 + $0x11d]] }
 0x486   : > { %v2899_v58 = vadd.f32 %v2895_v21, %v2787_v44  ;;  %v2851_v19 = vpop.permute.xlu0 %2850  ;;  %v3395_v44 = vmul.f32 %v3394_v43, %v7508_v27  ;;  %v2963_v21 = vmul.f32 %v2962_v34, %v7239_v12 }
 0x487   : > { %v2856_v41 = vadd.f32 %v2851_v19, %v2744_v37  ;;  %3401 = vrot.lane.b32.xlu1 %v3396_v45, %s8326_s14  ;;  %v3452_v45 = vmul.f32 %v3450_v13, %v7469_v36 }
 0x488   : > { %3357 = vrot.lane.b32.xlu0 %v3353_v50, %s8336_s26  ;;  %v7661_v11 = vadd.f32 %v2964_v39, %v2899_v58  ;;  %v3409_v50 = vmul.f32 %v3408_v35, %v7508_v27  ;;  %v2969_v39 = vmul.f32 %v2968_v5, %v7239_v12 }
 0x489   : > { %v2909_v18 = vpop.permute.xlu1 %2908  ;;  %v7666_v33 = vadd.f32 %v2945_v54, %v2856_v41 }
 0x48a   : > { %v2913_v10 = vadd.f32 %v2909_v18, %v2801_v55  ;;  %v2865_v6 = vpop.permute.xlu0 %2864  ;;  %v7737_v55 = vld [vmem:[#allocation2 + $0x52] sm:$0xff] }
 0x48b   : > { %v2870_v51 = vadd.f32 %v2865_v6, %v2758_v24  ;;  %3415 = vrot.lane.b32.xlu1 %v3410_v42, %s8326_s14  ;;  %v3423_v24 = vmul.f32 %v3422_v16, %v7508_v27  ;;  %v2975_v42 = vmul.f32 %v2974_v3, %v7239_v12  ;;  %v3542_v12 = vstv %s7730_s28  ;;  %s8396_s28 = sld [smem:[#allocation24_spill]] }
 0x48c   : > { %3371 = vrot.lane.b32.xlu0 %v3367_v32, %s8326_s14  ;;  %v7681_v38 = vadd.f32 %v2970_v59, %v2913_v10  ;;  %v3530_v10 = vmul.f32 %v3528_v49, %v7737_v55  ;;  %v3437_v59 = vmul.f32 %v3436_v62, %v7508_v27  ;;  %v3544_v3 = vmul.f32 %v3542_v12, %v7737_v55 }
 0x48d   : > { %v2923_v17 = vpop.permute.xlu1 %2922  ;;  %v7686_v28 = vadd.f32 %v2951_v15, %v2870_v51  ;;  %v3451_v16 = vmul.f32 %v3450_v13, %v7508_v27 }
 0x48e   : > { %v2927_v1 = vadd.f32 %v2923_v17, %v2815_v60  ;;  %v2879_v31 = vpop.permute.xlu0 %2878 }
 0x48f   : > { %v2884_v25 = vadd.f32 %v2879_v31, %v2772_v22  ;;  %3429 = vrot.lane.b32.xlu1 %v3424_v53, %s8326_s14  ;;  %v3556_v22 = vstv %s7747_s24  ;;  %v3465_v31 = vmul.f32 %v3464_v26, %v7508_v27 }
 0x490   : > { %3385 = vrot.lane.b32.xlu0 %v3381_v57, %s8326_s14  ;;  %v7698_v8 = vadd.f32 %v2976_v40, %v2927_v1  ;;  %v3558_v53 = vmul.f32 %v3556_v22, %v7737_v55  ;;  %v7782_v57 = vld [vmem:[#allocation2 + $0x4a] sm:$0xff]  ;;  %v3570_v40 = vstv %s7762_s17 }
 0x491   : > { %v2988_v63 = vpop.permute.xlu1 %2987  ;;  %v7703_v4 = vadd.f32 %v2957_v56, %v2884_v25  ;;  %s3946_s24 = sshll.u32 %s8396_s28, 7 }
 0x492   : > { %v7706_v2 = vadd.f32 %v2988_v63, %v7561_v23  ;;  %v2893_v61 = vpop.permute.xlu0 %2892  ;;  %v3584_v63 = vstv %s7775_s25  ;;  %s8097_s17 = scalar_lea.vmem [#allocation10], %s3946_s24  ;;  %s8397_s25 = sld [smem:[#allocation19_spill]] }
 0x493   : > { %v2898_v37 = vadd.f32 %v2893_v61, %v2786_v29  ;;  %3443 = vrot.lane.b32.xlu1 %v3438_v7, %s8326_s14  ;;  %v3586_v61 = vmul.f32 %v3584_v63, %v7737_v55 }
 0x494   : > { %3399 = vrot.lane.b32.xlu0 %v3395_v44, %s8326_s14 }
 0x495   : > { %v3002_v23 = vpop.permute.xlu1 %3001  ;;  %v7720_v58 = vadd.f32 %v2963_v21, %v2898_v37  ;;  %v3598_v21 = vstv %s7790_s20  ;;  %s8398_s20 = sld [smem:[#allocation22_spill]] }
 0x496   : > { %v7723_v43 = vadd.f32 %v3002_v23, %v7578_v52  ;;  %v2907_v19 = vpop.permute.xlu0 %2906  ;;  %v3466_v52 = vmul.f32 %v3464_v26, %v7469_v36 }
 0x497   : > { %v2912_v34 = vadd.f32 %v2907_v19, %v2800_v14  ;;  %3457 = vrot.lane.b32.xlu1 %v3452_v45, %s8326_s14  ;;  %v3600_v14 = vmul.f32 %v3598_v21, %v7737_v55 }
 0x498   : > { %3413 = vrot.lane.b32.xlu0 %v3409_v50, %s8326_s14 }
 0x499   : > { %v3016_v41 = vpop.permute.xlu1 %3015  ;;  %v7735_v54 = vadd.f32 %v2969_v39, %v2912_v34  ;;  %v3612_v34 = vstv %s7805_s18  ;;  %s3837_s18 = sshll.u32 %s8097_s17, 4  ;;  %s8159_s18 = int_to_ptr.vmem [resolvable:$true] %s3837_s18 }
 0x49a   : > { %v7740_v35 = vadd.f32 %v3016_v41, %v7597_v0  ;;  %v2921_v5 = vpop.permute.xlu0 %2920 }
 0x49b   : > { %v2926_v18 = vadd.f32 %v2921_v5, %v2814_v30  ;;  %3471 = vrot.lane.b32.xlu1 %v3466_v52, %s8326_s14  ;;  %v3212_v30 = vstv %s7808_s30  ;;  %v3571_v52 = vmul.f32 %v3570_v40, %v7782_v57  ;;  %p8400_p10 = scmp.ne.s32.totalorder %s8398_s20, 0 }
 0x49c   : > { %3427 = vrot.lane.b32.xlu0 %v3423_v24, %s8326_s14  ;;  %v3214_v5 = vmul.f32 %v3212_v30, %v7469_v36 }
 0x49d   : > { %v3030_v46 = vpop.permute.xlu1 %3029  ;;  %v7750_v6 = vadd.f32 %v2975_v42, %v2926_v18  ;;  %v3626_v18 = vstv %s7820_s29 }
 0x49e   : > { %v7753_v0 = vadd.f32 %v3030_v46, %v7617_v48  ;;  %v2986_v32 = vpop.permute.xlu0 %2985  ;;  %v3218_v46 = vstv %s7824_s8  ;;  %s8399_s8 = sld [smem:[#allocation53_spill]] }
 0x49f   : > { %v7757_v51 = vadd.f32 %v2986_v32, %v7622_v20  ;;  %3535 = vrot.lane.b32.xlu1 %v3530_v10, %s8336_s26  ;;  %v3585_v32 = vmul.f32 %v3584_v63, %v7782_v57 }
 0x4a0   : > { %3441 = vrot.lane.b32.xlu0 %v3437_v59, %s8326_s14  ;;  %v3220_v59 = vmul.f32 %v3218_v46, %v7469_v36 }
 0x4a1   : > { %v3044_v15 = vpop.permute.xlu1 %3043 }
 0x4a2   : > { %v7766_v48 = vadd.f32 %v3044_v15, %v7639_v9  ;;  %v3000_v60 = vpop.permute.xlu0 %2999  ;;  %v3640_v15 = vstv %s7835_s4 }
 0x4a3   : > { %v7770_v20 = vadd.f32 %v3000_v60, %v7644_v47  ;;  %3549 = vrot.lane.b32.xlu1 %v3544_v3, %s8336_s26 }
 0x4a4   : > { %3455 = vrot.lane.b32.xlu0 %v3451_v16, %s8326_s14  ;;  %v3224_v16 = vstv %s7841_s11  ;;  %s3824_s11 = scalar_lea.sflag [#allocation5], %s8396_s28 }
 0x4a5   : > { %v3058_v17 = vpop.permute.xlu1 %3057 }
 0x4a6   : > { %v7779_v9 = vadd.f32 %v3058_v17, %v7661_v11  ;;  %v3014_v1 = vpop.permute.xlu0 %3013  ;;  %v3572_v11 = vmul.f32 %v3570_v40, %v7737_v55  ;;  %v3599_v17 = vmul.f32 %v3598_v21, %v7782_v57  ;;  %v3654_v40 = vstv %s7852_s19  ;;  %s4431_s19 = scalar_lea.vmem %s8159_s18, 2048 }
 0x4a7   : > { %v7785_v47 = vadd.f32 %v3014_v1, %v7666_v33  ;;  %3563 = vrot.lane.b32.xlu1 %v3558_v53, %s8336_s26  ;;  %v3529_v33 = vmul.f32 %v3528_v49, %v7782_v57  ;;  %v3226_v53 = vmul.f32 %v3224_v16, %v7469_v36  ;;  %v3668_v21 = vstv %s7869_s7  ;;  %p4432_p9 = scmp.ne.s32.totalorder %s8159_s18, %s4431_s19 }
 0x4a8   : > { %3469 = vrot.lane.b32.xlu0 %v3465_v31, %s8326_s14 }
 0x4a9   : > { %v3072_v25 = vpop.permute.xlu1 %3071  ;;  %p4433_p2 = pnand %p4432_p9, %p8400_p10 }
 0x4aa   : > { %v7796_v56 = vadd.f32 %v3072_v25, %v7681_v38  ;;  %v3028_v62 = vpop.permute.xlu0 %3027 }
 0x4ab   : > { %v7800_v29 = vadd.f32 %v3028_v62, %v7686_v28  ;;  %3577 = vrot.lane.b32.xlu1 %v3572_v11, %s8336_s26  ;;  %v3543_v28 = vmul.f32 %v3542_v12, %v7782_v57  ;;  %v3656_v11 = vmul.f32 %v3654_v40, %v7737_v55  ;;  %p4434_p0 = pneg %p4433_p2 }
 0x4ac   : > { %3533 = vrot.lane.b32.xlu0 %v3529_v33, %s8336_s26  ;;  %v3230_v33 = vstv %s7858_s27  ;;  %s4514_s27 = smov [#allocation10]  }
 0x4ad   : > { %v3086_v7 = vpop.permute.xlu1 %3085  ;;  %s4435_s7 = sshll.u32 %s4514_s27, 4  ;;  %s4436_s7 = int_to_ptr.vmem [resolvable:$false] %s4435_s7 }
 0x4ae   : > { %v7811_v38 = vadd.f32 %v3086_v7, %v7698_v8  ;;  %v3042_v44 = vpop.permute.xlu0 %3041  ;;  %v3206_v8 = vstv %s7793_s16  ;;  %v3613_v7 = vmul.f32 %v3612_v34, %v7782_v57  ;;  %s4261_s16 = sshll.u32 %s8397_s25, 11  ;;  %p4438_p4 = scmp.lt.s32.totalorder %s8159_s18, %s4436_s7 }
 0x4af   : > { %v7815_v37 = vadd.f32 %v3042_v44, %v7703_v4  ;;  %3591 = vrot.lane.b32.xlu1 %v3586_v61, %s8336_s26  ;;  %v3557_v4 = vmul.f32 %v3556_v22, %v7782_v57  ;;  %v3208_v19 = vmul.f32 %v3206_v8, %v7469_v36  ;;  %v3207_v31 = vmul.f32 %v3206_v8, %v7508_v27  ;;  %s8157_s4 = scalar_lea.hbm %s8399_s8, %s4261_s16 }
 0x4b0   : > { %3547 = vrot.lane.b32.xlu0 %v3543_v28, %s8336_s26  ;;  %v3232_v61 = vmul.f32 %v3230_v33, %v7469_v36  ;;  %v3213_v28 = vmul.f32 %v3212_v30, %v7508_v27 }
 0x4b1   : > { %v3100_v13 = vpop.permute.xlu1 %3099 }
 0x4b2   : > { %v3104_v23 = vadd.f32 %v3100_v13, %v7706_v2  ;;  %v3056_v45 = vpop.permute.xlu0 %3055  ;;  %v3614_v2 = vmul.f32 %v3612_v34, %v7737_v55 }
 0x4b3   : > { %v7830_v50 = vadd.f32 %v3056_v45, %v7720_v58  ;;  %3605 = vrot.lane.b32.xlu1 %v3600_v14, %s8336_s26  ;;  %v3670_v14 = vmul.f32 %v3668_v21, %v7737_v55 }
 0x4b4   : > { %3561 = vrot.lane.b32.xlu0 %v3557_v4, %s8336_s26  ;;  %v7837_v39 = vadd.f32 %v3208_v19, %v3104_v23  ;;  %v3236_v23 = vstv %s7875_s23  ;;  %v3627_v4 = vmul.f32 %v3626_v18, %v7782_v57  ;;  %s4437_s23 = scalar_lea.vmem %s4436_s7, 4096 }
 0x4b5   : > { %v3114_v26 = vpop.permute.xlu1 %3113  ;;  %v3238_v19 = vmul.f32 %v3236_v23, %v7469_v36  ;;  %p4439_p5 = scmp.lt.s32.totalorder %s4437_s23, %s4431_s19 }
 0x4b6   : > { %v3118_v58 = vadd.f32 %v3114_v26, %v7723_v43  ;;  %v3070_v41 = vpop.permute.xlu0 %3069  ;;  %v3628_v43 = vmul.f32 %v3626_v18, %v7737_v55  ;;  %v3219_v26 = vmul.f32 %v3218_v46, %v7508_v27  ;;  %v3641_v18 = vmul.f32 %v3640_v15, %v7782_v57 }
 0x4b7   : > { %v7847_v24 = vadd.f32 %v3070_v41, %v7735_v54  ;;  %3619 = vrot.lane.b32.xlu1 %v3614_v2, %s8336_s26  ;;  %v3682_v2 = vstv %s7885_s22  ;;  %v3225_v46 = vmul.f32 %v3224_v16, %v7508_v27  ;;  %p4440_p1 = por %p4439_p5, %p4438_p4 }
 0x4b8   : > { %3575 = vrot.lane.b32.xlu0 %v3571_v52, %s8336_s26  ;;  %v7854_v42 = vadd.f32 %v3214_v5, %v3118_v58  ;;  %v3684_v58 = vmul.f32 %v3682_v2, %v7737_v55  ;;  %v3242_v52 = vstv %s7893_s21 }
 0x4b9   : > { %v3128_v49 = vpop.permute.xlu1 %3127  ;;  %p4441_p8 = pnand %p4440_p1, %p4434_p0 }
 0x4ba   : > { %v3132_v54 = vadd.f32 %v3128_v49, %v7740_v35  ;;  %v3084_v10 = vpop.permute.xlu0 %3083  ;;  %v3642_v35 = vmul.f32 %v3640_v15, %v7737_v55  ;;  %v3244_v49 = vmul.f32 %v3242_v52, %v7469_v36  ;;  %v3248_v15 = vstv %s7911_s1 }
 0x4bb   : > { %v7864_v12 = vadd.f32 %v3084_v10, %v7750_v6  ;;  %3633 = vrot.lane.b32.xlu1 %v3628_v43, %s8336_s26  ;;  %v3250_v16 = vmul.f32 %v3248_v15, %v7469_v36 }
 0x4bc   : > { %3589 = vrot.lane.b32.xlu0 %v3585_v32, %s8336_s26  ;;  %v7871_v3 = vadd.f32 %v3220_v59, %v3132_v54  ;;  %v3696_v54 = vstv %s7903_s9 }
 0x4bd   : > { %v3142_v60 = vpop.permute.xlu1 %3141  ;;  %v3698_v32 = vmul.f32 %v3696_v54, %v7737_v55 }
 0x4be   : > { %v3146_v6 = vadd.f32 %v3142_v60, %v7753_v0  ;;  %v3098_v22 = vpop.permute.xlu0 %3097 }
 0x4bf   : > { %v3103_v1 = vadd.f32 %v3098_v22, %v7757_v51  ;;  %3647 = vrot.lane.b32.xlu1 %v3642_v35, %s8326_s14  ;;  %v3655_v35 = vmul.f32 %v3654_v40, %v7782_v57  ;;  %v3231_v22 = vmul.f32 %v3230_v33, %v7508_v27 }
 0x4c0   : > { %3603 = vrot.lane.b32.xlu0 %v3599_v17, %s8336_s26  ;;  %v7887_v25 = vadd.f32 %v3226_v53, %v3146_v6  ;;  %v3710_v17 = vstv %s7921_s0 }
 0x4c1   : > { %v3156_v0 = vpop.permute.xlu1 %3155  ;;  %v7890_v62 = vadd.f32 %v3207_v31, %v3103_v1 }
 0x4c2   : > { %v3160_v51 = vadd.f32 %v3156_v0, %v7766_v48  ;;  %v3112_v63 = vpop.permute.xlu0 %3111 }
 0x4c3   : > { %v3117_v44 = vadd.f32 %v3112_v63, %v7770_v20  ;;  %3661 = vrot.lane.b32.xlu1 %v3656_v11, %s8326_s14  ;;  %v3237_v11 = vmul.f32 %v3236_v23, %v7508_v27 }
 0x4c4   : > { %3617 = vrot.lane.b32.xlu0 %v3613_v7, %s8336_s26  ;;  %v7905_v13 = vadd.f32 %v3232_v61, %v3160_v51 }
 0x4c5   : > { %v3170_v48 = vpop.permute.xlu1 %3169  ;;  %v7908_v8 = vadd.f32 %v3213_v28, %v3117_v44  ;;  %v3683_v44 = vmul.f32 %v3682_v2, %v7782_v57 }
 0x4c6   : > { %v3174_v20 = vadd.f32 %v3170_v48, %v7779_v9  ;;  %v3126_v45 = vpop.permute.xlu0 %3125 }
 0x4c7   : > { %v3131_v34 = vadd.f32 %v3126_v45, %v7785_v47  ;;  %3675 = vrot.lane.b32.xlu1 %v3670_v14, %s8326_s14 }
 0x4c8   : > { %3631 = vrot.lane.b32.xlu0 %v3627_v4, %s8336_s26  ;;  %v7923_v30 = vadd.f32 %v3238_v19, %v3174_v20  ;;  %s7937_s26 = sld [smem:[#allocation8 + $0xfb]] }
 0x4c9   : > { %v3184_v9 = vpop.permute.xlu1 %3183  ;;  %v7926_v41 = vadd.f32 %v3219_v26, %v3131_v34 }
 0x4ca   : > { %v3188_v47 = vadd.f32 %v3184_v9, %v7796_v56  ;;  %v3140_v5 = vpop.permute.xlu0 %3139  ;;  %v3711_v9 = vmul.f32 %v3710_v17, %v7782_v57 }
 0x4cb   : > { %v3145_v43 = vadd.f32 %v3140_v5, %v7800_v29  ;;  %3689 = vrot.lane.b32.xlu1 %v3684_v58, %s8326_s14 }
 0x4cc   : > { %3645 = vrot.lane.b32.xlu0 %v3641_v18, %s8326_s14  ;;  %v7939_v10 = vadd.f32 %v3244_v49, %v3188_v47 }
 0x4cd   : > { %v3198_v56 = vpop.permute.xlu1 %3197  ;;  %v7942_v59 = vadd.f32 %v3225_v46, %v3145_v43 }
 0x4ce   : > { %v3202_v29 = vadd.f32 %v3198_v56, %v7811_v38  ;;  %v3154_v60 = vpop.permute.xlu0 %3153  ;;  %v3712_v38 = vmul.f32 %v3710_v17, %v7737_v55  ;;  %v3724_v33 = vstv %s7937_s26 }
 0x4cf   : > { %v3159_v6 = vadd.f32 %v3154_v60, %v7815_v37  ;;  %3703 = vrot.lane.b32.xlu1 %v3698_v32, %s8326_s14  ;;  %v3669_v37 = vmul.f32 %v3668_v21, %v7782_v57  ;;  %v3726_v63 = vmul.f32 %v3724_v33, %v7737_v55  ;;  %v3738_v21 = vstv %s7953_s2 }
 0x4d0   : > { %3659 = vrot.lane.b32.xlu0 %v3655_v35, %s8326_s14  ;;  %v3252_v53 = vadd.f32 %v3250_v16, %v3202_v29  ;;  %v3740_v14 = vmul.f32 %v3738_v21, %v7737_v55  ;;  %v3725_v47 = vmul.f32 %v3724_v33, %v7782_v57  ;;  %v3739_v49 = vmul.f32 %v3738_v21, %v7782_v57 }
 0x4d1   : > { %v3262_v1 = vpop.permute.xlu1 %3261  ;;  %v3233_v31 = vadd.f32 %v3231_v22, %v3159_v6  ;;  %v3486_v6 = vstv %s7998_s13 }
 0x4d2   : > { %v3266_v40 = vadd.f32 %v3262_v1, %v7837_v39  ;;  %v3168_v36 = vpop.permute.xlu0 %3167 }
 0x4d3   : > { %v3173_v0 = vadd.f32 %v3168_v36, %v7830_v50  ;;  %3717 = vrot.lane.b32.xlu1 %v3712_v38, %s8326_s14  ;;  %v3243_v50 = vmul.f32 %v3242_v52, %v7508_v27 }
 0x4d4   : > { %3673 = vrot.lane.b32.xlu0 %v3669_v37, %s8326_s14 }
 0x4d5   : > { %v3276_v51 = vpop.permute.xlu1 %3275  ;;  %v3239_v7 = vadd.f32 %v3237_v11, %v3173_v0 }
 0x4d6   : > { %v3280_v61 = vadd.f32 %v3276_v51, %v7854_v42  ;;  %v3182_v39 = vpop.permute.xlu0 %3181  ;;  %v3697_v42 = vmul.f32 %v3696_v54, %v7782_v57 }
 0x4d7   : > { %v3187_v28 = vadd.f32 %v3182_v39, %v7847_v24  ;;  %3731 = vrot.lane.b32.xlu1 %v3726_v63, %s8326_s14  ;;  %v3249_v24 = vmul.f32 %v3248_v15, %v7508_v27  ;;  %v3480_v15 = vstv %s7990_s3  ;;  %v3498_v63 = vstv %s8013_s15 }
 0x4d8   : > { %3687 = vrot.lane.b32.xlu0 %v3683_v44, %s8326_s14  ;;  %v3482_v60 = vmul.f32 %v3480_v15, %v7737_v55  ;;  %v3500_v39 = vmul.f32 %v3498_v63, %v7737_v55 }
 0x4d9   : > { %v3290_v48 = vpop.permute.xlu1 %3289  ;;  %v3245_v23 = vadd.f32 %v3243_v50, %v3187_v28  ;;  %v3481_v28 = vmul.f32 %v3480_v15, %v7782_v57 }
 0x4da   : > { %v3294_v20 = vadd.f32 %v3290_v48, %v7871_v3  ;;  %v3196_v45 = vpop.permute.xlu0 %3195 }
 0x4db   : > { %v3201_v4 = vadd.f32 %v3196_v45, %v7864_v12  ;;  %3745 = vrot.lane.b32.xlu1 %v3740_v14, %s8326_s14  ;;  %v3504_v14 = vstv %s8021_s10 }
 0x4dc   : > { %3701 = vrot.lane.b32.xlu0 %v3697_v42, %s8326_s14  ;;  %v3506_v45 = vmul.f32 %v3504_v14, %v7737_v55 }
 0x4dd   : > { %v3304_v19 = vpop.permute.xlu1 %3303  ;;  %v3251_v34 = vadd.f32 %v3249_v24, %v3201_v4  ;;  %v3487_v4 = vmul.f32 %v3486_v6, %v7782_v57 }
 0x4de   : > { %v3308_v26 = vadd.f32 %v3304_v19, %v7887_v25  ;;  %v3260_v2 = vpop.permute.xlu0 %3259 }
 0x4df   : > { %v3265_v3 = vadd.f32 %v3260_v2, %v7890_v62 }
 0x4e0   : > { %3715 = vrot.lane.b32.xlu0 %v3711_v9, %s8326_s14 }
 0x4e1   : > { %v3318_v58 = vpop.permute.xlu1 %3317 }
 0x4e2   : > { %v3322_v12 = vadd.f32 %v3318_v58, %v7905_v13  ;;  %v3274_v52 = vpop.permute.xlu0 %3273 }
 0x4e3   : > { %v3279_v27 = vadd.f32 %v3274_v52, %v7908_v8 }
 0x4e4   : > { %3729 = vrot.lane.b32.xlu0 %v3725_v47, %s8326_s14 }
 0x4e5   : > { %v3332_v5 = vpop.permute.xlu1 %3331 }
 0x4e6   : > { %v3336_v25 = vadd.f32 %v3332_v5, %v7923_v30  ;;  %v3288_v18 = vpop.permute.xlu0 %3287  ;;  %v3516_v5 = vstv %s8036_s6 }
 0x4e7   : > { %v3293_v62 = vadd.f32 %v3288_v18, %v7926_v41 }
 0x4e8   : > { %3743 = vrot.lane.b32.xlu0 %v3739_v49, %s8326_s14  ;;  %s8005_s14 = sld [smem:[#allocation8 + $0x69]] }
 0x4e9   : > { %v3346_v43 = vpop.permute.xlu1 %3345 }
 0x4ea   : > { %v7993_v13 = vadd.f32 %v3346_v43, %v7939_v10  ;;  %v3302_v8 = vpop.permute.xlu0 %3301  ;;  %v3518_v43 = vmul.f32 %v3516_v5, %v7737_v55 }
 0x4eb   : > { %v7996_v46 = vadd.f32 %v3302_v8, %v7942_v59  ;;  %v3499_v8 = vmul.f32 %v3498_v63, %v7782_v57 }
 0x4ed   : > { %v3360_v54 = vpop.permute.xlu1 %3359 }
 0x4ee   : > { %v8000_v30 = vadd.f32 %v3360_v54, %v3252_v53  ;;  %v3316_v41 = vpop.permute.xlu0 %3315  ;;  %v3488_v53 = vmul.f32 %v3486_v6, %v7737_v55 }
 0x4ef   : > { %v8002_v56 = vadd.f32 %v3316_v41, %v3233_v31 }
 0x4f1   : > { %v3374_v32 = vpop.permute.xlu1 %3373 }
 0x4f2   : > { %v3378_v10 = vadd.f32 %v3374_v32, %v3266_v40  ;;  %v3330_v29 = vpop.permute.xlu0 %3329  ;;  %v3492_v40 = vstv %s8005_s14  ;;  %v3522_v32 = vstv %s8045_s5 }
 0x4f3   : > { %v8008_v59 = vadd.f32 %v3330_v29, %v3239_v7  ;;  %v3494_v0 = vmul.f32 %v3492_v40, %v7737_v55  ;;  %v3524_v29 = vmul.f32 %v3522_v32, %v7737_v55  ;;  %v3523_v63 = vmul.f32 %v3522_v32, %v7782_v57 }
 0x4f4   : > { %v8010_v35 = vadd.f32 %v3482_v60, %v3378_v10  ;;  %v3505_v60 = vmul.f32 %v3504_v14, %v7782_v57 }
 0x4f5   : > { %v3388_v16 = vpop.permute.xlu1 %3387 }
 0x4f6   : > { %v3392_v22 = vadd.f32 %v3388_v16, %v3280_v61  ;;  %v3344_v17 = vpop.permute.xlu0 %3343 }
 0x4f7   : > { %v8016_v1 = vadd.f32 %v3344_v17, %v3245_v23 }
 0x4f8   : > { %v8018_v38 = vadd.f32 %v3488_v53, %v3392_v22 }
 0x4f9   : > { %v3402_v31 = vpop.permute.xlu1 %3401 }
 0x4fa   : > { %v3406_v36 = vadd.f32 %v3402_v31, %v3294_v20  ;;  %v3358_v37 = vpop.permute.xlu0 %3357 }
 0x4fb   : > { %v3363_v11 = vadd.f32 %v3358_v37, %v3251_v34 }
 0x4fc   : > { %v8024_v33 = vadd.f32 %v3494_v0, %v3406_v36 }
 0x4fd   : > { %v3416_v51 = vpop.permute.xlu1 %3415 }
 0x4fe   : > { %v3420_v7 = vadd.f32 %v3416_v51, %v3308_v26  ;;  %v3372_v61 = vpop.permute.xlu0 %3371  ;;  %v3510_v26 = vstv %s8027_s12 }
 0x4ff   : > { %v3377_v44 = vadd.f32 %v3372_v61, %v3265_v3  ;;  %v3512_v3 = vmul.f32 %v3510_v26, %v7737_v55  ;;  %v3511_v53 = vmul.f32 %v3510_v26, %v7782_v57 }
 0x500   : > { %v8031_v50 = vadd.f32 %v3500_v39, %v3420_v7 }
 0x501   : > { %v3430_v21 = vpop.permute.xlu1 %3429  ;;  %v8033_v48 = vadd.f32 %v3481_v28, %v3377_v44 }
 0x502   : > { %v3434_v23 = vadd.f32 %v3430_v21, %v3322_v12  ;;  %v3386_v20 = vpop.permute.xlu0 %3385  ;;  %v3493_v12 = vmul.f32 %v3492_v40, %v7782_v57 }
 0x503   : > { %v3391_v42 = vadd.f32 %v3386_v20, %v3279_v27 }
 0x504   : > { %v8040_v24 = vadd.f32 %v3506_v45, %v3434_v23 }
 0x505   : > { %v3444_v19 = vpop.permute.xlu1 %3443  ;;  %v8042_v34 = vadd.f32 %v3487_v4, %v3391_v42 }
 0x506   : > { %v3448_v2 = vadd.f32 %v3444_v19, %v3336_v25  ;;  %v3400_v9 = vpop.permute.xlu0 %3399 }
 0x507   : > { %v3405_v58 = vadd.f32 %v3400_v9, %v3293_v62 }
 0x508   : > { %v8049_v52 = vadd.f32 %v3512_v3, %v3448_v2 }
 0x509   : > { %v3458_v47 = vpop.permute.xlu1 %3457  ;;  %v8051_v27 = vadd.f32 %v3493_v12, %v3405_v58 }
 0x50a   : > { %v3462_v18 = vadd.f32 %v3458_v47, %v7993_v13  ;;  %v3414_v49 = vpop.permute.xlu0 %3413 }
 0x50b   : > { %v3419_v25 = vadd.f32 %v3414_v49, %v7996_v46 }
 0x50c   : > { %v8058_v54 = vadd.f32 %v3518_v43, %v3462_v18 }
 0x50d   : > { %v3472_v62 = vpop.permute.xlu1 %3471  ;;  %v8060_v41 = vadd.f32 %v3499_v8, %v3419_v25 }
 0x50e   : > { %v3476_v15 = vadd.f32 %v3472_v62, %v8000_v30  ;;  %v3428_v10 = vpop.permute.xlu0 %3427 }
 0x50f   : > { %v3433_v13 = vadd.f32 %v3428_v10, %v8002_v56  ;;  %v3517_v56 = vmul.f32 %v3516_v5, %v7782_v57 }
 0x510   : > { %v8067_v16 = vadd.f32 %v3524_v29, %v3476_v15 }
 0x511   : > { %v3536_v46 = vpop.permute.xlu1 %3535  ;;  %v8069_v6 = vadd.f32 %v3505_v60, %v3433_v13 }
 0x512   : > { %v3442_v22 = vpop.permute.xlu0 %3441 }
 0x513   : > { %v3447_v17 = vadd.f32 %v3442_v22, %v8008_v59 }
 0x515   : > { %v3550_v31 = vpop.permute.xlu1 %3549  ;;  %v8073_v40 = vadd.f32 %v3511_v53, %v3447_v17 }
 0x516   : > { %v3456_v30 = vpop.permute.xlu0 %3455  ;;  %v3554_v4 = vadd.f32 %v3550_v31, %v8018_v38 }
 0x517   : > { %v3461_v55 = vadd.f32 %v3456_v30, %v8016_v1 }
 0x519   : > { %v3564_v36 = vpop.permute.xlu1 %3563  ;;  %v8077_v37 = vadd.f32 %v3517_v56, %v3461_v55 }
 0x51a   : > { %v3470_v0 = vpop.permute.xlu0 %3469 }
 0x51b   : > { %v3475_v51 = vadd.f32 %v3470_v0, %v3363_v11  ;;  %v3540_v11 = vadd.f32 %v3536_v46, %v8010_v35  ;;  %v3568_v35 = vadd.f32 %v3564_v36, %v8024_v33 }
 0x51d   : > { %v3578_v7 = vpop.permute.xlu1 %3577  ;;  %v8080_v59 = vadd.f32 %v3523_v63, %v3475_v51 }
 0x51e   : > { %v3534_v61 = vpop.permute.xlu0 %3533  ;;  %v3582_v18 = vadd.f32 %v3578_v7, %v8031_v50 }
 0x51f   : > { %v3539_v43 = vadd.f32 %v3534_v61, %v8033_v48 }
 0x521   : > { %v3592_v39 = vpop.permute.xlu1 %3591 }
 0x522   : > { %v3548_v44 = vpop.permute.xlu0 %3547  ;;  %v3596_v15 = vadd.f32 %v3592_v39, %v8040_v24 }
 0x523   : > { %v3553_v29 = vadd.f32 %v3548_v44, %v8042_v34 }
 0x525   : > { %v3606_v28 = vpop.permute.xlu1 %3605 }
 0x526   : > { %v3562_v21 = vpop.permute.xlu0 %3561  ;;  %v3610_v53 = vadd.f32 %v3606_v28, %v8049_v52 }
 0x527   : > { %v3567_v34 = vadd.f32 %v3562_v21, %v8051_v27 }
 0x529   : > { %v8082_v14 = vpop.permute.xlu1 %3619 }
 0x52a   : > { %v8084_v1 = vpop.permute.xlu0 %3575  ;;  %v3624_v52 = vadd.f32 %v8082_v14, %v8058_v54 }
 0x52b   : > { %v3581_v27 = vadd.f32 %v8084_v1, %v8060_v41 }
 0x52d   : > { %v8086_v23 = vpop.permute.xlu1 %3633 }
 0x52e   : > { %v8088_v20 = vpop.permute.xlu0 %3589  ;;  %v3638_v54 = vadd.f32 %v8086_v23, %v8067_v16 }
 0x52f   : > { %v3595_v41 = vadd.f32 %v8088_v20, %v8069_v6 }
 0x531   : > { %v3648_v45 = vpop.permute.xlu1 %3647 }
 0x532   : > { %v3652_v57 = vadd.f32 %v3648_v45, %v3540_v11  ;;  %v8092_v42 = vpop.permute.xlu0 %3603 }
 0x533   : > { %v3609_v6 = vadd.f32 %v8092_v42, %v8073_v40 }
 0x534   : > { %vm3752_vm7 = vcmp.ge.f32.partialorder %v3652_v57, 0.0  ;;  %v3754_v19 = vmul.f32 0.2, %v3652_v57 }
 0x535   : > { %v3662_v26 = vpop.permute.xlu1 %3661 }
 0x536   : > { %v3756_v2 = vsel %vm3752_vm7, %v3652_v57, %v3754_v19  ;;  %v3666_v9 = vadd.f32 %v3662_v26, %v3554_v4  ;;  %v8095_v3 = vpop.permute.xlu0 %3617 }
 0x537   : > { %3759 = vst.msk [vmem:[%s8097_s17 + $0x8] sm:$0xff] %vm3757_vm6, %v3756_v2 }
 0x538   : > { %vm3761_vm8 = vcmp.ge.f32.partialorder %v3666_v9, 0.0  ;;  %v3763_v58 = vmul.f32 0.2, %v3666_v9 }
 0x539   : > { %v3676_v38 = vpop.permute.xlu1 %3675 }
 0x53a   : > { %v3765_v12 = vsel %vm3761_vm8, %v3666_v9, %v3763_v58  ;;  %v3680_v47 = vadd.f32 %v3676_v38, %v3568_v35  ;;  %v8102_v5 = vpop.permute.xlu0 %3631  ;;  %v3623_v38 = vadd.f32 %v8095_v3, %v8077_v37 }
 0x53b   : > { %4242 = vst.msk [vmem:[%s8097_s17 + $0x18] sm:$0xff] %vm3757_vm6, %v3765_v12 }
 0x53c   : > { %vm3770_vm9 = vcmp.ge.f32.partialorder %v3680_v47, 0.0  ;;  %v3772_v49 = vmul.f32 0.2, %v3680_v47 }
 0x53d   : > { %v3690_v25 = vpop.permute.xlu1 %3689 }
 0x53e   : > { %v3774_v8 = vsel %vm3770_vm9, %v3680_v47, %v3772_v49  ;;  %v3694_v33 = vadd.f32 %v3690_v25, %v3582_v18  ;;  %v3646_v62 = vpop.permute.xlu0 %3645  ;;  %v3637_v18 = vadd.f32 %v8102_v5, %v8080_v59 }
 0x53f   : > { %4244 = vst.msk [vmem:[%s8097_s17 + $0x28] sm:$0xff] %vm3757_vm6, %v3774_v8  ;;  %v3651_v32 = vadd.f32 %v3646_v62, %v3539_v43 }
 0x540   : > { %vm3779_vm10 = vcmp.ge.f32.partialorder %v3694_v33, 0.0  ;;  %v3781_v10 = vmul.f32 0.2, %v3694_v33 }
 0x541   : > { %vm3751_vm11 = vcmp.ge.f32.partialorder %v3651_v32, 0.0  ;;  %v3753_v50 = vmul.f32 0.2, %v3651_v32  ;;  %v3704_v13 = vpop.permute.xlu1 %3703 }
 0x542   : > { %v3783_v60 = vsel %vm3779_vm10, %v3694_v33, %v3781_v10  ;;  %v3708_v48 = vadd.f32 %v3704_v13, %v3596_v15  ;;  %v3660_v46 = vpop.permute.xlu0 %3659 }
 0x543   : > { %4246 = vst.msk [vmem:[%s8097_s17 + $0x38] sm:$0xff] %vm3757_vm6, %v3783_v60  ;;  %v3755_v22 = vsel %vm3751_vm11, %v3651_v32, %v3753_v50  ;;  %v3665_v17 = vadd.f32 %v3660_v46, %v3553_v29 }
 0x544   : > { %3758 = vst.msk [vmem:[%s8097_s17] sm:$0xff] %vm3757_vm6, %v3755_v22  ;;  %vm3788_vm12 = vcmp.ge.f32.partialorder %v3708_v48, 0.0  ;;  %v3790_v24 = vmul.f32 0.2, %v3708_v48 }
 0x545   : > { %vm3760_vm13 = vcmp.ge.f32.partialorder %v3665_v17, 0.0  ;;  %v3762_v31 = vmul.f32 0.2, %v3665_v17  ;;  %v3718_v30 = vpop.permute.xlu1 %3717 }
 0x546   : > { %v3792_v55 = vsel %vm3788_vm12, %v3708_v48, %v3790_v24  ;;  %v3722_v56 = vadd.f32 %v3718_v30, %v3610_v53  ;;  %v3674_v36 = vpop.permute.xlu0 %3673 }
 0x547   : > { %4248 = vst.msk [vmem:[%s8097_s17 + $0x48] sm:$0xff] %vm3757_vm6, %v3792_v55  ;;  %v3764_v0 = vsel %vm3760_vm13, %v3665_v17, %v3762_v31  ;;  %v3679_v51 = vadd.f32 %v3674_v36, %v3567_v34 }
 0x548   : > { %4241 = vst.msk [vmem:[%s8097_s17 + $0x10] sm:$0xff] %vm3757_vm6, %v3764_v0  ;;  %vm3797_vm14 = vcmp.ge.f32.partialorder %v3722_v56, 0.0  ;;  %v3799_v63 = vmul.f32 0.2, %v3722_v56 }
 0x549   : > { %vm3769_vm15 = vcmp.ge.f32.partialorder %v3679_v51, 0.0  ;;  %v3771_v7 = vmul.f32 0.2, %v3679_v51  ;;  %v3732_v61 = vpop.permute.xlu1 %3731 }
 0x54a   : > { %v3801_v39 = vsel %vm3797_vm14, %v3722_v56, %v3799_v63  ;;  %v3736_v44 = vadd.f32 %v3732_v61, %v3624_v52  ;;  %v3688_v28 = vpop.permute.xlu0 %3687 }
 0x54b   : > { %4250 = vst.msk [vmem:[%s8097_s17 + $0x58] sm:$0xff] %vm3757_vm6, %v3801_v39  ;;  %v3773_v21 = vsel %vm3769_vm15, %v3679_v51, %v3771_v7  ;;  %v3693_v11 = vadd.f32 %v3688_v28, %v3581_v27 }
 0x54c   : > { %4243 = vst.msk [vmem:[%s8097_s17 + $0x20] sm:$0xff] %vm3757_vm6, %v3773_v21  ;;  %vm3806_vm0 = vcmp.ge.f32.partialorder %v3736_v44, 0.0  ;;  %v3808_v14 = vmul.f32 0.2, %v3736_v44 }
 0x54d   : > { %vm3778_vm1 = vcmp.ge.f32.partialorder %v3693_v11, 0.0  ;;  %v3780_v1 = vmul.f32 0.2, %v3693_v11  ;;  %v3746_v45 = vpop.permute.xlu1 %3745 }
 0x54e   : > { %v3810_v57 = vsel %vm3806_vm0, %v3736_v44, %v3808_v14  ;;  %v3750_v4 = vadd.f32 %v3746_v45, %v3638_v54  ;;  %v3702_v19 = vpop.permute.xlu0 %3701 }
 0x54f   : > { %4252 = vst.msk [vmem:[%s8097_s17 + $0x68] sm:$0xff] %vm3757_vm6, %v3810_v57  ;;  %v3782_v26 = vsel %vm3778_vm1, %v3693_v11, %v3780_v1  ;;  %v3707_v2 = vadd.f32 %v3702_v19, %v3595_v41 }
 0x550   : > { %4245 = vst.msk [vmem:[%s8097_s17 + $0x30] sm:$0xff] %vm3757_vm6, %v3782_v26  ;;  %vm3815_vm2 = vcmp.ge.f32.partialorder %v3750_v4, 0.0  ;;  %v3817_v16 = vmul.f32 0.2, %v3750_v4 }
 0x551   : > { %vm3787_vm3 = vcmp.ge.f32.partialorder %v3707_v2, 0.0  ;;  %v3789_v23 = vmul.f32 0.2, %v3707_v2 }
 0x552   : > { %v3819_v20 = vsel %vm3815_vm2, %v3750_v4, %v3817_v16  ;;  %v3716_v9 = vpop.permute.xlu0 %3715 }
 0x553   : > { %4254 = vst.msk [vmem:[%s8097_s17 + $0x78] sm:$0xff] %vm3757_vm6, %v3819_v20  ;;  %v3791_v35 = vsel %vm3787_vm3, %v3707_v2, %v3789_v23  ;;  %v3721_v58 = vadd.f32 %v3716_v9, %v3609_v6 }
 0x554   : > { %4247 = vst.msk [vmem:[%s8097_s17 + $0x40] sm:$0xff] %vm3757_vm6, %v3791_v35 }
 0x555   : > { %vm3796_vm4 = vcmp.ge.f32.partialorder %v3721_v58, 0.0  ;;  %v3798_v12 = vmul.f32 0.2, %v3721_v58 }
 0x556   : > { %v3730_v47 = vpop.permute.xlu0 %3729 }
 0x557   : > { %v3800_v40 = vsel %vm3796_vm4, %v3721_v58, %v3798_v12  ;;  %v3735_v42 = vadd.f32 %v3730_v47, %v3623_v38 }
 0x558   : > { %4249 = vst.msk [vmem:[%s8097_s17 + $0x50] sm:$0xff] %vm3757_vm6, %v3800_v40 }
 0x559   : > { %vm3805_vm5 = vcmp.ge.f32.partialorder %v3735_v42, 0.0  ;;  %v3807_v49 = vmul.f32 0.2, %v3735_v42 }
 0x55a   : > { %v3744_v43 = vpop.permute.xlu0 %3743 }
 0x55b   : > { %v3809_v25 = vsel %vm3805_vm5, %v3735_v42, %v3807_v49  ;;  %v3749_v37 = vadd.f32 %v3744_v43, %v3637_v18 }
 0x55c   : > { %4251 = vst.msk [vmem:[%s8097_s17 + $0x60] sm:$0xff] %vm3757_vm6, %v3809_v25 }
 0x55d   : > { %vm3814_vm7 = vcmp.ge.f32.partialorder %v3749_v37, 0.0  ;;  %v3816_v3 = vmul.f32 0.2, %v3749_v37 }
 0x55f   : > { %v3818_v59 = vsel %vm3814_vm7, %v3749_v37, %v3816_v3 }
 0x560   : > { %4253 = vst.msk [vmem:[%s8097_s17 + $0x70] sm:$0xff] %vm3757_vm6, %v3818_v59 }
 0x561   : > { %4444 = shalt.err (!%p4441_p8)
}
 0x562   : > { %s4445_s22 = scalar_lea.hbm %s8157_s4, 2048  ;;  %s4449_s1 = scalar_lea.hbm %s8399_s8, 4096 }
 0x563   : > { %p4446_p7 = scmp.ne.s32.totalorder %s8157_s4, %s4445_s22  ;;  %p4450_p12 = scmp.lt.s32.totalorder %s8157_s4, %s8399_s8 }
 0x564   : > { %p4451_p13 = scmp.lt.s32.totalorder %s4449_s1, %s4445_s22 }
 0x565   : > { %p4447_p6 = pnand %p4446_p7, %p8400_p10 }
 0x566   : > { %p4452_p3 = por %p4451_p13, %p4450_p12 }
 0x567   : > { %p4448_p11 = pneg %p4447_p6 }
 0x569   : > { %p4453_p9 = pnand %p4452_p3, %p4448_p11 }
 0x56b   : > { %4456 = shalt.err (!%p4453_p9)
}
 0x56c   : > { %s4515_s2 = smov 128   ;;  %s4516_s3 = smov 8  }
 0x56d   : > { %4291 = dma.vmem_to_hbm [thread:$0]  (%p8400_p10), %s8159_s18, 2048, %s8157_s4, %s3824_s11, %s4515_s2, %s4515_s2, %s4516_s3  }
 0x56e PF: > { %s8401_s13 = sld [smem:[#allocation15_spill]] }
 0x56f   : > { %s8402_s14 = sld [smem:[#allocation23_spill]] }
 0x570   : > { %s8403_s15 = sld [smem:[#allocation18_spill]] }
 0x574   : > { %s3852_s10 = sand.u32 1, %s8401_s13  }
 0x575   : > { %p8404_p2 = scmp.ne.s32.totalorder %s8402_s14, 0  ;;  %s3853_s12 = scalar_lea.sflag [#allocation5], %s3852_s10 }
 0x576   : > { %p8405_p0 = scmp.ge.s32.totalorder %s8403_s15, 2 }
 0x578   : > { %p4305_p4 = pnand %p8405_p0, %p8404_p2 }
 0x57a   : > { %p4306_p5 = pneg %p4305_p4 }
 0x57c   : > { %4486 = dma.done.wait (%p4306_p5), %s3853_s12, 2048  }
 0x57d   : > { %4488 = vsyncadd (%p4306_p5), %s3853_s12, 4294965248  ;;  %s8406_s15 = sld [smem:[#allocation20_spill]] }
 0x57e   : > { %s8407_s12 = sld [smem:[#allocation16_spill]] }
 0x57f   : > { %s8408_s13 = sld [smem:[#allocation17_spill]] }
 0x580   : > { %s8409_s14 = sld [smem:[#allocation21_spill]] }
 0x583   : > { %p18_p1 = scmp.ge.s32.totalorder %s8406_s15, 4  }
 0x585   :  { %20 = sbr.rel (!%p18_p1) target bundleno = 12 (0xc), region = 97 }
 0x58a   :  { %3858 = vsyncpa [#allocation4], 1 }
 0x58b   :  { %3860 = vsyncpa [#allocation4 + $0x1], 1 }
 0x58c   :  { %3861 = vsyncpa [#allocation5], 1 }
 0x58d   :  { %3863 = vsyncpa [#allocation5 + $0x1], 1 }
 0x58e   :  { %3864 = vsyncpa [#allocation6], 1 }
 0x58f   :  { %3866 = vsyncpa [#allocation6 + $0x1], 1 }
 0x590   :  { %3867 = vsyncpa [#allocation7], 1 }
 0x591   :  { %3869 = vsyncpa [#allocation7 + $0x1], 1 }

</bundles_post_ra>
